<compile_context>
chip_gen: v6e
topology: v6e:2x2x1
jax: 0.10.0
libtpu: 0.0.40
codegen_flags: <defaults>
</compile_context>

<pallas_src>
import numpy as np
import jax
import jax.numpy as jnp
from jax import lax
from jax.experimental import pallas as pl
from jax.experimental.pallas import tpu as pltpu


def _gelu(v):
    # TODO(synk): torch nn.GELU() defaults to the exact erf form; Mosaic has no
    # guaranteed erf lowering, so the tanh approximation is used here (the
    # in-script reference uses the same form).
    c = 0.7978845608028654  # sqrt(2/pi)
    return 0.5 * v * (1.0 + jnp.tanh(c * (v + 0.044715 * v * v * v)))


# --------------------------- kernel 1: routing --------------------------------

def _make_routing_kernel(num_leaves, top_k):
    apply_topk = (top_k is not None) and (top_k < num_leaves)

    def kernel(x_ref, w1_ref, b1_ref, wd_ref, bd_ref, pL_ref, pR_ref, leaf_ref):
        xb = x_ref[...].astype(jnp.bfloat16)                        # [bt, D]

        # all nodes' first layers in one lane-dense matmul: [bt, N*Hd] f32
        h = _gelu(jnp.dot(xb, w1_ref[...],
                          preferred_element_type=jnp.float32) + b1_ref[...])

        # per-node logit difference d_n = h_n . wdiff_n + bdiff_n via a tiny
        # block-diagonal selector matmul (no [bt,N*Hd]->[bt,N,Hd] relayout).
        d = jnp.dot(h, wd_ref[...],
                    preferred_element_type=jnp.float32) + bd_ref[...]   # [bt, N]

        # softmax over 2 == sigmoid(l0-l1); log-probs via stable log-sigmoid
        lpl = jnp.minimum(d, 0.0) - jnp.log(1.0 + jnp.exp(-jnp.abs(d)))  # log p_left
        lpr = lpl - d                                                    # log p_right

        # log-space path sum -> leaf probabilities, directly in [bt, L]
        leaf = jnp.exp(
            jnp.dot(lpl, pL_ref[...], preferred_element_type=jnp.float32)
            + jnp.dot(lpr, pR_ref[...], preferred_element_type=jnp.float32))

        if apply_topk:
            bt = leaf.shape[0]
            idx = lax.broadcasted_iota(jnp.int32, (bt, num_leaves), 1
                                       ).astype(jnp.float32)
            remaining = leaf
            keep = jnp.zeros_like(leaf)
            for _ in range(top_k):                 # k-step max-and-mask, first-index ties
                m = jnp.max(remaining, axis=-1, keepdims=True)
                is_max = remaining >= m
                first = jnp.min(jnp.where(is_max, idx, float(num_leaves)),
                                axis=-1, keepdims=True)
                onehot = idx == first
                keep = jnp.where(onehot, 1.0, keep)
                remaining = jnp.where(onehot, -1e30, remaining)
            leaf = leaf * keep
            s = jnp.sum(leaf, axis=-1, keepdims=True)
            leaf = leaf * pl.reciprocal(s + 1e-8, approx=True)

        leaf_ref[...] = leaf                                        # [bt, L]

    return kernel


# --------------------------- kernel 2: leaf experts ----------------------------

def _make_expert_kernel():
    def kernel(ca_ref, src_ref, x_ref, g_ref, em_ref, e1_ref, eb1_ref,
               e2_ref, eb2_ref, out_ref, acc_ref):
        lblk = pl.program_id(1)

        @pl.when(lblk == 0)
        def _():
            acc_ref[...] = jnp.zeros_like(acc_ref)

        # Skip chunks whose leaves are all inactive for the batch (torch skips
        # experts with batch-max routing prob < 1e-3; their gates are 0 here).
        @pl.when(ca_ref[lblk] != 0)
        def _():
            xb = x_ref[...].astype(jnp.bfloat16)                    # [bt, D]
            # chunk's first layers as one matmul: [bt, lb*He] f32
            h = _gelu(jnp.dot(xb, e1_ref[0],
                              preferred_element_type=jnp.float32) + eb1_ref[0])
            g = g_ref[0]                                            # [bt, lb] f32
            # broadcast gate over He via a tiny constant 0/1 matmul
            ge = jnp.dot(g, em_ref[...], preferred_element_type=jnp.float32)
            hw = (h * ge).astype(jnp.bfloat16)                      # gated hidden
            # leaf reduction fused into the contraction dim; gated bias via matmul
            acc_ref[...] += (
                jnp.dot(hw, e2_ref[0], preferred_element_type=jnp.float32)
                + jnp.dot(g, eb2_ref[0], preferred_element_type=jnp.float32))

        @pl.when(lblk == pl.num_programs(1) - 1)
        def _():
            out_ref[...] = acc_ref[...]

    return kernel


# ------------------------------- wrapper ---------------------------------------

def probabilistic_routing_tree_forward(x, kp, *, top_k):
    """Pallas equivalent of ProbabilisticRoutingTree.forward(x, top_k)."""
    B, D = x.shape
    C, _, lbHe = kp['e1f'].shape
    lb, O = kp['eb2c'].shape[1], kp['eb2c'].shape[2]
    L = C * lb
    N = L - 1
    NHd = kp['w1f'].shape[1]

    # fixed MXU-friendly batch tile; pad B up to a multiple of it
    bt = 128
    Bp = ((B + bt - 1) // bt) * bt
    x_pad = x if Bp == B else jnp.pad(x, ((0, Bp - B), (0, 0)))
    nb = Bp // bt

    routing = _make_routing_kernel(L, top_k)
    leaf_pad = pl.pallas_call(
        routing,
        grid=(nb,),
        in_specs=[
            pl.BlockSpec((bt, D), lambda b: (b, 0)),
            pl.BlockSpec((D, NHd), lambda b: (0, 0)),
            pl.BlockSpec((1, NHd), lambda b: (0, 0)),
            pl.BlockSpec((NHd, N), lambda b: (0, 0)),
            pl.BlockSpec((1, N), lambda b: (0, 0)),
            pl.BlockSpec((N, L), lambda b: (0, 0)),
            pl.BlockSpec((N, L), lambda b: (0, 0)),
        ],
        out_specs=pl.BlockSpec((bt, L), lambda b: (b, 0)),
        out_shape=jax.ShapeDtypeStruct((Bp, L), jnp.float32),
        compiler_params=pltpu.CompilerParams(dimension_semantics=("parallel",)),
    )(x_pad, kp['w1f'], kp['b1f'], kp['wdbd'], kp['bdiff'],
      kp['pathL'], kp['pathR'])

    leaf_probs = leaf_pad[:B]                                       # [B, L]

    # Full-(real)-batch expert-activity mask (torch skips experts whose
    # batch-max routing prob < 1e-3); folded directly into the gate array.
    active = (jnp.max(leaf_probs, axis=0) >= 1e-3).astype(jnp.float32)     # [L]
    gate = leaf_pad * active[None, :]                                      # [Bp, L]
    gate_chunks = gate.reshape(Bp, C, lb).transpose(1, 0, 2)               # [C, Bp, lb]
    chunk_active = (jnp.max(active.reshape(C, lb), axis=1) > 0).astype(jnp.int32)
    idxs = jnp.arange(C, dtype=jnp.int32)
    # for inactive chunks, fetch the previous active chunk's weights (no new DMA)
    src_chunk = jnp.maximum(
        lax.cummax(jnp.where(chunk_active > 0, idxs, -1), axis=0), 0
    ).astype(jnp.int32)

    expert = _make_expert_kernel()
    out_pad = pl.pallas_call(
        expert,
        grid_spec=pltpu.PrefetchScalarGridSpec(
            num_scalar_prefetch=2,
            grid=(nb, C),                         # leaf chunks last (reduction)
            in_specs=[
                pl.BlockSpec((bt, D), lambda b, l, ca, sc: (b, 0)),
                pl.BlockSpec((1, bt, lb), lambda b, l, ca, sc: (l, b, 0)),
                pl.BlockSpec((lb, lbHe), lambda b, l, ca, sc: (0, 0)),
                pl.BlockSpec((1, D, lbHe), lambda b, l, ca, sc: (sc[l], 0, 0)),
                pl.BlockSpec((1, 1, lbHe), lambda b, l, ca, sc: (sc[l], 0, 0)),
                pl.BlockSpec((1, lbHe, O), lambda b, l, ca, sc: (sc[l], 0, 0)),
                pl.BlockSpec((1, lb, O), lambda b, l, ca, sc: (sc[l], 0, 0)),
            ],
            out_specs=pl.BlockSpec((bt, O), lambda b, l, ca, sc: (b, 0)),
            scratch_shapes=[pltpu.VMEM((bt, O), jnp.float32)],
        ),
        out_shape=jax.ShapeDtypeStruct((Bp, O), jnp.float32),
        compiler_params=pltpu.CompilerParams(
            dimension_semantics=("parallel", "arbitrary")),
    )(chunk_active, src_chunk, x_pad, gate_chunks, kp['em'],
      kp['e1f'], kp['eb1f'], kp['e2f'], kp['eb2c'])

    return out_pad[:B], leaf_probs


# ------------------- deterministic parameters + plain-JAX reference ------------

def _uniform(rng, shape, fan_in):
    b = 1.0 / np.sqrt(fan_in)
    return rng.uniform(-b, b, size=shape).astype(np.float32)


def build_raw_params(depth, D, O, Hd, *, seed=0):
    rng = np.random.default_rng(seed)
    L = 2 ** depth
    N = L - 1
    He = 2 * D                                   # LeafExpert default hidden_dim
    raw = dict(
        dw1=_uniform(rng, (N, D, Hd), D), db1=_uniform(rng, (N, Hd), D),
        dw2=_uniform(rng, (N, Hd, 2), Hd), db2=_uniform(rng, (N, 2), Hd),
        ew1=_uniform(rng, (L, D, He), D), eb1=_uniform(rng, (L, He), D),
        ew2=_uniform(rng, (L, He, O), He), eb2=_uniform(rng, (L, O), He),
        depth=depth, D=D, O=O, Hd=Hd, He=He, L=L, N=N)
    # reference params: same weights, bf16-rounded where the kernel uses bf16
    rp = {
        'dw1': jnp.asarray(raw['dw1'], jnp.bfloat16).astype(jnp.float32),
        'db1': jnp.asarray(raw['db1']),
        'dw2': jnp.asarray(raw['dw2']),
        'db2': jnp.asarray(raw['db2']),
        'ew1': jnp.asarray(raw['ew1'], jnp.bfloat16).astype(jnp.float32),
        'eb1': jnp.asarray(raw['eb1']),
        'ew2': jnp.asarray(raw['ew2'], jnp.bfloat16).astype(jnp.float32),
        'eb2': jnp.asarray(raw['eb2']),
    }
    return raw, rp


def pack_kernel_params(raw, *, leaf_block=None):
    depth, D, O, Hd, He = raw['depth'], raw['D'], raw['O'], raw['Hd'], raw['He']
    L, N = raw['L'], raw['N']

    # routing: node axis folded into the matmul lane dimension (col = n*Hd + h)
    w1f = raw['dw1'].transpose(1, 0, 2).reshape(D, N * Hd)
    b1f = raw['db1'].reshape(1, N * Hd)
    wdiff = raw['dw2'][:, :, 0] - raw['dw2'][:, :, 1]
    wdbd = np.zeros((N * Hd, N), np.float32)          # tiny block-diag selector
    for n in range(N):
        wdbd[n * Hd:(n + 1) * Hd, n] = wdiff[n]
    bdiff = (raw['db2'][:, 0] - raw['db2'][:, 1]).reshape(1, N)

    # 0/1 path matrices [N, L] for the log-space routing product
    pathL = np.zeros((N, L), np.float32)
    pathR = np.zeros((N, L), np.float32)
    for j in range(L):
        for lvl in range(depth):
            nidx = (2 ** lvl - 1) + (j >> (depth - lvl))   # BFS ancestor index
            if (j >> (depth - 1 - lvl)) & 1:
                pathR[nidx, j] = 1.0
            else:
                pathL[nidx, j] = 1.0

    # experts: pick the largest leaf chunk whose double-buffered bf16 weights
    # fit a conservative VMEM budget (v7x has only 64 MiB physical VMEM).
    if leaf_block is None:
        budget = 20 * 1024 * 1024
        lb = L
        while lb > 1 and 2 * 2 * lb * (D * He + He * O) > budget:
            lb //= 2
    else:
        lb = leaf_block
    assert L % lb == 0
    C = L // lb

    e1f = raw['ew1'].reshape(C, lb, D, He).transpose(0, 2, 1, 3).reshape(C, D, lb * He)
    eb1f = raw['eb1'].reshape(C, 1, lb * He)
    e2f = raw['ew2'].reshape(C, lb * He, O)            # K-fused second layer
    eb2c = raw['eb2'].reshape(C, lb, O)
    em = np.zeros((lb, lb * He), np.float32)           # gate->hidden expand matrix
    for l in range(lb):
        em[l, l * He:(l + 1) * He] = 1.0

    return {
        'w1f': jnp.asarray(w1f, jnp.bfloat16), 'b1f': jnp.asarray(b1f),
        'wdbd': jnp.asarray(wdbd), 'bdiff': jnp.asarray(bdiff),
        'pathL': jnp.asarray(pathL), 'pathR': jnp.asarray(pathR),
        'e1f': jnp.asarray(e1f, jnp.bfloat16), 'eb1f': jnp.asarray(eb1f),
        'e2f': jnp.asarray(e2f, jnp.bfloat16), 'eb2c': jnp.asarray(eb2c),
        'em': jnp.asarray(em),
    }


def reference_forward(x, rp, depth, top_k):
    """Plain-JAX port of the PyTorch ProbabilisticRoutingTree.forward."""
    x = x.astype(jnp.bfloat16).astype(jnp.float32)   # same operand rounding as kernel
    B = x.shape[0]
    L = 2 ** depth
    leaf_probs = jnp.zeros((B, L), jnp.float32)
    queue = [(0, 0, jnp.ones((B, 1), jnp.float32))]
    while queue:                                     # BFS, exactly like the torch code
        node, nd, probs = queue.pop(0)
        if nd == depth:
            leaf_probs = leaf_probs.at[:, node - (2 ** depth - 1)].set(probs[:, 0])
            continue
        h = _gelu(x @ rp['dw1'][node] + rp['db1'][node])
        logits = h @ rp['dw2'][node] + rp['db2'][node]
        dec = jax.nn.softmax(logits, axis=-1)
        queue.append((2 * node + 1, nd + 1, probs * dec[:, 0:1]))
        queue.append((2 * node + 2, nd + 1, probs * dec[:, 1:2]))
    if top_k is not None and top_k < L:
        vals, idx = lax.top_k(leaf_probs, top_k)
        sparse = jnp.zeros_like(leaf_probs).at[jnp.arange(B)[:, None], idx].set(vals)
        leaf_probs = sparse / (sparse.sum(axis=1, keepdims=True) + 1e-8)
    out = jnp.zeros((B, rp['ew2'].shape[-1]), jnp.float32)
    for i in range(L):
        lp = leaf_probs[:, i:i + 1]
        expert_out = _gelu(x @ rp['ew1'][i] + rp['eb1'][i]) @ rp['ew2'][i] + rp['eb2'][i]
        out = out + jnp.where(jnp.max(lp) >= 1e-3, expert_out * lp, 0.0)
    return out, leaf_probs


# ----------------------------------- demo --------------------------------------

if __name__ == "__main__":
    depth = 3          # 7 decision nodes, 8 leaf experts
    D = 64             # input_dim
    O = 8              # output_dim
    Hd = 128           # SoftDecisionNode hidden_dim (lane-aligned)
    B = 8              # batch (padded to 128 internally)
    top_k = 2

    raw, rp = build_raw_params(depth, D, O, Hd, seed=0)
    x = jax.random.normal(jax.random.PRNGKey(0), (B, D), dtype=jnp.float32)
    ref_out, ref_probs = reference_forward(x, rp, depth, top_k)

    # exercise both configurations: resident experts (C=1) and chunked reduction (C=2)
    for leaf_block in (None, 4):
        kp = pack_kernel_params(raw, leaf_block=leaf_block)
        fwd = jax.jit(lambda xx, kp=kp: probabilistic_routing_tree_forward(
            xx, kp, top_k=top_k))
        out, leaf_probs = fwd(x)
        out = jax.block_until_ready(out)

        assert out.shape == (B, O)
        assert leaf_probs.shape == (B, 2 ** depth)
        assert bool(jnp.all(jnp.isfinite(out)))
        np.testing.assert_allclose(np.asarray(leaf_probs), np.asarray(ref_probs),
                                   atol=5e-3, rtol=5e-3)
        np.testing.assert_allclose(np.asarray(out), np.asarray(ref_out),
                                   atol=2e-2, rtol=2e-2)

    print("KERNEL_OK")
</pallas_src>

<mosaic_0001>
module attributes {stable_mosaic.version = 11 : i64} {
  func.func @kernel(%arg0: i32, %arg1: memref<128x64xf32, #tpu.memory_space<vmem>>, %arg2: memref<64x896xbf16, #tpu.memory_space<vmem>>, %arg3: memref<1x896xf32, #tpu.memory_space<vmem>>, %arg4: memref<896x7xf32, #tpu.memory_space<vmem>>, %arg5: memref<1x7xf32, #tpu.memory_space<vmem>>, %arg6: memref<7x8xf32, #tpu.memory_space<vmem>>, %arg7: memref<7x8xf32, #tpu.memory_space<vmem>>, %arg8: memref<128x8xf32, #tpu.memory_space<vmem>>) attributes {dimension_semantics = [#tpu.dimension_semantics<parallel>], iteration_bounds = array<i64: 1>, scalar_prefetch = 0 : i64, scratch_operands = 0 : i64, tpu.core_type = #tpu.core_type<tc>, window_params = [{transform_indices = @transform_0, window_bounds = array<i64: 128, 64>}, {pipeline_mode = #tpu.pipeline_mode<synchronous>, transform_indices = @transform_1, window_bounds = array<i64: 64, 896>}, {pipeline_mode = #tpu.pipeline_mode<synchronous>, transform_indices = @transform_2, window_bounds = array<i64: 1, 896>}, {pipeline_mode = #tpu.pipeline_mode<synchronous>, transform_indices = @transform_3, window_bounds = array<i64: 896, 7>}, {pipeline_mode = #tpu.pipeline_mode<synchronous>, transform_indices = @transform_4, window_bounds = array<i64: 1, 7>}, {pipeline_mode = #tpu.pipeline_mode<synchronous>, transform_indices = @transform_5, window_bounds = array<i64: 7, 8>}, {pipeline_mode = #tpu.pipeline_mode<synchronous>, transform_indices = @transform_6, window_bounds = array<i64: 7, 8>}, {transform_indices = @transform_7, window_bounds = array<i64: 128, 8>}]} {
    %c0 = arith.constant 0 : index
    %c0_0 = arith.constant 0 : index
    %0 = vector.load %arg1[%c0, %c0_0] : memref<128x64xf32, #tpu.memory_space<vmem>>, vector<128x64xf32>
    %1 = arith.truncf %0 : vector<128x64xf32> to vector<128x64xbf16>
    %c0_1 = arith.constant 0 : index
    %c0_2 = arith.constant 0 : index
    %2 = vector.load %arg2[%c0_1, %c0_2] : memref<64x896xbf16, #tpu.memory_space<vmem>>, vector<64x896xbf16>
    %cst = arith.constant dense<0.000000e+00> : vector<128x896xf32>
    %3 = tpu.matmul %1, %2, %cst {dimension_numbers = #tpu.dot_dimension_numbers<[1], [0], [0], [1], [0, 0, 1, 1], [], []>} : vector<128x64xbf16>, vector<64x896xbf16>, vector<128x896xf32> -> vector<128x896xf32>
    %c0_3 = arith.constant 0 : index
    %c0_4 = arith.constant 0 : index
    %4 = vector.load %arg3[%c0_3, %c0_4] : memref<1x896xf32, #tpu.memory_space<vmem>>, vector<1x896xf32>
    %5 = vector.broadcast %4 : vector<1x896xf32> to vector<128x896xf32>
    %6 = arith.addf %3, %5 : vector<128x896xf32>
    %cst_5 = arith.constant 5.000000e-01 : f32
    %7 = vector.broadcast %cst_5 : f32 to vector<128x896xf32>
    %8 = arith.mulf %7, %6 : vector<128x896xf32>
    %cst_6 = arith.constant 4.471500e-02 : f32
    %9 = vector.broadcast %cst_6 : f32 to vector<128x896xf32>
    %10 = arith.mulf %9, %6 : vector<128x896xf32>
    %11 = arith.mulf %10, %6 : vector<128x896xf32>
    %12 = arith.mulf %11, %6 : vector<128x896xf32>
    %13 = arith.addf %6, %12 : vector<128x896xf32>
    %cst_7 = arith.constant 0.797884583 : f32
    %14 = vector.broadcast %cst_7 : f32 to vector<128x896xf32>
    %15 = arith.mulf %14, %13 : vector<128x896xf32>
    %16 = math.tanh %15 : vector<128x896xf32>
    %cst_8 = arith.constant 1.000000e+00 : f32
    %17 = vector.broadcast %cst_8 : f32 to vector<128x896xf32>
    %18 = arith.addf %17, %16 : vector<128x896xf32>
    %19 = arith.mulf %8, %18 : vector<128x896xf32>
    %c0_9 = arith.constant 0 : index
    %c0_10 = arith.constant 0 : index
    %20 = vector.load %arg4[%c0_9, %c0_10] : memref<896x7xf32, #tpu.memory_space<vmem>>, vector<896x7xf32>
    %cst_11 = arith.constant dense<0.000000e+00> : vector<128x7xf32>
    %21 = tpu.matmul %19, %20, %cst_11 {dimension_numbers = #tpu.dot_dimension_numbers<[1], [0], [0], [1], [0, 0, 1, 1], [], []>} : vector<128x896xf32>, vector<896x7xf32>, vector<128x7xf32> -> vector<128x7xf32>
    %c0_12 = arith.constant 0 : index
    %c0_13 = arith.constant 0 : index
    %22 = vector.load %arg5[%c0_12, %c0_13] : memref<1x7xf32, #tpu.memory_space<vmem>>, vector<1x7xf32>
    %23 = vector.broadcast %22 : vector<1x7xf32> to vector<128x7xf32>
    %24 = arith.addf %21, %23 : vector<128x7xf32>
    %cst_14 = arith.constant 0.000000e+00 : f32
    %25 = vector.broadcast %cst_14 : f32 to vector<128x7xf32>
    %26 = arith.minimumf %24, %25 : vector<128x7xf32>
    %27 = math.absf %24 : vector<128x7xf32>
    %cst_15 = arith.constant 0.000000e+00 : f32
    %28 = vector.broadcast %cst_15 : f32 to vector<128x7xf32>
    %29 = arith.subf %28, %27 : vector<128x7xf32>
    %30 = math.exp %29 : vector<128x7xf32>
    %cst_16 = arith.constant 1.000000e+00 : f32
    %31 = vector.broadcast %cst_16 : f32 to vector<128x7xf32>
    %32 = arith.addf %31, %30 : vector<128x7xf32>
    %33 = math.log %32 : vector<128x7xf32>
    %34 = arith.subf %26, %33 : vector<128x7xf32>
    %35 = arith.subf %34, %24 : vector<128x7xf32>
    %c0_17 = arith.constant 0 : index
    %c0_18 = arith.constant 0 : index
    %36 = vector.load %arg6[%c0_17, %c0_18] : memref<7x8xf32, #tpu.memory_space<vmem>>, vector<7x8xf32>
    %cst_19 = arith.constant dense<0.000000e+00> : vector<128x8xf32>
    %37 = tpu.matmul %34, %36, %cst_19 {dimension_numbers = #tpu.dot_dimension_numbers<[1], [0], [0], [1], [0, 0, 1, 1], [], []>} : vector<128x7xf32>, vector<7x8xf32>, vector<128x8xf32> -> vector<128x8xf32>
    %c0_20 = arith.constant 0 : index
    %c0_21 = arith.constant 0 : index
    %38 = vector.load %arg7[%c0_20, %c0_21] : memref<7x8xf32, #tpu.memory_space<vmem>>, vector<7x8xf32>
    %cst_22 = arith.constant dense<0.000000e+00> : vector<128x8xf32>
    %39 = tpu.matmul %35, %38, %cst_22 {dimension_numbers = #tpu.dot_dimension_numbers<[1], [0], [0], [1], [0, 0, 1, 1], [], []>} : vector<128x7xf32>, vector<7x8xf32>, vector<128x8xf32> -> vector<128x8xf32>
    %40 = arith.addf %37, %39 : vector<128x8xf32>
    %41 = math.exp %40 : vector<128x8xf32>
    %42 = tpu.iota {dimensions = array<i32: 1>} : vector<128x8xi32>
    %43 = arith.sitofp %42 : vector<128x8xi32> to vector<128x8xf32>
    %cst_23 = arith.constant 0.000000e+00 : f32
    %44 = vector.broadcast %cst_23 : f32 to vector<128x8xf32>
    %cst_24 = arith.constant dense<0xFF800000> : vector<128xf32>
    %45 = vector.multi_reduction <maximumf>, %41, %cst_24 [1] : vector<128x8xf32> to vector<128xf32>
    %46 = vector.shape_cast %45 : vector<128xf32> to vector<128x1xf32>
    %47 = vector.broadcast %46 : vector<128x1xf32> to vector<128x8xf32>
    %48 = arith.cmpf oge, %41, %47 : vector<128x8xf32>
    %cst_25 = arith.constant 8.000000e+00 : f32
    %49 = vector.broadcast %cst_25 : f32 to vector<128x8xf32>
    %50 = arith.select %48, %43, %49 : vector<128x8xi1>, vector<128x8xf32>
    %cst_26 = arith.constant dense<0x7F800000> : vector<128xf32>
    %51 = vector.multi_reduction <minimumf>, %50, %cst_26 [1] : vector<128x8xf32> to vector<128xf32>
    %52 = vector.shape_cast %51 : vector<128xf32> to vector<128x1xf32>
    %53 = vector.broadcast %52 : vector<128x1xf32> to vector<128x8xf32>
    %54 = arith.cmpf oeq, %43, %53 : vector<128x8xf32>
    %cst_27 = arith.constant 1.000000e+00 : f32
    %55 = vector.broadcast %cst_27 : f32 to vector<128x8xf32>
    %56 = arith.select %54, %55, %44 : vector<128x8xi1>, vector<128x8xf32>
    %cst_28 = arith.constant -1.000000e+30 : f32
    %57 = vector.broadcast %cst_28 : f32 to vector<128x8xf32>
    %58 = arith.select %54, %57, %41 : vector<128x8xi1>, vector<128x8xf32>
    %cst_29 = arith.constant dense<0xFF800000> : vector<128xf32>
    %59 = vector.multi_reduction <maximumf>, %58, %cst_29 [1] : vector<128x8xf32> to vector<128xf32>
    %60 = vector.shape_cast %59 : vector<128xf32> to vector<128x1xf32>
    %61 = vector.broadcast %60 : vector<128x1xf32> to vector<128x8xf32>
    %62 = arith.cmpf oge, %58, %61 : vector<128x8xf32>
    %cst_30 = arith.constant 8.000000e+00 : f32
    %63 = vector.broadcast %cst_30 : f32 to vector<128x8xf32>
    %64 = arith.select %62, %43, %63 : vector<128x8xi1>, vector<128x8xf32>
    %cst_31 = arith.constant dense<0x7F800000> : vector<128xf32>
    %65 = vector.multi_reduction <minimumf>, %64, %cst_31 [1] : vector<128x8xf32> to vector<128xf32>
    %66 = vector.shape_cast %65 : vector<128xf32> to vector<128x1xf32>
    %67 = vector.broadcast %66 : vector<128x1xf32> to vector<128x8xf32>
    %68 = arith.cmpf oeq, %43, %67 : vector<128x8xf32>
    %cst_32 = arith.constant 1.000000e+00 : f32
    %69 = vector.broadcast %cst_32 : f32 to vector<128x8xf32>
    %70 = arith.select %68, %69, %56 : vector<128x8xi1>, vector<128x8xf32>
    %71 = arith.mulf %41, %70 : vector<128x8xf32>
    %cst_33 = arith.constant dense<0.000000e+00> : vector<128xf32>
    %72 = vector.multi_reduction <add>, %71, %cst_33 [1] : vector<128x8xf32> to vector<128xf32>
    %73 = vector.shape_cast %72 : vector<128xf32> to vector<128x1xf32>
    %cst_34 = arith.constant 9.99999993E-9 : f32
    %74 = vector.broadcast %cst_34 : f32 to vector<128x1xf32>
    %75 = arith.addf %73, %74 : vector<128x1xf32>
    %76 = tpu.reciprocal %75 {approx = true} : vector<128x1xf32> -> vector<128x1xf32>
    %77 = vector.broadcast %76 : vector<128x1xf32> to vector<128x8xf32>
    %78 = arith.mulf %71, %77 : vector<128x8xf32>
    %c0_35 = arith.constant 0 : index
    %c0_36 = arith.constant 0 : index
    %79 = vector.load %arg8[%c0_35, %c0_36] : memref<128x8xf32, #tpu.memory_space<vmem>>, vector<128x8xf32>
    tpu.vector_store %arg8[%c0_35, %c0_36], %78 {strides = array<i32>} : memref<128x8xf32, #tpu.memory_space<vmem>>, vector<128x8xf32>,
    return
  }
  func.func @transform_0(%arg0: i32) -> (i32, i32) {
    %c0_i32 = arith.constant 0 : i32
    %c0_i32_0 = arith.constant 0 : i32
    return %arg0, %c0_i32 : i32, i32
  }
  func.func @transform_1(%arg0: i32) -> (i32, i32) {
    %c0_i32 = arith.constant 0 : i32
    %c0_i32_0 = arith.constant 0 : i32
    %c0_i32_1 = arith.constant 0 : i32
    return %c0_i32, %c0_i32_0 : i32, i32
  }
  func.func @transform_2(%arg0: i32) -> (i32, i32) {
    %c0_i32 = arith.constant 0 : i32
    %c0_i32_0 = arith.constant 0 : i32
    %c0_i32_1 = arith.constant 0 : i32
    return %c0_i32, %c0_i32_0 : i32, i32
  }
  func.func @transform_3(%arg0: i32) -> (i32, i32) {
    %c0_i32 = arith.constant 0 : i32
    %c0_i32_0 = arith.constant 0 : i32
    %c0_i32_1 = arith.constant 0 : i32
    return %c0_i32, %c0_i32_0 : i32, i32
  }
  func.func @transform_4(%arg0: i32) -> (i32, i32) {
    %c0_i32 = arith.constant 0 : i32
    %c0_i32_0 = arith.constant 0 : i32
    %c0_i32_1 = arith.constant 0 : i32
    return %c0_i32, %c0_i32_0 : i32, i32
  }
  func.func @transform_5(%arg0: i32) -> (i32, i32) {
    %c0_i32 = arith.constant 0 : i32
    %c0_i32_0 = arith.constant 0 : i32
    %c0_i32_1 = arith.constant 0 : i32
    return %c0_i32, %c0_i32_0 : i32, i32
  }
  func.func @transform_6(%arg0: i32) -> (i32, i32) {
    %c0_i32 = arith.constant 0 : i32
    %c0_i32_0 = arith.constant 0 : i32
    %c0_i32_1 = arith.constant 0 : i32
    return %c0_i32, %c0_i32_0 : i32, i32
  }
  func.func @transform_7(%arg0: i32) -> (i32, i32) {
    %c0_i32 = arith.constant 0 : i32
    %c0_i32_0 = arith.constant 0 : i32
    return %arg0, %c0_i32 : i32, i32
  }
}

module attributes {stable_mosaic.version = 11 : i64} {
  func.func @kernel(%arg0: i32, %arg1: i32, %arg2: memref<1xi32, #tpu.memory_space<smem>>, %arg3: memref<1xi32, #tpu.memory_space<smem>>, %arg4: memref<128x64xf32, #tpu.memory_space<vmem>>, %arg5: memref<1x128x8xf32, #tpu.memory_space<vmem>>, %arg6: memref<8x1024xf32, #tpu.memory_space<vmem>>, %arg7: memref<1x64x1024xbf16, #tpu.memory_space<vmem>>, %arg8: memref<1x1x1024xf32, #tpu.memory_space<vmem>>, %arg9: memref<1x1024x8xbf16, #tpu.memory_space<vmem>>, %arg10: memref<1x8x8xf32, #tpu.memory_space<vmem>>, %arg11: memref<128x8xf32, #tpu.memory_space<vmem>>, %arg12: memref<128x8xf32, #tpu.memory_space<vmem>>) attributes {dimension_semantics = [#tpu.dimension_semantics<parallel>, #tpu.dimension_semantics<arbitrary>], iteration_bounds = array<i64: 1, 1>, scalar_prefetch = 2 : i64, scratch_operands = 1 : i64, tpu.core_type = #tpu.core_type<tc>, window_params = [{transform_indices = @transform_0, window_bounds = array<i64: 128, 64>}, {transform_indices = @transform_1, window_bounds = array<i64: 1, 128, 8>}, {pipeline_mode = #tpu.pipeline_mode<synchronous>, transform_indices = @transform_2, window_bounds = array<i64: 8, 1024>}, {transform_indices = @transform_3, window_bounds = array<i64: 1, 64, 1024>}, {transform_indices = @transform_4, window_bounds = array<i64: 1, 1, 1024>}, {transform_indices = @transform_5, window_bounds = array<i64: 1, 1024, 8>}, {transform_indices = @transform_6, window_bounds = array<i64: 1, 8, 8>}, {transform_indices = @transform_7, window_bounds = array<i64: 128, 8>}]} {
    %c0_i32 = arith.constant 0 : i32
    %0 = arith.cmpi eq, %arg1, %c0_i32 : i32
    %1 = arith.extui %0 : i1 to i32
    %c0_i32_0 = arith.constant 0 : i32
    %2 = arith.cmpi ne, %1, %c0_i32_0 : i32
    scf.if %2 {
      %cst = arith.constant 0.000000e+00 : f32
      %11 = vector.broadcast %cst : f32 to vector<128x8xf32>
      %c0 = arith.constant 0 : index
      %c0_5 = arith.constant 0 : index
      %12 = vector.load %arg12[%c0, %c0_5] : memref<128x8xf32, #tpu.memory_space<vmem>>, vector<128x8xf32>
      tpu.vector_store %arg12[%c0, %c0_5], %11 {strides = array<i32>} : memref<128x8xf32, #tpu.memory_space<vmem>>, vector<128x8xf32>,
    } else {
    }
    %3 = arith.index_cast %arg1 : i32 to index
    %4 = memref.load %arg2[%3] : memref<1xi32, #tpu.memory_space<smem>>
    %c0_i32_1 = arith.constant 0 : i32
    %5 = arith.cmpi ne, %4, %c0_i32_1 : i32
    %6 = arith.extui %5 : i1 to i32
    %c0_i32_2 = arith.constant 0 : i32
    %7 = arith.cmpi ne, %6, %c0_i32_2 : i32
    scf.if %7 {
      %c0 = arith.constant 0 : index
      %c0_5 = arith.constant 0 : index
      %11 = vector.load %arg4[%c0, %c0_5] : memref<128x64xf32, #tpu.memory_space<vmem>>, vector<128x64xf32>
      %12 = arith.truncf %11 : vector<128x64xf32> to vector<128x64xbf16>
      %c0_6 = arith.constant 0 : index
      %c0_7 = arith.constant 0 : index
      %c0_8 = arith.constant 0 : index
      %13 = vector.load %arg7[%c0_6, %c0_7, %c0_8] : memref<1x64x1024xbf16, #tpu.memory_space<vmem>>, vector<1x64x1024xbf16>
      %14 = vector.shape_cast %13 : vector<1x64x1024xbf16> to vector<64x1024xbf16>
      %cst = arith.constant dense<0.000000e+00> : vector<128x1024xf32>
      %15 = tpu.matmul %12, %14, %cst {dimension_numbers = #tpu.dot_dimension_numbers<[1], [0], [0], [1], [0, 0, 1, 1], [], []>} : vector<128x64xbf16>, vector<64x1024xbf16>, vector<128x1024xf32> -> vector<128x1024xf32>
      %c0_9 = arith.constant 0 : index
      %c0_10 = arith.constant 0 : index
      %c0_11 = arith.constant 0 : index
      %16 = vector.load %arg8[%c0_9, %c0_10, %c0_11] : memref<1x1x1024xf32, #tpu.memory_space<vmem>>, vector<1x1x1024xf32>
      %17 = vector.shape_cast %16 : vector<1x1x1024xf32> to vector<1x1024xf32>
      %18 = vector.broadcast %17 : vector<1x1024xf32> to vector<128x1024xf32>
      %19 = arith.addf %15, %18 : vector<128x1024xf32>
      %cst_12 = arith.constant 5.000000e-01 : f32
      %20 = vector.broadcast %cst_12 : f32 to vector<128x1024xf32>
      %21 = arith.mulf %20, %19 : vector<128x1024xf32>
      %cst_13 = arith.constant 4.471500e-02 : f32
      %22 = vector.broadcast %cst_13 : f32 to vector<128x1024xf32>
      %23 = arith.mulf %22, %19 : vector<128x1024xf32>
      %24 = arith.mulf %23, %19 : vector<128x1024xf32>
      %25 = arith.mulf %24, %19 : vector<128x1024xf32>
      %26 = arith.addf %19, %25 : vector<128x1024xf32>
      %cst_14 = arith.constant 0.797884583 : f32
      %27 = vector.broadcast %cst_14 : f32 to vector<128x1024xf32>
      %28 = arith.mulf %27, %26 : vector<128x1024xf32>
      %29 = math.tanh %28 : vector<128x1024xf32>
      %cst_15 = arith.constant 1.000000e+00 : f32
      %30 = vector.broadcast %cst_15 : f32 to vector<128x1024xf32>
      %31 = arith.addf %30, %29 : vector<128x1024xf32>
      %32 = arith.mulf %21, %31 : vector<128x1024xf32>
      %c0_16 = arith.constant 0 : index
      %c0_17 = arith.constant 0 : index
      %c0_18 = arith.constant 0 : index
      %33 = vector.load %arg5[%c0_16, %c0_17, %c0_18] : memref<1x128x8xf32, #tpu.memory_space<vmem>>, vector<1x128x8xf32>
      %34 = vector.shape_cast %33 : vector<1x128x8xf32> to vector<128x8xf32>
      %c0_19 = arith.constant 0 : index
      %c0_20 = arith.constant 0 : index
      %35 = vector.load %arg6[%c0_19, %c0_20] : memref<8x1024xf32, #tpu.memory_space<vmem>>, vector<8x1024xf32>
      %cst_21 = arith.constant dense<0.000000e+00> : vector<128x1024xf32>
      %36 = tpu.matmul %34, %35, %cst_21 {dimension_numbers = #tpu.dot_dimension_numbers<[1], [0], [0], [1], [0, 0, 1, 1], [], []>} : vector<128x8xf32>, vector<8x1024xf32>, vector<128x1024xf32> -> vector<128x1024xf32>
      %37 = arith.mulf %32, %36 : vector<128x1024xf32>
      %38 = arith.truncf %37 : vector<128x1024xf32> to vector<128x1024xbf16>
      %c0_22 = arith.constant 0 : index
      %c0_23 = arith.constant 0 : index
      %39 = vector.load %arg12[%c0_22, %c0_23] : memref<128x8xf32, #tpu.memory_space<vmem>>, vector<128x8xf32>
      %c0_24 = arith.constant 0 : index
      %c0_25 = arith.constant 0 : index
      %c0_26 = arith.constant 0 : index
      %40 = vector.load %arg9[%c0_24, %c0_25, %c0_26] : memref<1x1024x8xbf16, #tpu.memory_space<vmem>>, vector<1x1024x8xbf16>
      %41 = vector.shape_cast %40 : vector<1x1024x8xbf16> to vector<1024x8xbf16>
      %cst_27 = arith.constant dense<0.000000e+00> : vector<128x8xf32>
      %42 = tpu.matmul %38, %41, %cst_27 {dimension_numbers = #tpu.dot_dimension_numbers<[1], [0], [0], [1], [0, 0, 1, 1], [], []>} : vector<128x1024xbf16>, vector<1024x8xbf16>, vector<128x8xf32> -> vector<128x8xf32>
      %c0_28 = arith.constant 0 : index
      %c0_29 = arith.constant 0 : index
      %c0_30 = arith.constant 0 : index
      %43 = vector.load %arg10[%c0_28, %c0_29, %c0_30] : memref<1x8x8xf32, #tpu.memory_space<vmem>>, vector<1x8x8xf32>
      %44 = vector.shape_cast %43 : vector<1x8x8xf32> to vector<8x8xf32>
      %cst_31 = arith.constant dense<0.000000e+00> : vector<128x8xf32>
      %45 = tpu.matmul %34, %44, %cst_31 {dimension_numbers = #tpu.dot_dimension_numbers<[1], [0], [0], [1], [0, 0, 1, 1], [], []>} : vector<128x8xf32>, vector<8x8xf32>, vector<128x8xf32> -> vector<128x8xf32>
      %46 = arith.addf %42, %45 : vector<128x8xf32>
      %47 = arith.addf %39, %46 : vector<128x8xf32>
      %c0_32 = arith.constant 0 : index
      %c0_33 = arith.constant 0 : index
      %48 = vector.load %arg12[%c0_32, %c0_33] : memref<128x8xf32, #tpu.memory_space<vmem>>, vector<128x8xf32>
      tpu.vector_store %arg12[%c0_32, %c0_33], %47 {strides = array<i32>} : memref<128x8xf32, #tpu.memory_space<vmem>>, vector<128x8xf32>,
    } else {
    }
    %c0_i32_3 = arith.constant 0 : i32
    %8 = arith.cmpi eq, %arg1, %c0_i32_3 : i32
    %9 = arith.extui %8 : i1 to i32
    %c0_i32_4 = arith.constant 0 : i32
    %10 = arith.cmpi ne, %9, %c0_i32_4 : i32
    scf.if %10 {
      %c0 = arith.constant 0 : index
      %c0_5 = arith.constant 0 : index
      %11 = vector.load %arg12[%c0, %c0_5] : memref<128x8xf32, #tpu.memory_space<vmem>>, vector<128x8xf32>
      %c0_6 = arith.constant 0 : index
      %c0_7 = arith.constant 0 : index
      %12 = vector.load %arg11[%c0_6, %c0_7] : memref<128x8xf32, #tpu.memory_space<vmem>>, vector<128x8xf32>
      tpu.vector_store %arg11[%c0_6, %c0_7], %11 {strides = array<i32>} : memref<128x8xf32, #tpu.memory_space<vmem>>, vector<128x8xf32>,
    } else {
    }
    return
  }
  func.func @transform_0(%arg0: i32, %arg1: i32, %arg2: memref<1xi32, #tpu.memory_space<smem>>, %arg3: memref<1xi32, #tpu.memory_space<smem>>) -> (i32, i32) {
    %c0_i32 = arith.constant 0 : i32
    %c0_i32_0 = arith.constant 0 : i32
    return %arg0, %c0_i32 : i32, i32
  }
  func.func @transform_1(%arg0: i32, %arg1: i32, %arg2: memref<1xi32, #tpu.memory_space<smem>>, %arg3: memref<1xi32, #tpu.memory_space<smem>>) -> (i32, i32, i32) {
    %c0_i32 = arith.constant 0 : i32
    %c0_i32_0 = arith.constant 0 : i32
    return %arg1, %arg0, %c0_i32 : i32, i32, i32
  }
  func.func @transform_2(%arg0: i32, %arg1: i32, %arg2: memref<1xi32, #tpu.memory_space<smem>>, %arg3: memref<1xi32, #tpu.memory_space<smem>>) -> (i32, i32) {
    %c0_i32 = arith.constant 0 : i32
    %c0_i32_0 = arith.constant 0 : i32
    %c0_i32_1 = arith.constant 0 : i32
    return %c0_i32, %c0_i32_0 : i32, i32
  }
  func.func @transform_3(%arg0: i32, %arg1: i32, %arg2: memref<1xi32, #tpu.memory_space<smem>>, %arg3: memref<1xi32, #tpu.memory_space<smem>>) -> (i32, i32, i32) {
    %0 = arith.index_cast %arg1 : i32 to index
    %1 = memref.load %arg3[%0] : memref<1xi32, #tpu.memory_space<smem>>
    %c0_i32 = arith.constant 0 : i32
    %c0_i32_0 = arith.constant 0 : i32
    %c0_i32_1 = arith.constant 0 : i32
    return %1, %c0_i32, %c0_i32_0 : i32, i32, i32
  }
  func.func @transform_4(%arg0: i32, %arg1: i32, %arg2: memref<1xi32, #tpu.memory_space<smem>>, %arg3: memref<1xi32, #tpu.memory_space<smem>>) -> (i32, i32, i32) {
    %0 = arith.index_cast %arg1 : i32 to index
    %1 = memref.load %arg3[%0] : memref<1xi32, #tpu.memory_space<smem>>
    %c0_i32 = arith.constant 0 : i32
    %c0_i32_0 = arith.constant 0 : i32
    %c0_i32_1 = arith.constant 0 : i32
    return %1, %c0_i32, %c0_i32_0 : i32, i32, i32
  }
  func.func @transform_5(%arg0: i32, %arg1: i32, %arg2: memref<1xi32, #tpu.memory_space<smem>>, %arg3: memref<1xi32, #tpu.memory_space<smem>>) -> (i32, i32, i32) {
    %0 = arith.index_cast %arg1 : i32 to index
    %1 = memref.load %arg3[%0] : memref<1xi32, #tpu.memory_space<smem>>
    %c0_i32 = arith.constant 0 : i32
    %c0_i32_0 = arith.constant 0 : i32
    %c0_i32_1 = arith.constant 0 : i32
    return %1, %c0_i32, %c0_i32_0 : i32, i32, i32
  }
  func.func @transform_6(%arg0: i32, %arg1: i32, %arg2: memref<1xi32, #tpu.memory_space<smem>>, %arg3: memref<1xi32, #tpu.memory_space<smem>>) -> (i32, i32, i32) {
    %0 = arith.index_cast %arg1 : i32 to index
    %1 = memref.load %arg3[%0] : memref<1xi32, #tpu.memory_space<smem>>
    %c0_i32 = arith.constant 0 : i32
    %c0_i32_0 = arith.constant 0 : i32
    %c0_i32_1 = arith.constant 0 : i32
    return %1, %c0_i32, %c0_i32_0 : i32, i32, i32
  }
  func.func @transform_7(%arg0: i32, %arg1: i32, %arg2: memref<1xi32, #tpu.memory_space<smem>>, %arg3: memref<1xi32, #tpu.memory_space<smem>>) -> (i32, i32) {
    %c0_i32 = arith.constant 0 : i32
    %c0_i32_0 = arith.constant 0 : i32
    return %arg0, %c0_i32 : i32, i32
  }
}

</mosaic_0001>

<bundles_post_ra>
// kernel: _lambda_.2
= control target key start
LH: loop header
LB: loop body
LE: loop exit
PB: predicated region body
PF: predicated region fallthrough
CT: control target
= control target key end

     0   :  { %12 = vsyncpa [#allocation3], 0  ;;  %s6984_s0 = inlined_call_operand.vmem [shape: f32[128,64], index: 0, kind: input, shape index: {}]   ;;  %s6985_s1 = inlined_call_operand.hbm [shape: bf16[64,896], index: 1, kind: input, shape index: {}]   ;;  %s6986_s2 = inlined_call_operand.vmem [shape: f32[1,896], index: 2, kind: input, shape index: {}]   ;;  %s6987_s3 = inlined_call_operand.hbm [shape: f32[896,7], index: 3, kind: input, shape index: {}]   ;;  %s6988_s4 = inlined_call_operand.vmem [shape: f32[1,7], index: 4, kind: input, shape index: {}]   ;;  %s6989_s5 = inlined_call_operand.vmem [shape: f32[7,8], index: 5, kind: input, shape index: {}]   ;;  %s6990_s6 = inlined_call_operand.vmem [shape: f32[7,8], index: 6, kind: input, shape index: {}]   ;;  %s6991_s7 = inlined_call_operand.vmem [shape: f32[128,8], index: 7, kind: output, shape index: {}]  }
   0x1   :  { %13 = vsyncpa [#allocation5], 0  ;;  %s4511_s24 = smov [#allocation2]  }
   0x2   :  { %s21_s25 = sshll.u32 %s4511_s24, 4  ;;  %s22_s25 = int_to_ptr.vmem [resolvable:$true] %s21_s25 }
   0x3   :  { %s4475_s26 = scalar_lea.vmem %s22_s25, 3584  ;;  %p4480_p1 = scmp.lt.s32.totalorder %s22_s25, %s22_s25 }
   0x4   :  { %p4476_p0 = scmp.ne.s32.totalorder %s22_s25, %s4475_s26  ;;  %p4481_p2 = scmp.lt.s32.totalorder %s4475_s26, %s4475_s26 }
   0x6   :  { %p4482_p3 = por %p4481_p2, %p4480_p1 }
   0x8   :  { %p4483_p4 = pnand %p4482_p3, %p4476_p0 }
   0xa   :  { %4486 = shalt.err (!%p4483_p4)
}
   0xb   :  { %s4512_s27 = smov 448   ;;  %s4513_s28 = smov 28  }
   0xc   :  { %27 = dma.hbm_to_vmem [thread:$0]  %s6985_s1, 3584, %s22_s25, [#allocation3], %s4512_s27, %s4512_s27, %s4513_s28  }
   0xd   :  { %s4514_s8 = smov [#allocation4]  }
   0xe   :  { %s35_s9 = sshll.u32 %s4514_s8, 4  ;;  %s36_s9 = int_to_ptr.vmem [resolvable:$true] %s35_s9 }
   0xf   :  { %s4495_s10 = scalar_lea.vmem %s36_s9, 14336  ;;  %p4500_p6 = scmp.lt.s32.totalorder %s36_s9, %s36_s9 }
  0x10   :  { %p4496_p5 = scmp.ne.s32.totalorder %s36_s9, %s4495_s10  ;;  %p4501_p7 = scmp.lt.s32.totalorder %s4495_s10, %s4495_s10 }
  0x12   :  { %p4502_p8 = por %p4501_p7, %p4500_p6 }
  0x14   :  { %p4503_p9 = pnand %p4502_p8, %p4496_p5 }
  0x16   :  { %4506 = shalt.err (!%p4503_p9)
}
  0x17   :  { %s4515_s11 = smov 128   ;;  %s4516_s12 = smov 8  }
  0x18   :  { %41 = dma.hbm_to_vmem [thread:$0]  %s6987_s3, 14336, %s36_s9, [#allocation5], %s4515_s11, %s4515_s11, %s4516_s12  }
  0x19   :  { %4507 = dma.done.wait [#allocation3], 3584  }
  0x1a   :  { %4508 = vsyncadd [#allocation3], 4294963712 }
  0x1b   :  { %4509 = dma.done.wait [#allocation5], 14336  }
  0x1c   :  { %4510 = vsyncadd [#allocation5], 4294952960  ;;  %v4517_v0 = vmov 0   ;;  %v4075_v1 = vld [vmem:[#allocation2 + $0xac] ss:$28 sps:$4 sm:$0xff]   ;;  %v55_v17 = vld [vmem:[%s6984_s0] sm:$0xff] }
  0x1d   :  { %349 = vmatprep.mubr.bf16.mxu0 %v4517_v0  ;;  %462 = vmatprep.mubr.bf16.mxu1 %v4517_v0  ;;  %v4077_v2 = vld [vmem:[#allocation2 + $0xb4] ss:$28 sps:$4 sm:$0xff]   ;;  %v4079_v3 = vld [vmem:[#allocation2 + $0xa8] ss:$28 sps:$4 sm:$0xff]   ;;  %v4083_v6 = vld [vmem:[#allocation2 + $0x7c] ss:$28 sps:$4 sm:$0xff]  }
  0x1e   :  { %325 = vmatprep.subr.bf16.mxu0 %v4075_v1  ;;  %v4080_v4 = vld [vmem:[#allocation2 + $0xb0] ss:$28 sps:$4 sm:$0xff]   ;;  %438 = vmatprep.subr.bf16.mxu1 %v4077_v2  ;;  %v4086_v8 = vld [vmem:[#allocation2 + $0x78] ss:$28 sps:$4 sm:$0xff]   ;;  %v4089_v10 = vld [vmem:[#allocation2 + $0x44] ss:$28 sps:$4 sm:$0xff]  }
  0x1f   :  { %v4081_v5 = vld [vmem:[#allocation2 + $0x74] ss:$28 sps:$4 sm:$0xff]   ;;  %326 = vmatpush1.bf16.msra.mxu0 %v4079_v3  ;;  %439 = vmatpush1.bf16.msra.mxu1 %v4080_v4  ;;  %v4087_v9 = vld [vmem:[#allocation2 + $0x3c] ss:$28 sps:$4 sm:$0xff]   ;;  %v4093_v13 = vld [vmem:[#allocation2 + $0x4] ss:$28 sps:$4 sm:$0xff]  }
  0x20   :  { %v4085_v7 = vld [vmem:[#allocation2 + $0x70] ss:$28 sps:$4 sm:$0xff]   ;;  %327 = vmatprep.subr.bf16.mxu0 %v4081_v5  ;;  %440 = vmatprep.subr.bf16.mxu1 %v4083_v6  ;;  %v4091_v11 = vld [vmem:[#allocation2 + $0x38] ss:$28 sps:$4 sm:$0xff]   ;;  %v4092_v12 = vld [vmem:[#allocation2 + $0x40] ss:$28 sps:$4 sm:$0xff]  }
  0x21   :  { %v4095_v14 = vld [vmem:[#allocation2 + $0xc] ss:$28 sps:$4 sm:$0xff]   ;;  %v4097_v15 = vld [vmem:[#allocation2] ss:$28 sps:$4 sm:$0xff]   ;;  %vm292_vm0 = vcmask 523264   ;;  %v57_v24 = vld [vmem:[%s6984_s0 + $0x10] sm:$0xff] }
  0x22   :  { %v4098_v16 = vld [vmem:[#allocation2 + $0x8] ss:$28 sps:$4 sm:$0xff]   ;;  %v4101_v19 = vld [vmem:[#allocation2 + $0xbc] ss:$28 sps:$4 sm:$0xff]   ;;  %v4113_v31 = vld [vmem:[#allocation2 + $0x50] ss:$28 sps:$4 sm:$0xff]  }
  0x23   :  { %328 = vmatpush1.bf16.msra.mxu0 %v4085_v7  ;;  %441 = vmatpush1.bf16.msra.mxu1 %v4086_v8  ;;  %v56_v18 = vld [vmem:[%s6984_s0 + $0x8] sm:$0xff]  ;;  %v4099_v21 = vld [vmem:[#allocation2 + $0xb8] ss:$28 sps:$4 sm:$0xff]   ;;  %v4105_v22 = vld [vmem:[#allocation2 + $0xc0] ss:$28 sps:$4 sm:$0xff]   ;;  %vm2671_vm1 = vcmask 1046528  }
  0x24   :  { %329 = vmatprep.subr.bf16.mxu0 %v4087_v9  ;;  %442 = vmatprep.subr.bf16.mxu1 %v4089_v10  ;;  %v4573_v20 = vpack.c.bf16 %v56_v18, %v55_v17  ;;  %v4104_v23 = vld [vmem:[#allocation2 + $0x84] ss:$28 sps:$4 sm:$0xff]   ;;  %v58_v25 = vld [vmem:[%s6984_s0 + $0x18] sm:$0xff]  ;;  %v4108_v28 = vld [vmem:[#allocation2 + $0x4c] ss:$28 sps:$4 sm:$0xff]   ;;  %vm2622_vm2 = vcmask 56320  }
  0x25   :  { %v4102_v26 = vld [vmem:[#allocation2 + $0x80] ss:$28 sps:$4 sm:$0xff]   ;;  %v4109_v27 = vld [vmem:[#allocation2 + $0x88] ss:$28 sps:$4 sm:$0xff]   ;;  %v4587_v29 = vpack.c.bf16 %v58_v25, %v57_v24  ;;  %v4112_v32 = vld [vmem:[#allocation2 + $0x14] ss:$28 sps:$4 sm:$0xff]  }
  0x26   :  { %v4106_v30 = vld [vmem:[#allocation2 + $0x48] ss:$28 sps:$4 sm:$0xff]   ;;  %v4114_v33 = vld [vmem:[#allocation2 + $0x18] ss:$28 sps:$4 sm:$0xff]   ;;  %v4110_v36 = vld [vmem:[#allocation2 + $0x10] ss:$28 sps:$4 sm:$0xff]  }
  0x27   :  { %330 = vmatpush1.bf16.msra.mxu0 %v4091_v11  ;;  %443 = vmatpush1.bf16.msra.mxu1 %v4092_v12  ;;  %v59_v34 = vld [vmem:[%s6984_s0 + $0x20] sm:$0xff]  ;;  %v60_v35 = vld [vmem:[%s6984_s0 + $0x28] sm:$0xff]  ;;  %v61_v38 = vld [vmem:[%s6984_s0 + $0x30] sm:$0xff]  ;;  %vm3051_vm3 = vcmask 64512  }
  0x28   :  { %331 = vmatprep.subr.bf16.mxu0 %v4093_v13  ;;  %444 = vmatprep.subr.bf16.mxu1 %v4095_v14  ;;  %v4601_v37 = vpack.c.bf16 %v60_v35, %v59_v34  ;;  %v62_v39 = vld [vmem:[%s6984_s0 + $0x38] sm:$0xff]  ;;  %v63_v41 = vld [vmem:[%s6984_s0 + $0x40] sm:$0xff]  ;;  %v64_v42 = vld [vmem:[%s6984_s0 + $0x48] sm:$0xff] }
  0x29   :  { %v4615_v40 = vpack.c.bf16 %v62_v39, %v61_v38  ;;  %v4629_v43 = vpack.c.bf16 %v64_v42, %v63_v41  ;;  %v65_v44 = vld [vmem:[%s6984_s0 + $0x50] sm:$0xff]  ;;  %v66_v45 = vld [vmem:[%s6984_s0 + $0x58] sm:$0xff]  ;;  %v67_v47 = vld [vmem:[%s6984_s0 + $0x60] sm:$0xff] }
  0x2a   :  { %v4643_v46 = vpack.c.bf16 %v66_v45, %v65_v44  ;;  %v68_v48 = vld [vmem:[%s6984_s0 + $0x68] sm:$0xff]  ;;  %v69_v50 = vld [vmem:[%s6984_s0 + $0x70] sm:$0xff]  ;;  %v70_v51 = vld [vmem:[%s6984_s0 + $0x78] sm:$0xff] }
  0x2b   :  { %332 = vmatpush1.bf16.msra.mxu0 %v4097_v15  ;;  %445 = vmatpush1.bf16.msra.mxu1 %v4098_v16  ;;  %v4657_v49 = vpack.c.bf16 %v68_v48, %v67_v47  ;;  %v4671_v52 = vpack.c.bf16 %v70_v51, %v69_v50  ;;  %v1792_v53 = vld [vmem:[#allocation4 + $0xf8] sm:$0xff]  ;;  %v1791_v57 = vld [vmem:[#allocation4 + $0xf0] sm:$0xff]  ;;  %v1790_v61 = vld [vmem:[#allocation4 + $0xe8] sm:$0xff] }
  0x2c   :  { %551 = vmatprep.subr.bf16.mxu0 %v4101_v19  ;;  %3935 = vmatprep.subr.bf16.mxu1 %v4105_v22  ;;  %v1824_v54 = vld [vmem:[#allocation4 + $0x1f8] sm:$0xff]  ;;  %v1823_v58 = vld [vmem:[#allocation4 + $0x1f0] sm:$0xff]  ;;  %v1822_v62 = vld [vmem:[#allocation4 + $0x1e8] sm:$0xff] }
  0x2d   :  { %v1776_v55 = vld [vmem:[#allocation4 + $0x78] sm:$0xff]  ;;  %v1775_v59 = vld [vmem:[#allocation4 + $0x70] sm:$0xff]  ;;  %v1774_v63 = vld [vmem:[#allocation4 + $0x68] sm:$0xff] }
  0x2e   :  { %3550 = vmatmul.mubr.msk.bf16.vlgmr.msra.gmra.mxu0 %vm292_vm0, %v4573_v20  ;;  %3558 = vmatmul.mubr.msk.bf16.vlgmr.msra.gmra.mxu1 %vm292_vm0, %v4573_v20  ;;  %v1808_v56 = vld [vmem:[#allocation4 + $0x178] sm:$0xff]  ;;  %v1807_v60 = vld [vmem:[#allocation4 + $0x170] sm:$0xff]  ;;  %v1806_v1 = vld [vmem:[#allocation4 + $0x168] sm:$0xff] }
  0x2f   :  { %552 = vmatpush1.bf16.msra.mxu0 %v4099_v21  ;;  %359 = vmatprep.mubr.bf16.mxu0 %v4517_v0  ;;  %v1789_v2 = vld [vmem:[#allocation4 + $0xe0] sm:$0xff]  ;;  %v1788_v6 = vld [vmem:[#allocation4 + $0xd8] sm:$0xff]  ;;  %v1787_v10 = vld [vmem:[#allocation4 + $0xd0] sm:$0xff] }
  0x30   :  { %472 = vmatprep.mubr.bf16.mxu1 %v4517_v0  ;;  %553 = vmatprep.subr.bf16.mxu0 %v4104_v23  ;;  %v1821_v3 = vld [vmem:[#allocation4 + $0x1e0] sm:$0xff]  ;;  %v1820_v7 = vld [vmem:[#allocation4 + $0x1d8] sm:$0xff]  ;;  %v1819_v11 = vld [vmem:[#allocation4 + $0x1d0] sm:$0xff] }
  0x31   :  { %3936 = vmatpush3.bf16.msra.mxu1 %v4105_v22  ;;  %v1773_v4 = vld [vmem:[#allocation4 + $0x60] sm:$0xff]  ;;  %v1772_v8 = vld [vmem:[#allocation4 + $0x58] sm:$0xff]  ;;  %v1771_v12 = vld [vmem:[#allocation4 + $0x50] sm:$0xff] }
  0x32   :  { %3937 = vmatprep.subr.bf16.mxu1 %v4109_v27  ;;  %v1805_v5 = vld [vmem:[#allocation4 + $0x160] sm:$0xff]  ;;  %v1804_v9 = vld [vmem:[#allocation4 + $0x158] sm:$0xff]  ;;  %v1803_v13 = vld [vmem:[#allocation4 + $0x150] sm:$0xff] }
  0x33   :  { %554 = vmatpush1.bf16.msra.mxu0 %v4102_v26  ;;  %v1786_v14 = vld [vmem:[#allocation4 + $0xc8] sm:$0xff]  ;;  %v1785_v18 = vld [vmem:[#allocation4 + $0xc0] sm:$0xff]  ;;  %v1784_v22 = vld [vmem:[#allocation4 + $0xb8] sm:$0xff] }
  0x34   :  { %555 = vmatprep.subr.bf16.mxu0 %v4108_v28  ;;  %v1818_v15 = vld [vmem:[#allocation4 + $0x1c8] sm:$0xff]  ;;  %v1817_v19 = vld [vmem:[#allocation4 + $0x1c0] sm:$0xff]  ;;  %v1816_v23 = vld [vmem:[#allocation4 + $0x1b8] sm:$0xff] }
  0x35   :  { %3938 = vmatpush3.bf16.msra.mxu1 %v4109_v27  ;;  %v1770_v16 = vld [vmem:[#allocation4 + $0x48] sm:$0xff]  ;;  %v1801_v21 = vld [vmem:[#allocation4 + $0x140] sm:$0xff]  ;;  %v1768_v24 = vld [vmem:[#allocation4 + $0x38] sm:$0xff] }
  0x36   :  { %3551 = vmatmul.mubr.msk.bf16.gmra.mxu0 %vm292_vm0, %v4587_v29  ;;  %3559 = vmatmul.mubr.msk.bf16.gmra.mxu1 %vm292_vm0, %v4587_v29  ;;  %v1802_v17 = vld [vmem:[#allocation4 + $0x148] sm:$0xff]  ;;  %v1800_v25 = vld [vmem:[#allocation4 + $0x138] sm:$0xff]  ;;  %v1783_v26 = vld [vmem:[#allocation4 + $0xb0] sm:$0xff] }
  0x37   :  { %369 = vmatprep.mubr.bf16.mxu0 %v4517_v0  ;;  %482 = vmatprep.mubr.bf16.mxu1 %v4517_v0  ;;  %v1815_v27 = vld [vmem:[#allocation4 + $0x1b0] sm:$0xff]  ;;  %v1781_v34 = vld [vmem:[#allocation4 + $0xa0] sm:$0xff]  ;;  %v1812_v39 = vld [vmem:[#allocation4 + $0x198] sm:$0xff] }
  0x38   :  { %556 = vmatpush1.bf16.msra.mxu0 %v4106_v30  ;;  %3939 = vmatprep.subr.bf16.mxu1 %v4113_v31  ;;  %v1767_v28 = vld [vmem:[#allocation4 + $0x30] sm:$0xff]  ;;  %v1782_v30 = vld [vmem:[#allocation4 + $0xa8] sm:$0xff]  ;;  %v1813_v35 = vld [vmem:[#allocation4 + $0x1a0] sm:$0xff] }
  0x39   :  { %557 = vmatprep.subr.bf16.mxu0 %v4112_v32  ;;  %3940 = vmatpush3.bf16.msra.mxu1 %v4113_v31  ;;  %v1814_v31 = vld [vmem:[#allocation4 + $0x1a8] sm:$0xff]  ;;  %v1797_v38 = vld [vmem:[#allocation4 + $0x120] sm:$0xff]  ;;  %v1796_v41 = vld [vmem:[#allocation4 + $0x118] sm:$0xff] }
  0x3a   :  { %3941 = vmatprep.subr.bf16.mxu1 %v4114_v33  ;;  %v1766_v32 = vld [vmem:[#allocation4 + $0x28] sm:$0xff]  ;;  %v1779_v42 = vld [vmem:[#allocation4 + $0x90] sm:$0xff] }
  0x3b   :  { %v1811_v44 = vld [vmem:[#allocation4 + $0x190] sm:$0xff]  ;;  %v1778_v48 = vld [vmem:[#allocation4 + $0x88] sm:$0xff] }
  0x3c   :  { %558 = vmatpush1.bf16.msra.mxu0 %v4110_v36  ;;  %v1765_v36 = vld [vmem:[#allocation4 + $0x20] sm:$0xff]  ;;  %v1763_v45 = vld [vmem:[#allocation4 + $0x10] sm:$0xff]  ;;  %v1810_v50 = vld [vmem:[#allocation4 + $0x188] sm:$0xff] }
  0x3d   :  { %3942 = vmatpush3.bf16.msra.mxu1 %v4114_v33  ;;  %3709 = vmatprep.subr.mxu0 %v1824_v54  ;;  %v1798_v33 = vld [vmem:[#allocation4 + $0x128] sm:$0xff]  ;;  %v1795_v47 = vld [vmem:[#allocation4 + $0x110] sm:$0xff]  ;;  %v1809_v54 = vld [vmem:[#allocation4 + $0x180] sm:$0xff] }
  0x3e   :  { %3552 = vmatmul.mubr.msk.bf16.gmra.mxu0 %vm292_vm0, %v4601_v37  ;;  %3560 = vmatmul.mubr.msk.bf16.gmra.mxu1 %vm292_vm0, %v4601_v37  ;;  %v1762_v51 = vld [vmem:[#allocation4 + $0x8] sm:$0xff] }
  0x3f   :  { %379 = vmatprep.mubr.bf16.mxu0 %v4517_v0  ;;  %492 = vmatprep.mubr.bf16.mxu1 %v4517_v0 }
  0x40   :  { %3629 = vmatprep.subr.mxu1 %v1792_v53  ;;  %v1794_v53 = vld [vmem:[#allocation4 + $0x108] sm:$0xff] }
  0x46   :  { %3553 = vmatmul.mubr.msk.bf16.gmra.mxu0 %vm292_vm0, %v4615_v40  ;;  %3561 = vmatmul.mubr.msk.bf16.gmra.mxu1 %vm292_vm0, %v4615_v40 }
  0x47   :  { %389 = vmatprep.mubr.bf16.mxu0 %v4517_v0  ;;  %502 = vmatprep.mubr.bf16.mxu1 %v4517_v0 }
  0x4e   :  { %3554 = vmatmul.mubr.msk.bf16.gmra.mxu0 %vm292_vm0, %v4629_v43  ;;  %3562 = vmatmul.mubr.msk.bf16.gmra.mxu1 %vm292_vm0, %v4629_v43 }
  0x4f   :  { %399 = vmatprep.mubr.bf16.mxu0 %v4517_v0  ;;  %512 = vmatprep.mubr.bf16.mxu1 %v4517_v0 }
  0x56   :  { %3555 = vmatmul.mubr.msk.bf16.gmra.mxu0 %vm292_vm0, %v4643_v46  ;;  %3563 = vmatmul.mubr.msk.bf16.gmra.mxu1 %vm292_vm0, %v4643_v46 }
  0x57   :  { %409 = vmatprep.mubr.bf16.mxu0 %v4517_v0  ;;  %522 = vmatprep.mubr.bf16.mxu1 %v4517_v0 }
  0x5e   :  { %3556 = vmatmul.mubr.msk.bf16.gmra.mxu0 %vm292_vm0, %v4657_v49  ;;  %3564 = vmatmul.mubr.msk.bf16.gmra.mxu1 %vm292_vm0, %v4657_v49 }
  0x5f   :  { %419 = vmatprep.mubr.bf16.mxu0 %v4517_v0  ;;  %532 = vmatprep.mubr.bf16.mxu1 %v4517_v0 }
  0x66   :  { %3557 = vmatmul.mubr.msk.bf16.gmra.mxu0 %vm292_vm0, %v4671_v52  ;;  %3565 = vmatmul.mubr.msk.bf16.gmra.mxu1 %vm292_vm0, %v4671_v52 }
  0x67   :  { %575 = vmatprep.mubr.bf16.mxu0 %v4517_v0  ;;  %3943 = vmatprep.mubr.msk.bf16.mxu1 %vm292_vm0, %v4573_v20 }
  0x6e   :  { %3566 = vmatmul.mubr.msk.bf16.vlgmr.msra.gmra.mxu0 %vm292_vm0, %v4573_v20  ;;  %3944 = vmatmul.mubr.msk.bf16.vlgmr.msra.gmra.mxu1 %vm292_vm0, %v4587_v29  ;;  %v1769_v20 = vld [vmem:[#allocation4 + $0x40] sm:$0xff] }
  0x6f   :  { %585 = vmatprep.mubr.bf16.mxu0 %v4517_v0  ;;  %3947 = vmatprep.mubr.msk.bf16.mxu1 %vm292_vm0, %v4601_v37 }
  0x70   :  { %3630 = vmatpush3.msra.mxu1 %v1776_v55  ;;  %3710 = vmatpush3.msra.mxu0 %v1808_v56  ;;  %v1761_v55 = vld [vmem:[#allocation4] sm:$0xff] }
  0x71   :  { %3631 = vmatprep.subr.mxu1 %v1791_v57  ;;  %3711 = vmatprep.subr.mxu0 %v1823_v58  ;;  %v1793_v56 = vld [vmem:[#allocation4 + $0x100] sm:$0xff]  ;;  %v1856_v57 = vld [vmem:[#allocation4 + $0x2f8] sm:$0xff]  ;;  %v6992_v58 = vlaneseq }
  0x72   :  { %3632 = vmatpush3.msra.mxu1 %v1775_v59  ;;  %3712 = vmatpush3.msra.mxu0 %v1807_v60 }
  0x73   :  { %3633 = vmatprep.subr.mxu1 %v1790_v61  ;;  %3713 = vmatprep.subr.mxu0 %v1822_v62  ;;  %v4718_v59 = vshrl.u32 %v6992_v58, 7  ;;  %v111_v61 = vld [vmem:[%s6986_s2] sm:$0xff] }
  0x74   :  { %3634 = vmatpush3.msra.mxu1 %v1774_v63  ;;  %3714 = vmatpush3.msra.mxu0 %v1806_v1 }
  0x75   :  { %3635 = vmatprep.subr.mxu1 %v1789_v2  ;;  %3715 = vmatprep.subr.mxu0 %v1821_v3  ;;  %v123_v60 = vsub.s32 2, %v4718_v59  ;;  %v119_v62 = vsub.s32 1, %v4718_v59 }
  0x76   :  { %3567 = vmatmul.mubr.msk.bf16.gmra.mxu0 %vm292_vm0, %v4587_v29  ;;  %3948 = vmatmul.mubr.msk.bf16.gmra.mxu1 %vm292_vm0, %v4615_v40  ;;  %v1799_v29 = vld [vmem:[#allocation4 + $0x130] sm:$0xff] }
  0x77   :  { %595 = vmatprep.mubr.bf16.mxu0 %v4517_v0  ;;  %3951 = vmatprep.mubr.msk.bf16.mxu1 %vm292_vm0, %v4629_v43  ;;  %v4729_v63 = vrot.slane %v111_v61, %v123_v60  ;;  %v4731_v2 = vrot.slane %v111_v61, %v119_v62 }
  0x78   :  { %3636 = vmatpush3.msra.mxu1 %v1773_v4  ;;  %3716 = vmatpush3.msra.mxu0 %v1805_v5 }
  0x79   :  { %3637 = vmatprep.subr.mxu1 %v1788_v6  ;;  %3717 = vmatprep.subr.mxu0 %v1820_v7 }
  0x7a   :  { %3638 = vmatpush3.msra.mxu1 %v1772_v8  ;;  %3718 = vmatpush3.msra.mxu0 %v1804_v9 }
  0x7b   :  { %3639 = vmatprep.subr.mxu1 %v1787_v10  ;;  %3719 = vmatprep.subr.mxu0 %v1819_v11  ;;  %v131_v10 = vsub.s32 4, %v4718_v59  ;;  %v139_v11 = vsub.s32 6, %v4718_v59 }
  0x7c   :  { %3640 = vmatpush3.msra.mxu1 %v1771_v12  ;;  %3720 = vmatpush3.msra.mxu0 %v1803_v13 }
  0x7d   :  { %3641 = vmatprep.subr.mxu1 %v1786_v14  ;;  %3721 = vmatprep.subr.mxu0 %v1818_v15 }
  0x7e   :  { %3568 = vmatmul.mubr.msk.bf16.gmra.mxu0 %vm292_vm0, %v4601_v37  ;;  %3952 = vmatmul.mubr.msk.bf16.gmra.mxu1 %vm292_vm0, %v4643_v46  ;;  %v1780_v37 = vld [vmem:[#allocation4 + $0x98] sm:$0xff] }
  0x7f   :  { %605 = vmatprep.mubr.bf16.mxu0 %v4517_v0  ;;  %3955 = vmatprep.mubr.msk.bf16.mxu1 %vm292_vm0, %v4657_v49 }
  0x80   :  { %3642 = vmatpush3.msra.mxu1 %v1770_v16  ;;  %3722 = vmatpush3.msra.mxu0 %v1802_v17 }
  0x81   :  { %3643 = vmatprep.subr.mxu1 %v1785_v18  ;;  %3723 = vmatprep.subr.mxu0 %v1817_v19 }
  0x82   :  { %3644 = vmatpush3.msra.mxu1 %v1769_v20  ;;  %3724 = vmatpush3.msra.mxu0 %v1801_v21 }
  0x83   :  { %3645 = vmatprep.subr.mxu1 %v1784_v22  ;;  %3725 = vmatprep.subr.mxu0 %v1816_v23  ;;  %v4748_v23 = vrot.slane %v111_v61, %v131_v10 }
  0x84   :  { %3646 = vmatpush3.msra.mxu1 %v1768_v24  ;;  %3726 = vmatpush3.msra.mxu0 %v1800_v25  ;;  %v4750_v24 = vrot.slane %v111_v61, %v139_v11 }
  0x85   :  { %3647 = vmatprep.subr.mxu1 %v1783_v26  ;;  %3727 = vmatprep.subr.mxu0 %v1815_v27  ;;  %7073 = vst [vmem:[#allocation8_spill] sm:$0xff] %v4748_v23 }
  0x86   :  { %3569 = vmatmul.mubr.msk.bf16.gmra.mxu0 %vm292_vm0, %v4615_v40  ;;  %3956 = vmatmul.mubr.msk.bf16.gmra.mxu1 %vm292_vm0, %v4671_v52  ;;  %v1764_v40 = vld [vmem:[#allocation4 + $0x18] sm:$0xff]  ;;  %7074 = vst [vmem:[#allocation9_spill] sm:$0xff] %v4750_v24 }
  0x87   :  { %615 = vmatprep.mubr.bf16.mxu0 %v4517_v0  ;;  %3648 = vmatpush3.msra.mxu1 %v1767_v28 }
  0x88   :  { %3728 = vmatpush3.msra.mxu0 %v1799_v29  ;;  %3649 = vmatprep.subr.mxu1 %v1782_v30 }
  0x89   :  { %3729 = vmatprep.subr.mxu0 %v1814_v31  ;;  %3650 = vmatpush3.msra.mxu1 %v1766_v32  ;;  %v4760_v31 = vld [vmem:[#allocation4 + $0x378] sm:$0xff] }
  0x8a   :  { %3730 = vmatpush3.msra.mxu0 %v1798_v33  ;;  %3651 = vmatprep.subr.mxu1 %v1781_v34 }
  0x8b   :  { %3731 = vmatprep.subr.mxu0 %v1813_v35  ;;  %3652 = vmatpush3.msra.mxu1 %v1765_v36  ;;  %v135_v35 = vsub.s32 5, %v4718_v59 }
  0x8c   :  { %3653 = vmatprep.subr.mxu1 %v1780_v37  ;;  %3732 = vmatpush3.msra.mxu0 %v1797_v38 }
  0x8d   :  { %3733 = vmatprep.subr.mxu0 %v1812_v39  ;;  %3654 = vmatpush3.msra.mxu1 %v1764_v40 }
  0x8e   :  { %3570 = vmatmul.mubr.msk.bf16.gmra.mxu0 %vm292_vm0, %v4629_v43  ;;  %3655 = vmatprep.subr.mxu1 %v1779_v42  ;;  %v1777_v43 = vld [vmem:[#allocation4 + $0x80] sm:$0xff] }
  0x8f   :  { %625 = vmatprep.mubr.bf16.mxu0 %v4517_v0  ;;  %3734 = vmatpush3.msra.mxu0 %v1796_v41 }
  0x90   :  { %3735 = vmatprep.subr.mxu0 %v1811_v44  ;;  %3656 = vmatpush3.msra.mxu1 %v1763_v45 }
  0x91   :  { %3736 = vmatpush3.msra.mxu0 %v1795_v47  ;;  %3657 = vmatprep.subr.mxu1 %v1778_v48 }
  0x92   :  { %3737 = vmatprep.subr.mxu0 %v1810_v50  ;;  %3658 = vmatpush3.msra.mxu1 %v1762_v51 }
  0x93   :  { %3738 = vmatpush3.msra.mxu0 %v1794_v53  ;;  %3659 = vmatprep.subr.mxu1 %v1777_v43 }
  0x94   :  { %3739 = vmatprep.subr.mxu0 %v1809_v54  ;;  %3660 = vmatpush3.msra.mxu1 %v1761_v55 }
  0x95   :  { %3740 = vmatpush3.msra.mxu0 %v1793_v56  ;;  %3789 = vmatprep.subr.mxu1 %v1856_v57 }
  0x96   :  { %3571 = vmatmul.mubr.msk.bf16.gmra.mxu0 %vm292_vm0, %v4643_v46  ;;  %v115_v46 = vsub.s32 0, %v4718_v59  ;;  %3959 = vmatprep.subr.mxu0 %v4760_v31 }
  0x97   :  { %635 = vmatprep.mubr.bf16.mxu0 %v4517_v0 }
  0x9e   :  { %3572 = vmatmul.mubr.msk.bf16.gmra.mxu0 %vm292_vm0, %v4657_v49  ;;  %v127_v49 = vsub.s32 3, %v4718_v59  ;;  %v4790_v59 = vrot.slane %v111_v61, %v135_v35 }
  0x9f   :  { %645 = vmatprep.mubr.bf16.mxu0 %v4517_v0  ;;  %v4727_v0 = vrot.slane %v111_v61, %v115_v46 }
  0xa0   :  { %v4733_v3 = vrot.slane %v111_v61, %v127_v49  ;;  %7075 = vst [vmem:[#allocation10_spill] sm:$0xff] %v4790_v59 }
  0xa6   :  { %3573 = vmatmul.mubr.msk.bf16.gmra.mxu0 %vm292_vm0, %v4671_v52 }
  0xee   :  { %v351_v52 = vpop.f32.mrf.mxu0  ;;  %v464_v1 = vpop.f32.mrf.mxu1 }
  0xef   :  { %v352_v4 = vadd.f32 %v351_v52, %v4727_v0  ;;  %v465_v5 = vadd.f32 %v464_v1, %v4729_v63 }
  0xf0   :  { %v353_v6 = vpop.f32.mrf.mxu0  ;;  %v466_v7 = vpop.f32.mrf.mxu1 }
  0xf1   :  { %v865_v8 = vmul.f32 0.044715, %v352_v4  ;;  %v867_v9 = vmul.f32 0.044715, %v465_v5  ;;  %v4740_v12 = vadd.f32 %v353_v6, %v4731_v2  ;;  %v4743_v13 = vadd.f32 %v466_v7, %v4733_v3 }
  0xf2   :  { %v355_v14 = vpop.f32.mrf.mxu0  ;;  %v468_v15 = vpop.f32.mrf.mxu1  ;;  %v4767_v36 = vmul.f32 0.5, %v352_v4  ;;  %v4769_v37 = vmul.f32 0.5, %v465_v5 }
  0xf3   :  { %v977_v16 = vmul.f32 %v865_v8, %v352_v4  ;;  %v979_v17 = vmul.f32 %v867_v9, %v465_v5  ;;  %v4746_v18 = vadd.f32 %v355_v14, %v4727_v0  ;;  %v866_v25 = vmul.f32 0.044715, %v4740_v12 }
  0xf4   :  { %v357_v19 = vpop.f32.mrf.mxu0  ;;  %v470_v20 = vpop.f32.mrf.mxu1  ;;  %v868_v26 = vmul.f32 0.044715, %v4743_v13  ;;  %v4755_v27 = vadd.f32 %v468_v15, %v4729_v63  ;;  %v4796_v49 = vmul.f32 0.5, %v4740_v12  ;;  %v4799_v52 = vmul.f32 0.5, %v4743_v13 }
  0xf5   :  { %v1089_v21 = vmul.f32 %v977_v16, %v352_v4  ;;  %v1091_v22 = vmul.f32 %v979_v17, %v465_v5  ;;  %v4758_v28 = vadd.f32 %v357_v19, %v4731_v2  ;;  %v4763_v34 = vadd.f32 %v470_v20, %v4733_v3 }
  0xf6   :  { %v361_v29 = vpop.f32.mrf.mxu0  ;;  %v474_v30 = vpop.f32.mrf.mxu1  ;;  %v872_v38 = vmul.f32 0.044715, %v4746_v18  ;;  %v978_v48 = vmul.f32 %v866_v25, %v4740_v12  ;;  %v980_v50 = vmul.f32 %v868_v26, %v4743_v13  ;;  %v874_v51 = vmul.f32 0.044715, %v4755_v27 }
  0xf7   :  { %v1201_v32 = vadd.f32 %v1089_v21, %v352_v4  ;;  %v1203_v33 = vadd.f32 %v1091_v22, %v465_v5  ;;  %v4773_v39 = vadd.f32 %v361_v29, %v4727_v0  ;;  %v4776_v45 = vadd.f32 %v474_v30, %v4729_v63 }
  0xf8   :  { %v363_v40 = vpop.f32.mrf.mxu0  ;;  %v476_v41 = vpop.f32.mrf.mxu1  ;;  %v873_v53 = vmul.f32 0.044715, %v4758_v28  ;;  %v875_v55 = vmul.f32 0.044715, %v4763_v34  ;;  %v4802_v1 = vmul.f32 %v872_v38, %v4746_v18  ;;  %v4807_v5 = vmul.f32 %v874_v51, %v4755_v27 }
  0xf9   :  { %v1313_v42 = vmul.f32 0.7978846, %v1201_v32  ;;  %v1315_v44 = vmul.f32 0.7978846, %v1203_v33  ;;  %v4779_v47 = vadd.f32 %v363_v40, %v4731_v2  ;;  %v879_v56 = vmul.f32 0.044715, %v4773_v39 }
  0xfa   :  { %v365_v43 = vpop.f32.mrf.mxu0  ;;  %v478_v54 = vpop.f32.mrf.mxu1  ;;  %v4788_v57 = vadd.f32 %v476_v41, %v4733_v3  ;;  %v881_v4 = vmul.f32 0.044715, %v4776_v45  ;;  %v985_v6 = vmul.f32 %v873_v53, %v4758_v28  ;;  %v1090_v9 = vmul.f32 %v978_v48, %v4740_v12 }
  0xfb   :  { %4115 = vtanh.f32 %v1313_v42  ;;  %v4793_v46 = vadd.f32 %v365_v43, %v4727_v0  ;;  %v880_v61 = vmul.f32 0.044715, %v4779_v47  ;;  %v1092_v10 = vmul.f32 %v980_v50, %v4743_v13 }
  0xfc   :  { %v367_v60 = vpop.f32.mrf.mxu0  ;;  %v480_v62 = vpop.f32.mrf.mxu1  ;;  %4117 = vtanh.f32 %v1315_v44  ;;  %v4813_v11 = vmul.f32 %v875_v55, %v4763_v34  ;;  %v4816_v14 = vmul.f32 %v879_v56, %v4773_v39  ;;  %v882_v15 = vmul.f32 0.044715, %v4788_v57 }
  0xfd   :  { %v4820_v16 = vadd.f32 %v478_v54, %v4729_v63  ;;  %v886_v17 = vmul.f32 0.044715, %v4793_v46  ;;  %v4824_v19 = vadd.f32 %v367_v60, %v4731_v2  ;;  %v1202_v22 = vadd.f32 %v1090_v9, %v4740_v12 }
  0xfe   :  { %v371_v7 = vpop.f32.mrf.mxu0  ;;  %v484_v8 = vpop.f32.mrf.mxu1  ;;  %v1204_v25 = vadd.f32 %v1092_v10, %v4743_v13  ;;  %v4829_v26 = vmul.f32 %v881_v4, %v4776_v45  ;;  %v4832_v29 = vmul.f32 %v880_v61, %v4779_v47  ;;  %v4835_v30 = vadd.f32 %v480_v62, %v4733_v3 }
  0xff   :  { %v4838_v32 = vadd.f32 %v371_v7, %v4727_v0  ;;  %v4841_v33 = vadd.f32 %v484_v8, %v4729_v63  ;;  %v1314_v38 = vmul.f32 0.7978846, %v1202_v22  ;;  %v4847_v41 = vmul.f32 %v882_v15, %v4788_v57 }
 0x100   :  { %v373_v20 = vpop.f32.mrf.mxu0  ;;  %v486_v21 = vpop.f32.mrf.mxu1  ;;  %v1316_v40 = vmul.f32 0.7978846, %v1204_v25  ;;  %v888_v42 = vmul.f32 0.044715, %v4820_v16  ;;  %v4857_v50 = vmul.f32 %v886_v17, %v4793_v46  ;;  %v887_v51 = vmul.f32 0.044715, %v4824_v19 }
 0x101   :  { %7076 = vst [vmem:[#allocation11_spill] sm:$0xff] %v4838_v32  ;;  %7077 = vst [vmem:[#allocation12_spill] sm:$0xff] %v4841_v33  ;;  %v4844_v35 = vadd.f32 %v373_v20, %v4731_v2  ;;  %v4851_v44 = vadd.f32 %v486_v21, %v4733_v3  ;;  %4119 = vtanh.f32 %v1314_v38  ;;  %v889_v55 = vmul.f32 0.044715, %v4835_v30 }
 0x102   :  { %v375_v12 = vpop.f32.mrf.mxu0  ;;  %v488_v13 = vpop.f32.mrf.mxu1  ;;  %v893_v56 = vmul.f32 0.044715, %v4838_v32  ;;  %v895_v4 = vmul.f32 0.044715, %v4841_v33  ;;  %4121 = vtanh.f32 %v1316_v40  ;;  %v1097_v9 = vmul.f32 %v985_v6, %v4758_v28 }
 0x103   :  { %v4854_v48 = vadd.f32 %v375_v12, %v4727_v0  ;;  %v4861_v53 = vadd.f32 %v488_v13, %v4729_v63  ;;  %v894_v61 = vmul.f32 0.044715, %v4844_v35  ;;  %v4875_v10 = vmul.f32 %v888_v42, %v4820_v16 }
 0x104   :  { %v377_v43 = vpop.f32.mrf.mxu0  ;;  %v490_v54 = vpop.f32.mrf.mxu1  ;;  %v896_v15 = vmul.f32 0.044715, %v4851_v44  ;;  %v4889_v40 = vmul.f32 %v887_v51, %v4824_v19  ;;  %v4892_v42 = vmul.f32 %v889_v55, %v4835_v30  ;;  %v4899_v58 = vmul.f32 %v895_v4, %v4841_v33 }
 0x105   :  { %7078 = vst [vmem:[#allocation13_spill] sm:$0xff] %v4854_v48  ;;  %7079 = vst [vmem:[#allocation14_spill] sm:$0xff] %v4861_v53  ;;  %v4866_v60 = vadd.f32 %v377_v43, %v4731_v2  ;;  %v4869_v62 = vadd.f32 %v490_v54, %v4733_v3  ;;  %v900_v17 = vmul.f32 0.044715, %v4854_v48  ;;  %v902_v21 = vmul.f32 0.044715, %v4861_v53 }
 0x106   :  { %v381_v7 = vpop.f32.mrf.mxu0  ;;  %v494_v8 = vpop.f32.mrf.mxu1  ;;  %v4895_v43 = vmul.f32 %v893_v56, %v4838_v32  ;;  %7085 = vst [vmem:[#allocation20_spill] sm:$0xff] %v4899_v58  ;;  %v1209_v55 = vadd.f32 %v1097_v9, %v4758_v28  ;;  %v4909_v23 = vmul.f32 %v896_v15, %v4851_v44 }
 0x107   :  { %7080 = vst [vmem:[#allocation15_spill] sm:$0xff] %v4866_v60  ;;  %7081 = vst [vmem:[#allocation16_spill] sm:$0xff] %v4869_v62  ;;  %v4880_v20 = vadd.f32 %v381_v7, %v4727_v0  ;;  %v901_v22 = vmul.f32 0.044715, %v4866_v60  ;;  %v903_v25 = vmul.f32 0.044715, %v4869_v62  ;;  %v4886_v12 = vadd.f32 %v494_v8, %v4729_v63 }
 0x108   :  { %v383_v6 = vpop.f32.mrf.mxu0  ;;  %v496_v13 = vpop.f32.mrf.mxu1  ;;  %7084 = vst [vmem:[#allocation19_spill] sm:$0xff] %v4895_v43  ;;  %v4902_v8 = vmul.f32 %v894_v61, %v4844_v35  ;;  %7087 = vst [vmem:[#allocation22_spill] sm:$0xff] %v4909_v23  ;;  %v4912_v56 = vmul.f32 %v900_v17, %v4854_v48  ;;  %v4919_v61 = vmul.f32 %v902_v21, %v4861_v53  ;;  %v1321_v48 = vmul.f32 0.7978846, %v1209_v55 }
 0x109   :  { %7082 = vst [vmem:[#allocation17_spill] sm:$0xff] %v4880_v20  ;;  %7083 = vst [vmem:[#allocation18_spill] sm:$0xff] %v4886_v12  ;;  %v4116_v38 = vpop.eup %4115  ;;  %v907_v54 = vmul.f32 0.044715, %v4880_v20  ;;  %v4905_v59 = vadd.f32 %v383_v6, %v4731_v2  ;;  %v909_v43 = vmul.f32 0.044715, %v4886_v12  ;;  %v4916_v4 = vadd.f32 %v496_v13, %v4733_v3 }
 0x10a   :  { %v4118_v7 = vpop.eup %4117  ;;  %v385_v51 = vpop.f32.mrf.mxu0  ;;  %7088 = vst [vmem:[#allocation23_spill] sm:$0xff] %v4912_v56  ;;  %7089 = vst [vmem:[#allocation24_spill] sm:$0xff] %v4919_v61  ;;  %v4922_v6 = vmul.f32 %v901_v22, %v4866_v60  ;;  %v4925_v58 = vmul.f32 %v903_v25, %v4869_v62  ;;  %v1537_v33 = vadd.f32 1.0, %v4116_v38  ;;  %v1099_v38 = vmul.f32 %v4813_v11, %v4763_v34 }
 0x10b   :  { %7086 = vst [vmem:[#allocation21_spill] sm:$0xff] %v4905_v59  ;;  %v498_v24 = vpop.f32.mrf.mxu1  ;;  %v4928_v17 = vmul.f32 %v907_v54, %v4880_v20  ;;  %v4931_v56 = vadd.f32 %v385_v51, %v4727_v0  ;;  %v1539_v21 = vadd.f32 1.0, %v4118_v7  ;;  %v908_v61 = vmul.f32 0.044715, %v4905_v59 }
 0x10c   :  { %7090 = vst [vmem:[#allocation25_spill] sm:$0xff] %v4922_v6  ;;  %7091 = vst [vmem:[#allocation26_spill] sm:$0xff] %v4925_v58  ;;  %v387_v9 = vpop.f32.mrf.mxu0  ;;  %v4934_v13 = vadd.f32 %v498_v24, %v4729_v63  ;;  %v4943_v54 = vmul.f32 %v909_v43, %v4886_v12  ;;  %v910_v51 = vmul.f32 0.044715, %v4916_v4  ;;  %v1649_v55 = vmul.f32 %v1537_v33, %v4767_v36 }
 0x10d   :  { %v500_v15 = vpop.f32.mrf.mxu1  ;;  %7092 = vst [vmem:[#allocation27_spill] sm:$0xff] %v4928_v17  ;;  %v4938_v22 = vadd.f32 %v387_v9, %v4731_v2  ;;  %4123 = vtanh.f32 %v1321_v48  ;;  %v1211_v11 = vadd.f32 %v1099_v38, %v4763_v34  ;;  %v4968_v6 = vmul.f32 %v908_v61, %v4905_v59  ;;  %v1840_v59 = vld [vmem:[#allocation4 + $0x278] sm:$0xff] }
 0x10e   :  { %v391_v25 = vpop.f32.mrf.mxu0  ;;  %7093 = vst [vmem:[#allocation28_spill] sm:$0xff] %v4943_v54  ;;  %v4947_v24 = vadd.f32 %v500_v15, %v4733_v3  ;;  %v4120_v43 = vpop.eup %4119  ;;  %v914_v54 = vmul.f32 0.044715, %v4931_v56  ;;  %v916_v12 = vmul.f32 0.044715, %v4934_v13 }
 0x10f   :  { %v504_v53 = vpop.f32.mrf.mxu1  ;;  %v4950_v7 = vadd.f32 %v391_v25, %v4727_v0  ;;  %v1651_v25 = vmul.f32 %v1539_v21, %v4769_v37  ;;  %v1538_v58 = vadd.f32 1.0, %v4120_v43  ;;  %v1323_v48 = vmul.f32 0.7978846, %v1211_v11  ;;  %v4122_v38 = vpop.eup %4121  ;;  %7096 = vst [vmem:[#allocation31_spill] sm:$0xff] %v4968_v6 }
 0x110   :  { %v4953_v9 = vadd.f32 %v504_v53, %v4729_v63  ;;  %v393_v17 = vpop.f32.mrf.mxu0  ;;  %v915_v53 = vmul.f32 0.044715, %v4938_v22  ;;  %v917_v60 = vmul.f32 0.044715, %v4947_v24  ;;  %v4976_v37 = vmul.f32 %v910_v51, %v4916_v4 }
 0x111   :  { %7094 = vst [vmem:[#allocation29_spill] sm:$0xff] %v4950_v7  ;;  %v506_v20 = vpop.f32.mrf.mxu1  ;;  %v4960_v15 = vadd.f32 %v393_v17, %v4731_v2  ;;  %v921_v17 = vmul.f32 0.044715, %v4950_v7  ;;  %v1650_v21 = vmul.f32 %v1538_v58, %v4796_v49  ;;  %v1540_v43 = vadd.f32 1.0, %v4122_v38  ;;  %v1855_v38 = vld [vmem:[#allocation4 + $0x2f0] sm:$0xff] }
 0x112   :  { %7095 = vst [vmem:[#allocation30_spill] sm:$0xff] %v4953_v9  ;;  %v4965_v62 = vadd.f32 %v506_v20, %v4733_v3  ;;  %v395_v36 = vpop.f32.mrf.mxu0  ;;  %v923_v20 = vmul.f32 0.044715, %v4953_v9  ;;  %v4981_v23 = vmul.f32 %v914_v54, %v4931_v56  ;;  %v4984_v61 = vmul.f32 %v916_v12, %v4934_v13 }
 0x113   :  { %v508_v33 = vpop.f32.mrf.mxu1  ;;  %v4973_v32 = vadd.f32 %v395_v36, %v4727_v0  ;;  %v922_v6 = vmul.f32 0.044715, %v4960_v15  ;;  %4125 = vtanh.f32 %v1323_v48  ;;  %v4988_v36 = vmul.f32 %v915_v53, %v4938_v22  ;;  %1944 = vmatprep.mubr.f32.mxu1 %v1650_v21 }
 0x114   :  { %v397_v11 = vpop.f32.mrf.mxu0  ;;  %7098 = vst [vmem:[#allocation33_spill] sm:$0xff] %v4984_v61  ;;  %v1652_v51 = vmul.f32 %v1540_v43, %v4799_v52  ;;  %v924_v58 = vmul.f32 0.044715, %v4965_v62  ;;  %v4993_v49 = vadd.f32 %v508_v33, %v4729_v63  ;;  %v4996_v12 = vmul.f32 %v917_v60, %v4947_v24  ;;  %1945 = vmatmul.mubr.f32.vlgmr.msra.gmra.mxu1 %v1649_v55  ;;  %v1839_v52 = vld [vmem:[#allocation4 + $0x270] sm:$0xff]  ;;  %v1854_v43 = vld [vmem:[#allocation4 + $0x2e8] sm:$0xff] }
 0x115   :  { %7097 = vst [vmem:[#allocation32_spill] sm:$0xff] %v4973_v32  ;;  %v510_v54 = vpop.f32.mrf.mxu1  ;;  %v4999_v61 = vmul.f32 %v921_v17, %v4950_v7  ;;  %v928_v53 = vmul.f32 0.044715, %v4973_v32  ;;  %v1096_v48 = vmul.f32 %v4802_v1, %v4746_v18  ;;  %v5005_v21 = vmul.f32 %v923_v20, %v4953_v9  ;;  %3790 = vmatpush3.msra.mxu1 %v1840_v59  ;;  %v1838_v59 = vld [vmem:[#allocation4 + $0x268] sm:$0xff]  ;;  %v1837_v9 = vld [vmem:[#allocation4 + $0x260] sm:$0xff]  ;;  %v1836_v7 = vld [vmem:[#allocation4 + $0x258] sm:$0xff] }
 0x116   :  { %7099 = vst [vmem:[#allocation34_spill] sm:$0xff] %v4993_v49  ;;  %2089 = vmatprep.mubr.f32.mxu0 %v1652_v51  ;;  %v761_v33 = vmul.f32 0.5, %v4758_v28  ;;  %v5009_v60 = vadd.f32 %v397_v11, %v4731_v2  ;;  %v1098_v17 = vmul.f32 %v4807_v5, %v4755_v27  ;;  %v401_v55 = vpop.f32.mrf.mxu0  ;;  %v5017_v1 = vmul.f32 0.5, %v4763_v34  ;;  %3791 = vmatprep.subr.mxu1 %v1855_v38  ;;  %v1871_v11 = vld [vmem:[#allocation4 + $0x370] sm:$0xff] }
 0x117   :  { %7100 = vst [vmem:[#allocation35_spill] sm:$0xff] %v4999_v61  ;;  %7101 = vst [vmem:[#allocation36_spill] sm:$0xff] %v5005_v21  ;;  %v5014_v61 = vmul.f32 %v922_v6, %v4960_v15  ;;  %2090 = vmatmul.mubr.f32.vlgmr.msra.gmra.mxu0 %v1651_v25  ;;  %v5020_v20 = vadd.f32 %v510_v54, %v4733_v3  ;;  %v1208_v28 = vadd.f32 %v1096_v48, %v4746_v18  ;;  %v1853_v25 = vld [vmem:[#allocation4 + $0x2e0] sm:$0xff]  ;;  %v514_v21 = vpop.f32.mrf.mxu1 }
 0x118   :  { %v5024_v51 = vmul.f32 %v924_v58, %v4965_v62  ;;  %v930_v5 = vmul.f32 0.044715, %v4993_v49  ;;  %v1210_v6 = vadd.f32 %v1098_v17, %v4755_v27  ;;  %3792 = vmatpush3.msra.mxu1 %v1839_v52  ;;  %v1104_v34 = vmul.f32 %v4832_v29, %v4779_v47  ;;  %3960 = vmatpush3.msra.mxu0 %v4760_v31  ;;  %v1870_v52 = vld [vmem:[#allocation4 + $0x368] sm:$0xff] }
 0x119   :  { %v5031_v54 = vmul.f32 %v928_v53, %v4973_v32  ;;  %v5034_v48 = vmul.f32 0.5, %v4746_v18  ;;  %v1320_v38 = vmul.f32 0.7978846, %v1208_v28  ;;  %v1106_v58 = vmul.f32 %v4847_v41, %v4788_v57  ;;  %3793 = vmatprep.subr.mxu1 %v1854_v43  ;;  %v403_v18 = vpop.f32.mrf.mxu0  ;;  %v1852_v28 = vld [vmem:[#allocation4 + $0x2d8] sm:$0xff]  ;;  %3961 = vmatprep.subr.mxu0 %v1871_v11 }
 0x11a   :  { %7102 = vst [vmem:[#allocation37_spill] sm:$0xff] %v5024_v51  ;;  %v929_v17 = vmul.f32 0.044715, %v5009_v60  ;;  %v5041_v29 = vmul.f32 0.5, %v4755_v27  ;;  %v1322_v53 = vmul.f32 0.7978846, %v1210_v6  ;;  %3794 = vmatpush3.msra.mxu1 %v1838_v59  ;;  %v4124_v32 = vpop.eup %4123  ;;  %v5046_v43 = vadd.f32 %v401_v55, %v4727_v0  ;;  %3962 = vmatpush3.msra.mxu0 %v1871_v11 }
 0x11b   :  { %7103 = vst [vmem:[#allocation38_spill] sm:$0xff] %v5031_v54  ;;  %v1216_v54 = vadd.f32 %v1104_v34, %v4779_v47  ;;  %v931_v41 = vmul.f32 0.044715, %v5020_v20  ;;  %4127 = vtanh.f32 %v1320_v38  ;;  %v1218_v31 = vadd.f32 %v1106_v58, %v4788_v57  ;;  %3795 = vmatprep.subr.mxu1 %v1853_v25  ;;  %v1869_v27 = vld [vmem:[#allocation4 + $0x360] sm:$0xff]  ;;  %v1851_v51 = vld [vmem:[#allocation4 + $0x2d0] sm:$0xff]  ;;  %3963 = vmatprep.subr.mxu0 %v1870_v52  ;;  %v516_v25 = vpop.f32.mrf.mxu1 }
 0x11c   :  { %v1545_v6 = vadd.f32 1.0, %v4124_v32  ;;  %4129 = vtanh.f32 %v1322_v53  ;;  %v5050_v34 = vadd.f32 %v514_v21, %v4729_v63  ;;  %3796 = vmatpush3.msra.mxu1 %v1837_v9  ;;  %v5053_v38 = vmul.f32 %v930_v5, %v4993_v49  ;;  %v1835_v32 = vld [vmem:[#allocation4 + $0x250] sm:$0xff]  ;;  %3964 = vmatpush3.msra.mxu0 %v1870_v52  ;;  %v405_v5 = vpop.f32.mrf.mxu0  ;;  %v1868_v53 = vld [vmem:[#allocation4 + $0x358] sm:$0xff]  ;;  %v1834_v52 = vld [vmem:[#allocation4 + $0x248] sm:$0xff] }
 0x11d   :  { %v1328_v59 = vmul.f32 0.7978846, %v1216_v54  ;;  %v5056_v55 = vmul.f32 0.5, %v4779_v47  ;;  %v1330_v58 = vmul.f32 0.7978846, %v1218_v31  ;;  %v1103_v11 = vmul.f32 %v4816_v14, %v4773_v39  ;;  %3797 = vmatprep.subr.mxu1 %v1852_v28  ;;  %v1850_v47 = vld [vmem:[#allocation4 + $0x2c8] sm:$0xff]  ;;  %3965 = vmatprep.subr.mxu0 %v1869_v27 }
 0x11e   :  { %7104 = vst [vmem:[#allocation39_spill] sm:$0xff] %v5050_v34  ;;  %7105 = vst [vmem:[#allocation40_spill] sm:$0xff] %v5053_v38  ;;  %v1657_v21 = vmul.f32 %v1545_v6, %v761_v33  ;;  %v5061_v54 = vmul.f32 %v929_v17, %v5009_v60  ;;  %v5064_v9 = vadd.f32 %v403_v18, %v4731_v2  ;;  %3798 = vmatpush3.msra.mxu1 %v1836_v7  ;;  %v1849_v6 = vld [vmem:[#allocation4 + $0x2c0] sm:$0xff] }
 0x11f   :  { %4131 = vtanh.f32 %v1328_v59  ;;  %v5067_v31 = vmul.f32 %v931_v41, %v5020_v20  ;;  %v1215_v14 = vadd.f32 %v1103_v11, %v4773_v39  ;;  %v1105_v33 = vmul.f32 %v4829_v26, %v4776_v45  ;;  %3799 = vmatprep.subr.mxu1 %v1851_v51  ;;  %3966 = vmatpush3.msra.mxu0 %v1869_v27  ;;  %v1867_v59 = vld [vmem:[#allocation4 + $0x350] sm:$0xff]  ;;  %v518_v11 = vpop.f32.mrf.mxu1 }
 0x120   :  { %4133 = vtanh.f32 %v1330_v58  ;;  %v4126_v17 = vpop.eup %4125  ;;  %1949 = vmatprep.mubr.f32.mxu1 %v1657_v21  ;;  %v935_v18 = vmul.f32 0.044715, %v5046_v43  ;;  %v937_v7 = vmul.f32 0.044715, %v5050_v34  ;;  %v5075_v28 = vadd.f32 %v516_v25, %v4733_v3  ;;  %3800 = vmatpush3.msra.mxu1 %v1835_v32  ;;  %v1833_v21 = vld [vmem:[#allocation4 + $0x240] sm:$0xff] }
 0x121   :  { %v1111_v41 = vmul.f32 %v4889_v40, %v4824_v19  ;;  %v1547_v58 = vadd.f32 1.0, %v4126_v17  ;;  %v1327_v26 = vmul.f32 0.7978846, %v1215_v14  ;;  %v1217_v51 = vadd.f32 %v1105_v33, %v4776_v45  ;;  %3801 = vmatprep.subr.mxu1 %v1850_v47  ;;  %3967 = vmatprep.subr.mxu0 %v1868_v53  ;;  %v1848_v14 = vld [vmem:[#allocation4 + $0x2b8] sm:$0xff]  ;;  %v1866_v17 = vld [vmem:[#allocation4 + $0x348] sm:$0xff] }
 0x122   :  { %v5081_v27 = vadd.f32 %v405_v5, %v4727_v0  ;;  %v5084_v25 = vmul.f32 0.5, %v4788_v57  ;;  %v936_v38 = vmul.f32 0.044715, %v5064_v9  ;;  %v5088_v40 = vadd.f32 %v518_v11, %v4729_v63  ;;  %3802 = vmatpush3.msra.mxu1 %v1834_v52  ;;  %3968 = vmatpush3.msra.mxu0 %v1868_v53  ;;  %v1832_v57 = vld [vmem:[#allocation4 + $0x238] sm:$0xff] }
 0x123   :  { %v1223_v32 = vadd.f32 %v1111_v41, %v4824_v19  ;;  %v1659_v5 = vmul.f32 %v1547_v58, %v5017_v1  ;;  %4135 = vtanh.f32 %v1327_v26  ;;  %v1329_v33 = vmul.f32 0.7978846, %v1217_v51  ;;  %3803 = vmatprep.subr.mxu1 %v1849_v6  ;;  %3969 = vmatprep.subr.mxu0 %v1867_v59  ;;  %v407_v41 = vpop.f32.mrf.mxu0  ;;  %v1847_v1 = vld [vmem:[#allocation4 + $0x2b0] sm:$0xff] }
 0x124   :  { %7106 = vst [vmem:[#allocation41_spill] sm:$0xff] %v5088_v40  ;;  %v1113_v47 = vmul.f32 %v4892_v42, %v4835_v30  ;;  %v5095_v49 = vmul.f32 %v935_v18, %v5046_v43  ;;  %v5098_v11 = vmul.f32 %v937_v7, %v5050_v34  ;;  %v938_v52 = vmul.f32 0.044715, %v5075_v28  ;;  %3804 = vmatpush3.msra.mxu1 %v1833_v21  ;;  %v1831_v58 = vld [vmem:[#allocation4 + $0x230] sm:$0xff]  ;;  %v1865_v7 = vld [vmem:[#allocation4 + $0x340] sm:$0xff] }
 0x125   :  { %v1335_v53 = vmul.f32 0.7978846, %v1223_v32  ;;  %3970 = vmatpush3.msra.mxu0 %v1867_v59  ;;  %2094 = vmatprep.mubr.f32.mxu0 %v1659_v5  ;;  %v5102_v42 = vmul.f32 0.5, %v4773_v39  ;;  %4137 = vtanh.f32 %v1329_v33  ;;  %v942_v6 = vmul.f32 0.044715, %v5081_v27  ;;  %v1846_v39 = vld [vmem:[#allocation4 + $0x2a8] sm:$0xff]  ;;  %v520_v5 = vpop.f32.mrf.mxu1 }
 0x126   :  { %7107 = vst [vmem:[#allocation42_spill] sm:$0xff] %v5095_v49  ;;  %7108 = vst [vmem:[#allocation43_spill] sm:$0xff] %v5098_v11  ;;  %v1225_v18 = vadd.f32 %v1113_v47, %v4835_v30  ;;  %3805 = vmatprep.subr.mxu1 %v1848_v14  ;;  %v5107_v26 = vmul.f32 %v936_v38, %v5064_v9  ;;  %v5110_v51 = vmul.f32 0.5, %v4776_v45  ;;  %3971 = vmatprep.subr.mxu0 %v1866_v17  ;;  %v1830_v45 = vld [vmem:[#allocation4 + $0x228] sm:$0xff]  ;;  %v1864_v33 = vld [vmem:[#allocation4 + $0x338] sm:$0xff]  ;;  %v411_v11 = vpop.f32.mrf.mxu0 }
 0x127   :  { %4139 = vtanh.f32 %v1335_v53  ;;  %v1110_v59 = vmul.f32 %v4857_v50, %v4793_v46  ;;  %3806 = vmatpush3.msra.mxu1 %v1832_v57  ;;  %v944_v21 = vmul.f32 0.044715, %v5088_v40  ;;  %v5116_v14 = vadd.f32 %v407_v41, %v4731_v2  ;;  %3972 = vmatpush3.msra.mxu0 %v1866_v17  ;;  %v1863_v34 = vld [vmem:[#allocation4 + $0x330] sm:$0xff] }
 0x128   :  { %v1337_v32 = vmul.f32 0.7978846, %v1225_v18  ;;  %v1112_v38 = vmul.f32 %v4875_v10, %v4820_v16  ;;  %3807 = vmatprep.subr.mxu1 %v1847_v1  ;;  %v4128_v47 = vpop.eup %4127  ;;  %v5121_v50 = vmul.f32 %v938_v52, %v5075_v28  ;;  %v5124_v57 = vmul.f32 0.5, %v4824_v19  ;;  %v1845_v18 = vld [vmem:[#allocation4 + $0x2a0] sm:$0xff]  ;;  %3973 = vmatprep.subr.mxu0 %v1865_v7 }
 0x129   :  { %v5127_v53 = vmul.f32 0.5, %v4835_v30  ;;  %v1222_v41 = vadd.f32 %v1110_v59, %v4793_v46  ;;  %3808 = vmatpush3.msra.mxu1 %v1831_v58  ;;  %v4130_v10 = vpop.eup %4129  ;;  %v1544_v1 = vadd.f32 1.0, %v4128_v47  ;;  %v5131_v17 = vmul.f32 %v942_v6, %v5081_v27  ;;  %v1829_v19 = vld [vmem:[#allocation4 + $0x220] sm:$0xff]  ;;  %3974 = vmatpush3.msra.mxu0 %v1865_v7  ;;  %v1844_v47 = vld [vmem:[#allocation4 + $0x298] sm:$0xff] }
 0x12a   :  { %4141 = vtanh.f32 %v1337_v32  ;;  %v1224_v52 = vadd.f32 %v1112_v38, %v4820_v16  ;;  %3809 = vmatprep.subr.mxu1 %v1846_v39  ;;  %v1546_v30 = vadd.f32 1.0, %v4130_v10  ;;  %v5135_v49 = vadd.f32 %v520_v5, %v4733_v3  ;;  %3975 = vmatprep.subr.mxu0 %v1864_v33  ;;  %v524_v10 = vpop.f32.mrf.mxu1 }
 0x12b   :  { %7109 = vst [vmem:[#allocation44_spill] sm:$0xff] %v5131_v17  ;;  %v1334_v58 = vmul.f32 0.7978846, %v1222_v41  ;;  %v1118_v59 = vmul.f32 %v4902_v8, %v4844_v35  ;;  %3810 = vmatpush3.msra.mxu1 %v1830_v45  ;;  %v1656_v32 = vmul.f32 %v1544_v1, %v5034_v48  ;;  %v5141_v38 = vmul.f32 %v944_v21, %v5088_v40  ;;  %v1828_v45 = vld [vmem:[#allocation4 + $0x218] sm:$0xff] }
 0x12c   :  { %v4132_v6 = vpop.eup %4131  ;;  %v943_v7 = vmul.f32 0.044715, %v5116_v14  ;;  %v1336_v39 = vmul.f32 0.7978846, %v1224_v52  ;;  %3811 = vmatprep.subr.mxu1 %v1845_v18  ;;  %3976 = vmatpush3.msra.mxu0 %v1864_v33  ;;  %v1658_v41 = vmul.f32 %v1546_v30, %v5041_v29  ;;  %v5146_v8 = vadd.f32 %v411_v11, %v4727_v0  ;;  %v1843_v33 = vld [vmem:[#allocation4 + $0x290] sm:$0xff] }
 0x12d   :  { %7110 = vst [vmem:[#allocation45_spill] sm:$0xff] %v5141_v38  ;;  %v4134_v5 = vpop.eup %4133  ;;  %v1552_v17 = vadd.f32 1.0, %v4132_v6  ;;  %4143 = vtanh.f32 %v1334_v58  ;;  %3812 = vmatpush3.msra.mxu1 %v1829_v19  ;;  %3977 = vmatprep.subr.mxu0 %v1863_v34  ;;  %v5149_v21 = vmul.f32 0.5, %v4793_v46  ;;  %v1230_v18 = vadd.f32 %v1118_v59, %v4844_v35  ;;  %v7112_v52 = vld [vmem:[#allocation22_spill] sm:$0xff]  ;;  %v526_v6 = vpop.f32.mrf.mxu1  ;;  %v1861_v38 = vld [vmem:[#allocation4 + $0x320] sm:$0xff] }
 0x12e   :  { %7111 = vst [vmem:[#allocation46_spill] sm:$0xff] %v5146_v8  ;;  %1950 = vmatmul.mubr.f32.gmra.mxu1 %v1656_v32  ;;  %v1554_v48 = vadd.f32 1.0, %v4134_v5  ;;  %4145 = vtanh.f32 %v1336_v39  ;;  %3813 = vmatprep.subr.mxu1 %v1844_v47  ;;  %v945_v1 = vmul.f32 0.044715, %v5135_v49  ;;  %v5155_v11 = vmul.f32 0.5, %v4820_v16  ;;  %v1827_v30 = vld [vmem:[#allocation4 + $0x210] sm:$0xff]  ;;  %v413_v47 = vpop.f32.mrf.mxu0 }
 0x12f   :  { %2095 = vmatmul.mubr.f32.gmra.mxu0 %v1658_v41  ;;  %v1664_v29 = vmul.f32 %v1552_v17, %v5056_v55  ;;  %v1120_v19 = vmul.f32 %v7112_v52, %v4851_v44  ;;  %v5161_v58 = vmul.f32 %v943_v7, %v5116_v14  ;;  %v1342_v59 = vmul.f32 0.7978846, %v1230_v18  ;;  %v7113_v32 = vld [vmem:[#allocation11_spill] sm:$0xff]  ;;  %3814 = vmatpush3.msra.mxu1 %v1828_v45  ;;  %v1862_v17 = vld [vmem:[#allocation4 + $0x328] sm:$0xff]  ;;  %v7117_v18 = vld [vmem:[#allocation20_spill] sm:$0xff] }
 0x130   :  { %v1666_v46 = vmul.f32 %v1554_v48, %v5084_v25  ;;  %v7114_v39 = vld [vmem:[#allocation19_spill] sm:$0xff]  ;;  %3978 = vmatpush3.msra.mxu0 %v1863_v34  ;;  %v4136_v16 = vpop.eup %4135  ;;  %v949_v5 = vmul.f32 0.044715, %v5146_v8  ;;  %v5167_v41 = vadd.f32 %v524_v10, %v4729_v63  ;;  %v5170_v25 = vmul.f32 0.5, %v4844_v35  ;;  %3815 = vmatprep.subr.mxu1 %v1843_v33  ;;  %v7116_v34 = vld [vmem:[#allocation12_spill] sm:$0xff] }
 0x131   :  { %v1117_v55 = vmul.f32 %v7114_v39, %v7113_v32  ;;  %1954 = vmatprep.mubr.f32.mxu1 %v1664_v29  ;;  %v1232_v7 = vadd.f32 %v1120_v19, %v4851_v44  ;;  %v1551_v48 = vadd.f32 1.0, %v4136_v16  ;;  %4147 = vtanh.f32 %v1342_v59  ;;  %3816 = vmatpush3.msra.mxu1 %v1827_v30  ;;  %v1842_v29 = vld [vmem:[#allocation4 + $0x288] sm:$0xff] }
 0x132   :  { %7115 = vst [vmem:[#allocation22_spill] sm:$0xff] %v5167_v41  ;;  %2099 = vmatprep.mubr.f32.mxu0 %v1666_v46  ;;  %v1119_v52 = vmul.f32 %v7117_v18, %v7116_v34  ;;  %v1826_v39 = vld [vmem:[#allocation4 + $0x208] sm:$0xff]  ;;  %v4138_v10 = vpop.eup %4137  ;;  %v5177_v40 = vmul.f32 %v945_v1, %v5135_v49  ;;  %v5180_v19 = vadd.f32 %v413_v47, %v4731_v2  ;;  %v415_v18 = vpop.f32.mrf.mxu0  ;;  %v5189_v47 = vmul.f32 0.5, %v4851_v44 }
 0x133   :  { %v1229_v45 = vadd.f32 %v1117_v55, %v7113_v32  ;;  %v1344_v35 = vmul.f32 0.7978846, %v1232_v7  ;;  %v5183_v33 = vadd.f32 %v526_v6, %v4733_v3  ;;  %3979 = vmatprep.subr.mxu0 %v1862_v17  ;;  %3817 = vmatprep.subr.mxu1 %v1842_v29  ;;  %v1663_v59 = vmul.f32 %v1551_v48, %v5102_v42  ;;  %v1860_v6 = vld [vmem:[#allocation4 + $0x318] sm:$0xff] }
 0x134   :  { %v4140_v46 = vpop.eup %4139  ;;  %v1553_v30 = vadd.f32 1.0, %v4138_v10  ;;  %v1231_v16 = vadd.f32 %v1119_v52, %v7116_v34  ;;  %3980 = vmatpush3.msra.mxu0 %v1862_v17  ;;  %3818 = vmatpush3.msra.mxu1 %v1826_v39  ;;  %v951_v7 = vmul.f32 0.044715, %v5167_v41  ;;  %v5193_v42 = vmul.f32 %v949_v5, %v5146_v8  ;;  %v7120_v39 = vld [vmem:[#allocation15_spill] sm:$0xff]  ;;  %v7121_v10 = vld [vmem:[#allocation25_spill] sm:$0xff]  ;;  %v1841_v8 = vld [vmem:[#allocation4 + $0x280] sm:$0xff] }
 0x135   :  { %v1341_v55 = vmul.f32 0.7978846, %v1229_v45  ;;  %v1559_v1 = vadd.f32 1.0, %v4140_v46  ;;  %4149 = vtanh.f32 %v1344_v35  ;;  %3981 = vmatprep.subr.mxu0 %v1861_v38  ;;  %1955 = vmatmul.mubr.f32.gmra.mxu1 %v1663_v59  ;;  %v950_v52 = vmul.f32 0.044715, %v5180_v19  ;;  %v528_v46 = vpop.f32.mrf.mxu1  ;;  %v7122_v59 = vld [vmem:[#allocation16_spill] sm:$0xff] }
 0x136   :  { %v1665_v29 = vmul.f32 %v1553_v30, %v5110_v51  ;;  %7118 = vst [vmem:[#allocation11_spill] sm:$0xff] %v5193_v42  ;;  %v1343_v48 = vmul.f32 0.7978846, %v1231_v16  ;;  %3982 = vmatpush3.msra.mxu0 %v1861_v38  ;;  %v5198_v44 = vadd.f32 %v415_v18, %v4727_v0  ;;  %v1125_v35 = vmul.f32 %v7121_v10, %v7120_v39  ;;  %v7123_v38 = vld [vmem:[#allocation26_spill] sm:$0xff]  ;;  %v7126_v10 = vld [vmem:[#allocation13_spill] sm:$0xff] }
 0x137   :  { %4151 = vtanh.f32 %v1341_v55  ;;  %v4142_v17 = vpop.eup %4141  ;;  %v1671_v45 = vmul.f32 %v1559_v1, %v5124_v57  ;;  %3983 = vmatprep.subr.mxu0 %v1860_v6  ;;  %v952_v5 = vmul.f32 0.044715, %v5183_v33  ;;  %v1127_v30 = vmul.f32 %v7123_v38, %v7122_v59  ;;  %3819 = vmatprep.subr.mxu1 %v1841_v8 }
 0x138   :  { %7119 = vst [vmem:[#allocation19_spill] sm:$0xff] %v5198_v44  ;;  %2100 = vmatmul.mubr.f32.gmra.mxu0 %v1665_v29  ;;  %v1561_v51 = vadd.f32 1.0, %v4142_v17  ;;  %4153 = vtanh.f32 %v1343_v48  ;;  %v5206_v57 = vmul.f32 %v951_v7, %v5167_v41  ;;  %v5209_v55 = vmul.f32 0.5, %v7113_v32  ;;  %v7127_v7 = vld [vmem:[#allocation23_spill] sm:$0xff] }
 0x139   :  { %1959 = vmatprep.mubr.f32.mxu1 %v1671_v45  ;;  %v5212_v16 = vadd.f32 %v528_v46, %v4729_v63  ;;  %v1237_v18 = vadd.f32 %v1125_v35, %v7120_v39  ;;  %v5217_v48 = vmul.f32 0.5, %v7116_v34  ;;  %v1239_v17 = vadd.f32 %v1127_v30, %v7122_v59  ;;  %v417_v45 = vpop.f32.mrf.mxu0  ;;  %3984 = vmatpush3.msra.mxu0 %v1860_v6  ;;  %v530_v30 = vpop.f32.mrf.mxu1 }
 0x13a   :  { %7124 = vst [vmem:[#allocation12_spill] sm:$0xff] %v5206_v57  ;;  %v4144_v1 = vpop.eup %4143  ;;  %v1673_v29 = vmul.f32 %v1561_v51, %v5127_v53  ;;  %v1124_v38 = vmul.f32 %v7127_v7, %v7126_v10  ;;  %v5223_v46 = vmul.f32 %v950_v52, %v5180_v19  ;;  %v956_v35 = vmul.f32 0.044715, %v5198_v44  ;;  %v7130_v52 = vld [vmem:[#allocation14_spill] sm:$0xff]  ;;  %v7131_v7 = vld [vmem:[#allocation24_spill] sm:$0xff] }
 0x13b   :  { %7125 = vst [vmem:[#allocation20_spill] sm:$0xff] %v5212_v16  ;;  %v4146_v32 = vpop.eup %4145  ;;  %v1558_v57 = vadd.f32 1.0, %v4144_v1  ;;  %v1349_v41 = vmul.f32 0.7978846, %v1237_v18  ;;  %v5227_v34 = vmul.f32 %v952_v5, %v5183_v33  ;;  %v1351_v51 = vmul.f32 0.7978846, %v1239_v17 }
 0x13c   :  { %7128 = vst [vmem:[#allocation15_spill] sm:$0xff] %v5223_v46  ;;  %2104 = vmatprep.mubr.f32.mxu0 %v1673_v29  ;;  %v1560_v53 = vadd.f32 1.0, %v4146_v32  ;;  %v1236_v42 = vadd.f32 %v1124_v38, %v7126_v10  ;;  %v958_v1 = vmul.f32 0.044715, %v5212_v16  ;;  %v1126_v46 = vmul.f32 %v7131_v7, %v7130_v52  ;;  %v1825_v18 = vld [vmem:[#allocation4 + $0x200] sm:$0xff]  ;;  %v1859_v29 = vld [vmem:[#allocation4 + $0x310] sm:$0xff] }
 0x13d   :  { %7129 = vst [vmem:[#allocation25_spill] sm:$0xff] %v5227_v34  ;;  %v1670_v6 = vmul.f32 %v1558_v57, %v5149_v21  ;;  %4155 = vtanh.f32 %v1349_v41  ;;  %v1858_v32 = vld [vmem:[#allocation4 + $0x308] sm:$0xff]  ;;  %v5236_v17 = vadd.f32 %v417_v45, %v4731_v2  ;;  %v421_v34 = vpop.f32.mrf.mxu0  ;;  %3820 = vmatpush3.msra.mxu1 %v1825_v18  ;;  %3985 = vmatprep.subr.mxu0 %v1859_v29  ;;  %v5242_v8 = vmul.f32 0.5, %v7120_v39  ;;  %v1857_v45 = vld [vmem:[#allocation4 + $0x300] sm:$0xff] }
 0x13e   :  { %v1672_v5 = vmul.f32 %v1560_v53, %v5155_v11  ;;  %4157 = vtanh.f32 %v1351_v51  ;;  %v1348_v38 = vmul.f32 0.7978846, %v1236_v42  ;;  %v4148_v21 = vpop.eup %4147  ;;  %v5239_v41 = vmul.f32 %v956_v35, %v5198_v44  ;;  %3986 = vmatpush3.msra.mxu0 %v1859_v29  ;;  %v534_v51 = vpop.f32.mrf.mxu1  ;;  %v7134_v35 = vld [vmem:[#allocation31_spill] sm:$0xff] }
 0x13f   :  { %1960 = vmatmul.mubr.f32.gmra.mxu1 %v1670_v6  ;;  %v5245_v57 = vadd.f32 %v530_v30, %v4733_v3  ;;  %v1238_v11 = vadd.f32 %v1126_v46, %v7130_v52  ;;  %v1566_v42 = vadd.f32 1.0, %v4148_v21  ;;  %v5249_v53 = vmul.f32 0.5, %v7122_v59  ;;  %v7133_v6 = vld [vmem:[#allocation21_spill] sm:$0xff]  ;;  %3987 = vmatprep.subr.mxu0 %v1858_v32 }
 0x140   :  { %7132 = vst [vmem:[#allocation16_spill] sm:$0xff] %v5239_v41  ;;  %2105 = vmatmul.mubr.f32.gmra.mxu0 %v1672_v5  ;;  %4159 = vtanh.f32 %v1348_v38  ;;  %v1132_v7 = vmul.f32 %v7134_v35, %v7133_v6  ;;  %v5254_v39 = vmul.f32 %v958_v1, %v5212_v16  ;;  %v5257_v18 = vadd.f32 %v421_v34, %v4727_v0  ;;  %v423_v1 = vpop.f32.mrf.mxu0 }
 0x141   :  { %v1350_v30 = vmul.f32 0.7978846, %v1238_v11  ;;  %v1134_v46 = vmul.f32 %v4976_v37, %v4916_v4  ;;  %3988 = vmatpush3.msra.mxu0 %v1858_v32  ;;  %v1678_v59 = vmul.f32 %v1566_v42, %v5170_v25  ;;  %v957_v5 = vmul.f32 0.044715, %v5236_v17  ;;  %v536_v42 = vpop.f32.mrf.mxu1 }
 0x142   :  { %7135 = vst [vmem:[#allocation26_spill] sm:$0xff] %v5254_v39  ;;  %7136 = vst [vmem:[#allocation13_spill] sm:$0xff] %v5257_v18  ;;  %v4150_v29 = vpop.eup %4149  ;;  %v5264_v38 = vmul.f32 0.5, %v7126_v10  ;;  %v1244_v21 = vadd.f32 %v1132_v7, %v7133_v6  ;;  %3989 = vmatprep.subr.mxu0 %v1857_v45  ;;  %v959_v34 = vmul.f32 0.044715, %v5245_v57  ;;  %v5269_v39 = vmul.f32 0.5, %v7130_v52 }
 0x143   :  { %v1568_v35 = vadd.f32 1.0, %v4150_v29  ;;  %4161 = vtanh.f32 %v1350_v30  ;;  %3990 = vmatpush3.msra.mxu0 %v1857_v45  ;;  %1964 = vmatprep.mubr.f32.mxu1 %v1678_v59  ;;  %v5272_v25 = vadd.f32 %v534_v51, %v4729_v63  ;;  %v1246_v32 = vadd.f32 %v1134_v46, %v4916_v4  ;;  %v7137_v52 = vld [vmem:[#allocation17_spill] sm:$0xff]  ;;  %v7138_v30 = vld [vmem:[#allocation27_spill] sm:$0xff] }
 0x144   :  { %v4152_v11 = vpop.eup %4151  ;;  %v1356_v10 = vmul.f32 0.7978846, %v1244_v21  ;;  %v963_v29 = vmul.f32 0.044715, %v5257_v18  ;;  %v5278_v41 = vadd.f32 %v423_v1, %v4731_v2  ;;  %v1131_v45 = vmul.f32 %v7138_v30, %v7137_v52 }
 0x145   :  { %v1565_v37 = vadd.f32 1.0, %v4152_v11  ;;  %v4154_v7 = vpop.eup %4153  ;;  %v1680_v16 = vmul.f32 %v1568_v35, %v5189_v47  ;;  %v1358_v51 = vmul.f32 0.7978846, %v1246_v32  ;;  %v5284_v46 = vmul.f32 %v957_v5, %v5236_v17  ;;  %v425_v35 = vpop.f32.mrf.mxu0 }
 0x146   :  { %v1567_v11 = vadd.f32 1.0, %v4154_v7  ;;  %4163 = vtanh.f32 %v1356_v10  ;;  %v5287_v21 = vmul.f32 %v959_v34, %v5245_v57  ;;  %v5290_v47 = vadd.f32 %v536_v42, %v4733_v3 }
 0x147   :  { %v1677_v59 = vmul.f32 %v1565_v37, %v5209_v55  ;;  %2109 = vmatprep.mubr.f32.mxu0 %v1680_v16  ;;  %v1243_v1 = vadd.f32 %v1131_v45, %v7137_v52  ;;  %v965_v55 = vmul.f32 0.044715, %v5272_v25  ;;  %4165 = vtanh.f32 %v1358_v51  ;;  %v7139_v37 = vld [vmem:[#allocation18_spill] sm:$0xff]  ;;  %v7140_v16 = vld [vmem:[#allocation28_spill] sm:$0xff] }
 0x148   :  { %v1679_v30 = vmul.f32 %v1567_v11, %v5217_v48  ;;  %v1133_v10 = vmul.f32 %v7140_v16, %v7139_v37  ;;  %v5298_v5 = vmul.f32 0.5, %v7133_v6  ;;  %v5301_v34 = vmul.f32 0.5, %v4916_v4 }
 0x149   :  { %1965 = vmatmul.mubr.f32.gmra.mxu1 %v1677_v59  ;;  %v1355_v32 = vmul.f32 0.7978846, %v1243_v1  ;;  %v1139_v42 = vmul.f32 %v4988_v36, %v4938_v22  ;;  %v5306_v48 = vmul.f32 %v963_v29, %v5257_v18  ;;  %v964_v45 = vmul.f32 0.044715, %v5278_v41  ;;  %v427_v36 = vpop.f32.mrf.mxu0 }
 0x14a   :  { %v4156_v7 = vpop.eup %4155  ;;  %2110 = vmatmul.mubr.f32.gmra.mxu0 %v1679_v30  ;;  %v1245_v59 = vadd.f32 %v1133_v10, %v7139_v37  ;;  %v1141_v6 = vmul.f32 %v4996_v12, %v4947_v24  ;;  %v966_v4 = vmul.f32 0.044715, %v5290_v47  ;;  %v5315_v30 = vmul.f32 %v965_v55, %v5272_v25 }
 0x14b   :  { %7141 = vst [vmem:[#allocation23_spill] sm:$0xff] %v5306_v48  ;;  %v4158_v11 = vpop.eup %4157  ;;  %v1573_v51 = vadd.f32 1.0, %v4156_v7  ;;  %4167 = vtanh.f32 %v1355_v32  ;;  %v1251_v1 = vadd.f32 %v1139_v42, %v4938_v22  ;;  %v538_v48 = vpop.f32.mrf.mxu1  ;;  %v5320_v12 = vmul.f32 0.5, %v7137_v52 }
 0x14c   :  { %v1575_v16 = vadd.f32 1.0, %v4158_v11  ;;  %v1357_v29 = vmul.f32 0.7978846, %v1245_v59  ;;  %v1253_v18 = vadd.f32 %v1141_v6, %v4947_v24  ;;  %v5323_v7 = vadd.f32 %v425_v35, %v4727_v0  ;;  %v577_v52 = vpop.f32.mrf.mxu0 }
 0x14d   :  { %v4160_v10 = vpop.eup %4159  ;;  %v1685_v44 = vmul.f32 %v1573_v51, %v5242_v8  ;;  %v1363_v32 = vmul.f32 0.7978846, %v1251_v1  ;;  %v5327_v59 = vmul.f32 %v964_v45, %v5278_v41  ;;  %v5330_v6 = vmul.f32 %v966_v4, %v5290_v47 }
 0x14e   :  { %7142 = vst [vmem:[#allocation14_spill] sm:$0xff] %v5323_v7  ;;  %v1687_v42 = vmul.f32 %v1575_v16, %v5249_v53  ;;  %v1572_v11 = vadd.f32 1.0, %v4160_v10  ;;  %4169 = vtanh.f32 %v1357_v29  ;;  %v1365_v55 = vmul.f32 0.7978846, %v1253_v18  ;;  %v7145_v16 = vld [vmem:[#allocation8_spill] sm:$0xff] }
 0x14f   :  { %1969 = vmatprep.mubr.f32.mxu1 %v1685_v44  ;;  %v5333_v8 = vadd.f32 %v538_v48, %v4729_v63  ;;  %4171 = vtanh.f32 %v1363_v32  ;;  %v5337_v53 = vmul.f32 0.5, %v7139_v37  ;;  %v540_v44 = vpop.f32.mrf.mxu1  ;;  %v1138_v18 = vmul.f32 %v4981_v23, %v4931_v56  ;;  %v7144_v48 = vld [vmem:[#allocation33_spill] sm:$0xff] }
 0x150   :  { %v4162_v0 = vpop.eup %4161  ;;  %2114 = vmatprep.mubr.f32.mxu0 %v1687_v42  ;;  %v1684_v35 = vmul.f32 %v1572_v11, %v5264_v38  ;;  %4173 = vtanh.f32 %v1365_v55  ;;  %v970_v51 = vmul.f32 0.044715, %v5323_v7  ;;  %v5343_v63 = vadd.f32 %v427_v36, %v4731_v2 }
 0x151   :  { %7143 = vst [vmem:[#allocation24_spill] sm:$0xff] %v5333_v8  ;;  %v1574_v45 = vadd.f32 1.0, %v4162_v0  ;;  %v1140_v4 = vmul.f32 %v7144_v48, %v4934_v13  ;;  %v5348_v38 = vmul.f32 0.5, %v4938_v22  ;;  %v5351_v37 = vmul.f32 0.5, %v4947_v24  ;;  %v3945_v55 = vpop.f32.mrf.mxu1 }
 0x152   :  { %1970 = vmatmul.mubr.f32.gmra.mxu1 %v1684_v35  ;;  %v1250_v1 = vadd.f32 %v1138_v18, %v4931_v56  ;;  %v578_v23 = vadd.f32 %v577_v52, %v7145_v16  ;;  %v972_v2 = vmul.f32 0.044715, %v5333_v8  ;;  %v1146_v32 = vmul.f32 %v5014_v61, %v4960_v15 }
 0x153   :  { %v4164_v29 = vpop.eup %4163  ;;  %v1686_v10 = vmul.f32 %v1574_v45, %v5269_v39  ;;  %v1252_v36 = vadd.f32 %v1140_v4, %v4934_v13  ;;  %v5361_v22 = vadd.f32 %v540_v44, %v4733_v3  ;;  %v5364_v52 = vmul.f32 %v970_v51, %v5323_v7  ;;  %v7149_v4 = vld [vmem:[#allocation37_spill] sm:$0xff] }
 0x154   :  { %v1580_v42 = vadd.f32 1.0, %v4164_v29  ;;  %v1362_v24 = vmul.f32 0.7978846, %v1250_v1  ;;  %v869_v11 = vmul.f32 0.044715, %v578_v23  ;;  %v4166_v0 = vpop.eup %4165  ;;  %v1258_v18 = vadd.f32 %v1146_v32, %v4960_v15 }
 0x155   :  { %7146 = vst [vmem:[#allocation21_spill] sm:$0xff] %v5361_v22  ;;  %2115 = vmatmul.mubr.f32.gmra.mxu0 %v1686_v10  ;;  %7147 = vst [vmem:[#allocation31_spill] sm:$0xff] %v5364_v52  ;;  %v971_v39 = vmul.f32 0.044715, %v5343_v63  ;;  %v1364_v35 = vmul.f32 0.7978846, %v1252_v36  ;;  %v5370_v3 = vmul.f32 %v972_v2, %v5333_v8  ;;  %v1148_v1 = vmul.f32 %v7149_v4, %v4965_v62  ;;  %v690_v2 = vpop.f32.mrf.mxu1 }
 0x156   :  { %v1692_v45 = vmul.f32 %v1580_v42, %v5298_v5  ;;  %v1582_v61 = vadd.f32 1.0, %v4166_v0  ;;  %4175 = vtanh.f32 %v1362_v24  ;;  %v981_v48 = vmul.f32 %v869_v11, %v578_v23  ;;  %v7150_v5 = vld [vmem:[#allocation9_spill] sm:$0xff]  ;;  %v579_v42 = vpop.f32.mrf.mxu0 }
 0x157   :  { %7148 = vst [vmem:[#allocation17_spill] sm:$0xff] %v5370_v3  ;;  %4177 = vtanh.f32 %v1364_v35  ;;  %v1370_v44 = vmul.f32 0.7978846, %v1258_v18  ;;  %v973_v10 = vmul.f32 0.044715, %v5361_v22  ;;  %v5377_v36 = vmul.f32 0.5, %v4931_v56 }
 0x158   :  { %v4168_v51 = vpop.eup %4167  ;;  %1974 = vmatprep.mubr.f32.mxu1 %v1692_v45  ;;  %v1694_v29 = vmul.f32 %v1582_v61, %v5301_v34  ;;  %v5380_v32 = vadd.f32 %v3945_v55, %v7150_v5  ;;  %v5383_v11 = vmul.f32 0.5, %v4934_v13  ;;  %v1260_v0 = vadd.f32 %v1148_v1, %v4965_v62  ;;  %v7152_v18 = vld [vmem:[#allocation29_spill] sm:$0xff]  ;;  %v7153_v55 = vld [vmem:[#allocation35_spill] sm:$0xff]  ;;  %v7154_v13 = vld [vmem:[#allocation10_spill] sm:$0xff] }
 0x159   :  { %v1579_v24 = vadd.f32 1.0, %v4168_v51  ;;  %4179 = vtanh.f32 %v1370_v44  ;;  %v5387_v34 = vmul.f32 %v971_v39, %v5343_v63  ;;  %v1093_v35 = vmul.f32 %v981_v48, %v578_v23  ;;  %v7155_v44 = vld [vmem:[#allocation30_spill] sm:$0xff]  ;;  %v7156_v1 = vld [vmem:[#allocation36_spill] sm:$0xff] }
 0x15a   :  { %2119 = vmatprep.mubr.f32.mxu0 %v1694_v29  ;;  %v5390_v56 = vmul.f32 0.5, %v4960_v15  ;;  %v1145_v45 = vmul.f32 %v7153_v55, %v7152_v18  ;;  %v1372_v51 = vmul.f32 0.7978846, %v1260_v0  ;;  %v5396_v3 = vadd.f32 %v579_v42, %v7154_v13  ;;  %v3946_v55 = vpop.f32.mrf.mxu1  ;;  %v581_v0 = vpop.f32.mrf.mxu0 }
 0x15b   :  { %7151 = vst [vmem:[#allocation27_spill] sm:$0xff] %v5387_v34  ;;  %v4170_v61 = vpop.eup %4169  ;;  %v1691_v4 = vmul.f32 %v1579_v24, %v5320_v12  ;;  %v1147_v29 = vmul.f32 %v7156_v1, %v7155_v44  ;;  %v5401_v48 = vmul.f32 %v973_v10, %v5361_v22  ;;  %v5403_v15 = vmul.f32 0.5, %v578_v23 }
 0x15c   :  { %v4172_v8 = vpop.eup %4171  ;;  %v1581_v39 = vadd.f32 1.0, %v4170_v61  ;;  %v885_v52 = vmul.f32 0.044715, %v5380_v32  ;;  %4181 = vtanh.f32 %v1372_v51  ;;  %v1257_v42 = vadd.f32 %v1145_v45, %v7152_v18 }
 0x15d   :  { %7157 = vst [vmem:[#allocation18_spill] sm:$0xff] %v5401_v48  ;;  %7158 = vst [vmem:[#allocation28_spill] sm:$0xff] %v5403_v15  ;;  %v4174_v7 = vpop.eup %4173  ;;  %1975 = vmatmul.mubr.f32.gmra.mxu1 %v1691_v4  ;;  %v1587_v12 = vadd.f32 1.0, %v4172_v8  ;;  %v1259_v24 = vadd.f32 %v1147_v29, %v7155_v44  ;;  %v1205_v34 = vadd.f32 %v1093_v35, %v578_v23  ;;  %v870_v48 = vmul.f32 0.044715, %v5396_v3 }
 0x15e   :  { %v1693_v1 = vmul.f32 %v1581_v39, %v5337_v53  ;;  %v1589_v61 = vadd.f32 1.0, %v4174_v7  ;;  %v5410_v10 = vadd.f32 %v690_v2, %v7150_v5  ;;  %v1369_v22 = vmul.f32 0.7978846, %v1257_v42  ;;  %v693_v53 = vpop.f32.mrf.mxu1 }
 0x15f   :  { %v1699_v15 = vmul.f32 %v1587_v12, %v5348_v38  ;;  %v1371_v4 = vmul.f32 0.7978846, %v1259_v24  ;;  %v5416_v45 = vmul.f32 0.5, %v4965_v62  ;;  %v5419_v51 = vadd.f32 %v581_v0, %v7145_v16  ;;  %v7160_v24 = vld [vmem:[#allocation38_spill] sm:$0xff] }
 0x160   :  { %2120 = vmatmul.mubr.f32.gmra.mxu0 %v1693_v1  ;;  %v1701_v8 = vmul.f32 %v1589_v61, %v5351_v37  ;;  %v1153_v7 = vmul.f32 %v5061_v54, %v5009_v60  ;;  %v5424_v38 = vmul.f32 %v885_v52, %v5380_v32  ;;  %v5427_v23 = vmul.f32 0.5, %v7152_v18 }
 0x161   :  { %1979 = vmatprep.mubr.f32.mxu1 %v1699_v15  ;;  %4183 = vtanh.f32 %v1369_v22  ;;  %v1155_v37 = vmul.f32 %v5067_v31, %v5020_v20  ;;  %v871_v62 = vmul.f32 0.044715, %v5410_v10  ;;  %v5433_v2 = vmul.f32 0.5, %v7155_v44  ;;  %v583_v22 = vpop.f32.mrf.mxu0  ;;  %v7159_v44 = vld [vmem:[#allocation32_spill] sm:$0xff] }
 0x162   :  { %2124 = vmatprep.mubr.f32.mxu0 %v1701_v8  ;;  %4185 = vtanh.f32 %v1371_v4  ;;  %v1265_v54 = vadd.f32 %v1153_v7, %v5009_v60  ;;  %v1317_v29 = vmul.f32 0.7978846, %v1205_v34  ;;  %v5437_v52 = vmul.f32 %v870_v48, %v5396_v3 }
 0x163   :  { %v4176_v35 = vpop.eup %4175  ;;  %v1267_v18 = vadd.f32 %v1155_v37, %v5020_v20  ;;  %v694_v39 = vadd.f32 %v693_v53, %v7150_v5  ;;  %v876_v12 = vmul.f32 0.044715, %v5419_v51  ;;  %v1152_v0 = vmul.f32 %v7160_v24, %v7159_v44  ;;  %v7162_v24 = vld [vmem:[#allocation40_spill] sm:$0xff] }
 0x164   :  { %v4178_v31 = vpop.eup %4177  ;;  %v1586_v15 = vadd.f32 1.0, %v4176_v35  ;;  %v1377_v42 = vmul.f32 0.7978846, %v1265_v54  ;;  %v5445_v61 = vadd.f32 %v3946_v55, %v7150_v5  ;;  %v5449_v7 = vadd.f32 %v583_v22, %v7154_v13 }
 0x165   :  { %v1588_v1 = vadd.f32 1.0, %v4178_v31  ;;  %v1379_v34 = vmul.f32 0.7978846, %v1267_v18  ;;  %v878_v48 = vmul.f32 0.044715, %v694_v39  ;;  %v1264_v53 = vadd.f32 %v1152_v0, %v7159_v44  ;;  %v7161_v31 = vld [vmem:[#allocation34_spill] sm:$0xff] }
 0x166   :  { %v4180_v4 = vpop.eup %4179  ;;  %v1698_v8 = vmul.f32 %v1586_v15, %v5377_v36  ;;  %4187 = vtanh.f32 %v1377_v42  ;;  %v5454_v55 = vmul.f32 %v871_v62, %v5410_v10  ;;  %v1154_v36 = vmul.f32 %v7162_v24, %v7161_v31  ;;  %v587_v15 = vpop.f32.mrf.mxu0 }
 0x167   :  { %v1700_v37 = vmul.f32 %v1588_v1, %v5383_v11  ;;  %v1594_v54 = vadd.f32 1.0, %v4180_v4  ;;  %4189 = vtanh.f32 %v1379_v34  ;;  %v990_v35 = vmul.f32 %v878_v48, %v694_v39 }
 0x168   :  { %1980 = vmatmul.mubr.f32.gmra.mxu1 %v1698_v8  ;;  %4191 = vtanh.f32 %v1317_v29  ;;  %v1376_v18 = vmul.f32 0.7978846, %v1264_v53  ;;  %v892_v42 = vmul.f32 0.044715, %v5445_v61  ;;  %v5461_v11 = vmul.f32 0.5, %v5009_v60 }
 0x169   :  { %2125 = vmatmul.mubr.f32.gmra.mxu0 %v1700_v37  ;;  %v1706_v22 = vmul.f32 %v1594_v54, %v5390_v56  ;;  %v1102_v0 = vmul.f32 %v990_v35, %v694_v39  ;;  %v4182_v1 = vpop.eup %4181  ;;  %v5464_v29 = vmul.f32 0.5, %v5020_v20  ;;  %v1266_v62 = vadd.f32 %v1154_v36, %v7161_v31 }
 0x16a   :  { %4193 = vtanh.f32 %v1376_v18  ;;  %v1160_v34 = vmul.f32 %v5107_v26, %v5064_v9  ;;  %v1596_v48 = vadd.f32 1.0, %v4182_v1  ;;  %v5470_v56 = vmul.f32 %v876_v12, %v5419_v51  ;;  %v3949_v18 = vpop.f32.mrf.mxu1 }
 0x16b   :  { %1984 = vmatprep.mubr.f32.mxu1 %v1706_v22  ;;  %v877_v4 = vmul.f32 0.044715, %v5449_v7  ;;  %v5474_v60 = vadd.f32 %v587_v15, %v7145_v16  ;;  %v1214_v8 = vadd.f32 %v1102_v0, %v694_v39  ;;  %v1378_v53 = vmul.f32 0.7978846, %v1266_v62 }
 0x16c   :  { %v1272_v20 = vadd.f32 %v1160_v34, %v5064_v9  ;;  %v1162_v37 = vmul.f32 %v5121_v50, %v5075_v28  ;;  %v1708_v54 = vmul.f32 %v1596_v48, %v5416_v45  ;;  %v5481_v26 = vmul.f32 %v892_v42, %v5445_v61  ;;  %v589_v50 = vpop.f32.mrf.mxu0 }
 0x16d   :  { %v5483_v35 = vmul.f32 0.5, %v694_v39  ;;  %v5486_v12 = vmul.f32 0.5, %v7159_v44  ;;  %4195 = vtanh.f32 %v1378_v53  ;;  %v5489_v36 = vadd.f32 %v3949_v18, %v7150_v5 }
 0x16e   :  { %v4184_v24 = vpop.eup %4183  ;;  %v1384_v15 = vmul.f32 0.7978846, %v1272_v20  ;;  %v1274_v22 = vadd.f32 %v1162_v37, %v5075_v28  ;;  %2129 = vmatprep.mubr.f32.mxu0 %v1708_v54  ;;  %v5493_v42 = vmul.f32 %v877_v4, %v5449_v7  ;;  %v5496_v39 = vmul.f32 0.5, %v7161_v31  ;;  %v706_v37 = vpop.f32.mrf.mxu1  ;;  %v7165_v4 = vld [vmem:[#allocation42_spill] sm:$0xff] }
 0x16f   :  { %7163 = vst [vmem:[#allocation33_spill] sm:$0xff] %v5483_v35  ;;  %7164 = vst [vmem:[#allocation8_spill] sm:$0xff] %v5489_v36  ;;  %v4186_v0 = vpop.eup %4185  ;;  %v1593_v45 = vadd.f32 1.0, %v4184_v24  ;;  %v883_v44 = vmul.f32 0.044715, %v5474_v60  ;;  %v5501_v53 = vmul.f32 0.5, %v5064_v9  ;;  %v5504_v20 = vadd.f32 %v589_v50, %v7154_v13 }
 0x170   :  { %v1595_v1 = vadd.f32 1.0, %v4186_v0  ;;  %v1326_v62 = vmul.f32 0.7978846, %v1214_v8  ;;  %4197 = vtanh.f32 %v1384_v15  ;;  %v1386_v34 = vmul.f32 0.7978846, %v1274_v22  ;;  %v7166_v8 = vld [vmem:[#allocation39_spill] sm:$0xff] }
 0x171   :  { %v1705_v48 = vmul.f32 %v1593_v45, %v5427_v23  ;;  %v1159_v54 = vmul.f32 %v7165_v4, %v5046_v43  ;;  %v913_v18 = vmul.f32 0.044715, %v5489_v36  ;;  %v7167_v24 = vld [vmem:[#allocation43_spill] sm:$0xff]  ;;  %v5513_v9 = vmul.f32 %v883_v44, %v5474_v60 }
 0x172   :  { %v1707_v31 = vmul.f32 %v1595_v1, %v5433_v2  ;;  %4199 = vtanh.f32 %v1386_v34  ;;  %v1161_v15 = vmul.f32 %v7167_v24, %v7166_v8  ;;  %v5516_v23 = vmul.f32 0.5, %v5075_v28  ;;  %v591_v2 = vpop.f32.mrf.mxu0 }
 0x173   :  { %v4188_v22 = vpop.eup %4187  ;;  %1985 = vmatmul.mubr.f32.gmra.mxu1 %v1705_v48  ;;  %7168 = vst [vmem:[#allocation37_spill] sm:$0xff] %v5513_v9  ;;  %v5519_v50 = vadd.f32 %v706_v37, %v7150_v5  ;;  %v1271_v0 = vadd.f32 %v1159_v54, %v5046_v43  ;;  %4201 = vtanh.f32 %v1326_v62  ;;  %v1167_v48 = vmul.f32 %v5161_v58, %v5116_v14  ;;  %v3950_v37 = vpop.f32.mrf.mxu1 }
 0x174   :  { %v4190_v45 = vpop.eup %4189  ;;  %2130 = vmatmul.mubr.f32.gmra.mxu0 %v1707_v31  ;;  %v1601_v1 = vadd.f32 1.0, %v4188_v22  ;;  %v1273_v34 = vadd.f32 %v1161_v15, %v7166_v8  ;;  %v884_v28 = vmul.f32 0.044715, %v5504_v20  ;;  %v1169_v54 = vmul.f32 %v5177_v40, %v5135_v49 }
 0x175   :  { %7169 = vst [vmem:[#allocation9_spill] sm:$0xff] %v5519_v50  ;;  %v5525_v44 = vpop.eup %4191  ;;  %v1603_v4 = vadd.f32 1.0, %v4190_v45  ;;  %v1383_v24 = vmul.f32 0.7978846, %v1271_v0  ;;  %v5532_v62 = vadd.f32 %v591_v2, %v7145_v16  ;;  %v1279_v15 = vadd.f32 %v1167_v48, %v5116_v14  ;;  %v593_v2 = vpop.f32.mrf.mxu0 }
 0x176   :  { %v1713_v35 = vmul.f32 %v1601_v1, %v5461_v11  ;;  %v1385_v31 = vmul.f32 0.7978846, %v1273_v34  ;;  %v5537_v45 = vadd.f32 %v3950_v37, %v7150_v5  ;;  %v1281_v0 = vadd.f32 %v1169_v54, %v5135_v49 }
 0x177   :  { %7170 = vst [vmem:[#allocation29_spill] sm:$0xff] %v5532_v62  ;;  %v4194_v22 = vpop.eup %4193  ;;  %v1715_v58 = vmul.f32 %v1603_v4, %v5464_v29  ;;  %4203 = vtanh.f32 %v1383_v24  ;;  %v5541_v40 = vmul.f32 %v913_v18, %v5489_v36  ;;  %v1391_v11 = vmul.f32 0.7978846, %v1279_v15  ;;  %v709_v4 = vpop.f32.mrf.mxu1  ;;  %v7173_v18 = vld [vmem:[#allocation44_spill] sm:$0xff]  ;;  %v7175_v15 = vld [vmem:[#allocation41_spill] sm:$0xff] }
 0x178   :  { %7171 = vst [vmem:[#allocation35_spill] sm:$0xff] %v5537_v45  ;;  %1989 = vmatprep.mubr.f32.mxu1 %v1713_v35  ;;  %v1600_v9 = vadd.f32 1.0, %v4194_v22  ;;  %4205 = vtanh.f32 %v1385_v31  ;;  %v5544_v1 = vmul.f32 %v884_v28, %v5504_v20  ;;  %v899_v29 = vmul.f32 0.044715, %v5519_v50 }
 0x179   :  { %7172 = vst [vmem:[#allocation10_spill] sm:$0xff] %v5541_v40  ;;  %2134 = vmatprep.mubr.f32.mxu0 %v1715_v58  ;;  %v5548_v34 = vmul.f32 0.5, %v5046_v43  ;;  %v1393_v48 = vmul.f32 0.7978846, %v1281_v0  ;;  %v890_v24 = vmul.f32 0.044715, %v5532_v62  ;;  %4207 = vtanh.f32 %v1391_v11 }
 0x17a   :  { %v1712_v35 = vmul.f32 %v1600_v9, %v5486_v12  ;;  %v1166_v37 = vmul.f32 %v7173_v18, %v5081_v27  ;;  %v4196_v54 = vpop.eup %4195  ;;  %v920_v31 = vmul.f32 0.044715, %v5537_v45  ;;  %v5556_v28 = vadd.f32 %v593_v2, %v7154_v13  ;;  %v7176_v43 = vld [vmem:[#allocation45_spill] sm:$0xff] }
 0x17b   :  { %4209 = vtanh.f32 %v1393_v48  ;;  %v1168_v22 = vmul.f32 %v7176_v43, %v7175_v15  ;;  %v1602_v58 = vadd.f32 1.0, %v4196_v54  ;;  %v825_v12 = vmul.f32 0.5, %v7166_v8  ;;  %v597_v54 = vpop.f32.mrf.mxu0 }
 0x17c   :  { %7174 = vst [vmem:[#allocation30_spill] sm:$0xff] %v5556_v28  ;;  %1990 = vmatmul.mubr.f32.gmra.mxu1 %v1712_v35  ;;  %v5562_v9 = vadd.f32 %v709_v4, %v7150_v5  ;;  %v1278_v0 = vadd.f32 %v1166_v37, %v5081_v27  ;;  %v5566_v18 = vmul.f32 %v899_v29, %v5519_v50  ;;  %v5569_v48 = vmul.f32 0.5, %v5116_v14 }
 0x17d   :  { %v4198_v11 = vpop.eup %4197  ;;  %v5572_v2 = vmul.f32 0.5, %v5135_v49  ;;  %v1280_v35 = vadd.f32 %v1168_v22, %v7175_v15  ;;  %v1714_v8 = vmul.f32 %v1602_v58, %v5496_v39  ;;  %v5577_v4 = vmul.f32 %v890_v24, %v5532_v62  ;;  %v7181_v49 = vld [vmem:[#allocation15_spill] sm:$0xff] }
 0x17e   :  { %7177 = vst [vmem:[#allocation36_spill] sm:$0xff] %v5562_v9  ;;  %7178 = vst [vmem:[#allocation32_spill] sm:$0xff] %v5566_v18  ;;  %v1608_v43 = vadd.f32 1.0, %v4198_v11  ;;  %v1390_v37 = vmul.f32 0.7978846, %v1278_v0  ;;  %v5580_v29 = vmul.f32 %v920_v31, %v5537_v45  ;;  %v1174_v18 = vmul.f32 %v7181_v49, %v5180_v19  ;;  %v3953_v31 = vpop.f32.mrf.mxu1  ;;  %v7182_v11 = vld [vmem:[#allocation25_spill] sm:$0xff]  ;;  %v599_v49 = vpop.f32.mrf.mxu0 }
 0x17f   :  { %7179 = vst [vmem:[#allocation38_spill] sm:$0xff] %v5577_v4  ;;  %v4200_v40 = vpop.eup %4199  ;;  %v891_v14 = vmul.f32 0.044715, %v5556_v28  ;;  %v1392_v36 = vmul.f32 0.7978846, %v1280_v35  ;;  %2135 = vmatmul.mubr.f32.gmra.mxu0 %v1714_v8  ;;  %v5590_v58 = vmul.f32 0.5, %v5081_v27  ;;  %v1176_v35 = vmul.f32 %v7182_v11, %v5183_v33 }
 0x180   :  { %7180 = vst [vmem:[#allocation34_spill] sm:$0xff] %v5580_v29  ;;  %v1720_v22 = vmul.f32 %v1608_v43, %v5501_v53  ;;  %v1610_v50 = vadd.f32 1.0, %v4200_v40  ;;  %v906_v39 = vmul.f32 0.044715, %v5562_v9  ;;  %4211 = vtanh.f32 %v1390_v37  ;;  %v5587_v24 = vpop.eup %4201  ;;  %v7185_v37 = vld [vmem:[#allocation46_spill] sm:$0xff]  ;;  %v7186_v11 = vld [vmem:[#allocation11_spill] sm:$0xff]  ;;  %v722_v4 = vpop.f32.mrf.mxu1 }
 0x181   :  { %4213 = vtanh.f32 %v1392_v36  ;;  %v1286_v0 = vadd.f32 %v1174_v18, %v5180_v19  ;;  %v5597_v40 = vmul.f32 0.5, %v7175_v15  ;;  %v5600_v8 = vadd.f32 %v597_v54, %v7145_v16  ;;  %v7188_v54 = vld [vmem:[#allocation22_spill] sm:$0xff] }
 0x182   :  { %1994 = vmatprep.mubr.f32.mxu1 %v1720_v22  ;;  %v1722_v53 = vmul.f32 %v1610_v50, %v5516_v23  ;;  %v5603_v27 = vadd.f32 %v3953_v31, %v7150_v5  ;;  %v5606_v36 = vmul.f32 %v891_v14, %v5556_v28  ;;  %v1288_v43 = vadd.f32 %v1176_v35, %v5183_v33  ;;  %v7189_v14 = vld [vmem:[#allocation12_spill] sm:$0xff] }
 0x183   :  { %v1398_v18 = vmul.f32 0.7978846, %v1286_v0  ;;  %v1173_v22 = vmul.f32 %v7186_v11, %v7185_v37  ;;  %v5612_v23 = vmul.f32 %v906_v39, %v5562_v9  ;;  %v5615_v50 = vmul.f32 0.5, %v5180_v19 }
 0x184   :  { %7183 = vst [vmem:[#allocation40_spill] sm:$0xff] %v5603_v27  ;;  %7184 = vst [vmem:[#allocation42_spill] sm:$0xff] %v5606_v36  ;;  %v4204_v29 = vpop.eup %4203  ;;  %2139 = vmatprep.mubr.f32.mxu0 %v1722_v53  ;;  %v5618_v15 = vadd.f32 %v599_v49, %v7154_v13  ;;  %v1175_v31 = vmul.f32 %v7189_v14, %v7188_v54  ;;  %v1400_v35 = vmul.f32 0.7978846, %v1288_v43  ;;  %v897_v39 = vmul.f32 0.044715, %v5600_v8  ;;  %v601_v49 = vpop.f32.mrf.mxu0 }
 0x185   :  { %7187 = vst [vmem:[#allocation39_spill] sm:$0xff] %v5612_v23  ;;  %v4206_v0 = vpop.eup %4205  ;;  %v1607_v45 = vadd.f32 1.0, %v4204_v29  ;;  %4215 = vtanh.f32 %v1398_v18  ;;  %v1285_v11 = vadd.f32 %v1173_v22, %v7185_v37  ;;  %v5625_v62 = vadd.f32 %v722_v4, %v7150_v5 }
 0x186   :  { %v1609_v53 = vadd.f32 1.0, %v4206_v0  ;;  %v1287_v19 = vadd.f32 %v1175_v31, %v7188_v54  ;;  %v4208_v23 = vpop.eup %4207  ;;  %v941_v14 = vmul.f32 0.044715, %v5603_v27  ;;  %4217 = vtanh.f32 %v1400_v35 }
 0x187   :  { %v1719_v9 = vmul.f32 %v1607_v45, %v5548_v34  ;;  %v1397_v29 = vmul.f32 0.7978846, %v1285_v11  ;;  %v1615_v36 = vadd.f32 1.0, %v4208_v23  ;;  %v5631_v22 = vmul.f32 0.5, %v5183_v33 }
 0x188   :  { %v4210_v18 = vpop.eup %4209  ;;  %v1721_v43 = vmul.f32 %v1609_v53, %v825_v12  ;;  %v1399_v0 = vmul.f32 0.7978846, %v1287_v19  ;;  %v898_v28 = vmul.f32 0.044715, %v5618_v15  ;;  %v5635_v31 = vadd.f32 %v601_v49, %v7145_v16  ;;  %v3954_v12 = vpop.f32.mrf.mxu1 }
 0x189   :  { %1995 = vmatmul.mubr.f32.gmra.mxu1 %v1719_v9  ;;  %v1617_v4 = vadd.f32 1.0, %v4210_v18  ;;  %4219 = vtanh.f32 %v1397_v29  ;;  %v1727_v45 = vmul.f32 %v1615_v36, %v5569_v48  ;;  %v927_v34 = vmul.f32 0.044715, %v5625_v62  ;;  %v603_v53 = vpop.f32.mrf.mxu0  ;;  %v7194_v29 = vld [vmem:[#allocation16_spill] sm:$0xff] }
 0x18a   :  { %7190 = vst [vmem:[#allocation43_spill] sm:$0xff] %v5635_v31  ;;  %2140 = vmatmul.mubr.f32.gmra.mxu0 %v1721_v43  ;;  %4221 = vtanh.f32 %v1399_v0  ;;  %v1181_v33 = vmul.f32 %v5284_v46, %v5236_v17  ;;  %v5643_v9 = vmul.f32 %v897_v39, %v5600_v8  ;;  %v5646_v35 = vadd.f32 %v3954_v12, %v7150_v5 }
 0x18b   :  { %v1729_v23 = vmul.f32 %v1617_v4, %v5572_v2  ;;  %v1183_v11 = vmul.f32 %v5287_v21, %v5245_v57  ;;  %1999 = vmatprep.mubr.f32.mxu1 %v1727_v45  ;;  %v5651_v48 = vmul.f32 %v941_v14, %v5603_v27  ;;  %v5654_v36 = vmul.f32 0.5, %v7185_v37  ;;  %v7193_v14 = vld [vmem:[#allocation19_spill] sm:$0xff]  ;;  %v7195_v4 = vld [vmem:[#allocation20_spill] sm:$0xff]  ;;  %v7196_v45 = vld [vmem:[#allocation26_spill] sm:$0xff] }
 0x18c   :  { %7191 = vst [vmem:[#allocation44_spill] sm:$0xff] %v5646_v35  ;;  %v5657_v46 = vmul.f32 0.5, %v7188_v54  ;;  %v1293_v2 = vadd.f32 %v1181_v33, %v5236_v17  ;;  %v5661_v19 = vmul.f32 %v898_v28, %v5618_v15  ;;  %v904_v21 = vmul.f32 0.044715, %v5635_v31 }
 0x18d   :  { %7192 = vst [vmem:[#allocation41_spill] sm:$0xff] %v5651_v48  ;;  %v4212_v39 = vpop.eup %4211  ;;  %2144 = vmatprep.mubr.f32.mxu0 %v1729_v23  ;;  %v1295_v49 = vadd.f32 %v1183_v11, %v5245_v57  ;;  %v1180_v18 = vmul.f32 %v7194_v29, %v7193_v14  ;;  %v5668_v54 = vmul.f32 %v927_v34, %v5625_v62  ;;  %v948_v28 = vmul.f32 0.044715, %v5646_v35  ;;  %v725_v48 = vpop.f32.mrf.mxu1 }
 0x18e   :  { %v4214_v37 = vpop.eup %4213  ;;  %v1614_v43 = vadd.f32 1.0, %v4212_v39  ;;  %v1405_v0 = vmul.f32 0.7978846, %v1293_v2  ;;  %v1182_v12 = vmul.f32 %v7196_v45, %v7195_v4  ;;  %v5676_v29 = vadd.f32 %v603_v53, %v7154_v13  ;;  %v607_v39 = vpop.f32.mrf.mxu0 }
 0x18f   :  { %v1616_v33 = vadd.f32 1.0, %v4214_v37  ;;  %v1407_v23 = vmul.f32 0.7978846, %v1295_v49  ;;  %v1292_v27 = vadd.f32 %v1180_v18, %v7193_v14  ;;  %v5681_v45 = vmul.f32 %v904_v21, %v5635_v31 }
 0x190   :  { %v1726_v11 = vmul.f32 %v1614_v43, %v5590_v58  ;;  %4223 = vtanh.f32 %v1405_v0  ;;  %v1294_v34 = vadd.f32 %v1182_v12, %v7195_v4  ;;  %v5684_v18 = vmul.f32 0.5, %v5236_v17  ;;  %v3957_v12 = vpop.f32.mrf.mxu1 }
 0x191   :  { %v1728_v2 = vmul.f32 %v1616_v33, %v5597_v40  ;;  %7197 = vst [vmem:[#allocation45_spill] sm:$0xff] %v5681_v45  ;;  %4225 = vtanh.f32 %v1407_v23  ;;  %v1404_v37 = vmul.f32 0.7978846, %v1292_v27  ;;  %v5687_v58 = vadd.f32 %v725_v48, %v7150_v5 }
 0x192   :  { %v4216_v49 = vpop.eup %4215  ;;  %2000 = vmatmul.mubr.f32.gmra.mxu1 %v1726_v11  ;;  %v1406_v53 = vmul.f32 0.7978846, %v1294_v34  ;;  %v1188_v43 = vmul.f32 %v5327_v59, %v5278_v41  ;;  %v5692_v40 = vmul.f32 %v948_v28, %v5646_v35  ;;  %v5695_v21 = vmul.f32 0.5, %v5245_v57  ;;  %v609_v59 = vpop.f32.mrf.mxu0 }
 0x193   :  { %7198 = vst [vmem:[#allocation15_spill] sm:$0xff] %v5687_v58  ;;  %2145 = vmatmul.mubr.f32.gmra.mxu0 %v1728_v2  ;;  %v1622_v0 = vadd.f32 1.0, %v4216_v49  ;;  %4227 = vtanh.f32 %v1404_v37  ;;  %v4218_v27 = vpop.eup %4217  ;;  %v905_v17 = vmul.f32 0.044715, %v5676_v29  ;;  %v1190_v33 = vmul.f32 %v5330_v6, %v5290_v47 }
 0x194   :  { %7199 = vst [vmem:[#allocation25_spill] sm:$0xff] %v5692_v40  ;;  %4229 = vtanh.f32 %v1406_v53  ;;  %v1300_v48 = vadd.f32 %v1188_v43, %v5278_v41  ;;  %v1624_v11 = vadd.f32 1.0, %v4218_v27  ;;  %v5703_v28 = vadd.f32 %v607_v39, %v7145_v16  ;;  %v611_v40 = vpop.f32.mrf.mxu0 }
 0x195   :  { %v1734_v23 = vmul.f32 %v1622_v0, %v5615_v50  ;;  %v5706_v57 = vadd.f32 %v3957_v12, %v7150_v5  ;;  %v934_v2 = vmul.f32 0.044715, %v5687_v58  ;;  %v5710_v37 = vmul.f32 0.5, %v7193_v14 }
 0x196   :  { %v4220_v34 = vpop.eup %4219  ;;  %v1412_v49 = vmul.f32 0.7978846, %v1300_v48  ;;  %v1302_v53 = vadd.f32 %v1190_v33, %v5290_v47  ;;  %v1736_v50 = vmul.f32 %v1624_v11, %v5631_v22  ;;  %v5715_v39 = vmul.f32 0.5, %v7195_v4  ;;  %v738_v48 = vpop.f32.mrf.mxu1  ;;  %v7201_v4 = vld [vmem:[#allocation13_spill] sm:$0xff]  ;;  %v7202_v11 = vld [vmem:[#allocation23_spill] sm:$0xff] }
 0x197   :  { %7200 = vst [vmem:[#allocation46_spill] sm:$0xff] %v5706_v57  ;;  %v4222_v6 = vpop.eup %4221  ;;  %2004 = vmatprep.mubr.f32.mxu1 %v1734_v23  ;;  %v1621_v43 = vadd.f32 1.0, %v4220_v34  ;;  %v5718_v0 = vadd.f32 %v609_v59, %v7154_v13  ;;  %v5721_v12 = vmul.f32 %v905_v17, %v5676_v29  ;;  %v911_v22 = vmul.f32 0.044715, %v5703_v28 }
 0x198   :  { %v1623_v27 = vadd.f32 1.0, %v4222_v6  ;;  %4231 = vtanh.f32 %v1412_v49  ;;  %v1414_v14 = vmul.f32 0.7978846, %v1302_v53  ;;  %2149 = vmatprep.mubr.f32.mxu0 %v1736_v50  ;;  %v969_v23 = vmul.f32 0.044715, %v5706_v57 }
 0x199   :  { %v1733_v33 = vmul.f32 %v1621_v43, %v5654_v36  ;;  %v1187_v34 = vmul.f32 %v7202_v11, %v7201_v4  ;;  %v5730_v6 = vmul.f32 %v934_v2, %v5687_v58  ;;  %v1189_v17 = vmul.f32 %v5315_v30, %v5272_v25  ;;  %v3958_v43 = vpop.f32.mrf.mxu1  ;;  %v7204_v30 = vld [vmem:[#allocation27_spill] sm:$0xff]  ;;  %v613_v11 = vpop.f32.mrf.mxu0 }
 0x19a   :  { %v1735_v59 = vmul.f32 %v1623_v27, %v5657_v46  ;;  %4233 = vtanh.f32 %v1414_v14  ;;  %v5735_v49 = vmul.f32 0.5, %v5278_v41  ;;  %v912_v36 = vmul.f32 0.044715, %v5718_v0  ;;  %v7205_v14 = vld [vmem:[#allocation21_spill] sm:$0xff]  ;;  %v7206_v41 = vld [vmem:[#allocation18_spill] sm:$0xff] }
 0x19b   :  { %7203 = vst [vmem:[#allocation11_spill] sm:$0xff] %v5730_v6  ;;  %2005 = vmatmul.mubr.f32.gmra.mxu1 %v1733_v33  ;;  %v5739_v53 = vadd.f32 %v738_v48, %v7150_v5  ;;  %v1299_v50 = vadd.f32 %v1187_v34, %v7201_v4  ;;  %v5743_v46 = vmul.f32 0.5, %v5290_v47  ;;  %v1301_v2 = vadd.f32 %v1189_v17, %v5272_v25 }
 0x19c   :  { %2150 = vmatmul.mubr.f32.gmra.mxu0 %v1735_v59  ;;  %v1195_v27 = vmul.f32 %v7204_v30, %v5343_v63  ;;  %v1197_v33 = vmul.f32 %v7206_v41, %v7205_v14  ;;  %v5751_v48 = vmul.f32 %v911_v22, %v5703_v28  ;;  %v5754_v34 = vmul.f32 %v969_v23, %v5706_v57  ;;  %v741_v57 = vpop.f32.mrf.mxu1 }
 0x19d   :  { %v4224_v35 = vpop.eup %4223  ;;  %v5757_v47 = vmul.f32 0.5, %v7201_v4  ;;  %v1411_v59 = vmul.f32 0.7978846, %v1299_v50  ;;  %v1413_v31 = vmul.f32 0.7978846, %v1301_v2  ;;  %v5762_v58 = vmul.f32 %v912_v36, %v5718_v0 }
 0x19e   :  { %7207 = vst [vmem:[#allocation22_spill] sm:$0xff] %v5751_v48  ;;  %7208 = vst [vmem:[#allocation12_spill] sm:$0xff] %v5754_v34  ;;  %v4226_v17 = vpop.eup %4225  ;;  %v1629_v45 = vadd.f32 1.0, %v4224_v35  ;;  %v1307_v30 = vadd.f32 %v1195_v27, %v5343_v63  ;;  %v1309_v6 = vadd.f32 %v1197_v33, %v7205_v14  ;;  %v955_v22 = vmul.f32 0.044715, %v5739_v53  ;;  %v617_v35 = vpop.f32.mrf.mxu0 }
 0x19f   :  { %v1631_v41 = vadd.f32 1.0, %v4226_v17  ;;  %4235 = vtanh.f32 %v1411_v59  ;;  %v5768_v33 = vadd.f32 %v611_v40, %v7145_v16  ;;  %v5771_v36 = vadd.f32 %v3958_v43, %v7150_v5 }
 0x1a0   :  { %v4228_v23 = vpop.eup %4227  ;;  %v1741_v34 = vmul.f32 %v1629_v45, %v5684_v18  ;;  %4237 = vtanh.f32 %v1413_v31  ;;  %v1419_v4 = vmul.f32 0.7978846, %v1307_v30  ;;  %v1421_v50 = vmul.f32 0.7978846, %v1309_v6  ;;  %v7209_v31 = vld [vmem:[#allocation14_spill] sm:$0xff]  ;;  %v7210_v45 = vld [vmem:[#allocation31_spill] sm:$0xff] }
 0x1a1   :  { %v4230_v2 = vpop.eup %4229  ;;  %v1743_v27 = vmul.f32 %v1631_v41, %v5695_v21  ;;  %v1628_v48 = vadd.f32 1.0, %v4228_v23  ;;  %v5774_v17 = vmul.f32 0.5, %v5272_v25  ;;  %v1194_v18 = vmul.f32 %v7210_v45, %v7209_v31  ;;  %v7211_v30 = vld [vmem:[#allocation24_spill] sm:$0xff]  ;;  %v7212_v41 = vld [vmem:[#allocation17_spill] sm:$0xff] }
 0x1a2   :  { %2009 = vmatprep.mubr.f32.mxu1 %v1741_v34  ;;  %v1630_v59 = vadd.f32 1.0, %v4230_v2  ;;  %4239 = vtanh.f32 %v1419_v4  ;;  %v5780_v21 = vadd.f32 %v613_v11, %v7154_v13  ;;  %v5783_v40 = vadd.f32 %v741_v57, %v7150_v5  ;;  %v619_v4 = vpop.f32.mrf.mxu0 }
 0x1a3   :  { %2154 = vmatprep.mubr.f32.mxu0 %v1743_v27  ;;  %v1740_v6 = vmul.f32 %v1628_v48, %v5710_v37  ;;  %4241 = vtanh.f32 %v1421_v50  ;;  %v5787_v34 = vmul.f32 %v955_v22, %v5739_v53  ;;  %v1306_v25 = vadd.f32 %v1194_v18, %v7209_v31 }
 0x1a4   :  { %v1742_v43 = vmul.f32 %v1630_v59, %v5715_v39  ;;  %v1196_v23 = vmul.f32 %v7212_v41, %v7211_v30  ;;  %v918_v37 = vmul.f32 0.044715, %v5768_v33  ;;  %v976_v11 = vmul.f32 0.044715, %v5771_v36 }
 0x1a5   :  { %v4232_v2 = vpop.eup %4231  ;;  %2010 = vmatmul.mubr.f32.gmra.mxu1 %v1740_v6  ;;  %v5795_v5 = vmul.f32 0.5, %v5343_v63  ;;  %v1094_v57 = vmul.f32 %v5437_v52, %v5396_v3  ;;  %v1418_v48 = vmul.f32 0.7978846, %v1306_v25  ;;  %v5801_v50 = vadd.f32 %v617_v35, %v7145_v16  ;;  %v621_v25 = vpop.f32.mrf.mxu0 }
 0x1a6   :  { %2155 = vmatmul.mubr.f32.gmra.mxu0 %v1742_v43  ;;  %v1636_v39 = vadd.f32 1.0, %v4232_v2  ;;  %v1308_v22 = vadd.f32 %v1196_v23, %v7211_v30  ;;  %v861_v59 = vmul.f32 0.5, %v7205_v14  ;;  %v919_v45 = vmul.f32 0.044715, %v5780_v21 }
 0x1a7   :  { %7213 = vst [vmem:[#allocation19_spill] sm:$0xff] %v5801_v50  ;;  %v4234_v27 = vpop.eup %4233  ;;  %v962_v18 = vmul.f32 0.044715, %v5783_v40  ;;  %v1206_v63 = vadd.f32 %v1094_v57, %v5396_v3  ;;  %4243 = vtanh.f32 %v1418_v48  ;;  %v5809_v41 = vmul.f32 %v918_v37, %v5768_v33 }
 0x1a8   :  { %v1748_v6 = vmul.f32 %v1636_v39, %v5735_v49  ;;  %v1638_v52 = vadd.f32 1.0, %v4234_v27  ;;  %v1420_v43 = vmul.f32 0.7978846, %v1308_v22  ;;  %v5812_v35 = vmul.f32 %v976_v11, %v5771_v36  ;;  %v623_v27 = vpop.f32.mrf.mxu0 }
 0x1a9   :  { %v5815_v14 = vmul.f32 0.5, %v7209_v31  ;;  %v1318_v23 = vmul.f32 0.7978846, %v1206_v63  ;;  %v925_v49 = vmul.f32 0.044715, %v5801_v50  ;;  %v5820_v57 = vadd.f32 %v619_v4, %v7154_v13 }
 0x1aa   :  { %7214 = vst [vmem:[#allocation16_spill] sm:$0xff] %v5812_v35  ;;  %2014 = vmatprep.mubr.f32.mxu1 %v1748_v6  ;;  %v1750_v2 = vmul.f32 %v1638_v52, %v5743_v46  ;;  %4245 = vtanh.f32 %v1420_v43  ;;  %v5823_v39 = vmul.f32 %v919_v45, %v5780_v21  ;;  %v1541_v37 = vadd.f32 1.0, %v5525_v44 }
 0x1ab   :  { %4247 = vtanh.f32 %v1318_v23  ;;  %v1095_v31 = vmul.f32 %v5454_v55, %v5410_v10  ;;  %v5829_v48 = vmul.f32 %v962_v18, %v5783_v40  ;;  %v5832_v46 = vmul.f32 0.5, %v7211_v30  ;;  %v7216_v23 = vld [vmem:[#allocation28_spill] sm:$0xff] }
 0x1ac   :  { %v4236_v11 = vpop.eup %4235  ;;  %2159 = vmatprep.mubr.f32.mxu0 %v1750_v2  ;;  %v5835_v4 = vadd.f32 %v621_v25, %v7145_v16  ;;  %v1101_v22 = vmul.f32 %v5493_v42, %v5449_v7  ;;  %v5840_v63 = vmul.f32 0.5, %v5396_v3  ;;  %v1100_v18 = vmul.f32 %v5470_v56, %v5419_v51 }
 0x1ad   :  { %v4238_v45 = vpop.eup %4237  ;;  %v1635_v44 = vadd.f32 1.0, %v4236_v11  ;;  %v1207_v55 = vadd.f32 %v1095_v31, %v5410_v10  ;;  %v5846_v30 = vmul.f32 %v925_v49, %v5801_v50  ;;  %v926_v52 = vmul.f32 0.044715, %v5820_v57  ;;  %v627_v50 = vpop.f32.mrf.mxu0 }
 0x1ae   :  { %v1637_v6 = vadd.f32 1.0, %v4238_v45  ;;  %v1213_v43 = vadd.f32 %v1101_v22, %v5449_v7  ;;  %v5852_v2 = vmul.f32 %v1541_v37, %v7216_v23  ;;  %v1212_v31 = vadd.f32 %v1100_v18, %v5419_v51 }
 0x1af   :  { %7215 = vst [vmem:[#allocation20_spill] sm:$0xff] %v5846_v30  ;;  %v4240_v42 = vpop.eup %4239  ;;  %v1747_v25 = vmul.f32 %v1635_v44, %v5757_v47  ;;  %v1319_v3 = vmul.f32 0.7978846, %v1207_v55  ;;  %v932_v49 = vmul.f32 0.044715, %v5835_v4  ;;  %v1109_v47 = vmul.f32 %v5424_v38, %v5380_v32 }
 0x1b0   :  { %v4242_v11 = vpop.eup %4241  ;;  %v1749_v56 = vmul.f32 %v1637_v6, %v5774_v17  ;;  %v1643_v45 = vadd.f32 1.0, %v4240_v42  ;;  %v1325_v30 = vmul.f32 0.7978846, %v1213_v43  ;;  %v1324_v22 = vmul.f32 0.7978846, %v1212_v31  ;;  %v7217_v42 = vld [vmem:[#allocation37_spill] sm:$0xff] }
 0x1b1   :  { %2015 = vmatmul.mubr.f32.gmra.mxu1 %v1747_v25  ;;  %v1645_v35 = vadd.f32 1.0, %v4242_v11  ;;  %4249 = vtanh.f32 %v1319_v3  ;;  %v5861_v44 = vmul.f32 %v926_v52, %v5820_v57  ;;  %v5864_v17 = vmul.f32 0.5, %v5410_v10 }
 0x1b2   :  { %2160 = vmatmul.mubr.f32.gmra.mxu0 %v1749_v56  ;;  %v1755_v37 = vmul.f32 %v1643_v45, %v5795_v5  ;;  %4251 = vtanh.f32 %v1325_v30  ;;  %v1221_v18 = vadd.f32 %v1109_v47, %v5380_v32  ;;  %v1108_v6 = vmul.f32 %v5544_v1, %v5504_v20 }
 0x1b3   :  { %v1757_v55 = vmul.f32 %v1645_v35, %v861_v59  ;;  %4253 = vtanh.f32 %v1324_v22  ;;  %v5870_v38 = vmul.f32 %v932_v49, %v5835_v4  ;;  %v5873_v5 = vmul.f32 0.5, %v5449_v7  ;;  %v629_v59 = vpop.f32.mrf.mxu0 }
 0x1b4   :  { %2019 = vmatprep.mubr.f32.mxu1 %v1755_v37  ;;  %v5876_v52 = vadd.f32 %v623_v27, %v7154_v13  ;;  %v1116_v10 = vmul.f32 %v5481_v26, %v5445_v61  ;;  %v4244_v35 = vpop.eup %4243  ;;  %v1550_v30 = vadd.f32 1.0, %v5587_v24  ;;  %v1333_v43 = vmul.f32 0.7978846, %v1221_v18  ;;  %v7219_v37 = vld [vmem:[#allocation33_spill] sm:$0xff] }
 0x1b5   :  { %2164 = vmatprep.mubr.f32.mxu0 %v1757_v55  ;;  %v1220_v1 = vadd.f32 %v1108_v6, %v5504_v20  ;;  %v1107_v25 = vmul.f32 %v7217_v42, %v5474_v60  ;;  %v1642_v23 = vadd.f32 1.0, %v4244_v35  ;;  %v5885_v7 = vmul.f32 0.5, %v5419_v51  ;;  %v631_v47 = vpop.f32.mrf.mxu0  ;;  %v7221_v35 = vld [vmem:[#allocation32_spill] sm:$0xff] }
 0x1b6   :  { %v5888_v27 = vadd.f32 %v627_v50, %v7145_v16  ;;  %v1228_v26 = vadd.f32 %v1116_v10, %v5445_v61  ;;  %4255 = vtanh.f32 %v1333_v43  ;;  %v5892_v24 = vadd.f32 %v629_v59, %v7154_v13  ;;  %v7220_v59 = vld [vmem:[#allocation9_spill] sm:$0xff] }
 0x1b7   :  { %v4246_v3 = vpop.eup %4245  ;;  %v1332_v31 = vmul.f32 0.7978846, %v1220_v1  ;;  %v1219_v11 = vadd.f32 %v1107_v25, %v5474_v60  ;;  %v1754_v45 = vmul.f32 %v1642_v23, %v5815_v14  ;;  %v933_v51 = vmul.f32 0.044715, %v5876_v52  ;;  %v7222_v25 = vld [vmem:[#allocation30_spill] sm:$0xff] }
 0x1b8   :  { %7218 = vst [vmem:[#allocation26_spill] sm:$0xff] %v5888_v27  ;;  %v4248_v56 = vpop.eup %4247  ;;  %v1644_v49 = vadd.f32 1.0, %v4246_v3  ;;  %v1340_v22 = vmul.f32 0.7978846, %v1228_v26  ;;  %v1662_v55 = vmul.f32 %v1550_v30, %v7219_v37  ;;  %v5900_v10 = vmul.f32 0.5, %v5380_v32  ;;  %v7223_v32 = vld [vmem:[#allocation42_spill] sm:$0xff] }
 0x1b9   :  { %v1542_v50 = vadd.f32 1.0, %v4248_v56  ;;  %4257 = vtanh.f32 %v1332_v31  ;;  %v1331_v18 = vmul.f32 0.7978846, %v1219_v11  ;;  %2020 = vmatmul.mubr.f32.gmra.mxu1 %v1754_v45  ;;  %v1123_v14 = vmul.f32 %v7221_v35, %v7220_v59  ;;  %v7224_v26 = vld [vmem:[#allocation36_spill] sm:$0xff]  ;;  %v7225_v3 = vld [vmem:[#allocation39_spill] sm:$0xff]  ;;  %v633_v11 = vpop.f32.mrf.mxu0 }
 0x1ba   :  { %v1756_v6 = vmul.f32 %v1644_v49, %v5832_v46  ;;  %4259 = vtanh.f32 %v1340_v22  ;;  %v939_v1 = vmul.f32 0.044715, %v5888_v27  ;;  %v940_v42 = vmul.f32 0.044715, %v5892_v24  ;;  %v7226_v49 = vld [vmem:[#allocation29_spill] sm:$0xff] }
 0x1bb   :  { %v1654_v43 = vmul.f32 %v1542_v50, %v5840_v63  ;;  %4261 = vtanh.f32 %v1331_v18  ;;  %v5908_v30 = vmul.f32 %v933_v51, %v5876_v52  ;;  %v1235_v46 = vadd.f32 %v1123_v14, %v7220_v59  ;;  %v7227_v51 = vld [vmem:[#allocation38_spill] sm:$0xff] }
 0x1bc   :  { %2165 = vmatmul.mubr.f32.gmra.mxu0 %v1756_v6  ;;  %v1115_v23 = vmul.f32 %v7223_v32, %v7222_v25  ;;  %v1130_v31 = vmul.f32 %v7225_v3, %v7224_v26  ;;  %v5916_v63 = vmul.f32 0.5, %v5504_v20  ;;  %v5919_v56 = vmul.f32 0.5, %v5445_v61 }
 0x1bd   :  { %2234 = vmatprep.mubr.f32.mxu1 %v1654_v43  ;;  %v5922_v45 = vadd.f32 %v631_v47, %v7145_v16  ;;  %v1114_v22 = vmul.f32 %v7227_v51, %v7226_v49  ;;  %v5928_v37 = vmul.f32 0.5, %v5474_v60  ;;  %v1347_v18 = vmul.f32 0.7978846, %v1235_v46  ;;  %v637_v46 = vpop.f32.mrf.mxu0 }
 0x1be   :  { %v4250_v50 = vpop.eup %4249  ;;  %2235 = vmatmul.mubr.f32.vlgmr.msra.gmra.mxu1 %v5852_v2  ;;  %v1227_v6 = vadd.f32 %v1115_v23, %v7222_v25  ;;  %v1242_v20 = vadd.f32 %v1130_v31, %v7224_v26  ;;  %v5933_v14 = vmul.f32 %v939_v1, %v5888_v27  ;;  %v5936_v47 = vmul.f32 %v940_v42, %v5892_v24 }
 0x1bf   :  { %v4252_v35 = vpop.eup %4251  ;;  %v1543_v61 = vadd.f32 1.0, %v4250_v50  ;;  %v1226_v43 = vadd.f32 %v1114_v22, %v7226_v49  ;;  %4263 = vtanh.f32 %v1347_v18  ;;  %v946_v31 = vmul.f32 0.044715, %v5922_v45  ;;  %v7230_v22 = vld [vmem:[#allocation10_spill] sm:$0xff] }
 0x1c0   :  { %7228 = vst [vmem:[#allocation13_spill] sm:$0xff] %v5933_v14  ;;  %v4254_v32 = vpop.eup %4253  ;;  %v1549_v2 = vadd.f32 1.0, %v4252_v35  ;;  %v1339_v60 = vmul.f32 0.7978846, %v1227_v6  ;;  %v1354_v3 = vmul.f32 0.7978846, %v1242_v20  ;;  %v5943_v42 = vadd.f32 %v633_v11, %v7154_v13 }
 0x1c1   :  { %v1655_v23 = vmul.f32 %v1543_v61, %v5864_v17  ;;  %v1548_v51 = vadd.f32 1.0, %v4254_v32  ;;  %v1338_v50 = vmul.f32 0.7978846, %v1226_v43  ;;  %v7229_v14 = vld [vmem:[#allocation8_spill] sm:$0xff]  ;;  %v5949_v6 = vadd.f32 %v637_v46, %v7145_v16  ;;  %v7231_v35 = vld [vmem:[#allocation35_spill] sm:$0xff]  ;;  %v7232_v61 = vld [vmem:[#allocation34_spill] sm:$0xff] }
 0x1c2   :  { %v1661_v1 = vmul.f32 %v1549_v2, %v5873_v5  ;;  %4265 = vtanh.f32 %v1339_v60  ;;  %v1137_v27 = vmul.f32 %v7230_v22, %v7229_v14  ;;  %v1122_v17 = vmul.f32 %v5661_v19, %v5618_v15 }
 0x1c3   :  { %3991 = vmatprep.mubr.f32.mxu0 %v1655_v23  ;;  %v1660_v18 = vmul.f32 %v1548_v51, %v5885_v7  ;;  %4267 = vtanh.f32 %v1354_v3  ;;  %v4256_v20 = vpop.eup %4255  ;;  %v787_v5 = vmul.f32 0.5, %v7220_v59  ;;  %v1144_v43 = vmul.f32 %v7232_v61, %v7231_v35 }
 0x1c4   :  { %2239 = vmatprep.mubr.f32.mxu1 %v1661_v1  ;;  %3992 = vmatmul.mubr.f32.vlgmr.msra.gmra.mxu0 %v1662_v55  ;;  %4269 = vtanh.f32 %v1338_v50  ;;  %v1249_v11 = vadd.f32 %v1137_v27, %v7229_v14  ;;  %v1557_v7 = vadd.f32 1.0, %v4256_v20  ;;  %v5958_v32 = vmul.f32 %v946_v31, %v5922_v45  ;;  %v639_v27 = vpop.f32.mrf.mxu0 }
 0x1c5   :  { %2240 = vmatmul.mubr.f32.gmra.mxu1 %v1660_v18  ;;  %v5961_v2 = vmul.f32 0.5, %v7222_v25  ;;  %v1234_v19 = vadd.f32 %v1122_v17, %v5618_v15  ;;  %v947_v55 = vmul.f32 0.044715, %v5943_v42  ;;  %v1256_v3 = vadd.f32 %v1144_v43, %v7231_v35 }
 0x1c6   :  { %v4258_v60 = vpop.eup %4257  ;;  %v1361_v59 = vmul.f32 0.7978846, %v1249_v11  ;;  %v1121_v46 = vmul.f32 %v5643_v9, %v5600_v8  ;;  %v1669_v51 = vmul.f32 %v1557_v7, %v5900_v10  ;;  %v953_v50 = vmul.f32 0.044715, %v5949_v6  ;;  %v641_v7 = vpop.f32.mrf.mxu0 }
 0x1c7   :  { %v4260_v23 = vpop.eup %4259  ;;  %v1556_v31 = vadd.f32 1.0, %v4258_v60  ;;  %v1346_v25 = vmul.f32 0.7978846, %v1234_v19  ;;  %v1368_v18 = vmul.f32 0.7978846, %v1256_v3  ;;  %v794_v61 = vmul.f32 0.5, %v7224_v26 }
 0x1c8   :  { %v4262_v1 = vpop.eup %4261  ;;  %v1564_v22 = vadd.f32 1.0, %v4260_v23  ;;  %4271 = vtanh.f32 %v1361_v59  ;;  %v1233_v17 = vadd.f32 %v1121_v46, %v5600_v8  ;;  %3994 = vmatprep.mubr.f32.mxu0 %v1669_v51  ;;  %v778_v10 = vmul.f32 0.5, %v7226_v49  ;;  %v7234_v46 = vld [vmem:[#allocation11_spill] sm:$0xff] }
 0x1c9   :  { %v1668_v20 = vmul.f32 %v1556_v31, %v5916_v63  ;;  %v1555_v11 = vadd.f32 1.0, %v4262_v1  ;;  %4273 = vtanh.f32 %v1346_v25  ;;  %v5977_v60 = vmul.f32 0.5, %v7229_v14  ;;  %v7236_v25 = vld [vmem:[#allocation45_spill] sm:$0xff] }
 0x1ca   :  { %v1676_v9 = vmul.f32 %v1564_v22, %v5919_v56  ;;  %4275 = vtanh.f32 %v1368_v18  ;;  %v1345_v43 = vmul.f32 0.7978846, %v1233_v17  ;;  %v5980_v59 = vadd.f32 %v639_v27, %v7154_v13  ;;  %v7233_v27 = vld [vmem:[#allocation15_spill] sm:$0xff] }
 0x1cb   :  { %2244 = vmatprep.mubr.f32.mxu1 %v1668_v20  ;;  %v1667_v19 = vmul.f32 %v1555_v11, %v5928_v37  ;;  %v1151_v26 = vmul.f32 %v5668_v54, %v5625_v62  ;;  %v5985_v63 = vmul.f32 %v947_v55, %v5943_v42  ;;  %v5988_v56 = vmul.f32 %v953_v50, %v5949_v6  ;;  %v7235_v50 = vld [vmem:[#allocation43_spill] sm:$0xff]  ;;  %v643_v20 = vpop.f32.mrf.mxu0 }
 0x1cc   :  { %3995 = vmatmul.mubr.f32.gmra.mxu0 %v1676_v9  ;;  %4277 = vtanh.f32 %v1345_v43  ;;  %v1129_v49 = vmul.f32 %v5721_v12, %v5676_v29  ;;  %v4264_v37 = vpop.eup %4263  ;;  %v786_v14 = vmul.f32 0.5, %v5618_v15  ;;  %v5994_v3 = vadd.f32 %v641_v7, %v7145_v16 }
 0x1cd   :  { %2245 = vmatmul.mubr.f32.gmra.mxu1 %v1667_v19  ;;  %v1263_v54 = vadd.f32 %v1151_v26, %v5625_v62  ;;  %v1158_v55 = vmul.f32 %v7234_v46, %v7233_v27  ;;  %v1571_v23 = vadd.f32 1.0, %v4264_v37  ;;  %v808_v51 = vmul.f32 0.5, %v7231_v35 }
 0x1ce   :  { %v1241_v31 = vadd.f32 %v1129_v49, %v5676_v29  ;;  %v1128_v12 = vmul.f32 %v7236_v25, %v7235_v50  ;;  %v954_v22 = vmul.f32 0.044715, %v5980_v59  ;;  %v6005_v15 = vmul.f32 0.5, %v5600_v8 }
 0x1cf   :  { %v4266_v1 = vpop.eup %4265  ;;  %v1375_v18 = vmul.f32 0.7978846, %v1263_v54  ;;  %v1270_v17 = vadd.f32 %v1158_v55, %v7233_v27  ;;  %v1683_v9 = vmul.f32 %v1571_v23, %v787_v5  ;;  %v960_v49 = vmul.f32 0.044715, %v5994_v3  ;;  %v647_v5 = vpop.f32.mrf.mxu0  ;;  %v7237_v23 = vld [vmem:[#allocation40_spill] sm:$0xff] }
 0x1d0   :  { %v4268_v11 = vpop.eup %4267  ;;  %v1563_v43 = vadd.f32 1.0, %v4266_v1  ;;  %v1353_v7 = vmul.f32 0.7978846, %v1241_v31  ;;  %v1240_v35 = vadd.f32 %v1128_v12, %v7235_v50  ;;  %v6012_v25 = vmul.f32 %v954_v22, %v5980_v59  ;;  %v7238_v31 = vld [vmem:[#allocation41_spill] sm:$0xff] }
 0x1d1   :  { %v4270_v19 = vpop.eup %4269  ;;  %v1578_v26 = vadd.f32 1.0, %v4268_v11  ;;  %4279 = vtanh.f32 %v1375_v18  ;;  %v1382_v37 = vmul.f32 0.7978846, %v1270_v17  ;;  %3997 = vmatprep.mubr.f32.mxu0 %v1683_v9  ;;  %v1165_v12 = vmul.f32 %v7238_v31, %v7237_v23  ;;  %v7239_v9 = vld [vmem:[#allocation44_spill] sm:$0xff] }
 0x1d2   :  { %v1675_v8 = vmul.f32 %v1563_v43, %v5961_v2  ;;  %v1562_v46 = vadd.f32 1.0, %v4270_v19  ;;  %4281 = vtanh.f32 %v1353_v7  ;;  %v1352_v54 = vmul.f32 0.7978846, %v1240_v35  ;;  %v7240_v43 = vld [vmem:[#allocation25_spill] sm:$0xff] }
 0x1d3   :  { %v1690_v55 = vmul.f32 %v1578_v26, %v794_v61  ;;  %4283 = vtanh.f32 %v1382_v37  ;;  %v6017_v18 = vadd.f32 %v643_v20, %v7154_v13  ;;  %v1136_v2 = vmul.f32 %v5762_v58, %v5718_v0 }
 0x1d4   :  { %2249 = vmatprep.mubr.f32.mxu1 %v1675_v8  ;;  %v1674_v1 = vmul.f32 %v1562_v46, %v778_v10  ;;  %4285 = vtanh.f32 %v1352_v54  ;;  %v815_v61 = vmul.f32 0.5, %v5625_v62  ;;  %v6023_v22 = vmul.f32 0.5, %v5676_v29  ;;  %v7241_v8 = vld [vmem:[#allocation22_spill] sm:$0xff] }
 0x1d5   :  { %v4272_v17 = vpop.eup %4271  ;;  %3998 = vmatmul.mubr.f32.gmra.mxu0 %v1690_v55  ;;  %v1277_v11 = vadd.f32 %v1165_v12, %v7237_v23  ;;  %v1172_v7 = vmul.f32 %v7240_v43, %v7239_v9  ;;  %v6029_v35 = vmul.f32 %v960_v49, %v5994_v3  ;;  %v6032_v58 = vadd.f32 %v647_v5, %v7145_v16  ;;  %v649_v12 = vpop.f32.mrf.mxu0 }
 0x1d6   :  { %v4274_v10 = vpop.eup %4273  ;;  %2250 = vmatmul.mubr.f32.gmra.mxu1 %v1674_v1  ;;  %v1585_v20 = vadd.f32 1.0, %v4272_v17  ;;  %v1248_v19 = vadd.f32 %v1136_v2, %v5718_v0  ;;  %v1135_v46 = vmul.f32 %v7241_v8, %v5703_v28  ;;  %v961_v31 = vmul.f32 0.044715, %v6017_v18 }
 0x1d7   :  { %v4276_v62 = vpop.eup %4275  ;;  %v1570_v26 = vadd.f32 1.0, %v4274_v10  ;;  %v1389_v29 = vmul.f32 0.7978846, %v1277_v11  ;;  %v1284_v37 = vadd.f32 %v1172_v7, %v7239_v9  ;;  %v967_v7 = vmul.f32 0.044715, %v6032_v58 }
 0x1d8   :  { %v1697_v54 = vmul.f32 %v1585_v20, %v5977_v60  ;;  %v1592_v55 = vadd.f32 1.0, %v4276_v62  ;;  %v1360_v49 = vmul.f32 0.7978846, %v1248_v19  ;;  %v1247_v2 = vadd.f32 %v1135_v46, %v5703_v28 }
 0x1d9   :  { %v4278_v1 = vpop.eup %4277  ;;  %v1682_v5 = vmul.f32 %v1570_v26, %v786_v14  ;;  %4287 = vtanh.f32 %v1389_v29  ;;  %v1396_v17 = vmul.f32 0.7978846, %v1284_v37  ;;  %v822_v60 = vmul.f32 0.5, %v7233_v27 }
 0x1da   :  { %4000 = vmatprep.mubr.f32.mxu0 %v1697_v54  ;;  %v1704_v11 = vmul.f32 %v1592_v55, %v808_v51  ;;  %v1569_v43 = vadd.f32 1.0, %v4278_v1  ;;  %4289 = vtanh.f32 %v1360_v49  ;;  %v6044_v10 = vadd.f32 %v649_v12, %v7154_v13 }
 0x1db   :  { %2254 = vmatprep.mubr.f32.mxu1 %v1682_v5  ;;  %4291 = vtanh.f32 %v1396_v17  ;;  %v1359_v20 = vmul.f32 0.7978846, %v1247_v2  ;;  %v792_v19 = vmul.f32 0.5, %v7235_v50  ;;  %v1179_v51 = vmul.f32 %v5787_v34, %v5739_v53 }
 0x1dc   :  { %4001 = vmatmul.mubr.f32.gmra.mxu0 %v1704_v11  ;;  %v1681_v14 = vmul.f32 %v1569_v43, %v6005_v15  ;;  %v1143_v62 = vmul.f32 %v5823_v39, %v5780_v21  ;;  %v6053_v26 = vmul.f32 %v961_v31, %v6017_v18  ;;  %v6056_v27 = vmul.f32 0.5, %v7237_v23  ;;  %v651_v15 = vpop.f32.mrf.mxu0 }
 0x1dd   :  { %4293 = vtanh.f32 %v1359_v20  ;;  %v1186_v29 = vmul.f32 %v5829_v48, %v5783_v40  ;;  %v6061_v50 = vmul.f32 %v967_v7, %v6032_v58  ;;  %v800_v34 = vmul.f32 0.5, %v5718_v0 }
 0x1de   :  { %v4280_v37 = vpop.eup %4279  ;;  %2255 = vmatmul.mubr.f32.gmra.mxu1 %v1681_v14  ;;  %v1291_v39 = vadd.f32 %v1179_v51, %v5739_v53  ;;  %v1255_v8 = vadd.f32 %v1143_v62, %v5780_v21  ;;  %v968_v23 = vmul.f32 0.044715, %v6044_v10  ;;  %v1142_v48 = vmul.f32 %v5809_v41, %v5768_v33  ;;  %v7243_v62 = vld [vmem:[#allocation12_spill] sm:$0xff] }
 0x1df   :  { %v4282_v46 = vpop.eup %4281  ;;  %v1599_v54 = vadd.f32 1.0, %v4280_v37  ;;  %v1298_v55 = vadd.f32 %v1186_v29, %v5783_v40  ;;  %v836_v12 = vmul.f32 0.5, %v7239_v9  ;;  %v6072_v11 = vadd.f32 %v651_v15, %v7145_v16  ;;  %v7242_v9 = vld [vmem:[#allocation46_spill] sm:$0xff] }
 0x1e0   :  { %v4284_v31 = vpop.eup %4283  ;;  %v1577_v49 = vadd.f32 1.0, %v4282_v46  ;;  %v1403_v1 = vmul.f32 0.7978846, %v1291_v39  ;;  %v1367_v0 = vmul.f32 0.7978846, %v1255_v8  ;;  %v1254_v14 = vadd.f32 %v1142_v48, %v5768_v33 }
 0x1e1   :  { %v4286_v5 = vpop.eup %4285  ;;  %v1711_v17 = vmul.f32 %v1599_v54, %v815_v61  ;;  %v1606_v2 = vadd.f32 1.0, %v4284_v31  ;;  %v1410_v43 = vmul.f32 0.7978846, %v1298_v55  ;;  %v799_v51 = vmul.f32 0.5, %v5703_v28  ;;  %v653_v54 = vpop.f32.mrf.mxu0 }
 0x1e2   :  { %v1689_v7 = vmul.f32 %v1577_v49, %v6023_v22  ;;  %v1576_v20 = vadd.f32 1.0, %v4286_v5  ;;  %4295 = vtanh.f32 %v1403_v1  ;;  %v1193_v29 = vmul.f32 %v7243_v62, %v7242_v9 }
 0x1e3   :  { %4003 = vmatprep.mubr.f32.mxu0 %v1711_v17  ;;  %v1718_v41 = vmul.f32 %v1606_v2, %v822_v60  ;;  %4297 = vtanh.f32 %v1367_v0  ;;  %v6080_v16 = vmul.f32 %v968_v23, %v6044_v10  ;;  %v1366_v37 = vmul.f32 0.7978846, %v1254_v14  ;;  %v7244_v60 = vld [vmem:[#allocation16_spill] sm:$0xff]  ;;  %v7245_v23 = vld [vmem:[#allocation19_spill] sm:$0xff]  ;;  %v6098_v0 = vpop.f32.mrf.mxu1 }
 0x1e4   :  { %2259 = vmatprep.mubr.f32.mxu1 %v1689_v7  ;;  %v1688_v61 = vmul.f32 %v1576_v20, %v792_v19  ;;  %4299 = vtanh.f32 %v1410_v43  ;;  %v6083_v22 = vmul.f32 0.5, %v5739_v53  ;;  %v1305_v15 = vadd.f32 %v1193_v29, %v7242_v9  ;;  %v7246_v53 = vld [vmem:[#allocation20_spill] sm:$0xff]  ;;  %v6106_v7 = vpop.f32.mrf.mxu0 }
 0x1e5   :  { %4004 = vmatmul.mubr.f32.gmra.mxu0 %v1718_v41  ;;  %v1150_v28 = vmul.f32 %v5861_v44, %v5820_v57  ;;  %v1200_v39 = vmul.f32 %v7244_v60, %v5771_v36  ;;  %v974_v19 = vmul.f32 0.044715, %v6072_v11  ;;  %v6092_v46 = vmul.f32 0.5, %v5780_v21  ;;  %v6112_v60 = vpop.f32.mrf.mxu1 }
 0x1e6   :  { %v4288_v8 = vpop.eup %4287  ;;  %2260 = vmatmul.mubr.f32.gmra.mxu1 %v1688_v61  ;;  %4301 = vtanh.f32 %v1366_v37  ;;  %v1149_v55 = vmul.f32 %v7246_v53, %v7245_v23  ;;  %v1417_v49 = vmul.f32 0.7978846, %v1305_v15  ;;  %v6101_v2 = vmul.f32 0.5, %v5783_v40 }
 0x1e7   :  { %v4290_v48 = vpop.eup %4289  ;;  %v1613_v31 = vadd.f32 1.0, %v4288_v8  ;;  %v1262_v44 = vadd.f32 %v1150_v28, %v5820_v57  ;;  %v1312_v1 = vadd.f32 %v1200_v39, %v5771_v36  ;;  %v1157_v43 = vmul.f32 %v5908_v30, %v5876_v52  ;;  %v6119_v8 = vpop.f32.mrf.mxu0 }
 0x1e8   :  { %v4292_v5 = vpop.eup %4291  ;;  %v1584_v17 = vadd.f32 1.0, %v4290_v48  ;;  %v1261_v21 = vadd.f32 %v1149_v55, %v7245_v23  ;;  %4303 = vtanh.f32 %v1417_v49  ;;  %v1156_v30 = vmul.f32 %v5870_v38, %v5835_v4  ;;  %v7248_v48 = vld [vmem:[#allocation13_spill] sm:$0xff] }
 0x1e9   :  { %v1725_v20 = vmul.f32 %v1613_v31, %v6056_v27  ;;  %v1620_v14 = vadd.f32 1.0, %v4292_v5  ;;  %v1374_v41 = vmul.f32 0.7978846, %v1262_v44  ;;  %v1424_v61 = vmul.f32 0.7978846, %v1312_v1 }
 0x1ea   :  { %v4294_v62 = vpop.eup %4293  ;;  %v1696_v29 = vmul.f32 %v1584_v17, %v800_v34  ;;  %v1373_v37 = vmul.f32 0.7978846, %v1261_v21  ;;  %v1269_v15 = vadd.f32 %v1157_v43, %v5876_v52  ;;  %v6115_v27 = vadd.f32 %v653_v54, %v7154_v13  ;;  %v7247_v54 = vld [vmem:[#allocation26_spill] sm:$0xff] }
 0x1eb   :  { %4006 = vmatprep.mubr.f32.mxu0 %v1725_v20  ;;  %v1732_v40 = vmul.f32 %v1620_v14, %v836_v12  ;;  %v1583_v28 = vadd.f32 1.0, %v4294_v62  ;;  %4305 = vtanh.f32 %v1374_v41  ;;  %v1164_v34 = vmul.f32 %v5936_v47, %v5892_v24 }
 0x1ec   :  { %2264 = vmatprep.mubr.f32.mxu1 %v1696_v29  ;;  %4307 = vtanh.f32 %v1424_v61  ;;  %v1381_v39 = vmul.f32 0.7978846, %v1269_v15  ;;  %v806_v53 = vmul.f32 0.5, %v5768_v33  ;;  %v1268_v38 = vadd.f32 %v1156_v30, %v5835_v4 }
 0x1ed   :  { %4007 = vmatmul.mubr.f32.gmra.mxu0 %v1732_v40  ;;  %v1695_v12 = vmul.f32 %v1583_v28, %v799_v51  ;;  %4309 = vtanh.f32 %v1373_v37  ;;  %v6124_v55 = vmul.f32 %v974_v19, %v6072_v11  ;;  %v1276_v13 = vadd.f32 %v1164_v34, %v5892_v24 }
 0x1ee   :  { %4311 = vtanh.f32 %v1381_v39  ;;  %v1163_v31 = vmul.f32 %v7248_v48, %v7247_v54  ;;  %v857_v47 = vmul.f32 0.5, %v7242_v9  ;;  %v1380_v44 = vmul.f32 0.7978846, %v1268_v38  ;;  %v6134_v1 = vpop.f32.mrf.mxu1 }
 0x1ef   :  { %v4296_v49 = vpop.eup %4295  ;;  %2265 = vmatmul.mubr.f32.gmra.mxu1 %v1695_v12  ;;  %v1171_v33 = vmul.f32 %v5985_v63, %v5943_v42  ;;  %v1170_v51 = vmul.f32 %v5958_v32, %v5922_v45  ;;  %v975_v17 = vmul.f32 0.044715, %v6115_v27  ;;  %v1388_v21 = vmul.f32 0.7978846, %v1276_v13  ;;  %v6138_v20 = vpop.f32.mrf.mxu0 }
 0x1f0   :  { %v4298_v19 = vpop.eup %4297  ;;  %v1627_v5 = vadd.f32 1.0, %v4296_v49  ;;  %v1275_v43 = vadd.f32 %v1163_v31, %v7247_v54  ;;  %4313 = vtanh.f32 %v1380_v44  ;;  %v1178_v28 = vmul.f32 %v6012_v25, %v5980_v59  ;;  %v6146_v30 = vpop.f32.mrf.mxu1 }
 0x1f1   :  { %v4300_v14 = vpop.eup %4299  ;;  %v1591_v9 = vadd.f32 1.0, %v4298_v19  ;;  %v1283_v41 = vadd.f32 %v1171_v33, %v5943_v42  ;;  %v1282_v63 = vadd.f32 %v1170_v51, %v5922_v45  ;;  %4315 = vtanh.f32 %v1388_v21 }
 0x1f2   :  { %v1739_v32 = vmul.f32 %v1627_v5, %v6083_v22  ;;  %v1634_v62 = vadd.f32 1.0, %v4300_v14  ;;  %v1387_v29 = vmul.f32 0.7978846, %v1275_v43  ;;  %v1087_v34 = vmul.f32 %v975_v17, %v6115_v27  ;;  %v6150_v22 = vpop.f32.mrf.mxu0 }
 0x1f3   :  { %v4302_v61 = vpop.eup %4301  ;;  %v1703_v37 = vmul.f32 %v1591_v9, %v6092_v46  ;;  %v1395_v15 = vmul.f32 0.7978846, %v1283_v41  ;;  %v1394_v40 = vmul.f32 0.7978846, %v1282_v63  ;;  %v814_v38 = vmul.f32 0.5, %v5820_v57 }
 0x1f4   :  { %4009 = vmatprep.mubr.f32.mxu0 %v1739_v32  ;;  %v1746_v39 = vmul.f32 %v1634_v62, %v6101_v2  ;;  %v1590_v12 = vadd.f32 1.0, %v4302_v61  ;;  %4317 = vtanh.f32 %v1387_v29  ;;  %v1290_v46 = vadd.f32 %v1178_v28, %v5980_v59 }
 0x1f5   :  { %2269 = vmatprep.mubr.f32.mxu1 %v1703_v37  ;;  %4319 = vtanh.f32 %v1395_v15  ;;  %v1177_v25 = vmul.f32 %v5988_v56, %v5949_v6  ;;  %v4304_v13 = vpop.eup %4303  ;;  %v864_v2 = vmul.f32 0.5, %v5771_v36  ;;  %v1185_v31 = vmul.f32 %v6053_v26, %v6017_v18  ;;  %v6162_v51 = vpop.f32.mrf.mxu1 }
 0x1f6   :  { %4010 = vmatmul.mubr.f32.gmra.mxu0 %v1746_v39  ;;  %v1702_v48 = vmul.f32 %v1590_v12, %v806_v53  ;;  %4321 = vtanh.f32 %v1394_v40  ;;  %v1641_v49 = vadd.f32 1.0, %v4304_v13  ;;  %v1402_v44 = vmul.f32 0.7978846, %v1290_v46 }
 0x1f7   :  { %v1289_v33 = vadd.f32 %v1177_v25, %v5949_v6  ;;  %v1184_v57 = vmul.f32 %v6029_v35, %v5994_v3  ;;  %v813_v56 = vmul.f32 0.5, %v7245_v23  ;;  %v821_v53 = vmul.f32 0.5, %v5876_v52  ;;  %v3668_v29 = vpop.f32.mrf.mxu1 }
 0x1f8   :  { %v4306_v19 = vpop.eup %4305  ;;  %2270 = vmatmul.mubr.f32.gmra.mxu1 %v1702_v48  ;;  %v1297_v36 = vadd.f32 %v1185_v31, %v6017_v18  ;;  %v1192_v26 = vmul.f32 %v6080_v16, %v6044_v10  ;;  %v6169_v5 = vpop.f32.mrf.mxu0  ;;  %v1753_v21 = vmul.f32 %v1641_v49, %v857_v47  ;;  %4323 = vtanh.f32 %v1402_v44 }
 0x1f9   :  { %v4308_v17 = vpop.eup %4307  ;;  %v1598_v43 = vadd.f32 1.0, %v4306_v19  ;;  %v1401_v35 = vmul.f32 0.7978846, %v1289_v33  ;;  %v1296_v63 = vadd.f32 %v1184_v57, %v5994_v3  ;;  %v1191_v16 = vmul.f32 %v6061_v50, %v6032_v58 }
 0x1fa   :  { %v4310_v14 = vpop.eup %4309  ;;  %v1648_v9 = vadd.f32 1.0, %v4308_v17  ;;  %v1409_v41 = vmul.f32 0.7978846, %v1297_v36  ;;  %v1304_v23 = vadd.f32 %v1192_v26, %v6044_v10  ;;  %4012 = vmatprep.mubr.f32.mxu0 %v1753_v21  ;;  %v3748_v15 = vpop.f32.mrf.mxu0  ;;  %v1199_v25 = vmul.f32 %v1087_v34, %v6115_v27 }
 0x1fb   :  { %v4312_v52 = vpop.eup %4311  ;;  %v1710_v32 = vmul.f32 %v1598_v43, %v814_v38  ;;  %v1597_v62 = vadd.f32 1.0, %v4310_v14  ;;  %4325 = vtanh.f32 %v1401_v35  ;;  %v1408_v37 = vmul.f32 0.7978846, %v1296_v63 }
 0x1fc   :  { %v1760_v47 = vmul.f32 %v1648_v9, %v864_v2  ;;  %v1605_v61 = vadd.f32 1.0, %v4312_v52  ;;  %4327 = vtanh.f32 %v1409_v41  ;;  %v1416_v28 = vmul.f32 0.7978846, %v1304_v23 }
 0x1fd   :  { %2274 = vmatprep.mubr.f32.mxu1 %v1710_v32  ;;  %v1709_v40 = vmul.f32 %v1597_v62, %v813_v56  ;;  %v1303_v39 = vadd.f32 %v1191_v16, %v6032_v58  ;;  %v4314_v12 = vpop.eup %4313  ;;  %v820_v38 = vmul.f32 0.5, %v5835_v4  ;;  %4329 = vtanh.f32 %v1408_v37 }
 0x1fe   :  { %4013 = vmatmul.mubr.f32.gmra.mxu0 %v1760_v47  ;;  %v1717_v46 = vmul.f32 %v1605_v61, %v821_v53  ;;  %v4316_v50 = vpop.eup %4315  ;;  %v1604_v13 = vadd.f32 1.0, %v4314_v12  ;;  %4331 = vtanh.f32 %v1416_v28  ;;  %v1198_v2 = vmul.f32 %v6124_v55, %v6072_v11 }
 0x1ff   :  { %2275 = vmatmul.mubr.f32.gmra.mxu1 %v1709_v40  ;;  %v1415_v48 = vmul.f32 0.7978846, %v1303_v39  ;;  %v3670_v31 = vpop.f32.mrf.mxu1  ;;  %v828_v49 = vmul.f32 0.5, %v5892_v24  ;;  %v1612_v44 = vadd.f32 1.0, %v4316_v50  ;;  %v1311_v33 = vadd.f32 %v1199_v25, %v6115_v27 }
 0x200   :  { %2279 = vmatprep.mubr.f32.mxu1 %v1717_v46  ;;  %v3750_v57 = vpop.f32.mrf.mxu0  ;;  %v1716_v19 = vmul.f32 %v1604_v13, %v820_v38  ;;  %v1310_v34 = vadd.f32 %v1198_v2, %v6072_v11  ;;  %v827_v36 = vmul.f32 0.5, %v7247_v54  ;;  %v835_v21 = vmul.f32 0.5, %v5943_v42  ;;  %v6189_v54 = vld [vmem:[%s6988_s4] ss:$0 sm:$0xff] }
 0x201   :  { %v4318_v4 = vpop.eup %4317  ;;  %4333 = vtanh.f32 %v1415_v48  ;;  %v1724_v53 = vmul.f32 %v1612_v44, %v828_v49  ;;  %v1423_v17 = vmul.f32 0.7978846, %v1311_v33  ;;  %v3671_v35 = vpop.f32.mrf.mxu1  ;;  %v3669_v23 = vadd.f32 %v3668_v29, %v6162_v51 }
 0x202   :  { %v4320_v56 = vpop.eup %4319  ;;  %v1611_v26 = vadd.f32 1.0, %v4318_v4  ;;  %v1422_v43 = vmul.f32 0.7978846, %v1310_v34  ;;  %v3751_v14 = vpop.f32.mrf.mxu0  ;;  %v3749_v42 = vadd.f32 %v3748_v15, %v6169_v5  ;;  %v3672_v32 = vadd.f32 %v3671_v35, %v3670_v31 }
 0x203   :  { %v4322_v55 = vpop.eup %4321  ;;  %2280 = vmatmul.mubr.f32.gmra.mxu1 %v1716_v19  ;;  %v1619_v24 = vadd.f32 1.0, %v4320_v56  ;;  %4335 = vtanh.f32 %v1423_v17  ;;  %v3752_v62 = vadd.f32 %v3751_v14, %v3750_v57  ;;  %v834_v16 = vmul.f32 0.5, %v5922_v45 }
 0x204   :  { %2284 = vmatprep.mubr.f32.mxu1 %v1724_v53  ;;  %v1723_v9 = vmul.f32 %v1611_v26, %v827_v36  ;;  %v1618_v63 = vadd.f32 1.0, %v4322_v55  ;;  %4337 = vtanh.f32 %v1422_v43  ;;  %v842_v47 = vmul.f32 0.5, %v5980_v59 }
 0x205   :  { %v1731_v41 = vmul.f32 %v1619_v24, %v835_v21  ;;  %v4324_v52 = vpop.eup %4323  ;;  %v1957_v37 = vadd.f32 %v3669_v23, %v6189_v54  ;;  %v1962_v51 = vadd.f32 %v3672_v32, %v6189_v54  ;;  %v841_v15 = vmul.f32 0.5, %v5949_v6 }
 0x206   :  { %v1626_v61 = vadd.f32 1.0, %v4324_v52  ;;  %v1730_v39 = vmul.f32 %v1618_v63, %v834_v16  ;;  %v849_v45 = vmul.f32 0.5, %v6017_v18  ;;  %v856_v18 = vmul.f32 0.5, %v6044_v10 }
 0x207   :  { %2285 = vmatmul.mubr.f32.gmra.mxu1 %v1723_v9  ;;  %v6196_v5 = vadd.f32 %v3749_v42, %v1957_v37  ;;  %v6200_v59 = vadd.f32 %v3752_v62, %v1962_v51  ;;  %v848_v34 = vmul.f32 0.5, %v5994_v3  ;;  %v863_v21 = vmul.f32 0.5, %v6115_v27 }
 0x208   :  { %v4326_v40 = vpop.eup %4325  ;;  %2289 = vmatprep.mubr.f32.mxu1 %v1731_v41  ;;  %v1738_v12 = vmul.f32 %v1626_v61, %v842_v47  ;;  %v855_v35 = vmul.f32 0.5, %v6032_v58  ;;  %v862_v23 = vmul.f32 0.5, %v6072_v11 }
 0x209   :  { %v3673_v29 = vpop.f32.mrf.mxu1  ;;  %v4328_v28 = vpop.eup %4327  ;;  %v1625_v46 = vadd.f32 1.0, %v4326_v40 }
 0x20a   :  { %v1633_v38 = vadd.f32 1.0, %v4328_v28  ;;  %v3753_v25 = vpop.f32.mrf.mxu0  ;;  %v4330_v13 = vpop.eup %4329 }
 0x20b   :  { %v3674_v50 = vpop.f32.mrf.mxu1  ;;  %2290 = vmatmul.mubr.f32.gmra.mxu1 %v1730_v39  ;;  %v4332_v2 = vpop.eup %4331  ;;  %v1737_v31 = vmul.f32 %v1625_v46, %v841_v15  ;;  %v1632_v33 = vadd.f32 1.0, %v4330_v13 }
 0x20c   :  { %v3675_v48 = vadd.f32 %v3674_v50, %v3673_v29  ;;  %2294 = vmatprep.mubr.f32.mxu1 %v1738_v12  ;;  %v1745_v49 = vmul.f32 %v1633_v38, %v849_v45  ;;  %v3754_v44 = vpop.f32.mrf.mxu0  ;;  %v1640_v57 = vadd.f32 1.0, %v4332_v2 }
 0x20d   :  { %v3755_v6 = vadd.f32 %v3754_v44, %v3753_v25  ;;  %v1744_v26 = vmul.f32 %v1632_v33, %v848_v34 }
 0x20e   :  { %v1967_v4 = vadd.f32 %v3675_v48, %v6189_v54  ;;  %v4334_v19 = vpop.eup %4333  ;;  %v1752_v53 = vmul.f32 %v1640_v57, %v856_v18 }
 0x20f   :  { %2295 = vmatmul.mubr.f32.gmra.mxu1 %v1737_v31  ;;  %v1639_v17 = vadd.f32 1.0, %v4334_v19 }
 0x210   :  { %v6205_v56 = vadd.f32 %v3755_v6, %v1967_v4  ;;  %2299 = vmatprep.mubr.f32.mxu1 %v1745_v49  ;;  %v4336_v36 = vpop.eup %4335 }
 0x211   :  { %v4338_v55 = vpop.eup %4337  ;;  %v1647_v24 = vadd.f32 1.0, %v4336_v36  ;;  %v1751_v9 = vmul.f32 %v1639_v17, %v855_v35  ;;  %v2620_v36 = vld [vmem:[%s6989_s5] sm:$0x7f] }
 0x212   :  { %v3676_v43 = vpop.f32.mrf.mxu1  ;;  %v1646_v3 = vadd.f32 1.0, %v4338_v55  ;;  %4041 = vmatprep.subr.msk.mxu1 %vm2671_vm1, %v2620_v36 }
 0x213   :  { %2300 = vmatmul.mubr.f32.gmra.mxu1 %v1744_v26  ;;  %v1759_v10 = vmul.f32 %v1647_v24, %v863_v21 }
 0x214   :  { %2304 = vmatprep.mubr.f32.mxu1 %v1752_v53  ;;  %v3677_v14 = vpop.f32.mrf.mxu1  ;;  %v1758_v32 = vmul.f32 %v1646_v3, %v862_v23  ;;  %4042 = vmatpush3.msk.msra.mxu1 %vm2671_vm1, %v2620_v36  ;;  %v3743_v36 = vadd.f32 %v6119_v8, %v6106_v7  ;;  %v3746_v7 = vadd.f32 %v6150_v22, %v6138_v20 }
 0x215   :  { %v3756_v41 = vpop.f32.mrf.mxu0  ;;  %v3678_v63 = vadd.f32 %v3677_v14, %v3676_v43 }
 0x217   :  { %2305 = vmatmul.mubr.f32.gmra.mxu1 %v1751_v9  ;;  %v1972_v52 = vadd.f32 %v3678_v63, %v6189_v54  ;;  %v3757_v42 = vpop.f32.mrf.mxu0 }
 0x218   :  { %2309 = vmatprep.mubr.f32.mxu1 %v1759_v10  ;;  %v3758_v27 = vadd.f32 %v3757_v42, %v3756_v41 }
 0x21a   :  { %v6211_v62 = vadd.f32 %v3758_v27, %v1972_v52  ;;  %v2621_v27 = vld [vmem:[%s6990_s6] sm:$0x7f] }
 0x21b   :  { %2310 = vmatmul.mubr.f32.gmra.mxu1 %v1758_v32  ;;  %4015 = vmatprep.subr.msk.mxu0 %vm2671_vm1, %v2621_v27 }
 0x21c   :  { %4016 = vmatpush3.msk.msra.mxu0 %vm2671_vm1, %v2621_v27 }
 0x21d   :  { %v3679_v58 = vpop.f32.mrf.mxu1 }
 0x21f   :  { %v3680_v16 = vpop.f32.mrf.mxu1 }
 0x220   :  { %v3759_v47 = vpop.f32.mrf.mxu0  ;;  %v3681_v61 = vadd.f32 %v3680_v16, %v3679_v58 }
 0x222   :  { %v1977_v37 = vadd.f32 %v3681_v61, %v6189_v54  ;;  %v3760_v40 = vpop.f32.mrf.mxu0 }
 0x223   :  { %v3761_v51 = vadd.f32 %v3760_v40, %v3759_v47 }
 0x225   :  { %v6214_v29 = vadd.f32 %v3761_v51, %v1977_v37 }
 0x228   :  { %v3682_v11 = vpop.f32.mrf.mxu1 }
 0x229   :  { %v3762_v28 = vpop.f32.mrf.mxu0 }
 0x22a   :  { %v3683_v39 = vpop.f32.mrf.mxu1 }
 0x22b   :  { %v3684_v12 = vadd.f32 %v3683_v39, %v3682_v11  ;;  %v3763_v46 = vpop.f32.mrf.mxu0 }
 0x22c   :  { %v3764_v15 = vadd.f32 %v3763_v46, %v3762_v28 }
 0x22d   :  { %v1982_v45 = vadd.f32 %v3684_v12, %v6189_v54 }
 0x22f   :  { %v6217_v38 = vadd.f32 %v3764_v15, %v1982_v45 }
 0x233   :  { %v3685_v25 = vpop.f32.mrf.mxu1 }
 0x234   :  { %v3765_v50 = vpop.f32.mrf.mxu0 }
 0x235   :  { %v3686_v13 = vpop.f32.mrf.mxu1 }
 0x236   :  { %v3687_v48 = vadd.f32 %v3686_v13, %v3685_v25  ;;  %v3766_v2 = vpop.f32.mrf.mxu0 }
 0x237   :  { %v3767_v31 = vadd.f32 %v3766_v2, %v3765_v50 }
 0x238   :  { %v1987_v49 = vadd.f32 %v3687_v48, %v6189_v54 }
 0x23a   :  { %v6220_v44 = vadd.f32 %v3767_v31, %v1987_v49 }
 0x23c   :  { %v3688_v33 = vpop.f32.mrf.mxu1 }
 0x23e   :  { %v3689_v57 = vpop.f32.mrf.mxu1 }
 0x23f   :  { %v3690_v4 = vadd.f32 %v3689_v57, %v3688_v33  ;;  %v3768_v6 = vpop.f32.mrf.mxu0 }
 0x241   :  { %v1992_v19 = vadd.f32 %v3690_v4, %v6189_v54  ;;  %v3769_v18 = vpop.f32.mrf.mxu0  ;;  %v3663_v4 = vadd.f32 %v6112_v60, %v6098_v0 }
 0x242   :  { %v3770_v34 = vadd.f32 %v3769_v18, %v3768_v6 }
 0x244   :  { %v6223_v53 = vadd.f32 %v3770_v34, %v1992_v19  ;;  %v1947_v34 = vadd.f32 %v3663_v4, %v6189_v54 }
 0x249   :  { %v3691_v26 = vpop.f32.mrf.mxu1 }
 0x24a   :  { %v3771_v17 = vpop.f32.mrf.mxu0 }
 0x24b   :  { %v3692_v55 = vpop.f32.mrf.mxu1 }
 0x24c   :  { %v3693_v21 = vadd.f32 %v3692_v55, %v3691_v26  ;;  %v3772_v24 = vpop.f32.mrf.mxu0 }
 0x24d   :  { %v3773_v43 = vadd.f32 %v3772_v24, %v3771_v17 }
 0x24e   :  { %v1997_v35 = vadd.f32 %v3693_v21, %v6189_v54 }
 0x250   :  { %v6231_v10 = vadd.f32 %v3773_v43, %v1997_v35  ;;  %v3666_v43 = vadd.f32 %v6146_v30, %v6134_v1 }
 0x252   :  { %v3694_v14 = vpop.f32.mrf.mxu1 }
 0x253   :  { %v3774_v9 = vpop.f32.mrf.mxu0 }
 0x254   :  { %v3695_v3 = vpop.f32.mrf.mxu1 }
 0x255   :  { %v3696_v41 = vadd.f32 %v3695_v3, %v3694_v14  ;;  %v3775_v63 = vpop.f32.mrf.mxu0  ;;  %v2092_v14 = vadd.f32 %v3743_v36, %v1947_v34  ;;  %v1952_v3 = vadd.f32 %v3666_v43, %v6189_v54 }
 0x256   :  { %v3776_v23 = vadd.f32 %v3775_v63, %v3774_v9 }
 0x257   :  { %v2002_v52 = vadd.f32 %v3696_v41, %v6189_v54  ;;  %v2097_v27 = vadd.f32 %v3746_v7, %v1952_v3 }
 0x259   :  { %v6234_v42 = vadd.f32 %v3776_v23, %v2002_v52 }
 0x25b   :  { %v3697_v32 = vpop.f32.mrf.mxu1 }
 0x25c   :  { %v3777_v58 = vpop.f32.mrf.mxu0 }
 0x25d   :  { %v3698_v16 = vpop.f32.mrf.mxu1 }
 0x25e   :  { %v3699_v47 = vadd.f32 %v3698_v16, %v3697_v32  ;;  %v3778_v61 = vpop.f32.mrf.mxu0 }
 0x25f   :  { %v3779_v37 = vadd.f32 %v3778_v61, %v3777_v58 }
 0x260   :  { %v2007_v40 = vadd.f32 %v3699_v47, %v6189_v54 }
 0x262   :  { %v6242_v51 = vadd.f32 %v3779_v37, %v2007_v40 }
 0x265   :  { %v3700_v11 = vpop.f32.mrf.mxu1 }
 0x266   :  { %v3780_v28 = vpop.f32.mrf.mxu0 }
 0x267   :  { %v3701_v39 = vpop.f32.mrf.mxu1 }
 0x268   :  { %v3702_v12 = vadd.f32 %v3701_v39, %v3700_v11  ;;  %v3781_v46 = vpop.f32.mrf.mxu0 }
 0x269   :  { %v3782_v15 = vadd.f32 %v3781_v46, %v3780_v28 }
 0x26a   :  { %v2012_v45 = vadd.f32 %v3702_v12, %v6189_v54 }
 0x26c   :  { %v6245_v25 = vadd.f32 %v3782_v15, %v2012_v45 }
 0x271   :  { %v3703_v50 = vpop.f32.mrf.mxu1 }
 0x272   :  { %v3783_v13 = vpop.f32.mrf.mxu0 }
 0x273   :  { %v3704_v48 = vpop.f32.mrf.mxu1 }
 0x274   :  { %v3705_v2 = vadd.f32 %v3704_v48, %v3703_v50  ;;  %v3784_v31 = vpop.f32.mrf.mxu0 }
 0x275   :  { %v3785_v49 = vadd.f32 %v3784_v31, %v3783_v13 }
 0x276   :  { %v2017_v33 = vadd.f32 %v3705_v2, %v6189_v54 }
 0x278   :  { %v6248_v57 = vadd.f32 %v3785_v49, %v2017_v33 }
 0x279   :  { %v3706_v6 = vpop.f32.mrf.mxu1 }
 0x27b   :  { %v3707_v18 = vpop.f32.mrf.mxu1 }
 0x27c   :  { %v3786_v19 = vpop.f32.mrf.mxu0  ;;  %v3708_v26 = vadd.f32 %v3707_v18, %v3706_v6 }
 0x27e   :  { %v3787_v17 = vpop.f32.mrf.mxu0  ;;  %v3821_v55 = vpop.f32.mrf.mxu1  ;;  %v2022_v21 = vadd.f32 %v3708_v26, %v6189_v54 }
 0x27f   :  { %v3788_v24 = vadd.f32 %v3787_v17, %v3786_v19 }
 0x280   :  { %v3822_v35 = vpop.f32.mrf.mxu1 }
 0x281   :  { %v6258_v0 = vadd.f32 %v3788_v24, %v2022_v21  ;;  %v3823_v60 = vadd.f32 %v3822_v35, %v3821_v55 }
 0x283   :  { %v2237_v9 = vadd.f32 %v3823_v60, %v2092_v14 }
 0x284   :  { %v3993_v41 = vpop.f32.mrf.mxu0 }
 0x285   :  { %v3824_v63 = vpop.f32.mrf.mxu1 }
 0x286   :  { %v2381_v8 = vpop.f32.mrf.mxu0 }
 0x287   :  { %v6263_v23 = vadd.f32 %v2381_v8, %v2237_v9  ;;  %v3825_v52 = vpop.f32.mrf.mxu1 }
 0x288   :  { %v3826_v32 = vadd.f32 %v3825_v52, %v3824_v63 }
 0x289   :  { %v2476_v1 = vand.u32 2147483647, %v6263_v23 }
 0x28a   :  { %v2242_v30 = vadd.f32 %v3826_v32, %v2097_v27 }
 0x28b   :  { %v2492_v58 = vsub.f32 0.0, %v2476_v1 }
 0x28c   :  { %v6266_v16 = vadd.f32 %v3993_v41, %v2242_v30  ;;  %v3996_v37 = vpop.f32.mrf.mxu0 }
 0x28d   :  { %v2508_v47 = vmul.f32 1.442695, %v2492_v58  ;;  %v3827_v61 = vpop.f32.mrf.mxu1 }
 0x28e   :  { %v2477_v54 = vand.u32 2147483647, %v6266_v16  ;;  %v2391_v39 = vpop.f32.mrf.mxu0 }
 0x28f   :  { %4339 = vpow2.f32 %v2508_v47  ;;  %v3828_v40 = vpop.f32.mrf.mxu1 }
 0x290   :  { %v2493_v20 = vsub.f32 0.0, %v2477_v54  ;;  %v3829_v22 = vadd.f32 %v3828_v40, %v3827_v61 }
 0x292   :  { %v2510_v11 = vmul.f32 1.442695, %v2493_v20  ;;  %v2247_v28 = vadd.f32 %v3829_v22, %v6196_v5 }
 0x294   :  { %4341 = vpow2.f32 %v2510_v11  ;;  %v6270_v12 = vadd.f32 %v2391_v39, %v2247_v28 }
 0x295   :  { %v3999_v6 = vpop.f32.mrf.mxu0 }
 0x296   :  { %v2478_v46 = vand.u32 2147483647, %v6270_v12  ;;  %v3830_v15 = vpop.f32.mrf.mxu1 }
 0x298   :  { %v2494_v45 = vsub.f32 0.0, %v2478_v46  ;;  %v3831_v50 = vpop.f32.mrf.mxu1 }
 0x299   :  { %v3832_v13 = vadd.f32 %v3831_v50, %v3830_v15 }
 0x29a   :  { %v2512_v48 = vmul.f32 1.442695, %v2494_v45 }
 0x29b   :  { %v2252_v2 = vadd.f32 %v3832_v13, %v6200_v59  ;;  %v2401_v59 = vpop.f32.mrf.mxu0 }
 0x29c   :  { %v4340_v31 = vpop.eup %4339  ;;  %4343 = vpow2.f32 %v2512_v48 }
 0x29d   :  { %v2540_v49 = vadd.f32 1.0, %v4340_v31  ;;  %v6274_v33 = vadd.f32 %v3996_v37, %v2252_v2  ;;  %v4002_v47 = vpop.f32.mrf.mxu0  ;;  %v2461_v37 = vmin.f32 %v6266_v16, 0.0  ;;  %v2462_v2 = vmin.f32 %v6270_v12, 0.0 }
 0x29e   :  { %v3833_v4 = vpop.f32.mrf.mxu1 }
 0x29f   :  { %4345 = vlog2.f32 %v2540_v49  ;;  %v2479_v5 = vand.u32 2147483647, %v6274_v33  ;;  %v2411_v46 = vpop.f32.mrf.mxu0 }
 0x2a0   :  { %v3834_v19 = vpop.f32.mrf.mxu1 }
 0x2a1   :  { %v4342_v18 = vpop.eup %4341  ;;  %v2495_v34 = vsub.f32 0.0, %v2479_v5  ;;  %v3835_v36 = vadd.f32 %v3834_v19, %v3833_v4 }
 0x2a2   :  { %v2541_v26 = vadd.f32 1.0, %v4342_v18 }
 0x2a3   :  { %v2514_v17 = vmul.f32 1.442695, %v2495_v34  ;;  %v2257_v55 = vadd.f32 %v3835_v36, %v6205_v56  ;;  %v2460_v56 = vmin.f32 %v6263_v23, 0.0 }
 0x2a4   :  { %4347 = vlog2.f32 %v2541_v26 }
 0x2a5   :  { %4349 = vpow2.f32 %v2514_v17  ;;  %v6278_v21 = vadd.f32 %v2401_v59, %v2257_v55  ;;  %v4005_v26 = vpop.f32.mrf.mxu0 }
 0x2a6   :  { %v3836_v24 = vpop.f32.mrf.mxu1 }
 0x2a7   :  { %v2480_v43 = vand.u32 2147483647, %v6278_v21 }
 0x2a8   :  { %v3837_v35 = vpop.f32.mrf.mxu1 }
 0x2a9   :  { %v4344_v14 = vpop.eup %4343  ;;  %v2496_v60 = vsub.f32 0.0, %v2480_v43  ;;  %v3838_v9 = vadd.f32 %v3837_v35, %v3836_v24 }
 0x2aa   :  { %v2542_v3 = vadd.f32 1.0, %v4344_v14 }
 0x2ab   :  { %v2516_v41 = vmul.f32 1.442695, %v2496_v60  ;;  %v2262_v63 = vadd.f32 %v3838_v9, %v6211_v62 }
 0x2ac   :  { %v4346_v7 = vpop.eup %4345  ;;  %4351 = vlog2.f32 %v2542_v3 }
 0x2ad   :  { %v2557_v8 = vmul.f32 0.6931472, %v4346_v7  ;;  %4353 = vpow2.f32 %v2516_v41  ;;  %v6283_v52 = vadd.f32 %v3999_v6, %v2262_v63  ;;  %v2421_v41 = vpop.f32.mrf.mxu0 }
 0x2af   :  { %v2588_v27 = vsub.f32 %v2460_v56, %v2557_v8  ;;  %v2481_v32 = vand.u32 2147483647, %v6283_v52  ;;  %v3839_v1 = vpop.f32.mrf.mxu1 }
 0x2b1   :  { %v4348_v30 = vpop.eup %4347  ;;  %v2604_v58 = vsub.f32 %v2588_v27, %v6263_v23  ;;  %v2497_v61 = vsub.f32 0.0, %v2481_v32  ;;  %v3840_v54 = vpop.f32.mrf.mxu1  ;;  %4043 = vmatprep.mubr.msk.f32.mxu1 %vm2622_vm2, %v2588_v27 }
 0x2b2   :  { %v4350_v62 = vpop.eup %4349  ;;  %v2559_v40 = vmul.f32 0.6931472, %v4348_v30  ;;  %v3841_v20 = vadd.f32 %v3840_v54, %v3839_v1 }
 0x2b3   :  { %v2543_v22 = vadd.f32 1.0, %v4350_v62  ;;  %v2518_v11 = vmul.f32 1.442695, %v2497_v61  ;;  %4017 = vmatprep.mubr.msk.f32.mxu0 %vm2622_vm2, %v2604_v58  ;;  %v4008_v58 = vpop.f32.mrf.mxu0 }
 0x2b4   :  { %v2589_v28 = vsub.f32 %v2461_v37, %v2559_v40  ;;  %v2267_v39 = vadd.f32 %v3841_v20, %v6214_v29 }
 0x2b5   :  { %4355 = vlog2.f32 %v2543_v22 }
 0x2b6   :  { %v2605_v23 = vsub.f32 %v2589_v28, %v6266_v16  ;;  %4357 = vpow2.f32 %v2518_v11  ;;  %v6292_v15 = vadd.f32 %v2411_v46, %v2267_v39  ;;  %4044 = vmatmul.mubr.msk.f32.vlgmr.msra.gmra.mxu1 %vm2622_vm2, %v2589_v28 }
 0x2b8   :  { %v2482_v45 = vand.u32 2147483647, %v6292_v15  ;;  %v3842_v50 = vpop.f32.mrf.mxu1  ;;  %4018 = vmatmul.mubr.msk.f32.vlgmr.msra.gmra.mxu0 %vm2622_vm2, %v2605_v23 }
 0x2b9   :  { %v4352_v13 = vpop.eup %4351 }
 0x2ba   :  { %v4354_v48 = vpop.eup %4353  ;;  %v2498_v31 = vsub.f32 0.0, %v2482_v45  ;;  %v3843_v29 = vpop.f32.mrf.mxu1  ;;  %v2561_v49 = vmul.f32 0.6931472, %v4352_v13 }
 0x2bb   :  { %v3844_v4 = vadd.f32 %v3843_v29, %v3842_v50  ;;  %v2544_v5 = vadd.f32 1.0, %v4354_v48 }
 0x2bc   :  { %v2520_v16 = vmul.f32 1.442695, %v2498_v31  ;;  %v2590_v6 = vsub.f32 %v2462_v2, %v2561_v49 }
 0x2bd   :  { %v2272_v19 = vadd.f32 %v3844_v4, %v6217_v38  ;;  %4359 = vlog2.f32 %v2544_v5  ;;  %v2463_v38 = vmin.f32 %v6274_v33, 0.0 }
 0x2be   :  { %4361 = vpow2.f32 %v2520_v16  ;;  %4046 = vmatprep.mubr.msk.f32.mxu1 %vm2622_vm2, %v2590_v6  ;;  %v2606_v18 = vsub.f32 %v2590_v6, %v6270_v12 }
 0x2bf   :  { %v6301_v34 = vadd.f32 %v4002_v47, %v2272_v19  ;;  %v3845_v36 = vpop.f32.mrf.mxu1 }
 0x2c0   :  { %4020 = vmatprep.mubr.msk.f32.mxu0 %vm2622_vm2, %v2606_v18 }
 0x2c1   :  { %v2483_v17 = vand.u32 2147483647, %v6301_v34  ;;  %v3846_v55 = vpop.f32.mrf.mxu1 }
 0x2c2   :  { %v4356_v59 = vpop.eup %4355  ;;  %v3847_v24 = vadd.f32 %v3846_v55, %v3845_v36 }
 0x2c3   :  { %v4358_v43 = vpop.eup %4357  ;;  %v2563_v35 = vmul.f32 0.6931472, %v4356_v59  ;;  %v2499_v14 = vsub.f32 0.0, %v2483_v17  ;;  %v3848_v60 = vpop.f32.mrf.mxu1 }
 0x2c4   :  { %v2545_v9 = vadd.f32 1.0, %v4358_v43  ;;  %v2277_v12 = vadd.f32 %v3847_v24, %v6220_v44 }
 0x2c5   :  { %v2591_v3 = vsub.f32 %v2463_v38, %v2563_v35  ;;  %v2522_v63 = vmul.f32 1.442695, %v2499_v14  ;;  %v3849_v7 = vpop.f32.mrf.mxu1 }
 0x2c6   :  { %4363 = vlog2.f32 %v2545_v9  ;;  %v6307_v56 = vadd.f32 %v2421_v41, %v2277_v12  ;;  %v3850_v8 = vadd.f32 %v3849_v7, %v3848_v60 }
 0x2c7   :  { %v2607_v27 = vsub.f32 %v2591_v3, %v6274_v33  ;;  %4365 = vpow2.f32 %v2522_v63  ;;  %v3851_v32 = vpop.f32.mrf.mxu1  ;;  %4047 = vmatmul.mubr.msk.f32.gmra.mxu1 %vm2622_vm2, %v2591_v3  ;;  %v2464_v33 = vmin.f32 %v6278_v21, 0.0 }
 0x2c8   :  { %v2484_v1 = vand.u32 2147483647, %v6307_v56  ;;  %v2282_v30 = vadd.f32 %v3850_v8, %v6223_v53  ;;  %v2431_v53 = vpop.f32.mrf.mxu0 }
 0x2c9   :  { %v3852_v44 = vpop.f32.mrf.mxu1  ;;  %4021 = vmatmul.mubr.msk.f32.gmra.mxu0 %vm2622_vm2, %v2607_v27 }
 0x2ca   :  { %v4360_v47 = vpop.eup %4359  ;;  %v2500_v61 = vsub.f32 0.0, %v2484_v1  ;;  %v6314_v54 = vadd.f32 %v4005_v26, %v2282_v30  ;;  %v3853_v62 = vadd.f32 %v3852_v44, %v3851_v32  ;;  %v4011_v49 = vpop.f32.mrf.mxu0 }
 0x2cb   :  { %v4362_v37 = vpop.eup %4361  ;;  %v3854_v40 = vpop.f32.mrf.mxu1  ;;  %v2565_v20 = vmul.f32 0.6931472, %v4360_v47  ;;  %v2466_v47 = vmin.f32 %v6292_v15, 0.0 }
 0x2cc   :  { %v2524_v22 = vmul.f32 1.442695, %v2500_v61  ;;  %v2485_v11 = vand.u32 2147483647, %v6314_v54  ;;  %v2287_v28 = vadd.f32 %v3853_v62, %v6231_v10  ;;  %v2546_v23 = vadd.f32 1.0, %v4362_v37  ;;  %v2441_v59 = vpop.f32.mrf.mxu0 }
 0x2cd   :  { %v3855_v39 = vpop.f32.mrf.mxu1  ;;  %v2592_v46 = vsub.f32 %v2464_v33, %v2565_v20 }
 0x2ce   :  { %4367 = vpow2.f32 %v2524_v22  ;;  %v2501_v45 = vsub.f32 0.0, %v2485_v11  ;;  %v6319_v50 = vadd.f32 %v2431_v53, %v2287_v28  ;;  %v3856_v13 = vadd.f32 %v3855_v39, %v3854_v40 }
 0x2cf   :  { %v3857_v48 = vpop.f32.mrf.mxu1  ;;  %4049 = vmatprep.mubr.msk.f32.mxu1 %vm2622_vm2, %v2592_v46  ;;  %v2608_v2 = vsub.f32 %v2592_v46, %v6278_v21  ;;  %4369 = vlog2.f32 %v2546_v23  ;;  %v2465_v21 = vmin.f32 %v6283_v52, 0.0 }
 0x2d0   :  { %v2526_v31 = vmul.f32 1.442695, %v2501_v45  ;;  %v2486_v29 = vand.u32 2147483647, %v6319_v50  ;;  %v2292_v10 = vadd.f32 %v3856_v13, %v6234_v42 }
 0x2d1   :  { %v3858_v4 = vpop.f32.mrf.mxu1  ;;  %4023 = vmatprep.mubr.msk.f32.mxu0 %vm2622_vm2, %v2608_v2 }
 0x2d2   :  { %4371 = vpow2.f32 %v2526_v31  ;;  %v2502_v5 = vsub.f32 0.0, %v2486_v29  ;;  %v6326_v16 = vadd.f32 %v4008_v58, %v2292_v10  ;;  %v3859_v6 = vadd.f32 %v3858_v4, %v3857_v48 }
 0x2d3   :  { %v4364_v19 = vpop.eup %4363  ;;  %v3860_v18 = vpop.f32.mrf.mxu1  ;;  %v2467_v10 = vmin.f32 %v6301_v34, 0.0 }
 0x2d4   :  { %v4366_v36 = vpop.eup %4365  ;;  %v2567_v26 = vmul.f32 0.6931472, %v4364_v19  ;;  %v2528_v17 = vmul.f32 1.442695, %v2502_v5  ;;  %v2297_v55 = vadd.f32 %v3859_v6, %v6242_v51  ;;  %v2487_v24 = vand.u32 2147483647, %v6326_v16  ;;  %v4014_v51 = vpop.f32.mrf.mxu0 }
 0x2d5   :  { %v2547_v42 = vadd.f32 1.0, %v4366_v36  ;;  %v3861_v43 = vpop.f32.mrf.mxu1 }
 0x2d6   :  { %v2593_v38 = vsub.f32 %v2465_v21, %v2567_v26  ;;  %4373 = vpow2.f32 %v2528_v17  ;;  %v6331_v35 = vadd.f32 %v2441_v59, %v2297_v55  ;;  %v3862_v14 = vadd.f32 %v3861_v43, %v3860_v18  ;;  %v2451_v61 = vpop.f32.mrf.mxu0 }
 0x2d7   :  { %4375 = vlog2.f32 %v2547_v42  ;;  %v2503_v60 = vsub.f32 0.0, %v2487_v24  ;;  %v3863_v9 = vpop.f32.mrf.mxu1  ;;  %v2468_v17 = vmin.f32 %v6307_v56, 0.0 }
 0x2d8   :  { %v2609_v12 = vsub.f32 %v2593_v38, %v6283_v52  ;;  %v2488_v3 = vand.u32 2147483647, %v6331_v35  ;;  %v2302_v41 = vadd.f32 %v3862_v14, %v6245_v25  ;;  %4050 = vmatmul.mubr.msk.f32.gmra.mxu1 %vm2622_vm2, %v2593_v38 }
 0x2d9   :  { %v2530_v63 = vmul.f32 1.442695, %v2503_v60  ;;  %v3864_v7 = vpop.f32.mrf.mxu1 }
 0x2da   :  { %v2504_v8 = vsub.f32 0.0, %v2488_v3  ;;  %v6337_v27 = vadd.f32 %v4011_v49, %v2302_v41  ;;  %v3865_v32 = vadd.f32 %v3864_v7, %v3863_v9  ;;  %4024 = vmatmul.mubr.msk.f32.gmra.mxu0 %vm2622_vm2, %v2609_v12 }
 0x2db   :  { %v4368_v1 = vpop.eup %4367  ;;  %4377 = vpow2.f32 %v2530_v63  ;;  %v3866_v30 = vpop.f32.mrf.mxu1 }
 0x2dc   :  { %v4370_v58 = vpop.eup %4369  ;;  %v2532_v52 = vmul.f32 1.442695, %v2504_v8  ;;  %v2489_v44 = vand.u32 2147483647, %v6337_v27  ;;  %v2307_v25 = vadd.f32 %v3865_v32, %v6248_v57  ;;  %v2548_v33 = vadd.f32 1.0, %v4368_v1 }
 0x2dd   :  { %v3867_v62 = vpop.f32.mrf.mxu1  ;;  %v2569_v37 = vmul.f32 0.6931472, %v4370_v58  ;;  %v2471_v32 = vmin.f32 %v6326_v16, 0.0 }
 0x2de   :  { %4379 = vpow2.f32 %v2532_v52  ;;  %v2505_v40 = vsub.f32 0.0, %v2489_v44  ;;  %v6343_v20 = vadd.f32 %v2451_v61, %v2307_v25  ;;  %v3868_v22 = vadd.f32 %v3867_v62, %v3866_v30 }
 0x2df   :  { %v4372_v11 = vpop.eup %4371  ;;  %v2594_v28 = vsub.f32 %v2466_v47, %v2569_v37  ;;  %4381 = vlog2.f32 %v2548_v33  ;;  %v2472_v44 = vmin.f32 %v6331_v35, 0.0  ;;  %v2473_v37 = vmin.f32 %v6337_v27, 0.0 }
 0x2e0   :  { %v2549_v53 = vadd.f32 1.0, %v4372_v11  ;;  %v2534_v39 = vmul.f32 1.442695, %v2505_v40  ;;  %v2490_v46 = vand.u32 2147483647, %v6343_v20  ;;  %v2312_v57 = vadd.f32 %v3868_v22, %v6258_v0 }
 0x2e1   :  { %4052 = vmatprep.mubr.msk.f32.mxu1 %vm2622_vm2, %v2594_v28  ;;  %v2610_v23 = vsub.f32 %v2594_v28, %v6292_v15  ;;  %v2474_v11 = vmin.f32 %v6343_v20, 0.0 }
 0x2e2   :  { %4383 = vlog2.f32 %v2549_v53  ;;  %v2506_v45 = vsub.f32 0.0, %v2490_v46  ;;  %v6349_v48 = vadd.f32 %v4014_v51, %v2312_v57  ;;  %v2470_v51 = vmin.f32 %v6319_v50, 0.0 }
 0x2e3   :  { %v4374_v13 = vpop.eup %4373  ;;  %4385 = vpow2.f32 %v2534_v39  ;;  %4026 = vmatprep.mubr.msk.f32.mxu0 %vm2622_vm2, %v2610_v23 }
 0x2e4   :  { %v4376_v2 = vpop.eup %4375  ;;  %v2536_v31 = vmul.f32 1.442695, %v2506_v45  ;;  %v2550_v29 = vadd.f32 1.0, %v4374_v13  ;;  %v2491_v0 = vand.u32 2147483647, %v6349_v48  ;;  %v2475_v46 = vmin.f32 %v6349_v48, 0.0 }
 0x2e5   :  { %v2571_v49 = vmul.f32 0.6931472, %v4376_v2 }
 0x2e6   :  { %4387 = vpow2.f32 %v2536_v31  ;;  %v2507_v5 = vsub.f32 0.0, %v2491_v0 }
 0x2e7   :  { %v2595_v4 = vsub.f32 %v2467_v10, %v2571_v49  ;;  %4389 = vlog2.f32 %v2550_v29 }
 0x2e8   :  { %v4378_v15 = vpop.eup %4377  ;;  %v2538_v18 = vmul.f32 1.442695, %v2507_v5 }
 0x2e9   :  { %v2611_v6 = vsub.f32 %v2595_v4, %v6301_v34  ;;  %v2551_v19 = vadd.f32 1.0, %v4378_v15  ;;  %4053 = vmatmul.mubr.msk.f32.gmra.mxu1 %vm2622_vm2, %v2595_v4  ;;  %v2469_v34 = vmin.f32 %v6314_v54, 0.0 }
 0x2eb   :  { %v4380_v36 = vpop.eup %4379  ;;  %4391 = vlog2.f32 %v2551_v19  ;;  %4027 = vmatmul.mubr.msk.f32.gmra.mxu0 %vm2622_vm2, %v2611_v6 }
 0x2ec   :  { %v4382_v21 = vpop.eup %4381  ;;  %4393 = vpow2.f32 %v2538_v18  ;;  %v2552_v26 = vadd.f32 1.0, %v4380_v36 }
 0x2ed   :  { %v2573_v55 = vmul.f32 0.6931472, %v4382_v21 }
 0x2ee   :  { %4395 = vlog2.f32 %v2552_v26 }
 0x2ef   :  { %v4384_v59 = vpop.eup %4383  ;;  %v2596_v42 = vsub.f32 %v2468_v17, %v2573_v55 }
 0x2f0   :  { %v4386_v24 = vpop.eup %4385  ;;  %v2575_v43 = vmul.f32 0.6931472, %v4384_v59 }
 0x2f1   :  { %v2553_v38 = vadd.f32 1.0, %v4386_v24  ;;  %4055 = vmatprep.mubr.msk.f32.mxu1 %vm2622_vm2, %v2596_v42  ;;  %v2612_v14 = vsub.f32 %v2596_v42, %v6307_v56 }
 0x2f2   :  { %v2597_v60 = vsub.f32 %v2469_v34, %v2575_v43 }
 0x2f3   :  { %v4388_v9 = vpop.eup %4387  ;;  %4397 = vlog2.f32 %v2553_v38  ;;  %4029 = vmatprep.mubr.msk.f32.mxu0 %vm2622_vm2, %v2612_v14 }
 0x2f4   :  { %v4390_v12 = vpop.eup %4389  ;;  %v2613_v3 = vsub.f32 %v2597_v60, %v6314_v54  ;;  %4056 = vmatmul.mubr.msk.f32.gmra.mxu1 %vm2622_vm2, %v2597_v60  ;;  %v2554_v41 = vadd.f32 1.0, %v4388_v9 }
 0x2f5   :  { %v2577_v63 = vmul.f32 0.6931472, %v4390_v12 }
 0x2f6   :  { %4030 = vmatmul.mubr.msk.f32.gmra.mxu0 %vm2622_vm2, %v2613_v3  ;;  %4399 = vlog2.f32 %v2554_v41 }
 0x2f7   :  { %v2598_v7 = vsub.f32 %v2470_v51, %v2577_v63 }
 0x2f8   :  { %v4392_v8 = vpop.eup %4391 }
 0x2f9   :  { %v4394_v56 = vpop.eup %4393  ;;  %v2579_v1 = vmul.f32 0.6931472, %v4392_v8  ;;  %4058 = vmatprep.mubr.msk.f32.mxu1 %vm2622_vm2, %v2598_v7  ;;  %v2614_v30 = vsub.f32 %v2598_v7, %v6319_v50 }
 0x2fa   :  { %v2555_v54 = vadd.f32 1.0, %v4394_v56 }
 0x2fb   :  { %v4396_v58 = vpop.eup %4395  ;;  %v2599_v52 = vsub.f32 %v2471_v32, %v2579_v1  ;;  %4032 = vmatprep.mubr.msk.f32.mxu0 %vm2622_vm2, %v2614_v30 }
 0x2fc   :  { %4401 = vlog2.f32 %v2555_v54  ;;  %v2581_v25 = vmul.f32 0.6931472, %v4396_v58 }
 0x2fd   :  { %v2615_v47 = vsub.f32 %v2599_v52, %v6326_v16  ;;  %4059 = vmatmul.mubr.msk.f32.gmra.mxu1 %vm2622_vm2, %v2599_v52 }
 0x2fe   :  { %v2600_v61 = vsub.f32 %v2472_v44, %v2581_v25 }
 0x2ff   :  { %4033 = vmatmul.mubr.msk.f32.gmra.mxu0 %vm2622_vm2, %v2615_v47 }
 0x300   :  { %v4398_v62 = vpop.eup %4397  ;;  %4061 = vmatprep.mubr.msk.f32.mxu1 %vm2622_vm2, %v2600_v61  ;;  %v2616_v50 = vsub.f32 %v2600_v61, %v6331_v35 }
 0x301   :  { %v2583_v33 = vmul.f32 0.6931472, %v4398_v62 }
 0x302   :  { %4035 = vmatprep.mubr.msk.f32.mxu0 %vm2622_vm2, %v2616_v50 }
 0x303   :  { %v4400_v40 = vpop.eup %4399  ;;  %v2601_v22 = vsub.f32 %v2473_v37, %v2583_v33 }
 0x304   :  { %v2585_v16 = vmul.f32 0.6931472, %v4400_v40 }
 0x305   :  { %v2617_v28 = vsub.f32 %v2601_v22, %v6337_v27  ;;  %4062 = vmatmul.mubr.msk.f32.gmra.mxu1 %vm2622_vm2, %v2601_v22 }
 0x306   :  { %v2602_v53 = vsub.f32 %v2474_v11, %v2585_v16 }
 0x307   :  { %4036 = vmatmul.mubr.msk.f32.gmra.mxu0 %vm2622_vm2, %v2617_v28 }
 0x308   :  { %4064 = vmatprep.mubr.msk.f32.mxu1 %vm2622_vm2, %v2602_v53  ;;  %v2618_v35 = vsub.f32 %v2602_v53, %v6343_v20 }
 0x309   :  { %v4402_v39 = vpop.eup %4401 }
 0x30a   :  { %v2587_v57 = vmul.f32 0.6931472, %v4402_v39  ;;  %4038 = vmatprep.mubr.msk.f32.mxu0 %vm2622_vm2, %v2618_v35 }
 0x30c   :  { %v2603_v23 = vsub.f32 %v2475_v46, %v2587_v57 }
 0x30e   :  { %v2619_v45 = vsub.f32 %v2603_v23, %v6349_v48  ;;  %4065 = vmatmul.mubr.msk.f32.gmra.mxu1 %vm2622_vm2, %v2603_v23 }
 0x310   :  { %4039 = vmatmul.mubr.msk.f32.gmra.mxu0 %vm2622_vm2, %v2619_v45 }
 0x376   :  { %v4045_v27 = vpop.f32.mrf.mxu1 }
 0x378   :  { %v4019_v13 = vpop.f32.mrf.mxu0  ;;  %v2937_v31 = vpop.f32.mrf.mxu1 }
 0x379   :  { %v2943_v2 = vadd.f32 %v4045_v27, %v4019_v13 }
 0x37a   :  { %v2741_v29 = vpop.f32.mrf.mxu0 }
 0x37b   :  { %v3018_v10 = vmul.f32 1.442695, %v2943_v2  ;;  %v2938_v20 = vadd.f32 %v2937_v31, %v2741_v29 }
 0x37d   :  { %4403 = vpow2.f32 %v3018_v10  ;;  %v3016_v49 = vmul.f32 1.442695, %v2938_v20 }
 0x37f   :  { %4405 = vpow2.f32 %v3016_v49 }
 0x387   :  { %v4048_v0 = vpop.f32.mrf.mxu1 }
 0x389   :  { %v4022_v4 = vpop.f32.mrf.mxu0  ;;  %v2947_v15 = vpop.f32.mrf.mxu1 }
 0x38a   :  { %v6389_v5 = vpop.eup %4403  ;;  %v2953_v48 = vadd.f32 %v4048_v0, %v4022_v4 }
 0x38b   :  { %v2751_v6 = vpop.f32.mrf.mxu0  ;;  %v3055_v19 = vsel %vm3051_vm3, %v6389_v5, -inf }
 0x38c   :  { %v6393_v18 = vpop.eup %4405  ;;  %v3022_v36 = vmul.f32 1.442695, %v2953_v48  ;;  %v2948_v21 = vadd.f32 %v2947_v15, %v2751_v6  ;;  %3056 = vmax.xlane.f32.xlu0 %v3055_v19 }
 0x38d   :  { %v3052_v17 = vsel %vm3051_vm3, %v6393_v18, -inf }
 0x38e   :  { %4407 = vpow2.f32 %v3022_v36  ;;  %v3020_v26 = vmul.f32 1.442695, %v2948_v21 }
 0x390   :  { %4409 = vpow2.f32 %v3020_v26  ;;  %3053 = vmax.xlane.f32.xlu0 %v3052_v17 }
 0x398   :  { %v4051_v55 = vpop.f32.mrf.mxu1 }
 0x39a   :  { %v4025_v59 = vpop.f32.mrf.mxu0  ;;  %v2957_v34 = vpop.f32.mrf.mxu1 }
 0x39b   :  { %v6397_v42 = vpop.eup %4407  ;;  %v2963_v24 = vadd.f32 %v4051_v55, %v4025_v59 }
 0x39c   :  { %v2761_v43 = vpop.f32.mrf.mxu0  ;;  %v3061_v38 = vsel %vm3051_vm3, %v6397_v42, -inf }
 0x39d   :  { %v6401_v14 = vpop.eup %4409  ;;  %v3026_v60 = vmul.f32 1.442695, %v2963_v24  ;;  %v2958_v9 = vadd.f32 %v2957_v34, %v2761_v43  ;;  %3062 = vmax.xlane.f32.xlu1 %v3061_v38 }
 0x39e   :  { %v3058_v3 = vsel %vm3051_vm3, %v6401_v14, -inf }
 0x39f   :  { %4411 = vpow2.f32 %v3026_v60  ;;  %v3024_v12 = vmul.f32 1.442695, %v2958_v9 }
 0x3a1   :  { %4413 = vpow2.f32 %v3024_v12  ;;  %3059 = vmax.xlane.f32.xlu1 %v3058_v3 }
 0x3a9   :  { %v4054_v41 = vpop.f32.mrf.mxu1 }
 0x3ab   :  { %v4028_v51 = vpop.f32.mrf.mxu0  ;;  %v2967_v8 = vpop.f32.mrf.mxu1 }
 0x3ac   :  { %v6405_v63 = vpop.eup %4411  ;;  %v2973_v7 = vadd.f32 %v4054_v41, %v4028_v51 }
 0x3ad   :  { %v2771_v56 = vpop.f32.mrf.mxu0  ;;  %v3067_v32 = vsel %vm3051_vm3, %v6405_v63, -inf }
 0x3ae   :  { %v6409_v1 = vpop.eup %4413  ;;  %v3030_v30 = vmul.f32 1.442695, %v2973_v7  ;;  %v2968_v54 = vadd.f32 %v2967_v8, %v2771_v56  ;;  %3068 = vmax.xlane.f32.xlu1 %v3067_v32  ;;  %v7249_v56 = vlaneseq }
 0x3af   :  { %v3064_v58 = vsel %vm3051_vm3, %v6409_v1, -inf }
 0x3b0   :  { %4415 = vpow2.f32 %v3030_v30  ;;  %v3028_v52 = vmul.f32 1.442695, %v2968_v54  ;;  %3065 = vmax.xlane.f32.xlu0 %v3064_v58  ;;  %v3049_v32 = vand.u32 127, %v7249_v56 }
 0x3b2   :  { %4417 = vpow2.f32 %v3028_v52  ;;  %v6454_v30 = vcvt.s32.f32 %v3049_v32 }
 0x3b4   :  { %v4057_v44 = vpop.f32.mrf.mxu1 }
 0x3b6   :  { %v4031_v25 = vpop.f32.mrf.mxu0  ;;  %v2977_v61 = vpop.f32.mrf.mxu1 }
 0x3b7   :  { %v2983_v47 = vadd.f32 %v4057_v44, %v4031_v25 }
 0x3b8   :  { %v2781_v62 = vpop.f32.mrf.mxu0 }
 0x3b9   :  { %v3034_v50 = vmul.f32 1.442695, %v2983_v47  ;;  %v2978_v37 = vadd.f32 %v2977_v61, %v2781_v62 }
 0x3bb   :  { %4419 = vpow2.f32 %v3034_v50  ;;  %v3032_v33 = vmul.f32 1.442695, %v2978_v37 }
 0x3bd   :  { %v6413_v40 = vpop.eup %4415  ;;  %4421 = vpow2.f32 %v3032_v33  ;;  %v4060_v22 = vpop.f32.mrf.mxu1 }
 0x3be   :  { %v3073_v11 = vsel %vm3051_vm3, %v6413_v40, -inf }
 0x3bf   :  { %v6417_v16 = vpop.eup %4417  ;;  %v4034_v28 = vpop.f32.mrf.mxu0  ;;  %3074 = vmax.xlane.f32.xlu1 %v3073_v11 }
 0x3c0   :  { %v2993_v53 = vadd.f32 %v4060_v22, %v4034_v28  ;;  %v3070_v35 = vsel %vm3051_vm3, %v6417_v16, -inf  ;;  %v2987_v39 = vpop.f32.mrf.mxu1 }
 0x3c1   :  { %v2791_v46 = vpop.f32.mrf.mxu0  ;;  %3071 = vmax.xlane.f32.xlu0 %v3070_v35 }
 0x3c2   :  { %v3038_v57 = vmul.f32 1.442695, %v2993_v53  ;;  %v2988_v23 = vadd.f32 %v2987_v39, %v2791_v46 }
 0x3c4   :  { %4423 = vpow2.f32 %v3038_v57  ;;  %v3036_v45 = vmul.f32 1.442695, %v2988_v23 }
 0x3c5   :  { %v4063_v27 = vpop.f32.mrf.mxu1 }
 0x3c6   :  { %4425 = vpow2.f32 %v3036_v45 }
 0x3c7   :  { %v4037_v13 = vpop.f32.mrf.mxu0  ;;  %v2997_v29 = vpop.f32.mrf.mxu1 }
 0x3c8   :  { %v6421_v2 = vpop.eup %4419  ;;  %v3003_v31 = vadd.f32 %v4063_v27, %v4037_v13 }
 0x3c9   :  { %v2801_v10 = vpop.f32.mrf.mxu0  ;;  %v3079_v20 = vsel %vm3051_vm3, %v6421_v2, -inf }
 0x3ca   :  { %v6425_v49 = vpop.eup %4421  ;;  %v3042_v0 = vmul.f32 1.442695, %v3003_v31  ;;  %v2998_v4 = vadd.f32 %v2997_v29, %v2801_v10  ;;  %3080 = vmax.xlane.f32.xlu1 %v3079_v20 }
 0x3cb   :  { %v3076_v48 = vsel %vm3051_vm3, %v6425_v49, -inf }
 0x3cc   :  { %4427 = vpow2.f32 %v3042_v0  ;;  %v3040_v15 = vmul.f32 1.442695, %v2998_v4  ;;  %3077 = vmax.xlane.f32.xlu0 %v3076_v48 }
 0x3ce   :  { %4429 = vpow2.f32 %v3040_v15  ;;  %v4066_v6 = vpop.f32.mrf.mxu1 }
 0x3d0   :  { %v4040_v19 = vpop.f32.mrf.mxu0  ;;  %v3007_v26 = vpop.f32.mrf.mxu1 }
 0x3d1   :  { %v6429_v36 = vpop.eup %4423  ;;  %v3013_v21 = vadd.f32 %v4066_v6, %v4040_v19 }
 0x3d2   :  { %v2811_v17 = vpop.f32.mrf.mxu0  ;;  %v3085_v55 = vsel %vm3051_vm3, %v6429_v36, -inf }
 0x3d3   :  { %v6433_v59 = vpop.eup %4425  ;;  %v3046_v24 = vmul.f32 1.442695, %v3013_v21  ;;  %v3008_v34 = vadd.f32 %v3007_v26, %v2811_v17  ;;  %3086 = vmax.xlane.f32.xlu1 %v3085_v55 }
 0x3d4   :  { %v3082_v43 = vsel %vm3051_vm3, %v6433_v59, -inf }
 0x3d5   :  { %4431 = vpow2.f32 %v3046_v24  ;;  %v3044_v38 = vmul.f32 1.442695, %v3008_v34  ;;  %3083 = vmax.xlane.f32.xlu0 %v3082_v43 }
 0x3d7   :  { %4433 = vpow2.f32 %v3044_v38 }
 0x3d9   :  { %v6437_v60 = vpop.eup %4427 }
 0x3da   :  { %v3091_v9 = vsel %vm3051_vm3, %v6437_v60, -inf }
 0x3db   :  { %v6441_v12 = vpop.eup %4429  ;;  %3092 = vmax.xlane.f32.xlu1 %v3091_v9 }
 0x3dc   :  { %v3088_v3 = vsel %vm3051_vm3, %v6441_v12, -inf }
 0x3dd   :  { %3089 = vmax.xlane.f32.xlu0 %v3088_v3 }
 0x3e2   :  { %v6445_v41 = vpop.eup %4431 }
 0x3e3   :  { %v3097_v51 = vsel %vm3051_vm3, %v6445_v41, -inf }
 0x3e4   :  { %v6449_v7 = vpop.eup %4433  ;;  %3098 = vmax.xlane.f32.xlu1 %v3097_v51 }
 0x3e5   :  { %v3094_v8 = vsel %vm3051_vm3, %v6449_v7, -inf }
 0x3e6   :  { %3095 = vmax.xlane.f32.xlu0 %v3094_v8 }
 0x415   :  { %v3057_v54 = vpop.xlane.xlu0 %3056 }
 0x416   :  { %vm3101_vm4 = vcmp.ge.f32.partialorder %v6389_v5, %v3057_v54 }
 0x417   :  { %v3117_v58 = vsel %vm3101_vm4, %v6454_v30, 8.0 }
 0x418   :  { %v3135_v52 = vsel %vm3051_vm3, %v3117_v58, inf }
 0x419   :  { %v3054_v44 = vpop.xlane.xlu0 %3053  ;;  %3136 = vmin.xlane.f32.xlu1 %v3135_v52 }
 0x41a   :  { %vm3100_vm5 = vcmp.ge.f32.partialorder %v6393_v18, %v3054_v44 }
 0x41b   :  { %v3116_v25 = vsel %vm3100_vm5, %v6454_v30, 8.0 }
 0x41c   :  { %v3132_v47 = vsel %vm3051_vm3, %v3116_v25, inf }
 0x41d   :  { %3133 = vmin.xlane.f32.xlu0 %v3132_v47 }
 0x426   :  { %v3063_v61 = vpop.xlane.xlu1 %3062 }
 0x427   :  { %vm3103_vm6 = vcmp.ge.f32.partialorder %v6397_v42, %v3063_v61 }
 0x428   :  { %v3119_v62 = vsel %vm3103_vm6, %v6454_v30, 8.0 }
 0x429   :  { %v3141_v50 = vsel %vm3051_vm3, %v3119_v62, inf }
 0x42a   :  { %v3060_v37 = vpop.xlane.xlu1 %3059  ;;  %3142 = vmin.xlane.f32.xlu1 %v3141_v50 }
 0x42b   :  { %vm3102_vm7 = vcmp.ge.f32.partialorder %v6401_v14, %v3060_v37 }
 0x42c   :  { %v3118_v33 = vsel %vm3102_vm7, %v6454_v30, 8.0 }
 0x42d   :  { %v3138_v22 = vsel %vm3051_vm3, %v3118_v33, inf }
 0x42e   :  { %3139 = vmin.xlane.f32.xlu0 %v3138_v22 }
 0x437   :  { %v3069_v11 = vpop.xlane.xlu1 %3068 }
 0x438   :  { %vm3105_vm8 = vcmp.ge.f32.partialorder %v6405_v63, %v3069_v11 }
 0x439   :  { %v3066_v28 = vpop.xlane.xlu0 %3065  ;;  %v3121_v53 = vsel %vm3105_vm8, %v6454_v30, 8.0 }
 0x43a   :  { %vm3104_vm9 = vcmp.ge.f32.partialorder %v6409_v1, %v3066_v28  ;;  %v3147_v35 = vsel %vm3051_vm3, %v3121_v53, inf }
 0x43b   :  { %3148 = vmin.xlane.f32.xlu1 %v3147_v35  ;;  %v3120_v39 = vsel %vm3104_vm9, %v6454_v30, 8.0 }
 0x43c   :  { %v3144_v46 = vsel %vm3051_vm3, %v3120_v39, inf }
 0x43d   :  { %3145 = vmin.xlane.f32.xlu0 %v3144_v46 }
 0x448   :  { %v3075_v57 = vpop.xlane.xlu1 %3074 }
 0x449   :  { %vm3107_vm10 = vcmp.ge.f32.partialorder %v6413_v40, %v3075_v57 }
 0x44a   :  { %v3072_v23 = vpop.xlane.xlu0 %3071  ;;  %v3123_v45 = vsel %vm3107_vm10, %v6454_v30, 8.0 }
 0x44b   :  { %vm3106_vm11 = vcmp.ge.f32.partialorder %v6417_v16, %v3072_v23  ;;  %v3153_v27 = vsel %vm3051_vm3, %v3123_v45, inf }
 0x44c   :  { %3154 = vmin.xlane.f32.xlu1 %v3153_v27  ;;  %v3122_v13 = vsel %vm3106_vm11, %v6454_v30, 8.0 }
 0x44d   :  { %v3150_v31 = vsel %vm3051_vm3, %v3122_v13, inf }
 0x44e   :  { %3151 = vmin.xlane.f32.xlu0 %v3150_v31 }
 0x453   :  { %v3081_v29 = vpop.xlane.xlu1 %3080 }
 0x454   :  { %vm3109_vm12 = vcmp.ge.f32.partialorder %v6421_v2, %v3081_v29 }
 0x455   :  { %v3078_v10 = vpop.xlane.xlu0 %3077  ;;  %v3125_v20 = vsel %vm3109_vm12, %v6454_v30, 8.0 }
 0x456   :  { %vm3108_vm13 = vcmp.ge.f32.partialorder %v6425_v49, %v3078_v10  ;;  %v3159_v0 = vsel %vm3051_vm3, %v3125_v20, inf }
 0x457   :  { %3160 = vmin.xlane.f32.xlu1 %v3159_v0  ;;  %v3124_v4 = vsel %vm3108_vm13, %v6454_v30, 8.0 }
 0x458   :  { %v3156_v48 = vsel %vm3051_vm3, %v3124_v4, inf }
 0x459   :  { %3157 = vmin.xlane.f32.xlu0 %v3156_v48 }
 0x45c   :  { %v3087_v15 = vpop.xlane.xlu1 %3086 }
 0x45d   :  { %vm3111_vm14 = vcmp.ge.f32.partialorder %v6429_v36, %v3087_v15 }
 0x45e   :  { %v3084_v6 = vpop.xlane.xlu0 %3083  ;;  %v3127_v19 = vsel %vm3111_vm14, %v6454_v30, 8.0 }
 0x45f   :  { %vm3110_vm15 = vcmp.ge.f32.partialorder %v6433_v59, %v3084_v6  ;;  %v3165_v21 = vsel %vm3051_vm3, %v3127_v19, inf }
 0x460   :  { %3166 = vmin.xlane.f32.xlu1 %v3165_v21  ;;  %v3126_v26 = vsel %vm3110_vm15, %v6454_v30, 8.0 }
 0x461   :  { %v3162_v17 = vsel %vm3051_vm3, %v3126_v26, inf }
 0x462   :  { %3163 = vmin.xlane.f32.xlu0 %v3162_v17 }
 0x464   :  { %v3093_v55 = vpop.xlane.xlu1 %3092 }
 0x465   :  { %vm3113_vm0 = vcmp.ge.f32.partialorder %v6437_v60, %v3093_v55 }
 0x466   :  { %v3090_v24 = vpop.xlane.xlu0 %3089  ;;  %v3129_v34 = vsel %vm3113_vm0, %v6454_v30, 8.0 }
 0x467   :  { %vm3112_vm1 = vcmp.ge.f32.partialorder %v6441_v12, %v3090_v24  ;;  %v3171_v43 = vsel %vm3051_vm3, %v3129_v34, inf }
 0x468   :  { %3172 = vmin.xlane.f32.xlu1 %v3171_v43  ;;  %v3128_v38 = vsel %vm3112_vm1, %v6454_v30, 8.0 }
 0x469   :  { %v3168_v9 = vsel %vm3051_vm3, %v3128_v38, inf }
 0x46a   :  { %3169 = vmin.xlane.f32.xlu0 %v3168_v9 }
 0x46d   :  { %v3099_v3 = vpop.xlane.xlu1 %3098 }
 0x46e   :  { %vm3115_vm2 = vcmp.ge.f32.partialorder %v6445_v41, %v3099_v3 }
 0x46f   :  { %v3096_v51 = vpop.xlane.xlu0 %3095  ;;  %v3131_v8 = vsel %vm3115_vm2, %v6454_v30, 8.0 }
 0x470   :  { %vm3114_vm4 = vcmp.ge.f32.partialorder %v6449_v7, %v3096_v51  ;;  %v3177_v56 = vsel %vm3051_vm3, %v3131_v8, inf }
 0x471   :  { %3178 = vmin.xlane.f32.xlu1 %v3177_v56  ;;  %v3130_v32 = vsel %vm3114_vm4, %v6454_v30, 8.0 }
 0x472   :  { %v3174_v54 = vsel %vm3051_vm3, %v3130_v32, inf }
 0x473   :  { %3175 = vmin.xlane.f32.xlu0 %v3174_v54 }
 0x4a2   :  { %v6504_v58 = vpop.xlane.xlu1 %3136 }
 0x4a3   :  { %vm3181_vm5 = vcmp.eq.f32.partialorder %v6454_v30, %v6504_v58 }
 0x4a4   :  { %v6512_v52 = vsel %vm3181_vm5, -1e+30, %v6389_v5 }
 0x4a5   :  { %v3231_v44 = vsel %vm3051_vm3, %v6512_v52, -inf }
 0x4a6   :  { %3232 = vmax.xlane.f32.xlu1 %v3231_v44  ;;  %v6516_v25 = vpop.xlane.xlu0 %3133 }
 0x4a7   :  { %vm3180_vm6 = vcmp.eq.f32.partialorder %v6454_v30, %v6516_v25 }
 0x4a8   :  { %v6524_v47 = vsel %vm3180_vm6, -1e+30, %v6393_v18 }
 0x4a9   :  { %v3228_v61 = vsel %vm3051_vm3, %v6524_v47, -inf }
 0x4aa   :  { %3229 = vmax.xlane.f32.xlu0 %v3228_v61 }
 0x4b3   :  { %v6528_v62 = vpop.xlane.xlu1 %3142 }
 0x4b4   :  { %vm3183_vm7 = vcmp.eq.f32.partialorder %v6454_v30, %v6528_v62 }
 0x4b5   :  { %v6536_v50 = vsel %vm3183_vm7, -1e+30, %v6397_v42 }
 0x4b6   :  { %v3237_v37 = vsel %vm3051_vm3, %v6536_v50, -inf }
 0x4b7   :  { %3238 = vmax.xlane.f32.xlu1 %v3237_v37  ;;  %v6540_v33 = vpop.xlane.xlu0 %3139 }
 0x4b8   :  { %vm3182_vm8 = vcmp.eq.f32.partialorder %v6454_v30, %v6540_v33 }
 0x4b9   :  { %v6548_v22 = vsel %vm3182_vm8, -1e+30, %v6401_v14 }
 0x4ba   :  { %v3234_v11 = vsel %vm3051_vm3, %v6548_v22, -inf }
 0x4bb   :  { %3235 = vmax.xlane.f32.xlu0 %v3234_v11 }
 0x4c4   :  { %v6552_v28 = vpop.xlane.xlu1 %3148 }
 0x4c5   :  { %vm3185_vm9 = vcmp.eq.f32.partialorder %v6454_v30, %v6552_v28 }
 0x4c6   :  { %v6556_v53 = vpop.xlane.xlu0 %3145  ;;  %v6562_v35 = vsel %vm3185_vm9, -1e+30, %v6405_v63 }
 0x4c7   :  { %vm3184_vm10 = vcmp.eq.f32.partialorder %v6454_v30, %v6556_v53  ;;  %v3243_v39 = vsel %vm3051_vm3, %v6562_v35, -inf }
 0x4c8   :  { %3244 = vmax.xlane.f32.xlu1 %v3243_v39  ;;  %v6572_v46 = vsel %vm3184_vm10, -1e+30, %v6409_v1 }
 0x4c9   :  { %v3240_v57 = vsel %vm3051_vm3, %v6572_v46, -inf }
 0x4ca   :  { %3241 = vmax.xlane.f32.xlu0 %v3240_v57 }
 0x4d5   :  { %v6576_v23 = vpop.xlane.xlu1 %3154 }
 0x4d6   :  { %vm3187_vm11 = vcmp.eq.f32.partialorder %v6454_v30, %v6576_v23 }
 0x4d7   :  { %v6580_v45 = vpop.xlane.xlu0 %3151  ;;  %v6586_v27 = vsel %vm3187_vm11, -1e+30, %v6413_v40 }
 0x4d8   :  { %vm3186_vm12 = vcmp.eq.f32.partialorder %v6454_v30, %v6580_v45  ;;  %v3249_v13 = vsel %vm3051_vm3, %v6586_v27, -inf }
 0x4d9   :  { %3250 = vmax.xlane.f32.xlu1 %v3249_v13  ;;  %v6596_v31 = vsel %vm3186_vm12, -1e+30, %v6417_v16 }
 0x4da   :  { %v3246_v29 = vsel %vm3051_vm3, %v6596_v31, -inf }
 0x4db   :  { %3247 = vmax.xlane.f32.xlu0 %v3246_v29 }
 0x4e0   :  { %v6600_v10 = vpop.xlane.xlu1 %3160 }
 0x4e1   :  { %vm3189_vm13 = vcmp.eq.f32.partialorder %v6454_v30, %v6600_v10 }
 0x4e2   :  { %v6604_v20 = vpop.xlane.xlu0 %3157  ;;  %v6610_v0 = vsel %vm3189_vm13, -1e+30, %v6421_v2 }
 0x4e3   :  { %vm3188_vm14 = vcmp.eq.f32.partialorder %v6454_v30, %v6604_v20  ;;  %v3255_v4 = vsel %vm3051_vm3, %v6610_v0, -inf }
 0x4e4   :  { %3256 = vmax.xlane.f32.xlu1 %v3255_v4  ;;  %v6620_v48 = vsel %vm3188_vm14, -1e+30, %v6425_v49 }
 0x4e5   :  { %v3252_v15 = vsel %vm3051_vm3, %v6620_v48, -inf }
 0x4e6   :  { %3253 = vmax.xlane.f32.xlu0 %v3252_v15 }
 0x4e9   :  { %v6624_v6 = vpop.xlane.xlu1 %3166 }
 0x4ea   :  { %vm3191_vm15 = vcmp.eq.f32.partialorder %v6454_v30, %v6624_v6 }
 0x4eb   :  { %v6628_v19 = vpop.xlane.xlu0 %3163  ;;  %v6634_v21 = vsel %vm3191_vm15, -1e+30, %v6429_v36 }
 0x4ec   :  { %vm7072_vm0 = vcmp.eq.f32.partialorder %v6454_v30, %v6628_v19  ;;  %v3261_v26 = vsel %vm3051_vm3, %v6634_v21, -inf }
 0x4ed   :  { %3262 = vmax.xlane.f32.xlu1 %v3261_v26  ;;  %v6644_v17 = vsel %vm7072_vm0, -1e+30, %v6433_v59 }
 0x4ee   :  { %v3258_v55 = vsel %vm3051_vm3, %v6644_v17, -inf }
 0x4ef   :  { %3259 = vmax.xlane.f32.xlu0 %v3258_v55 }
 0x4f1   :  { %v6648_v24 = vpop.xlane.xlu1 %3172 }
 0x4f2   :  { %vm7070_vm1 = vcmp.eq.f32.partialorder %v6454_v30, %v6648_v24 }
 0x4f3   :  { %v6652_v34 = vpop.xlane.xlu0 %3169  ;;  %v6658_v43 = vsel %vm7070_vm1, -1e+30, %v6437_v60 }
 0x4f4   :  { %vm7068_vm2 = vcmp.eq.f32.partialorder %v6454_v30, %v6652_v34  ;;  %v3267_v38 = vsel %vm3051_vm3, %v6658_v43, -inf }
 0x4f5   :  { %3268 = vmax.xlane.f32.xlu1 %v3267_v38  ;;  %v6668_v9 = vsel %vm7068_vm2, -1e+30, %v6441_v12 }
 0x4f6   :  { %v3264_v3 = vsel %vm3051_vm3, %v6668_v9, -inf }
 0x4f7   :  { %3265 = vmax.xlane.f32.xlu0 %v3264_v3 }
 0x4fa   :  { %v6672_v51 = vpop.xlane.xlu1 %3178 }
 0x4fb   :  { %vm7069_vm4 = vcmp.eq.f32.partialorder %v6454_v30, %v6672_v51 }
 0x4fc   :  { %v6676_v8 = vpop.xlane.xlu0 %3175  ;;  %v6682_v56 = vsel %vm7069_vm4, -1e+30, %v6445_v41 }
 0x4fd   :  { %vm7071_vm2 = vcmp.eq.f32.partialorder %v6454_v30, %v6676_v8  ;;  %v3273_v32 = vsel %vm3051_vm3, %v6682_v56, -inf }
 0x4fe   :  { %3274 = vmax.xlane.f32.xlu1 %v3273_v32  ;;  %v6692_v54 = vsel %vm7071_vm2, -1e+30, %v6449_v7 }
 0x4ff   :  { %v3270_v44 = vsel %vm3051_vm3, %v6692_v54, -inf }
 0x500   :  { %3271 = vmax.xlane.f32.xlu0 %v3270_v44 }
 0x52f   :  { %v3233_v61 = vpop.xlane.xlu1 %3232 }
 0x530   :  { %vm3277_vm4 = vcmp.ge.f32.partialorder %v6512_v52, %v3233_v61 }
 0x531   :  { %v3293_v37 = vsel %vm3277_vm4, %v6454_v30, 8.0 }
 0x532   :  { %v3311_v11 = vsel %vm3051_vm3, %v3293_v37, inf }
 0x533   :  { %3312 = vmin.xlane.f32.xlu1 %v3311_v11  ;;  %v3230_v39 = vpop.xlane.xlu0 %3229 }
 0x534   :  { %vm3276_vm1 = vcmp.ge.f32.partialorder %v6524_v47, %v3230_v39 }
 0x535   :  { %v3292_v57 = vsel %vm3276_vm1, %v6454_v30, 8.0 }
 0x536   :  { %v3308_v13 = vsel %vm3051_vm3, %v3292_v57, inf }
 0x537   :  { %3309 = vmin.xlane.f32.xlu0 %v3308_v13 }
 0x540   :  { %v3239_v29 = vpop.xlane.xlu1 %3238 }
 0x541   :  { %vm3279_vm2 = vcmp.ge.f32.partialorder %v6536_v50, %v3239_v29 }
 0x542   :  { %v3295_v4 = vsel %vm3279_vm2, %v6454_v30, 8.0 }
 0x543   :  { %v3317_v52 = vsel %vm3051_vm3, %v3295_v4, inf }
 0x544   :  { %3318 = vmin.xlane.f32.xlu1 %v3317_v52  ;;  %v3236_v15 = vpop.xlane.xlu0 %3235 }
 0x545   :  { %vm3278_vm4 = vcmp.ge.f32.partialorder %v6548_v22, %v3236_v15 }
 0x546   :  { %v3294_v26 = vsel %vm3278_vm4, %v6454_v30, 8.0 }
 0x547   :  { %v3314_v47 = vsel %vm3051_vm3, %v3294_v26, inf }
 0x548   :  { %3315 = vmin.xlane.f32.xlu0 %v3314_v47 }
 0x551   :  { %v3245_v55 = vpop.xlane.xlu1 %3244 }
 0x552   :  { %vm3281_vm1 = vcmp.ge.f32.partialorder %v6562_v35, %v3245_v55 }
 0x553   :  { %v3242_v38 = vpop.xlane.xlu0 %3241  ;;  %v3297_v3 = vsel %vm3281_vm1, %v6454_v30, 8.0 }
 0x554   :  { %vm3280_vm0 = vcmp.ge.f32.partialorder %v6572_v46, %v3242_v38  ;;  %v3323_v50 = vsel %vm3051_vm3, %v3297_v3, inf }
 0x555   :  { %3324 = vmin.xlane.f32.xlu1 %v3323_v50  ;;  %v3296_v32 = vsel %vm3280_vm0, %v6454_v30, 8.0 }
 0x556   :  { %v3320_v22 = vsel %vm3051_vm3, %v3296_v32, inf }
 0x557   :  { %3321 = vmin.xlane.f32.xlu0 %v3320_v22 }
 0x562   :  { %v3251_v44 = vpop.xlane.xlu1 %3250 }
 0x563   :  { %vm3283_vm2 = vcmp.ge.f32.partialorder %v6586_v27, %v3251_v44 }
 0x564   :  { %v3248_v61 = vpop.xlane.xlu0 %3247  ;;  %v3299_v37 = vsel %vm3283_vm2, %v6454_v30, 8.0 }
 0x565   :  { %vm3282_vm4 = vcmp.ge.f32.partialorder %v6596_v31, %v3248_v61  ;;  %v3329_v35 = vsel %vm3051_vm3, %v3299_v37, inf  ;;  %v4518_v37 = vmov 0.0  }
 0x566   :  { %3330 = vmin.xlane.f32.xlu1 %v3329_v35  ;;  %v3298_v46 = vsel %vm3282_vm4, %v6454_v30, 8.0  ;;  %v3199_v25 = vsel %vm3183_vm7, 1.0, %v4518_v37  ;;  %v3201_v33 = vsel %vm3185_vm9, 1.0, %v4518_v37  ;;  %v3203_v53 = vsel %vm3187_vm11, 1.0, %v4518_v37 }
 0x567   :  { %v3326_v11 = vsel %vm3051_vm3, %v3298_v46, inf  ;;  %v3205_v45 = vsel %vm3189_vm13, 1.0, %v4518_v37  ;;  %v3207_v20 = vsel %vm3191_vm15, 1.0, %v4518_v37  ;;  %vm7251_vm15 = vcmp.eq.f32.partialorder %v6454_v30, %v6648_v24 }
 0x568   :  { %3327 = vmin.xlane.f32.xlu0 %v3326_v11  ;;  %v3196_v11 = vsel %vm3180_vm6, 1.0, %v4518_v37 }
 0x56d   :  { %v3257_v39 = vpop.xlane.xlu1 %3256 }
 0x56e   :  { %vm3285_vm0 = vcmp.ge.f32.partialorder %v6610_v0, %v3257_v39 }
 0x56f   :  { %v3254_v57 = vpop.xlane.xlu0 %3253  ;;  %v3301_v13 = vsel %vm3285_vm0, %v6454_v30, 8.0 }
 0x570   :  { %vm3284_vm1 = vcmp.ge.f32.partialorder %v6620_v48, %v3254_v57  ;;  %v3335_v27 = vsel %vm3051_vm3, %v3301_v13, inf }
 0x571   :  { %3336 = vmin.xlane.f32.xlu1 %v3335_v27  ;;  %v3300_v31 = vsel %vm3284_vm1, %v6454_v30, 8.0 }
 0x572   :  { %v3332_v29 = vsel %vm3051_vm3, %v3300_v31, inf }
 0x573   :  { %3333 = vmin.xlane.f32.xlu0 %v3332_v29 }
 0x576   :  { %v3263_v4 = vpop.xlane.xlu1 %3262 }
 0x577   :  { %vm3287_vm2 = vcmp.ge.f32.partialorder %v6634_v21, %v3263_v4 }
 0x578   :  { %v3260_v52 = vpop.xlane.xlu0 %3259  ;;  %v3303_v15 = vsel %vm3287_vm2, %v6454_v30, 8.0 }
 0x579   :  { %vm3286_vm4 = vcmp.ge.f32.partialorder %v6644_v17, %v3260_v52  ;;  %v3341_v0 = vsel %vm3051_vm3, %v3303_v15, inf }
 0x57a   :  { %3342 = vmin.xlane.f32.xlu1 %v3341_v0  ;;  %v3302_v48 = vsel %vm3286_vm4, %v6454_v30, 8.0 }
 0x57b   :  { %v3338_v26 = vsel %vm3051_vm3, %v3302_v48, inf }
 0x57c   :  { %3339 = vmin.xlane.f32.xlu0 %v3338_v26 }
 0x57e   :  { %v3269_v47 = vpop.xlane.xlu1 %3268 }
 0x57f   :  { %vm3289_vm0 = vcmp.ge.f32.partialorder %v6658_v43, %v3269_v47 }
 0x580   :  { %v3266_v55 = vpop.xlane.xlu0 %3265  ;;  %v3305_v38 = vsel %vm3289_vm0, %v6454_v30, 8.0 }
 0x581   :  { %vm3288_vm1 = vcmp.ge.f32.partialorder %v6668_v9, %v3266_v55  ;;  %v3347_v21 = vsel %vm3051_vm3, %v3305_v38, inf }
 0x582   :  { %3348 = vmin.xlane.f32.xlu1 %v3347_v21  ;;  %v3304_v17 = vsel %vm3288_vm1, %v6454_v30, 8.0 }
 0x583   :  { %v3344_v3 = vsel %vm3051_vm3, %v3304_v17, inf }
 0x584   :  { %3345 = vmin.xlane.f32.xlu0 %v3344_v3 }
 0x587   :  { %v3275_v50 = vpop.xlane.xlu1 %3274 }
 0x588   :  { %vm3291_vm2 = vcmp.ge.f32.partialorder %v6682_v56, %v3275_v50  ;;  %v3197_v56 = vsel %vm3181_vm5, 1.0, %v4518_v37 }
 0x589   :  { %v3272_v32 = vpop.xlane.xlu0 %3271  ;;  %v3307_v22 = vsel %vm3291_vm2, %v6454_v30, 8.0 }
 0x58a   :  { %vm3290_vm4 = vcmp.ge.f32.partialorder %v6692_v54, %v3272_v32  ;;  %v3353_v43 = vsel %vm3051_vm3, %v3307_v22, inf }
 0x58b   :  { %3354 = vmin.xlane.f32.xlu1 %v3353_v43  ;;  %v3306_v9 = vsel %vm3290_vm4, %v6454_v30, 8.0 }
 0x58c   :  { %v3350_v44 = vsel %vm3051_vm3, %v3306_v9, inf }
 0x58d   :  { %3351 = vmin.xlane.f32.xlu0 %v3350_v44 }
 0x5bc   :  { %v3313_v61 = vpop.xlane.xlu1 %3312 }
 0x5bd   :  { %vm3357_vm0 = vcmp.eq.f32.partialorder %v6454_v30, %v3313_v61 }
 0x5be   :  { %v3373_v35 = vsel %vm3357_vm0, 1.0, %v3197_v56  ;;  %vm7252_vm0 = vcmp.eq.f32.partialorder %v6454_v30, %v6652_v34 }
 0x5bf   :  { %v6750_v54 = vmul.f32 %v6389_v5, %v3373_v35 }
 0x5c0   :  { %v3310_v46 = vpop.xlane.xlu0 %3309 }
 0x5c1   :  { %vm3356_vm1 = vcmp.eq.f32.partialorder %v6454_v30, %v3310_v46  ;;  %v3407_v39 = vsel %vm3051_vm3, %v6750_v54, 0.0 }
 0x5c2   :  { %v3372_v57 = vsel %vm3356_vm1, 1.0, %v3196_v11  ;;  %3408 = vadd.xlane.f32.xlu1 %v3407_v39 }
 0x5c3   :  { %v6760_v58 = vmul.f32 %v6393_v18, %v3372_v57  ;;  %v3198_v18 = vsel %vm3182_vm8, 1.0, %v4518_v37 }
 0x5c5   :  { %v3404_v5 = vsel %vm3051_vm3, %v6760_v58, 0.0 }
 0x5c6   :  { %3405 = vadd.xlane.f32.xlu0 %v3404_v5 }
 0x5cd   :  { %v3319_v13 = vpop.xlane.xlu1 %3318 }
 0x5ce   :  { %vm3359_vm5 = vcmp.eq.f32.partialorder %v6454_v30, %v3319_v13 }
 0x5cf   :  { %v3375_v27 = vsel %vm3359_vm5, 1.0, %v3199_v25  ;;  %vm7253_vm5 = vcmp.eq.f32.partialorder %v6454_v30, %v6672_v51 }
 0x5d0   :  { %v6770_v31 = vmul.f32 %v6397_v42, %v3375_v27  ;;  %v3211_v34 = vsel %vm7253_vm5, 1.0, %v4518_v37 }
 0x5d1   :  { %v3316_v29 = vpop.xlane.xlu0 %3315 }
 0x5d2   :  { %vm3358_vm6 = vcmp.eq.f32.partialorder %v6454_v30, %v3316_v29  ;;  %v3413_v4 = vsel %vm3051_vm3, %v6770_v31, 0.0 }
 0x5d3   :  { %v3374_v52 = vsel %vm3358_vm6, 1.0, %v3198_v18  ;;  %3414 = vadd.xlane.f32.xlu1 %v3413_v4 }
 0x5d4   :  { %v6780_v62 = vmul.f32 %v6401_v14, %v3374_v52  ;;  %v3200_v14 = vsel %vm3184_vm10, 1.0, %v4518_v37 }
 0x5d6   :  { %v3410_v42 = vsel %vm3051_vm3, %v6780_v62, 0.0 }
 0x5d7   :  { %3411 = vadd.xlane.f32.xlu0 %v3410_v42 }
 0x5de   :  { %v3325_v15 = vpop.xlane.xlu1 %3324 }
 0x5df   :  { %vm3361_vm7 = vcmp.eq.f32.partialorder %v6454_v30, %v3325_v15 }
 0x5e0   :  { %v3377_v0 = vsel %vm3361_vm7, 1.0, %v3201_v33  ;;  %v3322_v48 = vpop.xlane.xlu0 %3321  ;;  %vm7254_vm7 = vcmp.eq.f32.partialorder %v6454_v30, %v6676_v8 }
 0x5e1   :  { %vm3360_vm8 = vcmp.eq.f32.partialorder %v6454_v30, %v3322_v48  ;;  %v6795_v26 = vmul.f32 %v6405_v63, %v3377_v0 }
 0x5e2   :  { %v3376_v47 = vsel %vm3360_vm8, 1.0, %v3200_v14 }
 0x5e3   :  { %v3419_v55 = vsel %vm3051_vm3, %v6795_v26, 0.0  ;;  %v6800_v28 = vmul.f32 %v6409_v1, %v3376_v47  ;;  %v3202_v1 = vsel %vm3186_vm12, 1.0, %v4518_v37 }
 0x5e4   :  { %3420 = vadd.xlane.f32.xlu1 %v3419_v55 }
 0x5e5   :  { %v3416_v38 = vsel %vm3051_vm3, %v6800_v28, 0.0 }
 0x5e6   :  { %3417 = vadd.xlane.f32.xlu0 %v3416_v38 }
 0x5ef   :  { %v3331_v21 = vpop.xlane.xlu1 %3330 }
 0x5f0   :  { %vm3363_vm9 = vcmp.eq.f32.partialorder %v6454_v30, %v3331_v21 }
 0x5f1   :  { %v3379_v63 = vsel %vm3363_vm9, 1.0, %v3203_v53  ;;  %v3328_v17 = vpop.xlane.xlu0 %3327 }
 0x5f2   :  { %vm3362_vm10 = vcmp.eq.f32.partialorder %v6454_v30, %v3328_v17  ;;  %v6815_v3 = vmul.f32 %v6413_v40, %v3379_v63 }
 0x5f3   :  { %v3378_v50 = vsel %vm3362_vm10, 1.0, %v3202_v1 }
 0x5f4   :  { %v3425_v32 = vsel %vm3051_vm3, %v6815_v3, 0.0  ;;  %v6820_v23 = vmul.f32 %v6417_v16, %v3378_v50  ;;  %v3204_v16 = vsel %vm3188_vm14, 1.0, %v4518_v37  ;;  %vm7250_vm14 = vcmp.eq.f32.partialorder %v6454_v30, %v6628_v19 }
 0x5f5   :  { %3426 = vadd.xlane.f32.xlu1 %v3425_v32  ;;  %v3209_v19 = vsel %vm7251_vm15, 1.0, %v4518_v37 }
 0x5f6   :  { %v3422_v22 = vsel %vm3051_vm3, %v6820_v23, 0.0 }
 0x5f7   :  { %3423 = vadd.xlane.f32.xlu0 %v3422_v22 }
 0x5fa   :  { %v3337_v43 = vpop.xlane.xlu1 %3336 }
 0x5fb   :  { %vm3365_vm11 = vcmp.eq.f32.partialorder %v6454_v30, %v3337_v43 }
 0x5fc   :  { %v3381_v40 = vsel %vm3365_vm11, 1.0, %v3205_v45  ;;  %v3334_v9 = vpop.xlane.xlu0 %3333 }
 0x5fd   :  { %vm3364_vm12 = vcmp.eq.f32.partialorder %v6454_v30, %v3334_v9  ;;  %v6835_v44 = vmul.f32 %v6421_v2, %v3381_v40 }
 0x5fe   :  { %v3380_v61 = vsel %vm3364_vm12, 1.0, %v3204_v16 }
 0x5ff   :  { %v3431_v56 = vsel %vm3051_vm3, %v6835_v44, 0.0  ;;  %v6840_v10 = vmul.f32 %v6425_v49, %v3380_v61  ;;  %v3206_v49 = vsel %vm7250_vm14, 1.0, %v4518_v37 }
 0x600   :  { %3432 = vadd.xlane.f32.xlu1 %v3431_v56 }
 0x601   :  { %v3428_v35 = vsel %vm3051_vm3, %v6840_v10, 0.0 }
 0x602   :  { %3429 = vadd.xlane.f32.xlu0 %v3428_v35 }
 0x603   :  { %v3343_v46 = vpop.xlane.xlu1 %3342 }
 0x604   :  { %vm3367_vm13 = vcmp.eq.f32.partialorder %v6454_v30, %v3343_v46 }
 0x605   :  { %v3383_v2 = vsel %vm3367_vm13, 1.0, %v3207_v20  ;;  %v3340_v11 = vpop.xlane.xlu0 %3339 }
 0x606   :  { %vm3366_vm2 = vcmp.eq.f32.partialorder %v6454_v30, %v3340_v11  ;;  %v6855_v39 = vmul.f32 %v6429_v36, %v3383_v2 }
 0x607   :  { %v3382_v57 = vsel %vm3366_vm2, 1.0, %v3206_v49 }
 0x608   :  { %v3437_v5 = vsel %vm3051_vm3, %v6855_v39, 0.0  ;;  %v6860_v6 = vmul.f32 %v6433_v59, %v3382_v57  ;;  %v3208_v59 = vsel %vm7252_vm0, 1.0, %v4518_v37 }
 0x609   :  { %3438 = vadd.xlane.f32.xlu1 %v3437_v5 }
 0x60a   :  { %v3434_v13 = vsel %vm3051_vm3, %v6860_v6, 0.0 }
 0x60b   :  { %v3349_v25 = vpop.xlane.xlu1 %3348  ;;  %3435 = vadd.xlane.f32.xlu0 %v3434_v13 }
 0x60c   :  { %vm3369_vm4 = vcmp.eq.f32.partialorder %v6454_v30, %v3349_v25 }
 0x60d   :  { %v3385_v36 = vsel %vm3369_vm4, 1.0, %v3209_v19  ;;  %v3346_v27 = vpop.xlane.xlu0 %3345 }
 0x60e   :  { %vm3368_vm1 = vcmp.eq.f32.partialorder %v6454_v30, %v3346_v27  ;;  %v6875_v29 = vmul.f32 %v6437_v60, %v3385_v36 }
 0x60f   :  { %v3384_v18 = vsel %vm3368_vm1, 1.0, %v3208_v59 }
 0x610   :  { %v3443_v4 = vsel %vm3051_vm3, %v6875_v29, 0.0  ;;  %v6880_v24 = vmul.f32 %v6441_v12, %v3384_v18  ;;  %v3210_v12 = vsel %vm7254_vm7, 1.0, %v4518_v37 }
 0x611   :  { %3444 = vadd.xlane.f32.xlu1 %v3443_v4 }
 0x612   :  { %v3440_v52 = vsel %vm3051_vm3, %v6880_v24, 0.0 }
 0x613   :  { %3441 = vadd.xlane.f32.xlu0 %v3440_v52 }
 0x614   :  { %v3355_v42 = vpop.xlane.xlu1 %3354 }
 0x615   :  { %vm3371_vm6 = vcmp.eq.f32.partialorder %v6454_v30, %v3355_v42 }
 0x616   :  { %v3387_v60 = vsel %vm3371_vm6, 1.0, %v3211_v34  ;;  %v3352_v15 = vpop.xlane.xlu0 %3351 }
 0x617   :  { %vm3370_vm8 = vcmp.eq.f32.partialorder %v6454_v30, %v3352_v15  ;;  %v6895_v33 = vmul.f32 %v6445_v41, %v3387_v60 }
 0x618   :  { %v3386_v0 = vsel %vm3370_vm8, 1.0, %v3210_v12 }
 0x619   :  { %v3449_v48 = vsel %vm3051_vm3, %v6895_v33, 0.0  ;;  %v6900_v51 = vmul.f32 %v6449_v7, %v3386_v0 }
 0x61a   :  { %3450 = vadd.xlane.f32.xlu1 %v3449_v48 }
 0x61b   :  { %v3446_v14 = vsel %vm3051_vm3, %v6900_v51, 0.0 }
 0x61c   :  { %3447 = vadd.xlane.f32.xlu0 %v3446_v14 }
 0x64b   :  { %v3409_v47 = vpop.xlane.xlu1 %3408 }
 0x64c   :  { %v3453_v8 = vadd.f32 1e-08, %v3409_v47 }
 0x64e   :  { %4435 = vrcp.f32 %v3453_v8 }
 0x64f   :  { %v3406_v37 = vpop.xlane.xlu0 %3405 }
 0x650   :  { %v3452_v30 = vadd.f32 1e-08, %v3406_v37 }
 0x652   :  { %4437 = vrcp.f32 %v3452_v30 }
 0x65b   :  { %v4436_v41 = vpop.eup %4435 }
 0x65c   :  { %v3485_v55 = vmul.f32 %v4436_v41, %v6750_v54  ;;  %v3415_v38 = vpop.xlane.xlu1 %3414 }
 0x65d   :  { %v3455_v21 = vadd.f32 1e-08, %v3415_v38 }
 0x65e   :  { %3501 = vst.msk [vmem:[%s6991_s7 + $0x8] sm:$0xff] %vm3051_vm3, %v3485_v55 }
 0x65f   :  { %v4438_v7 = vpop.eup %4437  ;;  %4439 = vrcp.f32 %v3455_v21 }
 0x660   :  { %v3484_v53 = vmul.f32 %v4438_v7, %v6760_v58  ;;  %v3412_v63 = vpop.xlane.xlu0 %3411 }
 0x661   :  { %v3454_v17 = vadd.f32 1e-08, %v3412_v63 }
 0x662   :  { %3500 = vst.msk [vmem:[%s6991_s7] sm:$0xff] %vm3051_vm3, %v3484_v53 }
 0x663   :  { %4441 = vrcp.f32 %v3454_v17 }
 0x66c   :  { %v4440_v54 = vpop.eup %4439 }
 0x66d   :  { %v3487_v1 = vmul.f32 %v4440_v54, %v6770_v31  ;;  %v3421_v50 = vpop.xlane.xlu1 %3420 }
 0x66e   :  { %v3457_v32 = vadd.f32 1e-08, %v3421_v50 }
 0x66f   :  { %3503 = vst.msk [vmem:[%s6991_s7 + $0x18] sm:$0xff] %vm3051_vm3, %v3487_v1  ;;  %v3418_v22 = vpop.xlane.xlu0 %3417 }
 0x670   :  { %v4442_v58 = vpop.eup %4441  ;;  %4443 = vrcp.f32 %v3457_v32  ;;  %v3456_v43 = vadd.f32 1e-08, %v3418_v22 }
 0x671   :  { %v3486_v45 = vmul.f32 %v4442_v58, %v6780_v62 }
 0x672   :  { %4445 = vrcp.f32 %v3456_v43 }
 0x673   :  { %3502 = vst.msk [vmem:[%s6991_s7 + $0x10] sm:$0xff] %vm3051_vm3, %v3486_v45 }
 0x67d   :  { %v4444_v31 = vpop.eup %4443 }
 0x67e   :  { %v3489_v40 = vmul.f32 %v4444_v31, %v6795_v26  ;;  %v3427_v9 = vpop.xlane.xlu1 %3426 }
 0x67f   :  { %v4446_v16 = vpop.eup %4445  ;;  %v3459_v61 = vadd.f32 1e-08, %v3427_v9 }
 0x680   :  { %3505 = vst.msk [vmem:[%s6991_s7 + $0x28] sm:$0xff] %vm3051_vm3, %v3489_v40  ;;  %v3488_v56 = vmul.f32 %v4446_v16, %v6800_v28  ;;  %v3424_v62 = vpop.xlane.xlu0 %3423 }
 0x681   :  { %4447 = vrcp.f32 %v3459_v61  ;;  %v3458_v35 = vadd.f32 1e-08, %v3424_v62 }
 0x682   :  { %3504 = vst.msk [vmem:[%s6991_s7 + $0x20] sm:$0xff] %vm3051_vm3, %v3488_v56 }
 0x683   :  { %4449 = vrcp.f32 %v3458_v35 }
 0x689   :  { %v3433_v26 = vpop.xlane.xlu1 %3432 }
 0x68a   :  { %v3461_v46 = vadd.f32 1e-08, %v3433_v26 }
 0x68b   :  { %v3430_v20 = vpop.xlane.xlu0 %3429 }
 0x68c   :  { %4451 = vrcp.f32 %v3461_v46  ;;  %v3460_v2 = vadd.f32 1e-08, %v3430_v20 }
 0x68e   :  { %v4448_v11 = vpop.eup %4447  ;;  %4453 = vrcp.f32 %v3460_v2 }
 0x68f   :  { %v3491_v49 = vmul.f32 %v4448_v11, %v6815_v3 }
 0x690   :  { %v4450_v57 = vpop.eup %4449 }
 0x691   :  { %3507 = vst.msk [vmem:[%s6991_s7 + $0x38] sm:$0xff] %vm3051_vm3, %v3491_v49  ;;  %v3490_v28 = vmul.f32 %v4450_v57, %v6820_v23 }
 0x692   :  { %v3439_v5 = vpop.xlane.xlu1 %3438 }
 0x693   :  { %3506 = vst.msk [vmem:[%s6991_s7 + $0x30] sm:$0xff] %vm3051_vm3, %v3490_v28  ;;  %v3463_v13 = vadd.f32 1e-08, %v3439_v5 }
 0x694   :  { %v3436_v25 = vpop.xlane.xlu0 %3435 }
 0x695   :  { %4455 = vrcp.f32 %v3463_v13  ;;  %v3462_v19 = vadd.f32 1e-08, %v3436_v25 }
 0x697   :  { %4457 = vrcp.f32 %v3462_v19 }
 0x699   :  { %v4452_v3 = vpop.eup %4451 }
 0x69a   :  { %v3493_v36 = vmul.f32 %v4452_v3, %v6835_v44  ;;  %v3445_v27 = vpop.xlane.xlu1 %3444 }
 0x69b   :  { %v4454_v59 = vpop.eup %4453  ;;  %v3465_v18 = vadd.f32 1e-08, %v3445_v27 }
 0x69c   :  { %3509 = vst.msk [vmem:[%s6991_s7 + $0x48] sm:$0xff] %vm3051_vm3, %v3493_v36  ;;  %v3492_v23 = vmul.f32 %v4454_v59, %v6840_v10  ;;  %v3442_v4 = vpop.xlane.xlu0 %3441 }
 0x69d   :  { %4459 = vrcp.f32 %v3465_v18  ;;  %v3464_v52 = vadd.f32 1e-08, %v3442_v4 }
 0x69e   :  { %3508 = vst.msk [vmem:[%s6991_s7 + $0x40] sm:$0xff] %vm3051_vm3, %v3492_v23 }
 0x69f   :  { %4461 = vrcp.f32 %v3464_v52 }
 0x6a2   :  { %v4456_v44 = vpop.eup %4455 }
 0x6a3   :  { %v3495_v42 = vmul.f32 %v4456_v44, %v6855_v39  ;;  %v3451_v34 = vpop.xlane.xlu1 %3450 }
 0x6a4   :  { %v4458_v60 = vpop.eup %4457  ;;  %v3467_v15 = vadd.f32 1e-08, %v3451_v34 }
 0x6a5   :  { %3511 = vst.msk [vmem:[%s6991_s7 + $0x58] sm:$0xff] %vm3051_vm3, %v3495_v42  ;;  %v3494_v10 = vmul.f32 %v4458_v60, %v6860_v6  ;;  %v3448_v12 = vpop.xlane.xlu0 %3447 }
 0x6a6   :  { %4463 = vrcp.f32 %v3467_v15  ;;  %v3466_v0 = vadd.f32 1e-08, %v3448_v12 }
 0x6a7   :  { %3510 = vst.msk [vmem:[%s6991_s7 + $0x50] sm:$0xff] %vm3051_vm3, %v3494_v10 }
 0x6a8   :  { %4465 = vrcp.f32 %v3466_v0 }
 0x6aa   :  { %v4460_v39 = vpop.eup %4459 }
 0x6ab   :  { %v3497_v48 = vmul.f32 %v4460_v39, %v6875_v29 }
 0x6ac   :  { %v4462_v14 = vpop.eup %4461 }
 0x6ad   :  { %3513 = vst.msk [vmem:[%s6991_s7 + $0x68] sm:$0xff] %vm3051_vm3, %v3497_v48  ;;  %v3496_v6 = vmul.f32 %v4462_v14, %v6880_v24 }
 0x6af   :  { %3512 = vst.msk [vmem:[%s6991_s7 + $0x60] sm:$0xff] %vm3051_vm3, %v3496_v6 }
 0x6b3   :  { %v4464_v47 = vpop.eup %4463 }
 0x6b4   :  { %v3499_v8 = vmul.f32 %v4464_v47, %v6895_v33 }
 0x6b5   :  { %v4466_v37 = vpop.eup %4465 }
 0x6b6   :  { %3515 = vst.msk [vmem:[%s6991_s7 + $0x78] sm:$0xff] %vm3051_vm3, %v3499_v8  ;;  %v3498_v29 = vmul.f32 %v4466_v37, %v6900_v51 }
 0x6b8   :  { %3514 = vst.msk [vmem:[%s6991_s7 + $0x70] sm:$0xff] %vm3051_vm3, %v3498_v29 }
 0x6b9   :  { %3520 = vsyncpa [#allocation3], 1 }
 0x6ba   :  { %3521 = vsyncpa [#allocation5], 1 }

// kernel: _lambda_.3
= control target key start
LH: loop header
LB: loop body
LE: loop exit
PB: predicated region body
PF: predicated region fallthrough
CT: control target
= control target key end

     0   :  { %vm109_vm0 = vcmask 64512   ;;  %v4937_v0 = vmov 0.0   ;;  %s7881_s0 = inlined_call_operand.<no memory space> [shape: s32[1], index: 0, kind: input, shape index: {}]   ;;  %s7882_s1 = inlined_call_operand.<no memory space> [shape: s32[1], index: 1, kind: input, shape index: {}]   ;;  %s7883_s2 = inlined_call_operand.vmem [shape: f32[128,64], index: 2, kind: input, shape index: {}]   ;;  %s7884_s3 = inlined_call_operand.vmem [shape: f32[1,128,8], index: 3, kind: input, shape index: {}]   ;;  %s7885_s4 = inlined_call_operand.vmem [shape: f32[8,1024], index: 4, kind: input, shape index: {}]   ;;  %s7886_s9 = inlined_call_operand.vmem [shape: f32[128,8], index: 9, kind: output, shape index: {}]   ;;  %s7887_s5 = inlined_call_operand.vmem [shape: bf16[1,64,1024], index: 5, kind: input, shape index: {}]   ;;  %s7888_s6 = inlined_call_operand.vmem [shape: f32[1,1,1024], index: 6, kind: input, shape index: {}]   ;;  %s7889_s8 = inlined_call_operand.vmem [shape: f32[1,8,8], index: 8, kind: input, shape index: {}]   ;;  %s7890_s7 = inlined_call_operand.vmem [shape: bf16[1,1024,8], index: 7, kind: input, shape index: {}]  }
   0x1   :  { %p79_p0 = scmp.lt.s32.totalorder %s7882_s1, 0  ;;  %110 = vst.msk [vmem:[#allocation2] sm:$0xff] %vm109_vm0, %v4937_v0  ;;  %111 = vst.msk [vmem:[#allocation2 + $0x8] sm:$0xff] %vm109_vm0, %v4937_v0  ;;  %p4091_p1 = scmp.eq.s32.totalorder %s7881_s0, 0 }
   0x2   :  { %112 = vst.msk [vmem:[#allocation2 + $0x10] sm:$0xff] %vm109_vm0, %v4937_v0  ;;  %113 = vst.msk [vmem:[#allocation2 + $0x18] sm:$0xff] %vm109_vm0, %v4937_v0 }
   0x3   :  { %114 = vst.msk [vmem:[#allocation2 + $0x20] sm:$0xff] %vm109_vm0, %v4937_v0  ;;  %115 = vst.msk [vmem:[#allocation2 + $0x28] sm:$0xff] %vm109_vm0, %v4937_v0  ;;  %s8607_s1 = smov (!%p79_p0, %s7882_s1), 0 }
   0x4   :  { %116 = vst.msk [vmem:[#allocation2 + $0x30] sm:$0xff] %vm109_vm0, %v4937_v0  ;;  %117 = vst.msk [vmem:[#allocation2 + $0x38] sm:$0xff] %vm109_vm0, %v4937_v0  ;;  %s4300_s15 = sshll.u32 %s8607_s1, 8  ;;  %s4087_s16 = sshll.u32 %s8607_s1, 3 }
   0x5   :  { %118 = vst.msk [vmem:[#allocation2 + $0x40] sm:$0xff] %vm109_vm0, %v4937_v0  ;;  %119 = vst.msk [vmem:[#allocation2 + $0x48] sm:$0xff] %vm109_vm0, %v4937_v0  ;;  %s5019_s19 = scalar_lea.vmem %s7887_s5, %s4300_s15  ;;  %s5024_s22 = scalar_lea.vmem %s7888_s6, %s4087_s16 }
   0x6   :  { %120 = vst.msk [vmem:[#allocation2 + $0x50] sm:$0xff] %vm109_vm0, %v4937_v0  ;;  %121 = vst.msk [vmem:[#allocation2 + $0x58] sm:$0xff] %vm109_vm0, %v4937_v0  ;;  %s4301_s23 = sshll.u32 %s8607_s1, 9  ;;  %s5029_s26 = scalar_lea.vmem %s7889_s8, %s4087_s16 }
   0x7   :  { %122 = vst.msk [vmem:[#allocation2 + $0x60] sm:$0xff] %vm109_vm0, %v4937_v0  ;;  %123 = vst.msk [vmem:[#allocation2 + $0x68] sm:$0xff] %vm109_vm0, %v4937_v0  ;;  %s5034_s29 = scalar_lea.vmem %s7890_s7, %s4301_s23  ;;  %130 = sbr.rel (%p4091_p1) target bundleno = 825 (0x339), region = 37 }
   0x8   :  { %124 = vst.msk [vmem:[#allocation2 + $0x70] sm:$0xff] %vm109_vm0, %v4937_v0  ;;  %125 = vst.msk [vmem:[#allocation2 + $0x78] sm:$0xff] %vm109_vm0, %v4937_v0 }
   0xc   :  { %v179_v1 = vld [vmem:[%s5019_s19 + $0xc0] sm:$0xff]  ;;  %v4938_v7 = vmov 0   ;;  %v180_v17 = vld [vmem:[%s5019_s19 + $0xc8] sm:$0xff]  ;;  %v181_v19 = vld [vmem:[%s5019_s19 + $0xd0] sm:$0xff]  ;;  %vm389_vm1 = vcmask 523264  }
   0xd   :  { %v183_v2 = vld [vmem:[%s5019_s19 + $0xe0] sm:$0xff]  ;;  %446 = vmatprep.mubr.bf16.mxu0 %v4938_v7  ;;  %506 = vmatprep.mubr.bf16.mxu1 %v4938_v7  ;;  %v184_v18 = vld [vmem:[%s5019_s19 + $0xe8] sm:$0xff]  ;;  %v185_v20 = vld [vmem:[%s5019_s19 + $0xf0] sm:$0xff] }
   0xe   :  { %v171_v3 = vld [vmem:[%s5019_s19 + $0x80] sm:$0xff]  ;;  %v4117_v4 = vcombine.high %v179_v1, %v183_v2  ;;  %v4116_v5 = vcombine.low %v179_v1, %v183_v2  ;;  %v132_v23 = vld [vmem:[%s7883_s2 + $0x8] sm:$0xff]  ;;  %v4119_v26 = vcombine.high %v180_v17, %v184_v18  ;;  %v4121_v27 = vcombine.high %v181_v19, %v185_v20  ;;  %v173_v33 = vld [vmem:[%s5019_s19 + $0x90] sm:$0xff] }
   0xf   :  { %v175_v6 = vld [vmem:[%s5019_s19 + $0xa0] sm:$0xff]  ;;  %v144_v25 = vld [vmem:[%s7883_s2 + $0x68] sm:$0xff]  ;;  %v4118_v32 = vcombine.low %v180_v17, %v184_v18  ;;  %v177_v34 = vld [vmem:[%s5019_s19 + $0xb0] sm:$0xff]  ;;  %v4120_v42 = vcombine.low %v181_v19, %v185_v20 }
  0x10   :  { %v4109_v8 = vcombine.high %v171_v3, %v175_v6  ;;  %v163_v9 = vld [vmem:[%s5019_s19 + $0x40] sm:$0xff]  ;;  %422 = vmatprep.subr.bf16.mxu0 %v4117_v4  ;;  %4601 = vmatprep.subr.bf16.mxu1 %v4117_v4  ;;  %v4108_v11 = vcombine.low %v171_v3, %v175_v6  ;;  %v172_v28 = vld [vmem:[%s5019_s19 + $0x88] sm:$0xff]  ;;  %v133_v36 = vld [vmem:[%s7883_s2 + $0x10] sm:$0xff]  ;;  %v4113_v43 = vcombine.high %v173_v33, %v177_v34 }
  0x11   :  { %v167_v10 = vld [vmem:[%s5019_s19 + $0x60] sm:$0xff]  ;;  %423 = vmatpush1.bf16.msra.mxu0 %v4116_v5  ;;  %4605 = vmatpush1.bf16.msra.mxu1 %v4116_v5  ;;  %v176_v29 = vld [vmem:[%s5019_s19 + $0xa8] sm:$0xff]  ;;  %v134_v37 = vld [vmem:[%s7883_s2 + $0x18] sm:$0xff]  ;;  %v4112_v50 = vcombine.low %v173_v33, %v177_v34 }
  0x12   :  { %424 = vmatprep.subr.bf16.mxu0 %v4109_v8  ;;  %4602 = vmatprep.subr.bf16.mxu1 %v4109_v8  ;;  %v4101_v12 = vcombine.high %v163_v9, %v167_v10  ;;  %v155_v13 = vld [vmem:[%s5019_s19] sm:$0xff]  ;;  %v4100_v15 = vcombine.low %v163_v9, %v167_v10  ;;  %v4111_v35 = vcombine.high %v172_v28, %v176_v29  ;;  %v145_v38 = vld [vmem:[%s7883_s2 + $0x70] sm:$0xff]  ;;  %v146_v39 = vld [vmem:[%s7883_s2 + $0x78] sm:$0xff] }
  0x13   :  { %v159_v14 = vld [vmem:[%s5019_s19 + $0x20] sm:$0xff]  ;;  %v164_v40 = vld [vmem:[%s5019_s19 + $0x48] sm:$0xff]  ;;  %v4110_v44 = vcombine.low %v172_v28, %v176_v29  ;;  %v165_v48 = vld [vmem:[%s5019_s19 + $0x50] sm:$0xff]  ;;  %v5097_v51 = vpack.c.bf16 %v134_v37, %v133_v36  ;;  %v5099_v52 = vpack.c.bf16 %v146_v39, %v145_v38 }
  0x14   :  { %v4093_v16 = vcombine.high %v155_v13, %v159_v14  ;;  %v131_v21 = vld [vmem:[%s7883_s2] sm:$0xff]  ;;  %v4092_v22 = vcombine.low %v155_v13, %v159_v14  ;;  %v168_v41 = vld [vmem:[%s5019_s19 + $0x68] sm:$0xff]  ;;  %v169_v49 = vld [vmem:[%s5019_s19 + $0x70] sm:$0xff] }
  0x15   :  { %425 = vmatpush1.bf16.msra.mxu0 %v4108_v11  ;;  %4606 = vmatpush1.bf16.msra.mxu1 %v4108_v11  ;;  %v143_v24 = vld [vmem:[%s7883_s2 + $0x60] sm:$0xff]  ;;  %v5067_v30 = vpack.c.bf16 %v132_v23, %v131_v21  ;;  %v156_v45 = vld [vmem:[%s5019_s19 + $0x8] sm:$0xff]  ;;  %v4103_v47 = vcombine.high %v164_v40, %v168_v41  ;;  %v157_v53 = vld [vmem:[%s5019_s19 + $0x10] sm:$0xff]  ;;  %v4102_v55 = vcombine.low %v164_v40, %v168_v41 }
  0x16   :  { %426 = vmatprep.subr.bf16.mxu0 %v4101_v12  ;;  %4603 = vmatprep.subr.bf16.mxu1 %v4101_v12  ;;  %v5069_v31 = vpack.c.bf16 %v144_v25, %v143_v24  ;;  %v160_v46 = vld [vmem:[%s5019_s19 + $0x28] sm:$0xff]  ;;  %v161_v54 = vld [vmem:[%s5019_s19 + $0x30] sm:$0xff]  ;;  %v182_v56 = vld [vmem:[%s5019_s19 + $0xd8] sm:$0xff]  ;;  %v4105_v61 = vcombine.high %v165_v48, %v169_v49  ;;  %v4104_v62 = vcombine.low %v165_v48, %v169_v49 }
  0x17   :  { %v4095_v57 = vcombine.high %v156_v45, %v160_v46  ;;  %v135_v58 = vld [vmem:[%s7883_s2 + $0x20] sm:$0xff]  ;;  %v136_v59 = vld [vmem:[%s7883_s2 + $0x28] sm:$0xff]  ;;  %v186_v60 = vld [vmem:[%s5019_s19 + $0xf8] sm:$0xff]  ;;  %v4094_v63 = vcombine.low %v156_v45, %v160_v46  ;;  %v4097_v2 = vcombine.high %v157_v53, %v161_v54  ;;  %v4096_v11 = vcombine.low %v157_v53, %v161_v54 }
  0x18   :  { %v174_v0 = vld [vmem:[%s5019_s19 + $0x98] sm:$0xff]  ;;  %v4123_v3 = vcombine.high %v182_v56, %v186_v60  ;;  %v5119_v4 = vpack.c.bf16 %v136_v59, %v135_v58  ;;  %v4122_v5 = vcombine.low %v182_v56, %v186_v60  ;;  %v137_v10 = vld [vmem:[%s7883_s2 + $0x30] sm:$0xff]  ;;  %v2035_v13 = vld [vmem:[%s7885_s4 + $0x8] sm:$0xff]  ;;  %v189_v53 = vlaneseq }
  0x19   :  { %427 = vmatpush1.bf16.msra.mxu0 %v4100_v15  ;;  %4607 = vmatpush1.bf16.msra.mxu1 %v4100_v15  ;;  %v178_v1 = vld [vmem:[%s5019_s19 + $0xb8] sm:$0xff]  ;;  %v139_v20 = vld [vmem:[%s7883_s2 + $0x40] sm:$0xff]  ;;  %v2036_v33 = vld [vmem:[%s7885_s4 + $0x10] sm:$0xff] }
  0x1a   :  { %428 = vmatprep.subr.bf16.mxu0 %v4093_v16  ;;  %4604 = vmatprep.subr.bf16.mxu1 %v4093_v16  ;;  %v166_v6 = vld [vmem:[%s5019_s19 + $0x58] sm:$0xff]  ;;  %v4115_v9 = vcombine.high %v174_v0, %v178_v1  ;;  %v4114_v14 = vcombine.low %v174_v0, %v178_v1  ;;  %v2034_v29 = vld [vmem:[%s7885_s4] sm:$0xff]  ;;  %v5244_v37 = vld [vmem:[%s7884_s3 + $0x8] sm:$0xff]  ;;  %v190_v54 = vshrl.u32 %v189_v53, 7 }
  0x1b   :  { %v170_v8 = vld [vmem:[%s5019_s19 + $0x78] sm:$0xff]  ;;  %v2038_v36 = vld [vmem:[%s7885_s4 + $0x20] sm:$0xff]  ;;  %v5253_v38 = vld [vmem:[%s7884_s3 + $0x10] sm:$0xff] }
  0x1c   :  { %v138_v12 = vld [vmem:[%s7883_s2 + $0x38] sm:$0xff]  ;;  %v4107_v15 = vcombine.high %v166_v6, %v170_v8  ;;  %v4106_v19 = vcombine.low %v166_v6, %v170_v8  ;;  %v5271_v40 = vld [vmem:[%s7884_s3 + $0x20] sm:$0xff]  ;;  %v5326_v45 = vld [vmem:[%s7884_s3 + $0x48] sm:$0xff]  ;;  %v211_v8 = vsub.s32 5, %v190_v54 }
  0x1d   :  { %429 = vmatpush1.bf16.msra.mxu0 %v4092_v22  ;;  %4608 = vmatpush1.bf16.msra.mxu1 %v4092_v22  ;;  %v158_v16 = vld [vmem:[%s5019_s19 + $0x18] sm:$0xff]  ;;  %v5140_v18 = vpack.c.bf16 %v138_v12, %v137_v10  ;;  %v140_v22 = vld [vmem:[%s7883_s2 + $0x48] sm:$0xff]  ;;  %v5274_v41 = vld [vmem:[%s5029_s26] sm:$0xff]  ;;  %v219_v12 = vsub.s32 7, %v190_v54 }
  0x1e   :  { %535 = vmatprep.subr.bf16.mxu1 %v4119_v26  ;;  %648 = vmatprep.subr.bf16.mxu0 %v4121_v27  ;;  %v162_v17 = vld [vmem:[%s5019_s19 + $0x38] sm:$0xff]  ;;  %v151_v25 = vpack.c.bf16 %v140_v22, %v139_v20  ;;  %v141_v26 = vld [vmem:[%s7883_s2 + $0x50] sm:$0xff]  ;;  %v5361_v49 = vld [vmem:[%s7884_s3 + $0x60] sm:$0xff] }
  0x1f   :  { %v4099_v21 = vcombine.high %v158_v16, %v162_v17  ;;  %v4098_v23 = vcombine.low %v158_v16, %v162_v17  ;;  %v2037_v24 = vld [vmem:[%s7885_s4 + $0x18] sm:$0xff]  ;;  %v5338_v46 = vld [vmem:[%s7884_s3 + $0x50] sm:$0xff]  ;;  %8102 = vst [vmem:[#allocation7_spill] sm:$0xff] %v5361_v49  ;;  %v187_v56 = vld [vmem:[%s5024_s22] sm:$0xff] }
  0x20   :  { %4124 = vmatmul.mubr.msk.bf16.vlgmr.msra.gmra.mxu0 %vm389_vm1, %v5067_v30  ;;  %4130 = vmatmul.mubr.msk.bf16.vlgmr.msra.gmra.mxu1 %vm389_vm1, %v5069_v31  ;;  %v142_v27 = vld [vmem:[%s7883_s2 + $0x58] sm:$0xff] }
  0x21   :  { %536 = vmatpush1.bf16.msra.mxu1 %v4118_v32  ;;  %456 = vmatprep.mubr.bf16.mxu0 %v4938_v7  ;;  %v152_v28 = vpack.c.bf16 %v142_v27, %v141_v26  ;;  %v2039_v32 = vld [vmem:[%s7885_s4 + $0x28] sm:$0xff]  ;;  %v2041_v34 = vld [vmem:[%s7885_s4 + $0x38] sm:$0xff] }
  0x22   :  { %537 = vmatprep.subr.bf16.mxu1 %v4111_v35  ;;  %516 = vmatprep.mubr.bf16.mxu1 %v4938_v7  ;;  %v5232_v35 = vld [vmem:[%s7884_s3] sm:$0xff]  ;;  %v5262_v39 = vld [vmem:[%s7884_s3 + $0x18] sm:$0xff] }
  0x23   :  { %649 = vmatpush1.bf16.msra.mxu0 %v4120_v42  ;;  %v5284_v42 = vld [vmem:[%s7884_s3 + $0x28] sm:$0xff]  ;;  %v4612_v48 = vld [vmem:[%s5034_s29 + $0x78] sm:$0xff]  }
  0x24   :  { %650 = vmatprep.subr.bf16.mxu0 %v4113_v43  ;;  %v5313_v43 = vld [vmem:[%s7884_s3 + $0x40] sm:$0xff]  ;;  %v4628_v58 = vld [vmem:[%s5034_s29 + $0xf8] sm:$0xff]  }
  0x25   :  { %538 = vmatpush1.bf16.msra.mxu1 %v4110_v44  ;;  %v2040_v44 = vld [vmem:[%s7885_s4 + $0x30] sm:$0xff] }
  0x26   :  { %539 = vmatprep.subr.bf16.mxu1 %v4103_v47  ;;  %v5349_v47 = vld [vmem:[%s7884_s3 + $0x58] sm:$0xff] }
  0x27   :  { %651 = vmatpush1.bf16.msra.mxu0 %v4112_v50  ;;  %8101 = vst [vmem:[#allocation6_spill] sm:$0xff] %v5349_v47  ;;  %v5372_v50 = vld [vmem:[%s7884_s3 + $0x68] sm:$0xff] }
  0x28   :  { %4125 = vmatmul.mubr.msk.bf16.gmra.mxu0 %vm389_vm1, %v5097_v51  ;;  %4131 = vmatmul.mubr.msk.bf16.gmra.mxu1 %vm389_vm1, %v5099_v52  ;;  %8103 = vst [vmem:[#allocation8_spill] sm:$0xff] %v5372_v50 }
  0x29   :  { %540 = vmatpush1.bf16.msra.mxu1 %v4102_v55  ;;  %466 = vmatprep.mubr.bf16.mxu0 %v4938_v7  ;;  %v191_v55 = vsub.s32 0, %v190_v54 }
  0x2a   :  { %541 = vmatprep.subr.bf16.mxu1 %v4095_v57  ;;  %559 = vmatprep.mubr.bf16.mxu1 %v4938_v7  ;;  %v195_v57 = vsub.s32 1, %v190_v54 }
  0x2b   :  { %652 = vmatprep.subr.bf16.mxu0 %v4105_v61  ;;  %v5429_v59 = vrot.slane %v187_v56, %v191_v55 }
  0x2c   :  { %653 = vmatpush1.bf16.msra.mxu0 %v4104_v62 }
  0x2d   :  { %542 = vmatpush1.bf16.msra.mxu1 %v4094_v63  ;;  %654 = vmatprep.subr.bf16.mxu0 %v4097_v2  ;;  %v5436_v63 = vrot.slane %v187_v56, %v195_v57  ;;  %v199_v2 = vsub.s32 2, %v190_v54 }
  0x2e   :  { %761 = vmatprep.subr.bf16.mxu1 %v4123_v3  ;;  %v203_v3 = vsub.s32 3, %v190_v54 }
  0x30   :  { %4126 = vmatmul.mubr.msk.bf16.gmra.mxu0 %vm389_vm1, %v5119_v4  ;;  %4132 = vmatmul.mubr.msk.bf16.vlgmr.msra.gmra.mxu1 %vm389_vm1, %v5067_v30 }
  0x31   :  { %762 = vmatpush1.bf16.msra.mxu1 %v4122_v5  ;;  %476 = vmatprep.mubr.bf16.mxu0 %v4938_v7 }
  0x32   :  { %569 = vmatprep.mubr.bf16.mxu1 %v4938_v7  ;;  %763 = vmatprep.subr.bf16.mxu1 %v4115_v9  ;;  %v215_v9 = vsub.s32 6, %v190_v54 }
  0x33   :  { %655 = vmatpush1.bf16.msra.mxu0 %v4096_v11 }
  0x34   :  { %2121 = vmatprep.subr.mxu0 %v2035_v13 }
  0x35   :  { %764 = vmatpush1.bf16.msra.mxu1 %v4114_v14 }
  0x36   :  { %765 = vmatprep.subr.bf16.mxu1 %v4107_v15 }
  0x38   :  { %4127 = vmatmul.mubr.msk.bf16.gmra.mxu0 %vm389_vm1, %v5140_v18  ;;  %4133 = vmatmul.mubr.msk.bf16.gmra.mxu1 %vm389_vm1, %v5097_v51 }
  0x39   :  { %486 = vmatprep.mubr.bf16.mxu0 %v4938_v7  ;;  %579 = vmatprep.mubr.bf16.mxu1 %v4938_v7 }
  0x3a   :  { %766 = vmatpush1.bf16.msra.mxu1 %v4106_v19  ;;  %v5458_v19 = vrot.slane %v187_v56, %v203_v3 }
  0x3b   :  { %767 = vmatprep.subr.bf16.mxu1 %v4099_v21 }
  0x3e   :  { %768 = vmatpush1.bf16.msra.mxu1 %v4098_v23 }
  0x3f   :  { %2282 = vmatprep.subr.mxu1 %v2037_v24  ;;  %v5466_v24 = vrot.slane %v187_v56, %v211_v8 }
  0x40   :  { %4128 = vmatmul.mubr.msk.bf16.gmra.mxu0 %vm389_vm1, %v151_v25  ;;  %4134 = vmatmul.mubr.msk.bf16.gmra.mxu1 %vm389_vm1, %v5119_v4 }
  0x41   :  { %496 = vmatprep.mubr.bf16.mxu0 %v4938_v7  ;;  %589 = vmatprep.mubr.bf16.mxu1 %v4938_v7 }
  0x48   :  { %4129 = vmatmul.mubr.msk.bf16.gmra.mxu0 %vm389_vm1, %v152_v28  ;;  %4135 = vmatmul.mubr.msk.bf16.gmra.mxu1 %vm389_vm1, %v5140_v18 }
  0x49   :  { %599 = vmatprep.mubr.bf16.mxu1 %v4938_v7  ;;  %672 = vmatprep.mubr.bf16.mxu0 %v4938_v7 }
  0x50   :  { %4136 = vmatmul.mubr.msk.bf16.gmra.mxu1 %vm389_vm1, %v151_v25  ;;  %4140 = vmatmul.mubr.msk.bf16.vlgmr.msra.gmra.mxu0 %vm389_vm1, %v5067_v30 }
  0x51   :  { %609 = vmatprep.mubr.bf16.mxu1 %v4938_v7  ;;  %682 = vmatprep.mubr.bf16.mxu0 %v4938_v7 }
  0x52   :  { %2122 = vmatpush1.msra.mxu0 %v2034_v29 }
  0x53   :  { %2443 = vmatprep.subr.mxu0 %v2039_v32 }
  0x58   :  { %4137 = vmatmul.mubr.msk.bf16.gmra.mxu1 %vm389_vm1, %v152_v28  ;;  %4141 = vmatmul.mubr.msk.bf16.gmra.mxu0 %vm389_vm1, %v5097_v51 }
  0x59   :  { %619 = vmatprep.mubr.bf16.mxu1 %v4938_v7  ;;  %692 = vmatprep.mubr.bf16.mxu0 %v4938_v7 }
  0x60   :  { %4138 = vmatmul.mubr.msk.bf16.gmra.mxu1 %vm389_vm1, %v5069_v31  ;;  %4142 = vmatmul.mubr.msk.bf16.gmra.mxu0 %vm389_vm1, %v5119_v4 }
  0x61   :  { %629 = vmatprep.mubr.bf16.mxu1 %v4938_v7  ;;  %702 = vmatprep.mubr.bf16.mxu0 %v4938_v7 }
  0x68   :  { %4139 = vmatmul.mubr.msk.bf16.gmra.mxu1 %vm389_vm1, %v5099_v52  ;;  %4143 = vmatmul.mubr.msk.bf16.gmra.mxu0 %vm389_vm1, %v5140_v18 }
  0x69   :  { %712 = vmatprep.mubr.bf16.mxu0 %v4938_v7  ;;  %785 = vmatprep.mubr.bf16.mxu1 %v4938_v7 }
  0x70   :  { %4144 = vmatmul.mubr.msk.bf16.gmra.mxu0 %vm389_vm1, %v151_v25  ;;  %4148 = vmatmul.mubr.msk.bf16.vlgmr.msra.gmra.mxu1 %vm389_vm1, %v5067_v30  ;;  %v7891_v30 = vmov 0.0  }
  0x71   :  { %2283 = vmatpush1.msra.mxu1 %v2036_v33  ;;  %722 = vmatprep.mubr.bf16.mxu0 %v4938_v7 }
  0x72   :  { %795 = vmatprep.mubr.bf16.mxu1 %v4938_v7  ;;  %2604 = vmatprep.subr.mxu1 %v2041_v34 }
  0x78   :  { %4145 = vmatmul.mubr.msk.bf16.gmra.mxu0 %vm389_vm1, %v152_v28  ;;  %4149 = vmatmul.mubr.msk.bf16.gmra.mxu1 %vm389_vm1, %v5097_v51  ;;  %v5383_v51 = vld [vmem:[%s7884_s3 + $0x70] sm:$0xff] }
  0x79   :  { %732 = vmatprep.mubr.bf16.mxu0 %v4938_v7  ;;  %805 = vmatprep.mubr.bf16.mxu1 %v4938_v7 }
  0x80   :  { %4146 = vmatmul.mubr.msk.bf16.gmra.mxu0 %vm389_vm1, %v5069_v31  ;;  %4150 = vmatmul.mubr.msk.bf16.gmra.mxu1 %vm389_vm1, %v5119_v4  ;;  %v207_v4 = vsub.s32 4, %v190_v54 }
  0x81   :  { %742 = vmatprep.mubr.bf16.mxu0 %v4938_v7  ;;  %815 = vmatprep.mubr.bf16.mxu1 %v4938_v7 }
  0x82   :  { %v5460_v20 = vrot.slane %v187_v56, %v207_v4 }
  0x88   :  { %4147 = vmatmul.mubr.msk.bf16.gmra.mxu0 %vm389_vm1, %v5099_v52  ;;  %4151 = vmatmul.mubr.msk.bf16.gmra.mxu1 %vm389_vm1, %v5140_v18  ;;  %v5456_v18 = vrot.slane %v187_v56, %v199_v2 }
  0x89   :  { %825 = vmatprep.mubr.bf16.mxu1 %v4938_v7  ;;  %2155 = vmatprep.mubr.f32.mxu0 %v7891_v30 }
  0x90   :  { %4152 = vmatmul.mubr.msk.bf16.gmra.mxu1 %vm389_vm1, %v151_v25  ;;  %4156 = vmatmul.mubr.msk.f32.vlgmr.msra.gmra.mxu0 %vm109_vm0, %v5232_v35  ;;  %v5468_v25 = vrot.slane %v187_v56, %v215_v9 }
  0x91   :  { %2161 = vmatprep.mubr.f32.mxu0 %v7891_v30  ;;  %835 = vmatprep.mubr.bf16.mxu1 %v4938_v7 }
  0x92   :  { %2444 = vmatpush1.msra.mxu0 %v2038_v36  ;;  %8105 = vst [vmem:[#allocation10_spill] sm:$0xff] %v5468_v25 }
  0x93   :  { %4575 = vmatprep.subr.mxu0 %v5274_v41 }
  0x94   :  { %4157 = vmatmul.mubr.msk.f32.gmra.mxu0 %vm109_vm0, %v5244_v37 }
  0x95   :  { %2167 = vmatprep.mubr.f32.mxu0 %v7891_v30 }
  0x98   :  { %4153 = vmatmul.mubr.msk.bf16.gmra.mxu1 %vm389_vm1, %v152_v28  ;;  %4158 = vmatmul.mubr.msk.f32.gmra.mxu0 %vm109_vm0, %v5253_v38  ;;  %v5474_v28 = vrot.slane %v187_v56, %v219_v12 }
  0x99   :  { %2173 = vmatprep.mubr.f32.mxu0 %v7891_v30  ;;  %845 = vmatprep.mubr.bf16.mxu1 %v4938_v7 }
  0x9a   :  { %8106 = vst [vmem:[#allocation11_spill] sm:$0xff] %v5474_v28  ;;  %v4621_v28 = vld [vmem:[%s5034_s29 + $0x18] sm:$0xff]  }
  0x9c   :  { %4159 = vmatmul.mubr.msk.f32.gmra.mxu0 %vm109_vm0, %v5262_v39 }
  0x9d   :  { %2179 = vmatprep.mubr.f32.mxu0 %v7891_v30 }
  0xa0   :  { %4154 = vmatmul.mubr.msk.bf16.gmra.mxu1 %vm389_vm1, %v5069_v31  ;;  %4160 = vmatmul.mubr.msk.f32.gmra.mxu0 %vm109_vm0, %v5271_v40  ;;  %v5294_v31 = vld [vmem:[%s7884_s3 + $0x30] sm:$0xff] }
  0xa1   :  { %2185 = vmatprep.mubr.f32.mxu0 %v7891_v30  ;;  %855 = vmatprep.mubr.bf16.mxu1 %v4938_v7  ;;  %v5304_v7 = vld [vmem:[%s7884_s3 + $0x38] sm:$0xff] }
  0xa4   :  { %4161 = vmatmul.mubr.msk.f32.gmra.mxu0 %vm109_vm0, %v5284_v42 }
  0xa5   :  { %2191 = vmatprep.mubr.f32.mxu0 %v7891_v30 }
  0xa8   :  { %4155 = vmatmul.mubr.msk.bf16.gmra.mxu1 %vm389_vm1, %v5099_v52  ;;  %4162 = vmatmul.mubr.msk.f32.gmra.mxu0 %vm109_vm0, %v5294_v31  ;;  %v5394_v52 = vld [vmem:[%s7884_s3 + $0x78] sm:$0xff] }
  0xa9   :  { %2197 = vmatprep.mubr.f32.mxu0 %v7891_v30  ;;  %2316 = vmatprep.mubr.f32.mxu1 %v7891_v30 }
  0xac   :  { %4163 = vmatmul.mubr.msk.f32.gmra.mxu0 %vm109_vm0, %v5304_v7 }
  0xad   :  { %2203 = vmatprep.mubr.f32.mxu0 %v7891_v30 }
  0xb0   :  { %4164 = vmatmul.mubr.msk.f32.gmra.mxu0 %vm109_vm0, %v5313_v43  ;;  %4172 = vmatmul.mubr.msk.f32.vlgmr.msra.gmra.mxu1 %vm109_vm0, %v5232_v35 }
  0xb1   :  { %2605 = vmatpush1.msra.mxu1 %v2040_v44  ;;  %2209 = vmatprep.mubr.f32.mxu0 %v7891_v30 }
  0xb2   :  { %2322 = vmatprep.mubr.f32.mxu1 %v7891_v30  ;;  %4319 = vmatprep.subr.bf16.mxu1 %v4612_v48 }
  0xb4   :  { %4165 = vmatmul.mubr.msk.f32.gmra.mxu0 %vm109_vm0, %v5326_v45  ;;  %4173 = vmatmul.mubr.msk.f32.gmra.mxu1 %vm109_vm0, %v5244_v37 }
  0xb5   :  { %2215 = vmatprep.mubr.f32.mxu0 %v7891_v30  ;;  %2328 = vmatprep.mubr.f32.mxu1 %v7891_v30 }
  0xb8   :  { %4166 = vmatmul.mubr.msk.f32.gmra.mxu0 %vm109_vm0, %v5338_v46  ;;  %4174 = vmatmul.mubr.msk.f32.gmra.mxu1 %vm109_vm0, %v5253_v38 }
  0xb9   :  { %2221 = vmatprep.mubr.f32.mxu0 %v7891_v30  ;;  %2334 = vmatprep.mubr.f32.mxu1 %v7891_v30 }
  0xbc   :  { %4167 = vmatmul.mubr.msk.f32.gmra.mxu0 %vm109_vm0, %v5349_v47  ;;  %4175 = vmatmul.mubr.msk.f32.gmra.mxu1 %vm109_vm0, %v5262_v39 }
  0xbd   :  { %2227 = vmatprep.mubr.f32.mxu0 %v7891_v30  ;;  %2340 = vmatprep.mubr.f32.mxu1 %v7891_v30 }
  0xc0   :  { %4168 = vmatmul.mubr.msk.f32.gmra.mxu0 %vm109_vm0, %v5361_v49  ;;  %4176 = vmatmul.mubr.msk.f32.gmra.mxu1 %vm109_vm0, %v5271_v40 }
  0xc1   :  { %2233 = vmatprep.mubr.f32.mxu0 %v7891_v30  ;;  %2346 = vmatprep.mubr.f32.mxu1 %v7891_v30 }
  0xc4   :  { %4169 = vmatmul.mubr.msk.f32.gmra.mxu0 %vm109_vm0, %v5372_v50  ;;  %4177 = vmatmul.mubr.msk.f32.gmra.mxu1 %vm109_vm0, %v5284_v42 }
  0xc5   :  { %2239 = vmatprep.mubr.f32.mxu0 %v7891_v30  ;;  %2352 = vmatprep.mubr.f32.mxu1 %v7891_v30 }
  0xc8   :  { %4170 = vmatmul.mubr.msk.f32.gmra.mxu0 %vm109_vm0, %v5383_v51  ;;  %4178 = vmatmul.mubr.msk.f32.gmra.mxu1 %vm109_vm0, %v5294_v31 }
  0xc9   :  { %2245 = vmatprep.mubr.f32.mxu0 %v7891_v30  ;;  %2358 = vmatprep.mubr.f32.mxu1 %v7891_v30 }
  0xcc   :  { %4171 = vmatmul.mubr.msk.f32.gmra.mxu0 %vm109_vm0, %v5394_v52  ;;  %4179 = vmatmul.mubr.msk.f32.gmra.mxu1 %vm109_vm0, %v5304_v7 }
  0xcd   :  { %2364 = vmatprep.mubr.f32.mxu1 %v7891_v30  ;;  %2477 = vmatprep.mubr.f32.mxu0 %v7891_v30 }
  0xd0   :  { %4180 = vmatmul.mubr.msk.f32.gmra.mxu1 %vm109_vm0, %v5313_v43  ;;  %4188 = vmatmul.mubr.msk.f32.vlgmr.msra.gmra.mxu0 %vm109_vm0, %v5232_v35 }
  0xd1   :  { %2370 = vmatprep.mubr.f32.mxu1 %v7891_v30  ;;  %2483 = vmatprep.mubr.f32.mxu0 %v7891_v30 }
  0xd2   :  { %4576 = vmatpush3.msra.mxu0 %v5274_v41 }
  0xd3   :  { %4383 = vmatprep.subr.bf16.mxu0 %v4628_v58 }
  0xd4   :  { %4181 = vmatmul.mubr.msk.f32.gmra.mxu1 %vm109_vm0, %v5326_v45  ;;  %4189 = vmatmul.mubr.msk.f32.gmra.mxu0 %vm109_vm0, %v5244_v37 }
  0xd5   :  { %2376 = vmatprep.mubr.f32.mxu1 %v7891_v30  ;;  %2489 = vmatprep.mubr.f32.mxu0 %v7891_v30 }
  0xd8   :  { %4182 = vmatmul.mubr.msk.f32.gmra.mxu1 %vm109_vm0, %v5338_v46  ;;  %4190 = vmatmul.mubr.msk.f32.gmra.mxu0 %vm109_vm0, %v5253_v38 }
  0xd9   :  { %2382 = vmatprep.mubr.f32.mxu1 %v7891_v30  ;;  %2495 = vmatprep.mubr.f32.mxu0 %v7891_v30 }
  0xdc   :  { %4183 = vmatmul.mubr.msk.f32.gmra.mxu1 %vm109_vm0, %v5349_v47  ;;  %4191 = vmatmul.mubr.msk.f32.gmra.mxu0 %vm109_vm0, %v5262_v39 }
  0xdd   :  { %2388 = vmatprep.mubr.f32.mxu1 %v7891_v30  ;;  %2501 = vmatprep.mubr.f32.mxu0 %v7891_v30 }
  0xe0   :  { %v448_v60 = vpop.f32.mrf.mxu0  ;;  %v508_v61 = vpop.f32.mrf.mxu1  ;;  %4184 = vmatmul.mubr.msk.f32.gmra.mxu1 %vm109_vm0, %v5361_v49  ;;  %4192 = vmatmul.mubr.msk.f32.gmra.mxu0 %vm109_vm0, %v5271_v40 }
  0xe1   :  { %v449_v62 = vadd.f32 %v448_v60, %v5429_v59  ;;  %2394 = vmatprep.mubr.f32.mxu1 %v7891_v30  ;;  %2507 = vmatprep.mubr.f32.mxu0 %v7891_v30  ;;  %v5448_v13 = vadd.f32 %v508_v61, %v5429_v59 }
  0xe2   :  { %v450_v0 = vpop.f32.mrf.mxu0  ;;  %v510_v1 = vpop.f32.mrf.mxu1 }
  0xe3   :  { %v994_v5 = vmul.f32 0.044715, %v449_v62  ;;  %v5441_v6 = vadd.f32 %v450_v0, %v5436_v63  ;;  %8104 = vst [vmem:[#allocation9_spill] sm:$0xff] %v5448_v13  ;;  %v1090_v33 = vmul.f32 0.044715, %v5448_v13  ;;  %v5488_v44 = vadd.f32 %v510_v1, %v5436_v63 }
  0xe4   :  { %v452_v10 = vpop.f32.mrf.mxu0  ;;  %v512_v11 = vpop.f32.mrf.mxu1  ;;  %4185 = vmatmul.mubr.msk.f32.gmra.mxu1 %vm109_vm0, %v5372_v50  ;;  %4193 = vmatmul.mubr.msk.f32.gmra.mxu0 %vm109_vm0, %v5284_v42  ;;  %v5498_v60 = vmul.f32 0.5, %v449_v62  ;;  %v5501_v61 = vmul.f32 0.5, %v5448_v13 }
  0xe5   :  { %v995_v14 = vmul.f32 0.044715, %v5441_v6  ;;  %v5452_v15 = vadd.f32 %v452_v10, %v5429_v59  ;;  %2400 = vmatprep.mubr.f32.mxu1 %v7891_v30  ;;  %2513 = vmatprep.mubr.f32.mxu0 %v7891_v30  ;;  %v1122_v21 = vmul.f32 %v994_v5, %v449_v62  ;;  %8108 = vst [vmem:[#allocation13_spill] sm:$0xff] %v5488_v44 }
  0xe6   :  { %v454_v16 = vpop.f32.mrf.mxu0  ;;  %v514_v17 = vpop.f32.mrf.mxu1  ;;  %8110 = vst [vmem:[#allocation15_spill] sm:$0xff] %v5501_v61  ;;  %v5511_v5 = vadd.f32 %v512_v11, %v5429_v59  ;;  %v1218_v10 = vmul.f32 %v1090_v33, %v5448_v13  ;;  %v4614_v33 = vld [vmem:[%s5034_s29 + $0x70] sm:$0xff]   ;;  %v8123_v61 = vmov 0.0  }
  0xe7   :  { %v1002_v22 = vmul.f32 0.044715, %v5452_v15  ;;  %v5464_v23 = vadd.f32 %v454_v16, %v5436_v63  ;;  %v1250_v29 = vmul.f32 %v1122_v21, %v449_v62  ;;  %v1123_v32 = vmul.f32 %v995_v14, %v5441_v6  ;;  %v4613_v21 = vld [vmem:[%s5034_s29 + $0x38] sm:$0xff]  }
  0xe8   :  { %v458_v26 = vpop.f32.mrf.mxu0  ;;  %v518_v27 = vpop.f32.mrf.mxu1  ;;  %4186 = vmatmul.mubr.msk.f32.gmra.mxu1 %vm109_vm0, %v5383_v51  ;;  %4194 = vmatmul.mubr.msk.f32.gmra.mxu0 %vm109_vm0, %v5294_v31  ;;  %8111 = vst [vmem:[#allocation16_spill] sm:$0xff] %v5511_v5 }
  0xe9   :  { %v1003_v34 = vmul.f32 0.044715, %v5464_v23  ;;  %v5480_v36 = vadd.f32 %v458_v26, %v5429_v59  ;;  %v5483_v41 = vadd.f32 %v518_v27, %v5429_v59  ;;  %2406 = vmatprep.mubr.f32.mxu1 %v7891_v30  ;;  %2519 = vmatprep.mubr.f32.mxu0 %v7891_v30  ;;  %v1378_v54 = vadd.f32 %v1250_v29, %v449_v62 }
  0xea   :  { %v460_v48 = vpop.f32.mrf.mxu0  ;;  %v520_v53 = vpop.f32.mrf.mxu1  ;;  %v1251_v55 = vmul.f32 %v1123_v32, %v5441_v6  ;;  %v1130_v56 = vmul.f32 %v1002_v22, %v5452_v15  ;;  %v5527_v27 = vadd.f32 %v514_v17, %v5436_v63 }
  0xeb   :  { %8107 = vst [vmem:[#allocation12_spill] sm:$0xff] %v5483_v41  ;;  %v5493_v57 = vadd.f32 %v460_v48, %v5436_v63  ;;  %v5496_v58 = vadd.f32 %v520_v53, %v5436_v63  ;;  %v1506_v2 = vmul.f32 0.7978846, %v1378_v54  ;;  %v1131_v62 = vmul.f32 %v1003_v34, %v5464_v23 }
  0xec   :  { %v462_v0 = vpop.f32.mrf.mxu0  ;;  %v522_v1 = vpop.f32.mrf.mxu1  ;;  %4187 = vmatmul.mubr.msk.f32.gmra.mxu1 %vm109_vm0, %v5394_v52  ;;  %4195 = vmatmul.mubr.msk.f32.gmra.mxu0 %vm109_vm0, %v5304_v7  ;;  %v1379_v3 = vadd.f32 %v1251_v55, %v5441_v6  ;;  %v1258_v4 = vmul.f32 %v1130_v56, %v5452_v15  ;;  %v1010_v8 = vmul.f32 0.044715, %v5480_v36  ;;  %8113 = vst [vmem:[#allocation18_spill] sm:$0xff] %v5527_v27  ;;  %v5543_v55 = vmul.f32 0.044715, %v5488_v44 }
  0xed   :  { %8109 = vst [vmem:[#allocation14_spill] sm:$0xff] %v5496_v58  ;;  %v5515_v9 = vadd.f32 %v522_v1, %v5429_v59  ;;  %2525 = vmatprep.mubr.f32.mxu0 %v7891_v30  ;;  %2638 = vmatprep.mubr.f32.mxu1 %v7891_v30  ;;  %v5521_v12 = vadd.f32 %v462_v0, %v5429_v59  ;;  %v1011_v29 = vmul.f32 0.044715, %v5493_v57  ;;  %4676 = vtanh.f32 %v1506_v2 }
  0xee   :  { %v464_v14 = vpop.f32.mrf.mxu0  ;;  %v524_v16 = vpop.f32.mrf.mxu1  ;;  %v1507_v11 = vmul.f32 0.7978846, %v1379_v3  ;;  %v1386_v22 = vadd.f32 %v1258_v4, %v5452_v15  ;;  %v1259_v26 = vmul.f32 %v1131_v62, %v5464_v23  ;;  %8115 = vst [vmem:[#allocation20_spill] sm:$0xff] %v5543_v55  ;;  %v5546_v56 = vmul.f32 0.044715, %v5511_v5  ;;  %v4615_v62 = vld [vmem:[%s5034_s29 + $0x30] sm:$0xff]  }
  0xef   :  { %8112 = vst [vmem:[#allocation17_spill] sm:$0xff] %v5515_v9  ;;  %v5531_v32 = vadd.f32 %v524_v16, %v5436_v63  ;;  %v5535_v34 = vadd.f32 %v464_v14, %v5436_v63  ;;  %v5551_v0 = vmul.f32 0.5, %v5441_v6  ;;  %v5554_v1 = vmul.f32 0.5, %v5488_v44  ;;  %v4616_v6 = vld [vmem:[%s5034_s29 + $0x68] sm:$0xff]  }
  0xf0   :  { %v468_v48 = vpop.f32.mrf.mxu0  ;;  %v561_v53 = vpop.f32.mrf.mxu1  ;;  %4196 = vmatmul.mubr.msk.f32.gmra.mxu0 %vm109_vm0, %v5313_v43  ;;  %4204 = vmatmul.mubr.msk.f32.vlgmr.msra.gmra.mxu1 %vm109_vm0, %v5232_v35  ;;  %4678 = vtanh.f32 %v1507_v11  ;;  %v1514_v17 = vmul.f32 0.7978846, %v1386_v22  ;;  %v1387_v54 = vadd.f32 %v1259_v26, %v5464_v23  ;;  %8116 = vst [vmem:[#allocation21_spill] sm:$0xff] %v5546_v56  ;;  %v1018_v2 = vmul.f32 0.044715, %v5521_v12 }
  0xf1   :  { %8114 = vst [vmem:[#allocation19_spill] sm:$0xff] %v5531_v32  ;;  %2531 = vmatprep.mubr.f32.mxu0 %v7891_v30  ;;  %2644 = vmatprep.mubr.f32.mxu1 %v7891_v30  ;;  %8117 = vst [vmem:[#allocation22_spill] sm:$0xff] %v5554_v1  ;;  %v5559_v14 = vmul.f32 0.5, %v5452_v15  ;;  %v1138_v11 = vmul.f32 %v1010_v8, %v5480_v36  ;;  %v5563_v22 = vmul.f32 0.044715, %v5527_v27  ;;  %v5567_v26 = vmul.f32 0.5, %v5464_v23 }
  0xf2   :  { %v470_v3 = vpop.f32.mrf.mxu0  ;;  %v563_v4 = vpop.f32.mrf.mxu1  ;;  %4320 = vmatpush3.bf16.msra.mxu1 %v4613_v21  ;;  %v1515_v16 = vmul.f32 0.7978846, %v1387_v54  ;;  %4680 = vtanh.f32 %v1514_v17  ;;  %v5570_v30 = vmul.f32 %v1218_v10, %v5448_v13  ;;  %v5573_v21 = vmul.f32 0.044715, %v5483_v41 }
  0xf3   :  { %8118 = vst [vmem:[#allocation23_spill] sm:$0xff] %v5563_v22  ;;  %4321 = vmatprep.subr.bf16.mxu1 %v4614_v33  ;;  %v1019_v15 = vmul.f32 0.044715, %v5535_v34  ;;  %v1266_v23 = vmul.f32 %v1138_v11, %v5480_v36  ;;  %v1139_v33 = vmul.f32 %v1011_v29, %v5493_v57  ;;  %v5583_v10 = vmul.f32 0.044715, %v5496_v58  ;;  %v4617_v58 = vld [vmem:[%s5034_s29 + $0x28] sm:$0xff]  }
  0xf4   :  { %8119 = vst [vmem:[#allocation24_spill] sm:$0xff] %v5570_v30  ;;  %8120 = vst [vmem:[#allocation25_spill] sm:$0xff] %v5573_v21  ;;  %v472_v54 = vpop.f32.mrf.mxu0  ;;  %v565_v8 = vpop.f32.mrf.mxu1  ;;  %4197 = vmatmul.mubr.msk.f32.gmra.mxu0 %vm109_vm0, %v5326_v45  ;;  %4205 = vmatmul.mubr.msk.f32.gmra.mxu1 %vm109_vm0, %v5244_v37  ;;  %v5586_v17 = vadd.f32 %v468_v48, %v5429_v59  ;;  %v5589_v1 = vadd.f32 %v561_v53, %v5456_v18  ;;  %4682 = vtanh.f32 %v1515_v16 }
  0xf5   :  { %8121 = vst [vmem:[#allocation26_spill] sm:$0xff] %v5583_v10  ;;  %2537 = vmatprep.mubr.f32.mxu0 %v8123_v61  ;;  %2650 = vmatprep.mubr.f32.mxu1 %v8123_v61  ;;  %v5594_v21 = vmul.f32 0.044715, %v5515_v9  ;;  %v1394_v10 = vadd.f32 %v1266_v23, %v5480_v36  ;;  %v1267_v48 = vmul.f32 %v1139_v33, %v5493_v57  ;;  %v5601_v41 = vmul.f32 0.044715, %v5531_v32  ;;  %v4619_v32 = vld [vmem:[%s5034_s29 + $0x20] sm:$0xff]  }
  0xf6   :  { %8122 = vst [vmem:[#allocation27_spill] sm:$0xff] %v5589_v1  ;;  %v474_v11 = vpop.f32.mrf.mxu0  ;;  %v567_v29 = vpop.f32.mrf.mxu1  ;;  %4322 = vmatpush3.bf16.msra.mxu1 %v4615_v62  ;;  %v1146_v53 = vmul.f32 %v1018_v2, %v5521_v12  ;;  %v5604_v22 = vadd.f32 %v470_v3, %v5436_v63  ;;  %v5607_v16 = vadd.f32 %v563_v4, %v5458_v19  ;;  %v5611_v62 = vmul.f32 0.5, %v5480_v36 }
  0xf7   :  { %8124 = vst [vmem:[#allocation28_spill] sm:$0xff] %v5594_v21  ;;  %8125 = vst [vmem:[#allocation29_spill] sm:$0xff] %v5601_v41  ;;  %4323 = vmatprep.subr.bf16.mxu1 %v4616_v6  ;;  %v4618_v21 = vld [vmem:[%s5034_s29 + $0x60] sm:$0xff]   ;;  %v1522_v2 = vmul.f32 0.7978846, %v1394_v10  ;;  %v1395_v3 = vadd.f32 %v1267_v48, %v5493_v57  ;;  %v1147_v6 = vmul.f32 %v1019_v15, %v5535_v34  ;;  %v5629_v41 = vmul.f32 0.5, %v5493_v57 }
  0xf8   :  { %8126 = vst [vmem:[#allocation30_spill] sm:$0xff] %v5607_v16  ;;  %v478_v9 = vpop.f32.mrf.mxu0  ;;  %v571_v23 = vpop.f32.mrf.mxu1  ;;  %4198 = vmatmul.mubr.msk.f32.gmra.mxu0 %vm109_vm0, %v5338_v46  ;;  %4206 = vmatmul.mubr.msk.f32.gmra.mxu1 %vm109_vm0, %v5253_v38  ;;  %v1274_v4 = vmul.f32 %v1146_v53, %v5521_v12  ;;  %v5621_v33 = vmul.f32 0.044715, %v5586_v17  ;;  %v5624_v36 = vmul.f32 0.044715, %v5589_v1  ;;  %v5632_v10 = vmul.f32 0.5, %v5521_v12 }
  0xf9   :  { %2543 = vmatprep.mubr.f32.mxu0 %v8123_v61  ;;  %2656 = vmatprep.mubr.f32.mxu1 %v8123_v61  ;;  %v5635_v48 = vadd.f32 %v472_v54, %v5429_v59  ;;  %v1523_v27 = vmul.f32 0.7978846, %v1395_v3  ;;  %v1275_v5 = vmul.f32 %v1147_v6, %v5535_v34  ;;  %v5641_v55 = vmul.f32 0.044715, %v5604_v22  ;;  %v4620_v54 = vld [vmem:[%s5034_s29 + $0x58] sm:$0xff]  }
  0xfa   :  { %8127 = vst [vmem:[#allocation31_spill] sm:$0xff] %v5624_v36  ;;  %v480_v15 = vpop.f32.mrf.mxu0  ;;  %v573_v53 = vpop.f32.mrf.mxu1  ;;  %4324 = vmatpush3.bf16.msra.mxu1 %v4617_v58  ;;  %v1402_v56 = vadd.f32 %v1274_v4, %v5521_v12  ;;  %v5644_v57 = vadd.f32 %v565_v8, %v5456_v18  ;;  %v5647_v44 = vadd.f32 %v474_v11, %v5436_v63  ;;  %4684 = vtanh.f32 %v1522_v2 }
  0xfb   :  { %4325 = vmatprep.subr.bf16.mxu1 %v4618_v21  ;;  %v4677_v30 = vpop.eup %4676  ;;  %v5651_v58 = vmul.f32 0.044715, %v5607_v16  ;;  %v5654_v12 = vadd.f32 %v567_v29, %v5458_v19  ;;  %v1403_v21 = vadd.f32 %v1275_v5, %v5535_v34  ;;  %v5662_v2 = vadd.f32 %v478_v9, %v5429_v59  ;;  %v4622_v16 = vld [vmem:[%s5034_s29 + $0x50] sm:$0xff]  }
  0xfc   :  { %8128 = vst [vmem:[#allocation32_spill] sm:$0xff] %v5644_v57  ;;  %v482_v3 = vpop.f32.mrf.mxu0  ;;  %v575_v4 = vpop.f32.mrf.mxu1  ;;  %4199 = vmatmul.mubr.msk.f32.gmra.mxu0 %vm109_vm0, %v5349_v47  ;;  %4207 = vmatmul.mubr.msk.f32.gmra.mxu1 %vm109_vm0, %v5262_v39  ;;  %v1530_v8 = vmul.f32 0.7978846, %v1402_v56  ;;  %v5665_v6 = vadd.f32 %v571_v23, %v5456_v18  ;;  %4686 = vtanh.f32 %v1523_v27  ;;  %v5670_v29 = vmul.f32 0.5, %v5535_v34 }
  0xfd   :  { %8129 = vst [vmem:[#allocation33_spill] sm:$0xff] %v5651_v58  ;;  %8130 = vst [vmem:[#allocation34_spill] sm:$0xff] %v5654_v12  ;;  %v4679_v11 = vpop.eup %4678  ;;  %2549 = vmatprep.mubr.f32.mxu0 %v8123_v61  ;;  %2662 = vmatprep.mubr.f32.mxu1 %v8123_v61  ;;  %v5673_v56 = vmul.f32 0.044715, %v5635_v48  ;;  %v5676_v5 = vadd.f32 %v480_v15, %v5436_v63  ;;  %v5679_v9 = vadd.f32 %v573_v53, %v5458_v19 }
  0xfe   :  { %8131 = vst [vmem:[#allocation35_spill] sm:$0xff] %v5665_v6  ;;  %v484_v23 = vpop.f32.mrf.mxu0  ;;  %v577_v13 = vpop.f32.mrf.mxu1  ;;  %4326 = vmatpush3.bf16.msra.mxu1 %v4619_v32  ;;  %v1531_v25 = vmul.f32 0.7978846, %v1403_v21  ;;  %v5683_v58 = vmul.f32 0.044715, %v5644_v57  ;;  %v5689_v34 = vadd.f32 %v482_v3, %v5429_v59  ;;  %v1762_v15 = vadd.f32 1.0, %v4677_v30 }
  0xff   :  { %8132 = vst [vmem:[#allocation36_spill] sm:$0xff] %v5679_v9  ;;  %v5686_v27 = vmul.f32 0.044715, %v5647_v44  ;;  %4327 = vmatprep.subr.bf16.mxu1 %v4620_v54  ;;  %v4681_v36 = vpop.eup %4680  ;;  %v5693_v53 = vmul.f32 0.044715, %v5654_v12  ;;  %v5696_v32 = vadd.f32 %v575_v4, %v5456_v18  ;;  %v1763_v3 = vadd.f32 1.0, %v4679_v11 }
 0x100   :  { %8133 = vst [vmem:[#allocation37_spill] sm:$0xff] %v5683_v58  ;;  %v488_v21 = vpop.f32.mrf.mxu0  ;;  %v581_v1 = vpop.f32.mrf.mxu1  ;;  %4200 = vmatmul.mubr.msk.f32.gmra.mxu0 %vm109_vm0, %v5361_v49  ;;  %4208 = vmatmul.mubr.msk.f32.gmra.mxu1 %vm109_vm0, %v5271_v40  ;;  %4688 = vtanh.f32 %v1530_v8  ;;  %v5703_v30 = vmul.f32 0.044715, %v5662_v2  ;;  %v5706_v54 = vmul.f32 0.044715, %v5665_v6  ;;  %v5709_v4 = vadd.f32 %v484_v23, %v5436_v63  ;;  %v4623_v23 = vld [vmem:[%s5034_s29 + $0x10] sm:$0xff]  }
 0x101   :  { %8134 = vst [vmem:[#allocation38_spill] sm:$0xff] %v5693_v53  ;;  %8135 = vst [vmem:[#allocation39_spill] sm:$0xff] %v5696_v32  ;;  %2555 = vmatprep.mubr.f32.mxu0 %v8123_v61  ;;  %2668 = vmatprep.mubr.f32.mxu1 %v8123_v61  ;;  %4690 = vtanh.f32 %v1531_v25  ;;  %v4683_v53 = vpop.eup %4682  ;;  %v5714_v12 = vmul.f32 0.044715, %v5676_v5  ;;  %v5717_v8 = vmul.f32 0.044715, %v5679_v9  ;;  %v5720_v11 = vadd.f32 %v577_v13, %v5458_v19 }
 0x102   :  { %8136 = vst [vmem:[#allocation40_spill] sm:$0xff] %v5706_v54  ;;  %v490_v54 = vpop.f32.mrf.mxu0  ;;  %v583_v6 = vpop.f32.mrf.mxu1  ;;  %4328 = vmatpush3.bf16.msra.mxu1 %v4621_v28  ;;  %v1154_v58 = vmul.f32 %v5621_v33, %v5586_v17  ;;  %v5726_v57 = vmul.f32 0.044715, %v5689_v34  ;;  %v5729_v25 = vadd.f32 %v488_v21, %v5429_v59  ;;  %v5732_v49 = vmul.f32 %v1762_v15, %v5498_v60  ;;  %v4624_v13 = vld [vmem:[%s5034_s29 + $0x48] sm:$0xff]  }
 0x103   :  { %8137 = vst [vmem:[#allocation41_spill] sm:$0xff] %v5717_v8  ;;  %8138 = vst [vmem:[#allocation42_spill] sm:$0xff] %v5720_v11  ;;  %4329 = vmatprep.subr.bf16.mxu1 %v4622_v16  ;;  %v1770_v8 = vadd.f32 1.0, %v4681_v36  ;;  %v5736_v9 = vmul.f32 0.044715, %v5696_v32  ;;  %v5743_v33 = vmul.f32 %v1763_v3, %v5551_v0  ;;  %v1155_v16 = vmul.f32 %v5641_v55, %v5604_v22 }
 0x104   :  { %8139 = vst [vmem:[#allocation43_spill] sm:$0xff] %v5732_v49  ;;  %v492_v28 = vpop.f32.mrf.mxu0  ;;  %v585_v47 = vpop.f32.mrf.mxu1  ;;  %4201 = vmatmul.mubr.msk.f32.gmra.mxu0 %vm109_vm0, %v5372_v50  ;;  %4209 = vmatmul.mubr.msk.f32.gmra.mxu1 %vm109_vm0, %v5284_v42  ;;  %v1282_v60 = vmul.f32 %v1154_v58, %v5586_v17  ;;  %v5749_v36 = vmul.f32 0.044715, %v5709_v4  ;;  %v5752_v15 = vadd.f32 %v581_v1, %v5456_v18  ;;  %v1771_v21 = vadd.f32 1.0, %v4683_v53 }
 0x105   :  { %8140 = vst [vmem:[#allocation44_spill] sm:$0xff] %v5736_v9  ;;  %8141 = vst [vmem:[#allocation45_spill] sm:$0xff] %v5743_v33  ;;  %2561 = vmatprep.mubr.f32.mxu0 %v8123_v61  ;;  %2674 = vmatprep.mubr.f32.mxu1 %v8123_v61  ;;  %v5757_v0 = vmul.f32 0.5, %v5586_v17  ;;  %v5760_v58 = vmul.f32 0.044715, %v5720_v11  ;;  %v4625_v33 = vld [vmem:[%s5034_s29 + $0x8] sm:$0xff]   ;;  %v1283_v1 = vmul.f32 %v1155_v16, %v5604_v22 }
 0x106   :  { %8142 = vst [vmem:[#allocation46_spill] sm:$0xff] %v5752_v15  ;;  %v494_v3 = vpop.f32.mrf.mxu0  ;;  %v587_v55 = vpop.f32.mrf.mxu1  ;;  %4330 = vmatpush3.bf16.msra.mxu1 %v4623_v23  ;;  %v1410_v9 = vadd.f32 %v1282_v60, %v5586_v17  ;;  %v1162_v32 = vmul.f32 %v5673_v56, %v5635_v48  ;;  %v5768_v49 = vmul.f32 0.044715, %v5729_v25  ;;  %v5771_v53 = vadd.f32 %v490_v54, %v5436_v63 }
 0x107   :  { %8143 = vst [vmem:[#allocation47_spill] sm:$0xff] %v5760_v58  ;;  %v5774_v11 = vmul.f32 %v1770_v8, %v5559_v14  ;;  %4331 = vmatprep.subr.bf16.mxu1 %v4624_v13  ;;  %v4626_v58 = vld [vmem:[%s5034_s29 + $0x40] sm:$0xff]   ;;  %v5778_v23 = vmul.f32 0.5, %v5604_v22  ;;  %v4685_v17 = vpop.eup %4684  ;;  %v5781_v60 = vadd.f32 %v583_v6, %v5458_v19  ;;  %v1411_v54 = vadd.f32 %v1283_v1, %v5604_v22 }
 0x108   :  { %v498_v16 = vpop.f32.mrf.mxu0  ;;  %v591_v56 = vpop.f32.mrf.mxu1  ;;  %4202 = vmatmul.mubr.msk.f32.gmra.mxu0 %vm109_vm0, %v5383_v51  ;;  %4210 = vmatmul.mubr.msk.f32.gmra.mxu1 %vm109_vm0, %v5294_v31  ;;  %v1538_v14 = vmul.f32 0.7978846, %v1410_v9  ;;  %v1290_v8 = vmul.f32 %v1162_v32, %v5635_v48  ;;  %v5790_v13 = vmul.f32 0.044715, %v5752_v15  ;;  %v5793_v6 = vadd.f32 %v492_v28, %v5429_v59 }
 0x109   :  { %8144 = vst [vmem:[#allocation48_spill] sm:$0xff] %v5774_v11  ;;  %8145 = vst [vmem:[#allocation49_spill] sm:$0xff] %v5781_v60  ;;  %v5796_v11 = vadd.f32 %v585_v47, %v5456_v18  ;;  %2567 = vmatprep.mubr.f32.mxu0 %v8123_v61  ;;  %2680 = vmatprep.mubr.f32.mxu1 %v8123_v61  ;;  %v5801_v51 = vmul.f32 %v1771_v21, %v5567_v26  ;;  %v4687_v22 = vpop.eup %4686  ;;  %v4627_v47 = vld [vmem:[%s5034_s29] sm:$0xff]   ;;  %v5811_v15 = vmul.f32 0.5, %v5635_v48 }
 0x10a   :  { %8146 = vst [vmem:[#allocation50_spill] sm:$0xff] %v5790_v13  ;;  %8147 = vst [vmem:[#allocation51_spill] sm:$0xff] %v5793_v6  ;;  %v5804_v9 = vadd.f32 %v494_v3, %v5436_v63  ;;  %v5807_v32 = vadd.f32 %v587_v55, %v5458_v19  ;;  %v500_v28 = vpop.f32.mrf.mxu0  ;;  %v593_v1 = vpop.f32.mrf.mxu1  ;;  %4332 = vmatpush3.bf16.msra.mxu1 %v4625_v33  ;;  %v1539_v13 = vmul.f32 0.7978846, %v1411_v54  ;;  %v5814_v26 = vmul.f32 0.044715, %v5771_v53 }
 0x10b   :  { %8148 = vst [vmem:[#allocation52_spill] sm:$0xff] %v5796_v11  ;;  %8149 = vst [vmem:[#allocation53_spill] sm:$0xff] %v5801_v51  ;;  %v5817_v21 = vadd.f32 %v498_v16, %v5429_v59  ;;  %v1778_v3 = vadd.f32 1.0, %v4685_v17  ;;  %4333 = vmatprep.subr.bf16.mxu1 %v4626_v58  ;;  %4692 = vtanh.f32 %v1538_v14  ;;  %v4644_v55 = vld [vmem:[%s5034_s29 + $0x178] sm:$0xff]   ;;  %v5821_v51 = vmul.f32 0.044715, %v5781_v60 }
 0x10c   :  { %8150 = vst [vmem:[#allocation54_spill] sm:$0xff] %v5814_v26  ;;  %v5824_v33 = vadd.f32 %v591_v56, %v5456_v18  ;;  %v502_v54 = vpop.f32.mrf.mxu0  ;;  %v595_v50 = vpop.f32.mrf.mxu1  ;;  %4203 = vmatmul.mubr.msk.f32.gmra.mxu0 %vm109_vm0, %v5394_v52  ;;  %4211 = vmatmul.mubr.msk.f32.gmra.mxu1 %vm109_vm0, %v5304_v7  ;;  %v4629_v16 = vld [vmem:[%s5034_s29 + $0xb8] sm:$0xff]   ;;  %v4630_v26 = vld [vmem:[%s5034_s29 + $0xf0] sm:$0xff]   ;;  %4694 = vtanh.f32 %v1539_v13  ;;  %v1418_v58 = vadd.f32 %v1290_v8, %v5635_v48  ;;  %v5834_v14 = vmul.f32 0.044715, %v5793_v6 }
 0x10d   :  { %8151 = vst [vmem:[#allocation55_spill] sm:$0xff] %v5821_v51  ;;  %v4689_v17 = vpop.eup %4688  ;;  %v5837_v56 = vmul.f32 0.044715, %v5796_v11  ;;  %2686 = vmatprep.mubr.f32.mxu1 %v8123_v61  ;;  %v1779_v51 = vadd.f32 1.0, %v4687_v22  ;;  %4577 = vmatprep.mubr.msk.f32.mxu0 %vm109_vm0, %v5232_v35  ;;  %v5843_v52 = vmul.f32 0.5, %v5647_v44  ;;  %v1163_v22 = vmul.f32 %v5686_v27, %v5647_v44 }
 0x10e   :  { %8152 = vst [vmem:[#allocation56_spill] sm:$0xff] %v5824_v33  ;;  %8153 = vst [vmem:[#allocation57_spill] sm:$0xff] %v5834_v14  ;;  %v4691_v60 = vpop.eup %4690  ;;  %v5846_v13 = vmul.f32 0.044715, %v5804_v9  ;;  %v5849_v48 = vmul.f32 0.044715, %v5807_v32  ;;  %v504_v8 = vpop.f32.mrf.mxu0  ;;  %4334 = vmatpush3.bf16.msra.mxu1 %v4627_v47  ;;  %v5857_v35 = vadd.f32 %v500_v28, %v5436_v63  ;;  %v5860_v6 = vadd.f32 %v593_v1, %v5458_v19 }
 0x10f   :  { %8154 = vst [vmem:[#allocation58_spill] sm:$0xff] %v5837_v56  ;;  %v597_v14 = vpop.f32.mrf.mxu1  ;;  %v1546_v56 = vmul.f32 0.7978846, %v1418_v58  ;;  %v5854_v11 = vmul.f32 0.044715, %v5817_v21  ;;  %4447 = vmatprep.subr.bf16.mxu1 %v4644_v55  ;;  %v5869_v58 = vadd.f32 %v502_v54, %v5429_v59  ;;  %v1786_v28 = vadd.f32 1.0, %v4689_v17 }
 0x110   :  { %8155 = vst [vmem:[#allocation59_spill] sm:$0xff] %v5846_v13  ;;  %8156 = vst [vmem:[#allocation60_spill] sm:$0xff] %v5849_v48  ;;  %v5863_v13 = vmul.f32 %v1778_v3, %v5611_v62  ;;  %v5866_v47 = vmul.f32 0.044715, %v5824_v33  ;;  %v674_v48 = vpop.f32.mrf.mxu0  ;;  %4212 = vmatmul.mubr.msk.f32.gmra.mxu1 %vm109_vm0, %v5313_v43  ;;  %4578 = vmatmul.mubr.msk.f32.vlgmr.msra.gmra.mxu0 %vm109_vm0, %v5244_v37  ;;  %v1291_v62 = vmul.f32 %v1163_v22, %v5647_v44  ;;  %v4631_v54 = vld [vmem:[%s5034_s29 + $0xb0] sm:$0xff]   ;;  %v4632_v37 = vld [vmem:[%s5034_s29 + $0xe8] sm:$0xff]  }
 0x111   :  { %v601_v27 = vpop.f32.mrf.mxu1  ;;  %v5877_v1 = vadd.f32 %v595_v50, %v5456_v18  ;;  %v5880_v3 = vadd.f32 %v504_v8, %v5436_v63  ;;  %2692 = vmatprep.mubr.f32.mxu1 %v8123_v61  ;;  %v5884_v59 = vmul.f32 %v1779_v51, %v5629_v41  ;;  %4384 = vmatpush3.bf16.msra.mxu0 %v4629_v16  ;;  %v1787_v55 = vadd.f32 1.0, %v4691_v60 }
 0x112   :  { %8157 = vst [vmem:[#allocation61_spill] sm:$0xff] %v5866_v47  ;;  %v676_v33 = vpop.f32.mrf.mxu0  ;;  %4580 = vmatprep.mubr.msk.f32.mxu0 %vm109_vm0, %v5253_v38  ;;  %4385 = vmatprep.subr.bf16.mxu0 %v4630_v26  ;;  %4696 = vtanh.f32 %v1546_v56  ;;  %v1419_v50 = vadd.f32 %v1291_v62, %v5647_v44  ;;  %v1170_v63 = vmul.f32 %v5703_v30, %v5662_v2  ;;  %v5896_v51 = vmul.f32 0.044715, %v5857_v35 }
 0x113   :  { %8158 = vst [vmem:[#allocation62_spill] sm:$0xff] %v5877_v1  ;;  %v603_v47 = vpop.f32.mrf.mxu1  ;;  %v1171_v41 = vmul.f32 %v5714_v12, %v5676_v5  ;;  %v5899_v60 = vmul.f32 0.044715, %v5860_v6  ;;  %v5902_v38 = vadd.f32 %v597_v14, %v5458_v19  ;;  %v5905_v26 = vadd.f32 %v601_v27, %v5456_v18 }
 0x114   :  { %v5908_v44 = vmul.f32 0.044715, %v5869_v58  ;;  %v678_v16 = vpop.f32.mrf.mxu0  ;;  %4213 = vmatmul.mubr.msk.f32.gmra.mxu1 %vm109_vm0, %v5326_v45  ;;  %v5913_v12 = vmul.f32 %v1786_v28, %v5632_v10  ;;  %4581 = vmatmul.mubr.msk.f32.gmra.mxu0 %vm109_vm0, %v5262_v39  ;;  %v1298_v17 = vmul.f32 %v1170_v63, %v5662_v2  ;;  %v5920_v56 = vmul.f32 0.044715, %v5877_v1  ;;  %v4633_v10 = vld [vmem:[%s5034_s29 + $0xa8] sm:$0xff]   ;;  %v4634_v63 = vld [vmem:[%s5034_s29 + $0xe0] sm:$0xff]  }
 0x115   :  { %8159 = vst [vmem:[#allocation63_spill] sm:$0xff] %v5902_v38  ;;  %8160 = vst [vmem:[#allocation64_spill] sm:$0xff] %v5905_v26  ;;  %v605_v30 = vpop.f32.mrf.mxu1  ;;  %v1299_v14 = vmul.f32 %v1171_v41, %v5676_v5  ;;  %v5923_v8 = vadd.f32 %v674_v48, %v5460_v20  ;;  %2698 = vmatprep.mubr.f32.mxu1 %v8123_v61  ;;  %v5927_v22 = vmul.f32 %v1787_v55, %v5670_v29 }
 0x116   :  { %8161 = vst [vmem:[#allocation65_spill] sm:$0xff] %v5920_v56  ;;  %4386 = vmatpush3.bf16.msra.mxu0 %v4631_v54  ;;  %v1547_v27 = vmul.f32 0.7978846, %v1419_v50  ;;  %v5931_v39 = vmul.f32 0.044715, %v5880_v3  ;;  %v680_v62 = vpop.f32.mrf.mxu0  ;;  %4583 = vmatprep.mubr.msk.f32.mxu0 %vm109_vm0, %v5271_v40  ;;  %v1426_v48 = vadd.f32 %v1298_v17, %v5662_v2  ;;  %v1178_v29 = vmul.f32 %v5726_v57, %v5689_v34 }
 0x117   :  { %8162 = vst [vmem:[#allocation66_spill] sm:$0xff] %v5923_v8  ;;  %v607_v28 = vpop.f32.mrf.mxu1  ;;  %4387 = vmatprep.subr.bf16.mxu0 %v4632_v37  ;;  %v1427_v41 = vadd.f32 %v1299_v14, %v5676_v5  ;;  %v5941_v55 = vmul.f32 0.044715, %v5902_v38  ;;  %v5944_v54 = vmul.f32 0.044715, %v5905_v26  ;;  %v5947_v50 = vmul.f32 0.5, %v5662_v2 }
 0x118   :  { %v5950_v40 = vmul.f32 0.5, %v5676_v5  ;;  %v4693_v37 = vpop.eup %4692  ;;  %v5953_v17 = vadd.f32 %v603_v47, %v5458_v19  ;;  %v684_v56 = vpop.f32.mrf.mxu0  ;;  %4214 = vmatmul.mubr.msk.f32.gmra.mxu1 %vm109_vm0, %v5338_v46  ;;  %4584 = vmatmul.mubr.msk.f32.gmra.mxu0 %vm109_vm0, %v5284_v42  ;;  %v1554_v57 = vmul.f32 0.7978846, %v1426_v48  ;;  %v1306_v2 = vmul.f32 %v1178_v29, %v5689_v34  ;;  %v4635_v42 = vld [vmem:[%s5034_s29 + $0xa0] sm:$0xff]  }
 0x119   :  { %8163 = vst [vmem:[#allocation67_spill] sm:$0xff] %v5941_v55  ;;  %8164 = vst [vmem:[#allocation68_spill] sm:$0xff] %v5944_v54  ;;  %v611_v14 = vpop.f32.mrf.mxu1  ;;  %v1555_v54 = vmul.f32 0.7978846, %v1427_v41  ;;  %v4695_v26 = vpop.eup %4694  ;;  %v5961_v5 = vadd.f32 %v676_v33, %v5466_v24  ;;  %v5964_v47 = vadd.f32 %v605_v30, %v5456_v18  ;;  %2704 = vmatprep.mubr.f32.mxu1 %v8123_v61  ;;  %4698 = vtanh.f32 %v1547_v27  ;;  %v4636_v27 = vld [vmem:[%s5034_s29 + $0xd8] sm:$0xff]  }
 0x11a   :  { %8165 = vst [vmem:[#allocation69_spill] sm:$0xff] %v5953_v17  ;;  %v5967_v55 = vadd.f32 %v611_v14, %v5456_v18  ;;  %4388 = vmatpush3.bf16.msra.mxu0 %v4633_v10  ;;  %v5972_v48 = vmul.f32 0.044715, %v5923_v8  ;;  %v5975_v41 = vadd.f32 %v678_v16, %v5460_v20  ;;  %v5978_v33 = vadd.f32 %v607_v28, %v5458_v19  ;;  %v686_v30 = vpop.f32.mrf.mxu0 }
 0x11b   :  { %8166 = vst [vmem:[#allocation70_spill] sm:$0xff] %v5961_v5  ;;  %8167 = vst [vmem:[#allocation71_spill] sm:$0xff] %v5964_v47  ;;  %v613_v29 = vpop.f32.mrf.mxu1  ;;  %4586 = vmatprep.mubr.msk.f32.mxu0 %vm109_vm0, %v5294_v31  ;;  %4389 = vmatprep.subr.bf16.mxu0 %v4634_v63  ;;  %v1434_v10 = vadd.f32 %v1306_v2, %v5689_v34  ;;  %v5985_v14 = vadd.f32 %v680_v62, %v5466_v24  ;;  %4700 = vtanh.f32 %v1554_v57  ;;  %v8175_v31 = vld [vmem:[#allocation6_spill] sm:$0xff]  ;;  %v4637_v2 = vld [vmem:[%s5034_s29 + $0x98] sm:$0xff]  }
 0x11c   :  { %8168 = vst [vmem:[#allocation72_spill] sm:$0xff] %v5967_v55  ;;  %8169 = vst [vmem:[#allocation73_spill] sm:$0xff] %v5972_v48  ;;  %v5988_v16 = vadd.f32 %v613_v29, %v5458_v19  ;;  %v1794_v48 = vadd.f32 1.0, %v4693_v37  ;;  %v5991_v28 = vadd.f32 %v684_v56, %v5460_v20  ;;  %v688_v38 = vpop.f32.mrf.mxu0  ;;  %4215 = vmatmul.mubr.msk.f32.gmra.mxu1 %vm109_vm0, %v8175_v31  ;;  %v1795_v63 = vadd.f32 1.0, %v4695_v26  ;;  %v4638_v29 = vld [vmem:[%s5034_s29 + $0xd0] sm:$0xff]  }
 0x11d   :  { %8170 = vst [vmem:[#allocation74_spill] sm:$0xff] %v5975_v41  ;;  %8171 = vst [vmem:[#allocation75_spill] sm:$0xff] %v5978_v33  ;;  %v615_v8 = vpop.f32.mrf.mxu1  ;;  %4587 = vmatmul.mubr.msk.f32.gmra.mxu0 %vm109_vm0, %v5304_v7  ;;  %4702 = vtanh.f32 %v1555_v54  ;;  %v5998_v62 = vmul.f32 0.5, %v5689_v34  ;;  %v6003_v37 = vmul.f32 0.044715, %v5953_v17  ;;  %2710 = vmatprep.mubr.f32.mxu1 %v8123_v61 }
 0x11e   :  { %8172 = vst [vmem:[#allocation76_spill] sm:$0xff] %v5985_v14  ;;  %8173 = vst [vmem:[#allocation77_spill] sm:$0xff] %v5988_v16  ;;  %v6006_v56 = vmul.f32 0.044715, %v5961_v5  ;;  %v6009_v57 = vadd.f32 %v615_v8, %v5456_v18  ;;  %4390 = vmatpush3.bf16.msra.mxu0 %v4635_v42  ;;  %v1562_v26 = vmul.f32 0.7978846, %v1434_v10  ;;  %4589 = vmatprep.mubr.msk.f32.mxu0 %vm109_vm0, %v5313_v43 }
 0x11f   :  { %8174 = vst [vmem:[#allocation78_spill] sm:$0xff] %v5991_v28  ;;  %8176 = vst [vmem:[#allocation6_spill] sm:$0xff] %v6003_v37  ;;  %v6013_v7 = vmul.f32 0.044715, %v5964_v47  ;;  %v6016_v34 = vmul.f32 0.044715, %v5975_v41  ;;  %v617_v31 = vpop.f32.mrf.mxu1  ;;  %v690_v37 = vpop.f32.mrf.mxu0  ;;  %4391 = vmatprep.subr.bf16.mxu0 %v4636_v27  ;;  %v1179_v8 = vmul.f32 %v5749_v36, %v5709_v4 }
 0x120   :  { %8177 = vst [vmem:[#allocation79_spill] sm:$0xff] %v6006_v56  ;;  %8178 = vst [vmem:[#allocation80_spill] sm:$0xff] %v6009_v57  ;;  %v6019_v54 = vmul.f32 0.044715, %v5978_v33  ;;  %v4697_v42 = vpop.eup %4696  ;;  %v6026_v10 = vmul.f32 0.044715, %v5985_v14  ;;  %4704 = vtanh.f32 %v1562_v26 }
 0x121   :  { %8179 = vst [vmem:[#allocation81_spill] sm:$0xff] %v6013_v7  ;;  %8180 = vst [vmem:[#allocation82_spill] sm:$0xff] %v6016_v34  ;;  %v6029_v7 = vmul.f32 0.044715, %v5967_v55  ;;  %v6032_v34 = vadd.f32 %v686_v30, %v5466_v24  ;;  %v6038_v43 = vmul.f32 0.044715, %v5991_v28  ;;  %v621_v27 = vpop.f32.mrf.mxu1  ;;  %v694_v33 = vpop.f32.mrf.mxu0  ;;  %4590 = vmatmul.mubr.msk.f32.gmra.mxu0 %vm109_vm0, %v5326_v45  ;;  %v1307_v30 = vmul.f32 %v1179_v8, %v5709_v4 }
 0x122   :  { %8181 = vst [vmem:[#allocation83_spill] sm:$0xff] %v6019_v54  ;;  %8182 = vst [vmem:[#allocation84_spill] sm:$0xff] %v6026_v10  ;;  %v6035_v54 = vmul.f32 %v1794_v48, %v5757_v0  ;;  %v8186_v36 = vld [vmem:[#allocation7_spill] sm:$0xff]  ;;  %v6043_v10 = vmul.f32 %v1795_v63, %v5778_v23  ;;  %v1186_v0 = vmul.f32 %v5768_v49, %v5729_v25  ;;  %4392 = vmatpush3.bf16.msra.mxu0 %v4637_v2  ;;  %v4639_v45 = vld [vmem:[%s5034_s29 + $0x90] sm:$0xff]  }
 0x123   :  { %8183 = vst [vmem:[#allocation85_spill] sm:$0xff] %v6029_v7  ;;  %8184 = vst [vmem:[#allocation86_spill] sm:$0xff] %v6032_v34  ;;  %4216 = vmatmul.mubr.msk.f32.gmra.mxu1 %vm109_vm0, %v8186_v36  ;;  %v6051_v48 = vadd.f32 %v688_v38, %v5460_v20  ;;  %v6058_v23 = vmul.f32 0.5, %v5709_v4  ;;  %v623_v63 = vpop.f32.mrf.mxu1  ;;  %v696_v8 = vpop.f32.mrf.mxu0  ;;  %v1802_v36 = vadd.f32 1.0, %v4697_v42  ;;  %v1435_v49 = vadd.f32 %v1307_v30, %v5709_v4  ;;  %v8190_v28 = vld [vmem:[#allocation31_spill] sm:$0xff] }
 0x124   :  { %8185 = vst [vmem:[#allocation87_spill] sm:$0xff] %v6038_v43  ;;  %v6054_v43 = vadd.f32 %v621_v27, %v5456_v18  ;;  %2716 = vmatprep.mubr.f32.mxu1 %v8123_v61  ;;  %4592 = vmatprep.mubr.msk.f32.mxu0 %vm109_vm0, %v5338_v46  ;;  %v1314_v38 = vmul.f32 %v1186_v0, %v5729_v25  ;;  %v8189_v27 = vld [vmem:[#allocation27_spill] sm:$0xff]  ;;  %v6069_v2 = vmul.f32 0.044715, %v5988_v16  ;;  %v6081_v46 = vmul.f32 0.044715, %v6032_v34 }
 0x125   :  { %8187 = vst [vmem:[#allocation7_spill] sm:$0xff] %v6051_v48  ;;  %v1124_v7 = vmul.f32 %v8190_v28, %v8189_v27  ;;  %4393 = vmatprep.subr.bf16.mxu0 %v4638_v29  ;;  %v4640_v26 = vld [vmem:[%s5034_s29 + $0xc8] sm:$0xff]   ;;  %v6072_v55 = vadd.f32 %v617_v31, %v5458_v19  ;;  %v6075_v42 = vadd.f32 %v690_v37, %v5466_v24  ;;  %v625_v30 = vpop.f32.mrf.mxu1  ;;  %v698_v28 = vpop.f32.mrf.mxu0  ;;  %v8196_v29 = vld [vmem:[#allocation8_spill] sm:$0xff]  ;;  %v1563_v0 = vmul.f32 0.7978846, %v1435_v49  ;;  %v4932_v31 = vld [vmem:[%s7884_s3 + $0x58] sm:$0xff] }
 0x126   :  { %8188 = vst [vmem:[#allocation88_spill] sm:$0xff] %v6054_v43  ;;  %8191 = vst [vmem:[#allocation27_spill] sm:$0xff] %v6069_v2  ;;  %v6078_v4 = vadd.f32 %v623_v63, %v5458_v19  ;;  %4593 = vmatmul.mubr.msk.f32.gmra.mxu0 %vm109_vm0, %v4932_v31  ;;  %v1442_v37 = vadd.f32 %v1314_v38, %v5729_v25  ;;  %v6092_v2 = vmul.f32 0.044715, %v6009_v57  ;;  %v6102_v49 = vmul.f32 0.5, %v5729_v25  ;;  %v4641_v31 = vld [vmem:[%s5034_s29 + $0x88] sm:$0xff]   ;;  %v4699_v38 = vpop.eup %4698 }
 0x127   :  { %8192 = vst [vmem:[#allocation31_spill] sm:$0xff] %v6072_v55  ;;  %8193 = vst [vmem:[#allocation89_spill] sm:$0xff] %v6075_v42  ;;  %4217 = vmatmul.mubr.msk.f32.gmra.mxu1 %vm109_vm0, %v8196_v29  ;;  %v1252_v63 = vmul.f32 %v1124_v7, %v8189_v27  ;;  %v6098_v29 = vadd.f32 %v625_v30, %v5456_v18  ;;  %4394 = vmatpush3.bf16.msra.mxu0 %v4639_v45  ;;  %v627_v34 = vpop.f32.mrf.mxu1  ;;  %v700_v7 = vpop.f32.mrf.mxu0  ;;  %v4642_v25 = vld [vmem:[%s5034_s29 + $0xc0] sm:$0xff]   ;;  %v6118_v45 = vmul.f32 0.044715, %v6072_v55 }
 0x128   :  { %8194 = vst [vmem:[#allocation90_spill] sm:$0xff] %v6078_v4  ;;  %8195 = vst [vmem:[#allocation91_spill] sm:$0xff] %v6081_v46  ;;  %v6095_v46 = vmul.f32 0.044715, %v6051_v48  ;;  %2722 = vmatprep.mubr.f32.mxu1 %v8123_v61  ;;  %v6106_v57 = vmul.f32 %v1802_v36, %v5811_v15  ;;  %v4933_v48 = vld [vmem:[%s7884_s3 + $0x60] sm:$0xff]  ;;  %4395 = vmatprep.subr.bf16.mxu0 %v4640_v26  ;;  %v6124_v36 = vadd.f32 %v694_v33, %v5460_v20  ;;  %v4934_v26 = vld [vmem:[%s7884_s3 + $0x70] sm:$0xff] }
 0x129   :  { %8197 = vst [vmem:[#allocation8_spill] sm:$0xff] %v6092_v2  ;;  %8199 = vst [vmem:[#allocation93_spill] sm:$0xff] %v6098_v29  ;;  %v1570_v2 = vmul.f32 0.7978846, %v1442_v37  ;;  %v1380_v30 = vadd.f32 %v1252_v63, %v8189_v27  ;;  %4595 = vmatprep.mubr.msk.f32.mxu0 %vm109_vm0, %v4933_v48  ;;  %v6121_v15 = vmul.f32 0.044715, %v6075_v42  ;;  %v631_v16 = vpop.f32.mrf.mxu1  ;;  %v704_v48 = vpop.f32.mrf.mxu0  ;;  %4706 = vtanh.f32 %v1563_v0 }
 0x12a   :  { %8198 = vst [vmem:[#allocation92_spill] sm:$0xff] %v6095_v46  ;;  %v6109_v46 = vmul.f32 0.5, %v8189_v27  ;;  %8200 = vst [vmem:[#allocation94_spill] sm:$0xff] %v6118_v45  ;;  %v6127_v37 = vmul.f32 0.5, %v5771_v53  ;;  %v4701_v27 = vpop.eup %4700  ;;  %v6130_v63 = vmul.f32 0.044715, %v6054_v43  ;;  %v6143_v43 = vadd.f32 %v696_v8, %v5466_v24 }
 0x12b   :  { %8201 = vst [vmem:[#allocation95_spill] sm:$0xff] %v6121_v15  ;;  %8202 = vst [vmem:[#allocation96_spill] sm:$0xff] %v6124_v36  ;;  %4218 = vmatmul.mubr.msk.f32.gmra.mxu1 %vm109_vm0, %v4934_v26  ;;  %v1508_v15 = vmul.f32 0.7978846, %v1380_v30  ;;  %v8204_v33 = vld [vmem:[#allocation54_spill] sm:$0xff]  ;;  %v4935_v45 = vld [vmem:[%s7884_s3 + $0x68] sm:$0xff]  ;;  %v6146_v55 = vadd.f32 %v698_v28, %v5460_v20  ;;  %v6149_v0 = vadd.f32 %v631_v16, %v5456_v18  ;;  %4396 = vmatpush3.bf16.msra.mxu0 %v4641_v31  ;;  %v633_v41 = vpop.f32.mrf.mxu1  ;;  %v706_v8 = vpop.f32.mrf.mxu0 }
 0x12c   :  { %8203 = vst [vmem:[#allocation97_spill] sm:$0xff] %v6130_v63  ;;  %v1187_v42 = vmul.f32 %v8204_v33, %v5771_v53  ;;  %4596 = vmatmul.mubr.msk.f32.gmra.mxu0 %vm109_vm0, %v4935_v45  ;;  %v4703_v63 = vpop.eup %4702  ;;  %8205 = vst [vmem:[#allocation54_spill] sm:$0xff] %v6143_v43  ;;  %2728 = vmatprep.mubr.f32.mxu1 %v8123_v61  ;;  %v1803_v30 = vadd.f32 1.0, %v4699_v38  ;;  %v4643_v33 = vld [vmem:[%s5034_s29 + $0x80] sm:$0xff]   ;;  %v6154_v14 = vadd.f32 %v627_v34, %v5458_v19  ;;  %v4646_v16 = vld [vmem:[%s5034_s29 + $0x1f8] sm:$0xff]  }
 0x12d   :  { %8206 = vst [vmem:[#allocation98_spill] sm:$0xff] %v6146_v55  ;;  %8207 = vst [vmem:[#allocation99_spill] sm:$0xff] %v6149_v0  ;;  %v6157_v45 = vadd.f32 %v700_v7, %v5466_v24  ;;  %4708 = vtanh.f32 %v1570_v2  ;;  %4598 = vmatprep.mubr.msk.f32.mxu0 %vm109_vm0, %v4934_v26  ;;  %4397 = vmatprep.subr.bf16.mxu0 %v4642_v25  ;;  %v6163_v61 = vadd.f32 %v704_v48, %v5460_v20  ;;  %v635_v2 = vpop.f32.mrf.mxu1  ;;  %v4936_v25 = vld [vmem:[%s7884_s3 + $0x78] sm:$0xff] }
 0x12e   :  { %8208 = vst [vmem:[#allocation100_spill] sm:$0xff] %v6154_v14  ;;  %v1315_v28 = vmul.f32 %v1187_v42, %v5771_v53  ;;  %v6166_v31 = vadd.f32 %v633_v41, %v5458_v19  ;;  %v1810_v34 = vadd.f32 1.0, %v4701_v27  ;;  %4710 = vtanh.f32 %v1508_v15  ;;  %v708_v42 = vpop.f32.mrf.mxu0 }
 0x12f   :  { %8209 = vst [vmem:[#allocation101_spill] sm:$0xff] %v6157_v45  ;;  %8210 = vst [vmem:[#allocation102_spill] sm:$0xff] %v6163_v61  ;;  %v6169_v38 = vmul.f32 0.044715, %v6124_v36  ;;  %v6172_v7 = vmul.f32 0.044715, %v6078_v4  ;;  %4219 = vmatmul.mubr.msk.f32.gmra.mxu1 %vm109_vm0, %v4936_v25  ;;  %v6187_v26 = vadd.f32 %v635_v2, %v5456_v18  ;;  %4398 = vmatpush3.bf16.msra.mxu0 %v4643_v33  ;;  %v4705_v4 = vpop.eup %4704 }
 0x130   :  { %8211 = vst [vmem:[#allocation103_spill] sm:$0xff] %v6166_v31  ;;  %v1811_v48 = vadd.f32 1.0, %v4703_v63  ;;  %v1443_v41 = vadd.f32 %v1315_v28, %v5771_v53  ;;  %4599 = vmatmul.mubr.msk.f32.gmra.mxu0 %vm109_vm0, %v4936_v25  ;;  %v6181_v15 = vmul.f32 0.044715, %v6143_v43  ;;  %v6184_v27 = vmul.f32 0.044715, %v6098_v29  ;;  %v637_v25 = vpop.f32.mrf.mxu1  ;;  %v710_v29 = vpop.f32.mrf.mxu0  ;;  %4511 = vmatprep.subr.bf16.mxu0 %v4646_v16 }
 0x131   :  { %8212 = vst [vmem:[#allocation104_spill] sm:$0xff] %v6169_v38  ;;  %8213 = vst [vmem:[#allocation105_spill] sm:$0xff] %v6172_v7  ;;  %v6190_v7 = vmul.f32 %v1803_v30, %v5843_v52  ;;  %v6193_v63 = vmul.f32 0.044715, %v6146_v55  ;;  %v6196_v53 = vmul.f32 0.044715, %v6154_v14  ;;  %v6210_v33 = vmul.f32 %v1810_v34, %v5947_v50 }
 0x132   :  { %8214 = vst [vmem:[#allocation106_spill] sm:$0xff] %v6181_v15  ;;  %8215 = vst [vmem:[#allocation107_spill] sm:$0xff] %v6184_v27  ;;  %v6199_v28 = vmul.f32 0.044715, %v6157_v45  ;;  %v8220_v27 = vld [vmem:[#allocation30_spill] sm:$0xff]  ;;  %v8221_v15 = vld [vmem:[#allocation33_spill] sm:$0xff]  ;;  %v787_v45 = vpop.f32.mrf.mxu1  ;;  %v6216_v14 = vmul.f32 %v1811_v48, %v5950_v40 }
 0x133   :  { %8216 = vst [vmem:[#allocation108_spill] sm:$0xff] %v6187_v26  ;;  %8217 = vst [vmem:[#allocation109_spill] sm:$0xff] %v6193_v63  ;;  %v1125_v18 = vmul.f32 %v8221_v15, %v8220_v27  ;;  %v6204_v52 = vmul.f32 0.044715, %v6149_v0  ;;  %v6207_v30 = vmul.f32 0.044715, %v6163_v61  ;;  %v6222_v61 = vadd.f32 %v708_v42, %v5460_v20 }
 0x134   :  { %8218 = vst [vmem:[#allocation110_spill] sm:$0xff] %v6196_v53  ;;  %8219 = vst [vmem:[#allocation111_spill] sm:$0xff] %v6199_v28  ;;  %v1571_v2 = vmul.f32 0.7978846, %v1443_v41  ;;  %v6213_v53 = vadd.f32 %v706_v8, %v5466_v24  ;;  %v714_v28 = vpop.f32.mrf.mxu0  ;;  %v8225_v15 = vld [vmem:[#allocation51_spill] sm:$0xff]  ;;  %v8226_v0 = vld [vmem:[#allocation57_spill] sm:$0xff]  ;;  %v6231_v41 = vadd.f32 %v637_v25, %v5458_v19  ;;  %v789_v48 = vpop.f32.mrf.mxu1 }
 0x135   :  { %8222 = vst [vmem:[#allocation30_spill] sm:$0xff] %v6204_v52  ;;  %8223 = vst [vmem:[#allocation33_spill] sm:$0xff] %v6207_v30  ;;  %v1253_v16 = vmul.f32 %v1125_v18, %v8220_v27  ;;  %v1194_v52 = vmul.f32 %v8226_v0, %v8225_v15  ;;  %v6225_v50 = vadd.f32 %v714_v28, %v5460_v20  ;;  %v1818_v34 = vadd.f32 1.0, %v4705_v4  ;;  %v8230_v0 = vld [vmem:[#allocation32_spill] sm:$0xff]  ;;  %v8231_v63 = vld [vmem:[#allocation37_spill] sm:$0xff] }
 0x136   :  { %8224 = vst [vmem:[#allocation112_spill] sm:$0xff] %v6213_v53  ;;  %8227 = vst [vmem:[#allocation51_spill] sm:$0xff] %v6222_v61  ;;  %v6228_v8 = vmul.f32 0.5, %v8220_v27  ;;  %v716_v40 = vpop.f32.mrf.mxu0  ;;  %v1132_v42 = vmul.f32 %v8231_v63, %v8230_v0  ;;  %v6238_v55 = vmul.f32 0.044715, %v6166_v31  ;;  %v6241_v4 = vadd.f32 %v710_v29, %v5466_v24  ;;  %v4707_v43 = vpop.eup %4706  ;;  %v8237_v29 = vld [vmem:[#allocation10_spill] sm:$0xff] }
 0x137   :  { %8228 = vst [vmem:[#allocation57_spill] sm:$0xff] %v6225_v50  ;;  %8229 = vst [vmem:[#allocation113_spill] sm:$0xff] %v6231_v41  ;;  %v1381_v18 = vadd.f32 %v1253_v16, %v8220_v27  ;;  %v1322_v30 = vmul.f32 %v1194_v52, %v8225_v15  ;;  %v6244_v28 = vadd.f32 %v716_v40, %v5466_v24  ;;  %4712 = vtanh.f32 %v1571_v2  ;;  %v791_v27 = vpop.f32.mrf.mxu1 }
 0x138   :  { %8232 = vst [vmem:[#allocation32_spill] sm:$0xff] %v6238_v55  ;;  %8233 = vst [vmem:[#allocation37_spill] sm:$0xff] %v6241_v4  ;;  %v6247_v19 = vmul.f32 0.044715, %v6213_v53  ;;  %v718_v25 = vpop.f32.mrf.mxu0  ;;  %v1260_v63 = vmul.f32 %v1132_v42, %v8230_v0  ;;  %v6252_v55 = vmul.f32 0.044715, %v6187_v26  ;;  %v6255_v31 = vadd.f32 %v787_v45, %v8237_v29 }
 0x139   :  { %8234 = vst [vmem:[#allocation114_spill] sm:$0xff] %v6244_v28  ;;  %v1509_v16 = vmul.f32 0.7978846, %v1381_v18  ;;  %v1450_v52 = vadd.f32 %v1322_v30, %v8225_v15  ;;  %v6258_v40 = vadd.f32 %v718_v25, %v5460_v20  ;;  %v6261_v2 = vmul.f32 %v1818_v34, %v5998_v62  ;;  %v793_v42 = vpop.f32.mrf.mxu1 }
 0x13a   :  { %8235 = vst [vmem:[#allocation115_spill] sm:$0xff] %v6247_v19  ;;  %8236 = vst [vmem:[#allocation116_spill] sm:$0xff] %v6252_v55  ;;  %v6264_v19 = vmul.f32 0.044715, %v6222_v61  ;;  %v6267_v30 = vmul.f32 0.044715, %v6231_v41  ;;  %v720_v18 = vpop.f32.mrf.mxu0  ;;  %v4709_v55 = vpop.eup %4708  ;;  %v1388_v36 = vadd.f32 %v1260_v63, %v8230_v0 }
 0x13b   :  { %8238 = vst [vmem:[#allocation10_spill] sm:$0xff] %v6255_v31  ;;  %8239 = vst [vmem:[#allocation117_spill] sm:$0xff] %v6258_v40  ;;  %v6270_v26 = vmul.f32 0.5, %v8225_v15  ;;  %v6273_v45 = vmul.f32 0.5, %v8230_v0  ;;  %v6276_v25 = vmul.f32 0.044715, %v6241_v4  ;;  %4714 = vtanh.f32 %v1509_v16  ;;  %v797_v53 = vpop.f32.mrf.mxu1 }
 0x13c   :  { %8240 = vst [vmem:[#allocation118_spill] sm:$0xff] %v6264_v19  ;;  %8241 = vst [vmem:[#allocation119_spill] sm:$0xff] %v6267_v30  ;;  %v1578_v62 = vmul.f32 0.7978846, %v1450_v52  ;;  %v6279_v34 = vmul.f32 0.5, %v5804_v9  ;;  %v4711_v19 = vpop.eup %4710  ;;  %v8244_v41 = vld [vmem:[#allocation11_spill] sm:$0xff]  ;;  %v724_v15 = vpop.f32.mrf.mxu0  ;;  %v6295_v52 = vadd.f32 %v791_v27, %v8237_v29 }
 0x13d   :  { %8242 = vst [vmem:[#allocation120_spill] sm:$0xff] %v6276_v25  ;;  %v6282_v30 = vmul.f32 0.044715, %v6225_v50  ;;  %v6285_v61 = vadd.f32 %v789_v48, %v8244_v41  ;;  %v1819_v38 = vadd.f32 1.0, %v4707_v43  ;;  %v6289_v4 = vmul.f32 0.044715, %v6255_v31  ;;  %v799_v25 = vpop.f32.mrf.mxu1 }
 0x13e   :  { %v6292_v16 = vmul.f32 0.044715, %v6244_v28  ;;  %8248 = vst [vmem:[#allocation124_spill] sm:$0xff] %v6295_v52  ;;  %v6298_v50 = vadd.f32 %v724_v15, %v5460_v20  ;;  %v6301_v48 = vadd.f32 %v720_v18, %v5466_v24  ;;  %v1826_v43 = vadd.f32 1.0, %v4709_v55  ;;  %v8251_v0 = vld [vmem:[#allocation59_spill] sm:$0xff] }
 0x13f   :  { %8243 = vst [vmem:[#allocation121_spill] sm:$0xff] %v6282_v30  ;;  %8245 = vst [vmem:[#allocation11_spill] sm:$0xff] %v6285_v61  ;;  %v726_v30 = vpop.f32.mrf.mxu0  ;;  %v1516_v47 = vmul.f32 0.7978846, %v1388_v36  ;;  %v1195_v63 = vmul.f32 %v8251_v0, %v5804_v9  ;;  %v1764_v27 = vadd.f32 1.0, %v4711_v19  ;;  %4716 = vtanh.f32 %v1578_v62  ;;  %v801_v28 = vpop.f32.mrf.mxu1  ;;  %v8255_v36 = vld [vmem:[#allocation34_spill] sm:$0xff] }
 0x140   :  { %8246 = vst [vmem:[#allocation122_spill] sm:$0xff] %v6289_v4  ;;  %8247 = vst [vmem:[#allocation123_spill] sm:$0xff] %v6292_v16  ;;  %v6306_v4 = vadd.f32 %v793_v42, %v8244_v41  ;;  %v6309_v16 = vadd.f32 %v726_v30, %v5466_v24  ;;  %v6312_v15 = vmul.f32 0.044715, %v6285_v61  ;;  %v6315_v31 = vmul.f32 %v1819_v38, %v6058_v23  ;;  %v8256_v0 = vld [vmem:[#allocation38_spill] sm:$0xff] }
 0x141   :  { %8249 = vst [vmem:[#allocation125_spill] sm:$0xff] %v6298_v50  ;;  %8250 = vst [vmem:[#allocation126_spill] sm:$0xff] %v6301_v48  ;;  %v728_v18 = vpop.f32.mrf.mxu0  ;;  %v1323_v55 = vmul.f32 %v1195_v63, %v5804_v9  ;;  %v1133_v56 = vmul.f32 %v8256_v0, %v8255_v36  ;;  %v6321_v42 = vmul.f32 0.044715, %v6258_v40  ;;  %v6324_v30 = vadd.f32 %v797_v53, %v8237_v29  ;;  %v803_v38 = vpop.f32.mrf.mxu1 }
 0x142   :  { %8252 = vst [vmem:[#allocation59_spill] sm:$0xff] %v6306_v4  ;;  %8253 = vst [vmem:[#allocation127_spill] sm:$0xff] %v6309_v16  ;;  %v6327_v19 = vadd.f32 %v728_v18, %v5460_v20  ;;  %4718 = vtanh.f32 %v1516_v47  ;;  %v6330_v62 = vmul.f32 0.044715, %v6295_v52  ;;  %v1202_v0 = vmul.f32 %v5854_v11, %v5817_v21 }
 0x143   :  { %8254 = vst [vmem:[#allocation128_spill] sm:$0xff] %v6312_v15  ;;  %8257 = vst [vmem:[#allocation34_spill] sm:$0xff] %v6321_v42  ;;  %v730_v23 = vpop.f32.mrf.mxu0  ;;  %v1451_v63 = vadd.f32 %v1323_v55, %v5804_v9  ;;  %v1261_v15 = vmul.f32 %v1133_v56, %v8255_v36  ;;  %v6337_v42 = vmul.f32 0.044715, %v6301_v48  ;;  %v6340_v53 = vmul.f32 0.044715, %v6306_v4  ;;  %v807_v55 = vpop.f32.mrf.mxu1 }
 0x144   :  { %8258 = vst [vmem:[#allocation38_spill] sm:$0xff] %v6324_v30  ;;  %8259 = vst [vmem:[#allocation129_spill] sm:$0xff] %v6327_v19  ;;  %v6343_v47 = vmul.f32 %v1826_v43, %v6102_v49  ;;  %v6346_v18 = vmul.f32 %v1764_v27, %v6109_v46  ;;  %v6349_v9 = vadd.f32 %v799_v25, %v8244_v41  ;;  %v6352_v11 = vmul.f32 0.5, %v8255_v36 }
 0x145   :  { %8260 = vst [vmem:[#allocation130_spill] sm:$0xff] %v6330_v62  ;;  %8261 = vst [vmem:[#allocation131_spill] sm:$0xff] %v6337_v42  ;;  %v4713_v62 = vpop.eup %4712  ;;  %v734_v56 = vpop.f32.mrf.mxu0  ;;  %v1389_v42 = vadd.f32 %v1261_v15, %v8255_v36  ;;  %v1330_v4 = vmul.f32 %v1202_v0, %v5817_v21  ;;  %v6360_v49 = vmul.f32 0.044715, %v6324_v30  ;;  %v1579_v25 = vmul.f32 0.7978846, %v1451_v63 }
 0x146   :  { %8262 = vst [vmem:[#allocation132_spill] sm:$0xff] %v6340_v53  ;;  %8263 = vst [vmem:[#allocation133_spill] sm:$0xff] %v6349_v9  ;;  %v6357_v53 = vmul.f32 0.044715, %v6298_v50  ;;  %v6363_v46 = vadd.f32 %v734_v56, %v5460_v20  ;;  %v6366_v43 = vadd.f32 %v801_v28, %v8237_v29  ;;  %v809_v48 = vpop.f32.mrf.mxu1  ;;  %v6369_v15 = vmul.f32 0.5, %v5817_v21 }
 0x147   :  { %8265 = vst [vmem:[#allocation135_spill] sm:$0xff] %v6360_v49  ;;  %v736_v27 = vpop.f32.mrf.mxu0  ;;  %v1517_v52 = vmul.f32 0.7978846, %v1389_v42  ;;  %v1458_v36 = vadd.f32 %v1330_v4, %v5817_v21  ;;  %v6373_v0 = vmul.f32 0.044715, %v6309_v16  ;;  %v6376_v49 = vadd.f32 %v730_v23, %v5466_v24  ;;  %v8273_v4 = vld [vmem:[#allocation35_spill] sm:$0xff] }
 0x148   :  { %8264 = vst [vmem:[#allocation134_spill] sm:$0xff] %v6357_v53  ;;  %8266 = vst [vmem:[#allocation136_spill] sm:$0xff] %v6363_v46  ;;  %v6379_v56 = vadd.f32 %v736_v27, %v5466_v24  ;;  %v1827_v63 = vadd.f32 1.0, %v4713_v62  ;;  %v4715_v28 = vpop.eup %4714  ;;  %v6382_v30 = vmul.f32 0.044715, %v6349_v9  ;;  %v6385_v42 = vadd.f32 %v803_v38, %v8244_v41  ;;  %v811_v50 = vpop.f32.mrf.mxu1  ;;  %v8274_v16 = vld [vmem:[#allocation40_spill] sm:$0xff] }
 0x149   :  { %8267 = vst [vmem:[#allocation137_spill] sm:$0xff] %v6366_v43  ;;  %8268 = vst [vmem:[#allocation138_spill] sm:$0xff] %v6373_v0  ;;  %v738_v53 = vpop.f32.mrf.mxu0  ;;  %v1586_v21 = vmul.f32 0.7978846, %v1458_v36  ;;  %v1140_v0 = vmul.f32 %v8274_v16, %v8273_v4  ;;  %v6390_v23 = vmul.f32 0.044715, %v6327_v19  ;;  %v6393_v27 = vadd.f32 %v807_v55, %v8237_v29 }
 0x14a   :  { %8269 = vst [vmem:[#allocation139_spill] sm:$0xff] %v6376_v49  ;;  %8270 = vst [vmem:[#allocation140_spill] sm:$0xff] %v6379_v56  ;;  %v6396_v62 = vadd.f32 %v738_v53, %v5460_v20  ;;  %4720 = vtanh.f32 %v1579_v25  ;;  %v6402_v38 = vadd.f32 %v809_v48, %v8244_v41  ;;  %v813_v9 = vpop.f32.mrf.mxu1  ;;  %v6409_v55 = vmul.f32 %v1827_v63, %v6127_v37 }
 0x14b   :  { %8271 = vst [vmem:[#allocation141_spill] sm:$0xff] %v6382_v30  ;;  %8272 = vst [vmem:[#allocation142_spill] sm:$0xff] %v6385_v42  ;;  %v6399_v30 = vmul.f32 0.044715, %v6366_v43  ;;  %v740_v36 = vpop.f32.mrf.mxu0  ;;  %4722 = vtanh.f32 %v1517_v52  ;;  %v1268_v16 = vmul.f32 %v1140_v0, %v8273_v4  ;;  %v1765_v53 = vadd.f32 1.0, %v4715_v28 }
 0x14c   :  { %8275 = vst [vmem:[#allocation35_spill] sm:$0xff] %v6390_v23  ;;  %8276 = vst [vmem:[#allocation40_spill] sm:$0xff] %v6393_v27  ;;  %v6406_v23 = vmul.f32 0.044715, %v6376_v49  ;;  %4724 = vtanh.f32 %v1586_v21  ;;  %v4717_v25 = vpop.eup %4716  ;;  %v6412_v43 = vmul.f32 0.044715, %v6385_v42  ;;  %v817_v48 = vpop.f32.mrf.mxu1  ;;  %v1203_v0 = vmul.f32 %v5896_v51, %v5857_v35 }
 0x14d   :  { %8277 = vst [vmem:[#allocation143_spill] sm:$0xff] %v6396_v62  ;;  %8278 = vst [vmem:[#allocation144_spill] sm:$0xff] %v6399_v30  ;;  %v744_v30 = vpop.f32.mrf.mxu0  ;;  %v6415_v19 = vmul.f32 0.5, %v8273_v4  ;;  %v1396_v52 = vadd.f32 %v1268_v16, %v8273_v4  ;;  %v6424_v37 = vmul.f32 0.044715, %v6393_v27  ;;  %v6427_v63 = vadd.f32 %v811_v50, %v8237_v29 }
 0x14e   :  { %8279 = vst [vmem:[#allocation145_spill] sm:$0xff] %v6402_v38  ;;  %8280 = vst [vmem:[#allocation146_spill] sm:$0xff] %v6406_v23  ;;  %v6421_v23 = vmul.f32 0.044715, %v6363_v46  ;;  %v6430_v28 = vadd.f32 %v744_v30, %v5460_v20  ;;  %v6436_v4 = vmul.f32 0.044715, %v6402_v38  ;;  %v819_v16 = vpop.f32.mrf.mxu1  ;;  %v6446_v30 = vmul.f32 %v1765_v53, %v6228_v8 }
 0x14f   :  { %8281 = vst [vmem:[#allocation147_spill] sm:$0xff] %v6412_v43  ;;  %8283 = vst [vmem:[#allocation149_spill] sm:$0xff] %v6424_v37  ;;  %v4719_v21 = vpop.eup %4718  ;;  %v6433_v43 = vmul.f32 0.044715, %v6379_v56  ;;  %v746_v51 = vpop.f32.mrf.mxu0  ;;  %v1524_v46 = vmul.f32 0.7978846, %v1396_v52  ;;  %v6440_v37 = vadd.f32 %v740_v36, %v5466_v24  ;;  %v6461_v8 = vadd.f32 %v817_v48, %v8237_v29 }
 0x150   :  { %8282 = vst [vmem:[#allocation148_spill] sm:$0xff] %v6421_v23  ;;  %8284 = vst [vmem:[#allocation150_spill] sm:$0xff] %v6427_v63  ;;  %v1331_v23 = vmul.f32 %v1203_v0, %v5857_v35  ;;  %v6443_v50 = vadd.f32 %v746_v51, %v5466_v24  ;;  %v1834_v27 = vadd.f32 1.0, %v4717_v25  ;;  %v821_v52 = vpop.f32.mrf.mxu1  ;;  %v8292_v56 = vld [vmem:[#allocation36_spill] sm:$0xff]  ;;  %v8293_v36 = vld [vmem:[#allocation41_spill] sm:$0xff]  ;;  %v1772_v25 = vadd.f32 1.0, %v4719_v21 }
 0x151   :  { %8285 = vst [vmem:[#allocation151_spill] sm:$0xff] %v6430_v28  ;;  %8286 = vst [vmem:[#allocation152_spill] sm:$0xff] %v6433_v43  ;;  %v6449_v43 = vmul.f32 0.044715, %v6396_v62  ;;  %v748_v38 = vpop.f32.mrf.mxu0  ;;  %v1141_v42 = vmul.f32 %v8293_v36, %v8292_v56  ;;  %v6458_v51 = vmul.f32 0.044715, %v6427_v63  ;;  %4726 = vtanh.f32 %v1524_v46 }
 0x152   :  { %8287 = vst [vmem:[#allocation153_spill] sm:$0xff] %v6436_v4  ;;  %8288 = vst [vmem:[#allocation154_spill] sm:$0xff] %v6440_v37  ;;  %v6452_v4 = vadd.f32 %v813_v9, %v8244_v41  ;;  %v1459_v0 = vadd.f32 %v1331_v23, %v5857_v35  ;;  %v6464_v53 = vadd.f32 %v748_v38, %v5460_v20  ;;  %v823_v62 = vpop.f32.mrf.mxu1  ;;  %v6482_v38 = vmul.f32 0.5, %v5857_v35 }
 0x153   :  { %8289 = vst [vmem:[#allocation155_spill] sm:$0xff] %v6443_v50  ;;  %8290 = vst [vmem:[#allocation156_spill] sm:$0xff] %v6449_v43  ;;  %v6467_v9 = vadd.f32 %v819_v16, %v8244_v41  ;;  %v750_v43 = vpop.f32.mrf.mxu0  ;;  %v1269_v23 = vmul.f32 %v1141_v42, %v8292_v56  ;;  %v1210_v36 = vmul.f32 %v5908_v44, %v5869_v58  ;;  %v6499_v35 = vmul.f32 0.5, %v8292_v56 }
 0x154   :  { %8291 = vst [vmem:[#allocation157_spill] sm:$0xff] %v6452_v4  ;;  %8294 = vst [vmem:[#allocation36_spill] sm:$0xff] %v6458_v51  ;;  %v6473_v51 = vmul.f32 0.044715, %v6440_v37  ;;  %v6476_v48 = vadd.f32 %v821_v52, %v8237_v29  ;;  %v6479_v20 = vmul.f32 %v1834_v27, %v6270_v26  ;;  %v6485_v21 = vmul.f32 0.044715, %v6452_v4  ;;  %v827_v46 = vpop.f32.mrf.mxu1 }
 0x155   :  { %8295 = vst [vmem:[#allocation41_spill] sm:$0xff] %v6461_v8  ;;  %8296 = vst [vmem:[#allocation158_spill] sm:$0xff] %v6464_v53  ;;  %v2157_v42 = vpop.f32.mrf.mxu0  ;;  %v1587_v16 = vmul.f32 0.7978846, %v1459_v0  ;;  %v1397_v44 = vadd.f32 %v1269_v23, %v8292_v56  ;;  %v1338_v37 = vmul.f32 %v1210_v36, %v5869_v58  ;;  %v6493_v52 = vmul.f32 0.044715, %v6461_v8 }
 0x156   :  { %8297 = vst [vmem:[#allocation159_spill] sm:$0xff] %v6467_v9  ;;  %8298 = vst [vmem:[#allocation160_spill] sm:$0xff] %v6473_v51  ;;  %v6490_v51 = vmul.f32 0.044715, %v6430_v28  ;;  %v6496_v26 = vadd.f32 %v827_v46, %v8237_v29  ;;  %v6505_v0 = vmul.f32 0.044715, %v6467_v9  ;;  %v829_v23 = vpop.f32.mrf.mxu1 }
 0x157   :  { %8299 = vst [vmem:[#allocation161_spill] sm:$0xff] %v6476_v48  ;;  %8300 = vst [vmem:[#allocation162_spill] sm:$0xff] %v6485_v21  ;;  %v4721_v27 = vpop.eup %4720  ;;  %v6502_v21 = vmul.f32 0.044715, %v6443_v50  ;;  %v2159_v36 = vpop.f32.mrf.mxu0  ;;  %v6512_v46 = vmul.f32 0.044715, %v6464_v53  ;;  %v6518_v50 = vadd.f32 %v829_v23, %v8244_v41  ;;  %4728 = vtanh.f32 %v1587_v16 }
 0x158   :  { %8301 = vst [vmem:[#allocation163_spill] sm:$0xff] %v6490_v51  ;;  %8302 = vst [vmem:[#allocation164_spill] sm:$0xff] %v6493_v52  ;;  %v6508_v51 = vmul.f32 %v1772_v25, %v6273_v45  ;;  %v1466_v52 = vadd.f32 %v1338_v37, %v5869_v58  ;;  %v4723_v8 = vpop.eup %4722  ;;  %v6515_v56 = vmul.f32 0.044715, %v6476_v48  ;;  %v6521_v9 = vmul.f32 0.5, %v5869_v58  ;;  %v831_v37 = vpop.f32.mrf.mxu1  ;;  %v8311_v53 = vld [vmem:[#allocation43_spill] sm:$0xff] }
 0x159   :  { %8303 = vst [vmem:[#allocation165_spill] sm:$0xff] %v6496_v26  ;;  %8304 = vst [vmem:[#allocation166_spill] sm:$0xff] %v6502_v21  ;;  %v6524_v21 = vadd.f32 %v750_v43, %v5466_v24  ;;  %v6527_v45 = vadd.f32 %v823_v62, %v8244_v41  ;;  %v2163_v25 = vpop.f32.mrf.mxu0  ;;  %v2735_v48 = vmul.f32 %v2157_v42, %v8311_v53  ;;  %v8313_v23 = vld [vmem:[#allocation48_spill] sm:$0xff]  ;;  %v8314_v58 = vld [vmem:[#allocation39_spill] sm:$0xff]  ;;  %v1835_v43 = vadd.f32 1.0, %v4721_v27 }
 0x15a   :  { %8305 = vst [vmem:[#allocation167_spill] sm:$0xff] %v6505_v0  ;;  %8306 = vst [vmem:[#allocation168_spill] sm:$0xff] %v6512_v46  ;;  %v4725_v0 = vpop.eup %4724  ;;  %v1525_v46 = vmul.f32 0.7978846, %v1397_v44  ;;  %v2743_v28 = vmul.f32 %v2163_v25, %v8313_v23  ;;  %v8315_v4 = vld [vmem:[#allocation44_spill] sm:$0xff]  ;;  %v833_v49 = vpop.f32.mrf.mxu1  ;;  %v1773_v40 = vadd.f32 1.0, %v4723_v8  ;;  %v1211_v16 = vmul.f32 %v5931_v39, %v5880_v3 }
 0x15b   :  { %8307 = vst [vmem:[#allocation169_spill] sm:$0xff] %v6515_v56  ;;  %8308 = vst [vmem:[#allocation170_spill] sm:$0xff] %v6518_v50  ;;  %v6531_v56 = vadd.f32 %v831_v37, %v8237_v29  ;;  %v1148_v63 = vmul.f32 %v8315_v4, %v8314_v58  ;;  %v2165_v24 = vpop.f32.mrf.mxu0  ;;  %v1594_v62 = vmul.f32 0.7978846, %v1466_v52  ;;  %v8316_v44 = vld [vmem:[#allocation45_spill] sm:$0xff]  ;;  %v1842_v5 = vadd.f32 1.0, %v4725_v0 }
 0x15c   :  { %8309 = vst [vmem:[#allocation171_spill] sm:$0xff] %v6524_v21  ;;  %8310 = vst [vmem:[#allocation172_spill] sm:$0xff] %v6527_v45  ;;  %v2736_v61 = vmul.f32 %v2159_v36, %v8316_v44  ;;  %v2863_v53 = vpack.c.bf16 %v2743_v28, %v2735_v48  ;;  %v8317_v42 = vld [vmem:[#allocation53_spill] sm:$0xff]  ;;  %v837_v17 = vpop.f32.mrf.mxu1  ;;  %4730 = vtanh.f32 %v1525_v46  ;;  %v1339_v27 = vmul.f32 %v1211_v16, %v5880_v3  ;;  %v8318_v8 = vld [vmem:[#allocation42_spill] sm:$0xff] }
 0x15d   :  { %8312 = vst [vmem:[#allocation43_spill] sm:$0xff] %v6531_v56  ;;  %v2744_v37 = vmul.f32 %v2165_v24, %v8317_v42  ;;  %v2169_v25 = vpop.f32.mrf.mxu0  ;;  %v1276_v4 = vmul.f32 %v1148_v63, %v8314_v58  ;;  %v8319_v52 = vld [vmem:[#allocation47_spill] sm:$0xff]  ;;  %v6545_v1 = vmul.f32 0.044715, %v6524_v21  ;;  %v6548_v39 = vmul.f32 0.044715, %v6527_v45 }
 0x15e   :  { %v1149_v23 = vmul.f32 %v8319_v52, %v8318_v8  ;;  %v6551_v48 = vadd.f32 %v837_v17, %v8237_v29  ;;  %v4645_v0 = vld [vmem:[%s5034_s29 + $0x138] sm:$0xff]   ;;  %v839_v36 = vpop.f32.mrf.mxu1  ;;  %4732 = vtanh.f32 %v1594_v62  ;;  %v1467_v24 = vadd.f32 %v1339_v27, %v5880_v3  ;;  %v4648_v44 = vld [vmem:[%s5034_s29 + $0x170] sm:$0xff]   ;;  %v4727_v42 = vpop.eup %4726 }
 0x15f   :  { %8320 = vst [vmem:[#allocation48_spill] sm:$0xff] %v6545_v1  ;;  %8321 = vst [vmem:[#allocation39_spill] sm:$0xff] %v6548_v39  ;;  %v2864_v28 = vpack.c.bf16 %v2744_v37, %v2736_v61  ;;  %v2171_v46 = vpop.f32.mrf.mxu0  ;;  %v1404_v63 = vadd.f32 %v1276_v4, %v8314_v58  ;;  %v6559_v52 = vmul.f32 0.044715, %v6496_v26  ;;  %v6562_v61 = vadd.f32 %v839_v36, %v8244_v41  ;;  %v8332_v39 = vld [vmem:[#allocation50_spill] sm:$0xff]  ;;  %v8334_v45 = vld [vmem:[#allocation20_spill] sm:$0xff] }
 0x160   :  { %8322 = vst [vmem:[#allocation44_spill] sm:$0xff] %v6551_v48  ;;  %v1277_v16 = vmul.f32 %v1149_v23, %v8318_v8  ;;  %v6565_v17 = vmul.f32 %v1835_v43, %v6279_v34  ;;  %v6568_v62 = vmul.f32 0.5, %v8314_v58  ;;  %v6571_v37 = vmul.f32 0.044715, %v6518_v50  ;;  %v841_v4 = vpop.f32.mrf.mxu1  ;;  %v4649_v50 = vld [vmem:[%s5034_s29 + $0x130] sm:$0xff]  }
 0x161   :  { %8323 = vst [vmem:[#allocation45_spill] sm:$0xff] %v6559_v52  ;;  %8324 = vst [vmem:[#allocation53_spill] sm:$0xff] %v6562_v61  ;;  %3633 = vmatprep.mubr.bf16.mxu1 %v2864_v28  ;;  %v2175_v27 = vpop.f32.mrf.mxu0  ;;  %v6574_v23 = vmul.f32 %v1773_v40, %v6352_v11  ;;  %v6577_v36 = vmul.f32 %v1842_v5, %v6369_v15  ;;  %v2751_v34 = vmul.f32 %v2169_v25, %v5863_v13  ;;  %v4650_v13 = vld [vmem:[%s5034_s29 + $0x168] sm:$0xff]  }
 0x162   :  { %8325 = vst [vmem:[#allocation42_spill] sm:$0xff] %v6571_v37  ;;  %3634 = vmatmul.mubr.bf16.vlgmr.msra.gmra.mxu1 %v2863_v53  ;;  %v1405_v28 = vadd.f32 %v1277_v16, %v8318_v8  ;;  %v6582_v58 = vadd.f32 %v841_v4, %v8237_v29  ;;  %v2759_v43 = vmul.f32 %v2175_v27, %v5913_v12  ;;  %v1532_v37 = vmul.f32 0.7978846, %v1404_v63  ;;  %v843_v40 = vpop.f32.mrf.mxu1  ;;  %v8329_v27 = vld [vmem:[#allocation9_spill] sm:$0xff] }
 0x163   :  { %4448 = vmatpush3.bf16.msra.mxu1 %v4645_v0  ;;  %v6587_v53 = vadd.f32 %v833_v49, %v8244_v41  ;;  %v2177_v11 = vpop.f32.mrf.mxu0  ;;  %v1780_v52 = vadd.f32 1.0, %v4727_v42  ;;  %v6590_v5 = vmul.f32 0.5, %v5880_v3  ;;  %v1595_v15 = vmul.f32 0.7978846, %v1467_v24  ;;  %v8330_v42 = vld [vmem:[#allocation24_spill] sm:$0xff]  ;;  %v8331_v3 = vld [vmem:[#allocation46_spill] sm:$0xff] }
 0x164   :  { %8326 = vst [vmem:[#allocation47_spill] sm:$0xff] %v6582_v58  ;;  %4449 = vmatprep.subr.bf16.mxu1 %v4648_v44  ;;  %v2752_v25 = vmul.f32 %v2171_v46, %v5884_v59  ;;  %v2871_v16 = vpack.c.bf16 %v2759_v43, %v2751_v34  ;;  %v2760_v12 = vmul.f32 %v2177_v11, %v5927_v22  ;;  %v1533_v0 = vmul.f32 0.7978846, %v1405_v28  ;;  %v847_v49 = vpop.f32.mrf.mxu1  ;;  %v8333_v44 = vld [vmem:[#allocation13_spill] sm:$0xff]  ;;  %v4729_v46 = vpop.eup %4728  ;;  %v4652_v43 = vld [vmem:[%s5034_s29 + $0x128] sm:$0xff]  }
 0x165   :  { %8327 = vst [vmem:[#allocation173_spill] sm:$0xff] %v6587_v53  ;;  %v6596_v63 = vmul.f32 0.044715, %v6531_v56  ;;  %v2181_v4 = vpop.f32.mrf.mxu0  ;;  %v1474_v26 = vadd.f32 %v8330_v42, %v8329_v27  ;;  %v1156_v24 = vmul.f32 %v8332_v39, %v8331_v3  ;;  %v1219_v59 = vmul.f32 %v8334_v45, %v8333_v44 }
 0x166   :  { %v2872_v34 = vpack.c.bf16 %v2760_v12, %v2752_v25  ;;  %v6605_v22 = vadd.f32 %v847_v49, %v8237_v29  ;;  %4734 = vtanh.f32 %v1532_v37  ;;  %v6608_v28 = vmul.f32 0.5, %v8318_v8  ;;  %v849_v27 = vpop.f32.mrf.mxu1  ;;  %v4654_v25 = vld [vmem:[%s5034_s29 + $0x160] sm:$0xff]  }
 0x167   :  { %8328 = vst [vmem:[#allocation174_spill] sm:$0xff] %v6596_v63  ;;  %4450 = vmatpush3.bf16.msra.mxu1 %v4649_v50  ;;  %v6612_v11 = vmul.f32 0.044715, %v6587_v53  ;;  %v2183_v39 = vpop.f32.mrf.mxu0  ;;  %4736 = vtanh.f32 %v1595_v15  ;;  %v1284_v42 = vmul.f32 %v1156_v24, %v8331_v3  ;;  %v1347_v45 = vmul.f32 %v1219_v59, %v8333_v44 }
 0x168   :  { %8335 = vst [vmem:[#allocation9_spill] sm:$0xff] %v6605_v22  ;;  %4451 = vmatprep.subr.bf16.mxu1 %v4650_v13  ;;  %v6618_v12 = vmul.f32 0.044715, %v6551_v48  ;;  %v6621_v8 = vadd.f32 %v849_v27, %v8244_v41  ;;  %3641 = vmatprep.mubr.bf16.mxu1 %v2872_v34  ;;  %v6624_v50 = vmul.f32 %v1780_v52, %v6415_v19  ;;  %4738 = vtanh.f32 %v1533_v0  ;;  %v851_v15 = vpop.f32.mrf.mxu1  ;;  %v4655_v0 = vld [vmem:[%s5034_s29 + $0x120] sm:$0xff]  }
 0x169   :  { %8336 = vst [vmem:[#allocation24_spill] sm:$0xff] %v6612_v11  ;;  %v6627_v37 = vmul.f32 0.044715, %v6562_v61  ;;  %v2187_v49 = vpop.f32.mrf.mxu0  ;;  %v1602_v13 = vmul.f32 0.7978846, %v1474_v26  ;;  %v1412_v24 = vadd.f32 %v1284_v42, %v8331_v3  ;;  %v1475_v59 = vadd.f32 %v1347_v45, %v8333_v44  ;;  %v4731_v27 = vpop.eup %4730  ;;  %v8342_v45 = vld [vmem:[#allocation49_spill] sm:$0xff] }
 0x16a   :  { %8337 = vst [vmem:[#allocation46_spill] sm:$0xff] %v6618_v12  ;;  %8338 = vst [vmem:[#allocation50_spill] sm:$0xff] %v6621_v8  ;;  %3642 = vmatmul.mubr.bf16.gmra.mxu1 %v2871_v16  ;;  %v2767_v34 = vmul.f32 %v2181_v4, %v6035_v54  ;;  %v6633_v12 = vadd.f32 %v851_v15, %v8237_v29  ;;  %v2775_v19 = vmul.f32 %v2187_v49, %v6106_v57  ;;  %v853_v26 = vpop.f32.mrf.mxu1  ;;  %v8343_v61 = vld [vmem:[#allocation55_spill] sm:$0xff]  ;;  %v4656_v4 = vld [vmem:[%s5034_s29 + $0x158] sm:$0xff]  }
 0x16b   :  { %8339 = vst [vmem:[#allocation13_spill] sm:$0xff] %v6627_v37  ;;  %v1843_v52 = vadd.f32 1.0, %v4729_v46  ;;  %4452 = vmatpush3.bf16.msra.mxu1 %v4652_v43  ;;  %v6638_v37 = vadd.f32 %v843_v40, %v8244_v41  ;;  %v2189_v16 = vpop.f32.mrf.mxu0  ;;  %v6641_v42 = vmul.f32 0.5, %v8331_v3  ;;  %v1540_v44 = vmul.f32 0.7978846, %v1412_v24  ;;  %v4733_v15 = vpop.eup %4732 }
 0x16c   :  { %8340 = vst [vmem:[#allocation20_spill] sm:$0xff] %v6633_v12  ;;  %v1157_v54 = vmul.f32 %v8343_v61, %v8342_v45  ;;  %4453 = vmatprep.subr.bf16.mxu1 %v4654_v25  ;;  %v2768_v57 = vmul.f32 %v2183_v39, %v6043_v10  ;;  %v2879_v46 = vpack.c.bf16 %v2775_v19, %v2767_v34  ;;  %v1603_v40 = vmul.f32 0.7978846, %v1475_v59  ;;  %v857_v48 = vpop.f32.mrf.mxu1  ;;  %v8345_v61 = vld [vmem:[#allocation16_spill] sm:$0xff]  ;;  %v8346_v25 = vld [vmem:[#allocation21_spill] sm:$0xff] }
 0x16d   :  { %8341 = vst [vmem:[#allocation175_spill] sm:$0xff] %v6638_v37  ;;  %v2776_v43 = vmul.f32 %v2189_v16, %v6190_v7  ;;  %v6649_v49 = vmul.f32 0.044715, %v6582_v58  ;;  %v2193_v3 = vpop.f32.mrf.mxu0  ;;  %v1781_v11 = vadd.f32 1.0, %v4731_v27  ;;  %v1226_v53 = vmul.f32 %v8346_v25, %v8345_v61  ;;  %v4658_v7 = vld [vmem:[%s5034_s29 + $0x118] sm:$0xff]   ;;  %v4660_v16 = vld [vmem:[%s5034_s29 + $0x150] sm:$0xff]  }
 0x16e   :  { %v1285_v24 = vmul.f32 %v1157_v54, %v8342_v45  ;;  %v6655_v56 = vadd.f32 %v857_v48, %v8237_v29  ;;  %v6658_v10 = vmul.f32 %v1843_v52, %v6482_v38  ;;  %4740 = vtanh.f32 %v1602_v13  ;;  %v859_v59 = vpop.f32.mrf.mxu1  ;;  %v8350_v13 = vld [vmem:[#allocation52_spill] sm:$0xff]  ;;  %v8351_v52 = vld [vmem:[#allocation58_spill] sm:$0xff] }
 0x16f   :  { %8344 = vst [vmem:[#allocation49_spill] sm:$0xff] %v6649_v49  ;;  %v2880_v63 = vpack.c.bf16 %v2776_v43, %v2768_v57  ;;  %4454 = vmatpush3.bf16.msra.mxu1 %v4655_v0  ;;  %v6662_v39 = vmul.f32 0.044715, %v6638_v37  ;;  %v2195_v27 = vpop.f32.mrf.mxu0  ;;  %v1850_v34 = vadd.f32 1.0, %v4733_v15  ;;  %4742 = vtanh.f32 %v1540_v44  ;;  %v8407_v37 = vld [vmem:[#allocation31_spill] sm:$0xff]  ;;  %v8408_v49 = vld [vmem:[#allocation94_spill] sm:$0xff] }
 0x170   :  { %8347 = vst [vmem:[#allocation55_spill] sm:$0xff] %v6655_v56  ;;  %v1354_v19 = vmul.f32 %v1226_v53, %v8345_v61  ;;  %4455 = vmatprep.subr.bf16.mxu1 %v4656_v4  ;;  %v6667_v48 = vadd.f32 %v859_v59, %v8244_v41  ;;  %4744 = vtanh.f32 %v1603_v40  ;;  %v1413_v38 = vadd.f32 %v1285_v24, %v8342_v45  ;;  %v861_v53 = vpop.f32.mrf.mxu1  ;;  %v8423_v58 = vld [vmem:[#allocation98_spill] sm:$0xff] }
 0x171   :  { %8348 = vst [vmem:[#allocation16_spill] sm:$0xff] %v6662_v39  ;;  %3649 = vmatprep.mubr.bf16.mxu1 %v2880_v63  ;;  %v1164_v0 = vmul.f32 %v8351_v52, %v8350_v13  ;;  %v6673_v54 = vmul.f32 0.044715, %v6605_v22  ;;  %v6676_v44 = vadd.f32 %v853_v26, %v8244_v41  ;;  %v2199_v4 = vpop.f32.mrf.mxu0  ;;  %v6679_v15 = vmul.f32 %v1781_v11, %v6499_v35  ;;  %v4661_v26 = vld [vmem:[%s5034_s29 + $0x110] sm:$0xff]  }
 0x172   :  { %8349 = vst [vmem:[#allocation21_spill] sm:$0xff] %v6667_v48  ;;  %3650 = vmatmul.mubr.bf16.gmra.mxu1 %v2879_v46  ;;  %v1482_v63 = vadd.f32 %v1354_v19, %v8345_v61  ;;  %v2783_v57 = vmul.f32 %v2193_v3, %v6210_v33  ;;  %v6684_v43 = vadd.f32 %v861_v53, %v8237_v29  ;;  %v6690_v46 = vmul.f32 0.044715, %v6621_v8  ;;  %v6692_v35 = vpop.f32.mrf.mxu1 }
 0x173   :  { %8352 = vst [vmem:[#allocation52_spill] sm:$0xff] %v6673_v54  ;;  %8353 = vst [vmem:[#allocation58_spill] sm:$0xff] %v6676_v44  ;;  %v2791_v40 = vmul.f32 %v2199_v4, %v6261_v2  ;;  %v1292_v24 = vmul.f32 %v1164_v0, %v8350_v13  ;;  %4456 = vmatpush3.bf16.msra.mxu1 %v4658_v7  ;;  %v4735_v25 = vpop.eup %4734  ;;  %v2201_v11 = vpop.f32.mrf.mxu0  ;;  %v6695_v59 = vmul.f32 %v1850_v34, %v6521_v9  ;;  %v4662_v2 = vld [vmem:[%s5034_s29 + $0x148] sm:$0xff]  }
 0x174   :  { %8354 = vst [vmem:[#allocation176_spill] sm:$0xff] %v6684_v43  ;;  %8355 = vst [vmem:[#allocation177_spill] sm:$0xff] %v6690_v46  ;;  %v6698_v33 = vmul.f32 0.5, %v8342_v45  ;;  %v1610_v29 = vmul.f32 0.7978846, %v1482_v63  ;;  %4457 = vmatprep.subr.bf16.mxu1 %v4660_v16  ;;  %v4737_v3 = vpop.eup %4736  ;;  %v2784_v7 = vmul.f32 %v2195_v27, %v6216_v14  ;;  %v2792_v52 = vmul.f32 %v2201_v11, %v6315_v31  ;;  %v2318_v34 = vpop.f32.mrf.mxu1  ;;  %v4664_v63 = vld [vmem:[%s5034_s29 + $0x108] sm:$0xff]  }
 0x175   :  { %v2887_v19 = vpack.c.bf16 %v2791_v40, %v2783_v57  ;;  %v1541_v0 = vmul.f32 0.7978846, %v1413_v38  ;;  %v4739_v53 = vpop.eup %4738  ;;  %v6704_v4 = vmul.f32 0.044715, %v6633_v12  ;;  %v2205_v9 = vpop.f32.mrf.mxu0  ;;  %v6707_v45 = vmul.f32 0.5, %v8345_v61  ;;  %v8364_v12 = vld [vmem:[#allocation56_spill] sm:$0xff] }
 0x176   :  { %4746 = vtanh.f32 %v1610_v29  ;;  %v1420_v16 = vadd.f32 %v1292_v24, %v8350_v13  ;;  %v6711_v14 = vmul.f32 0.044715, %v6676_v44  ;;  %v6714_v27 = vmul.f32 0.044715, %v6655_v56  ;;  %v2320_v40 = vpop.f32.mrf.mxu1  ;;  %v8360_v24 = vld [vmem:[#allocation23_spill] sm:$0xff] }
 0x177   :  { %8356 = vst [vmem:[#allocation178_spill] sm:$0xff] %v6704_v4  ;;  %v2888_v31 = vpack.c.bf16 %v2792_v52, %v2784_v7  ;;  %v6717_v38 = vmul.f32 0.5, %v8350_v13  ;;  %4458 = vmatpush3.bf16.msra.mxu1 %v4661_v26  ;;  %v2207_v57 = vpop.f32.mrf.mxu0  ;;  %v1788_v61 = vadd.f32 1.0, %v4735_v25  ;;  %v8359_v4 = vld [vmem:[#allocation18_spill] sm:$0xff]  ;;  %v1789_v7 = vadd.f32 1.0, %v4739_v53  ;;  %v8361_v13 = vld [vmem:[#allocation60_spill] sm:$0xff] }
 0x178   :  { %8357 = vst [vmem:[#allocation179_spill] sm:$0xff] %v6711_v14  ;;  %8358 = vst [vmem:[#allocation180_spill] sm:$0xff] %v6714_v27  ;;  %v1548_v11 = vmul.f32 0.7978846, %v1420_v16  ;;  %v6721_v29 = vmul.f32 0.5, %v8359_v4  ;;  %v1227_v44 = vmul.f32 %v8360_v24, %v8359_v4  ;;  %4459 = vmatprep.subr.bf16.mxu1 %v4662_v2  ;;  %v4666_v14 = vld [vmem:[%s5034_s29 + $0x140] sm:$0xff]   ;;  %4748 = vtanh.f32 %v1541_v0  ;;  %v2324_v56 = vpop.f32.mrf.mxu1 }
 0x179   :  { %3657 = vmatprep.mubr.bf16.mxu1 %v2888_v31  ;;  %v1851_v27 = vadd.f32 1.0, %v4737_v3  ;;  %v1165_v26 = vmul.f32 %v8361_v13, %v5807_v32  ;;  %v2799_v52 = vmul.f32 %v2205_v9, %v6343_v47  ;;  %v2737_v25 = vmul.f32 %v2318_v34, %v6346_v18  ;;  %v2211_v16 = vpop.f32.mrf.mxu0  ;;  %v4667_v31 = vld [vmem:[%s5034_s29 + $0x100] sm:$0xff]   ;;  %v8362_v34 = vld [vmem:[#allocation12_spill] sm:$0xff] }
 0x17a   :  { %3658 = vmatmul.mubr.bf16.gmra.mxu1 %v2887_v19  ;;  %4750 = vtanh.f32 %v1548_v11  ;;  %v1355_v24 = vmul.f32 %v1227_v44, %v8359_v4  ;;  %v2800_v2 = vmul.f32 %v2207_v57, %v6409_v55  ;;  %v2807_v3 = vmul.f32 %v2211_v16, %v6479_v20  ;;  %v2326_v9 = vpop.f32.mrf.mxu1  ;;  %v8363_v11 = vld [vmem:[#allocation25_spill] sm:$0xff] }
 0x17b   :  { %v2745_v53 = vmul.f32 %v2324_v56, %v6508_v51  ;;  %v1293_v0 = vmul.f32 %v1165_v26, %v5807_v32  ;;  %4460 = vmatpush3.bf16.msra.mxu1 %v4664_v63  ;;  %v4741_v13 = vpop.eup %4740  ;;  %v2738_v47 = vmul.f32 %v2320_v40, %v6446_v30  ;;  %v2213_v18 = vpop.f32.mrf.mxu0  ;;  %v1234_v44 = vmul.f32 %v8363_v11, %v8362_v34  ;;  %v8365_v55 = vld [vmem:[#allocation61_spill] sm:$0xff] }
 0x17c   :  { %v1483_v19 = vadd.f32 %v1355_v24, %v8359_v4  ;;  %v1172_v57 = vmul.f32 %v8365_v55, %v8364_v12  ;;  %4461 = vmatprep.subr.bf16.mxu1 %v4666_v14  ;;  %v4743_v51 = vpop.eup %4742  ;;  %v2895_v20 = vpack.c.bf16 %v2807_v3, %v2799_v52  ;;  %v2808_v63 = vmul.f32 %v2213_v18, %v6565_v17  ;;  %v2330_v16 = vpop.f32.mrf.mxu1  ;;  %v4647_v52 = vld [vmem:[%s5034_s29 + $0x1b8] sm:$0xff]   ;;  %v4651_v18 = vld [vmem:[%s5034_s29 + $0x1f0] sm:$0xff]  }
 0x17d   :  { %v2865_v56 = vpack.c.bf16 %v2745_v53, %v2737_v25  ;;  %v2746_v26 = vmul.f32 %v2326_v9, %v6574_v23  ;;  %v4745_v30 = vpop.eup %4744  ;;  %v6745_v40 = vmul.f32 0.044715, %v6667_v48  ;;  %v2217_v4 = vpop.f32.mrf.mxu0  ;;  %v1916_v24 = vmul.f32 %v1788_v61, %v6568_v62 }
 0x17e   :  { %v1611_v11 = vmul.f32 0.7978846, %v1483_v19  ;;  %v1421_v55 = vadd.f32 %v1293_v0, %v5807_v32  ;;  %v2896_v14 = vpack.c.bf16 %v2808_v63, %v2800_v2  ;;  %v1979_v25 = vmul.f32 %v1851_v27, %v6590_v5  ;;  %v2332_v3 = vpop.f32.mrf.mxu1 }
 0x17f   :  { %8366 = vst [vmem:[#allocation18_spill] sm:$0xff] %v6745_v40  ;;  %v2866_v43 = vpack.c.bf16 %v2746_v26, %v2738_v47  ;;  %v1917_v17 = vmul.f32 %v1789_v7, %v6608_v28  ;;  %4462 = vmatpush3.bf16.msra.mxu1 %v4667_v31  ;;  %v2219_v23 = vpop.f32.mrf.mxu0  ;;  %v1858_v53 = vadd.f32 1.0, %v4741_v13  ;;  %v1362_v40 = vmul.f32 %v1234_v44, %v8362_v34  ;;  %v8367_v31 = vld [vmem:[#allocation14_spill] sm:$0xff] }
 0x180   :  { %4752 = vtanh.f32 %v1611_v11  ;;  %v1549_v9 = vmul.f32 0.7978846, %v1421_v55  ;;  %v6755_v62 = vmul.f32 %v2217_v4, %v6577_v36  ;;  %3665 = vmatprep.mubr.bf16.mxu1 %v2896_v14  ;;  %v1796_v61 = vadd.f32 1.0, %v4743_v51  ;;  %v2336_v7 = vpop.f32.mrf.mxu1  ;;  %v8368_v13 = vld [vmem:[#allocation26_spill] sm:$0xff]  ;;  %v8369_v11 = vld [vmem:[#allocation15_spill] sm:$0xff] }
 0x181   :  { %3730 = vmatprep.mubr.bf16.mxu0 %v2866_v43  ;;  %v1859_v2 = vadd.f32 1.0, %v4745_v30  ;;  %v1300_v5 = vmul.f32 %v1172_v57, %v8364_v12  ;;  %v2753_v28 = vmul.f32 %v2330_v16, %v6624_v50  ;;  %v2223_v27 = vpop.f32.mrf.mxu0  ;;  %v1490_v0 = vadd.f32 %v1362_v40, %v8362_v34  ;;  %v4653_v57 = vld [vmem:[%s5034_s29 + $0x1b0] sm:$0xff]   ;;  %v4657_v40 = vld [vmem:[%s5034_s29 + $0x1e8] sm:$0xff]  }
 0x182   :  { %3666 = vmatmul.mubr.bf16.gmra.mxu1 %v2895_v20  ;;  %3731 = vmatmul.mubr.bf16.vlgmr.msra.gmra.mxu0 %v2865_v56  ;;  %4754 = vtanh.f32 %v1549_v9  ;;  %v1235_v36 = vmul.f32 %v8368_v13, %v8367_v31  ;;  %v2816_v43 = vmul.f32 %v2219_v23, %v6658_v10  ;;  %v2823_v19 = vmul.f32 %v2223_v27, %v6695_v59  ;;  %v2338_v56 = vpop.f32.mrf.mxu1 }
 0x183   :  { %v4747_v47 = vpop.eup %4746  ;;  %v2761_v44 = vmul.f32 %v2336_v7, %v1916_v24  ;;  %4512 = vmatpush3.bf16.msra.mxu0 %v4647_v52  ;;  %v1428_v50 = vadd.f32 %v1300_v5, %v8364_v12  ;;  %v2754_v51 = vmul.f32 %v2332_v3, %v6679_v15  ;;  %v2225_v20 = vpop.f32.mrf.mxu0  ;;  %v1618_v26 = vmul.f32 0.7978846, %v1490_v0  ;;  %v4663_v7 = vld [vmem:[%s5034_s29 + $0x1e0] sm:$0xff]  }
 0x184   :  { %v1866_v63 = vadd.f32 1.0, %v4747_v47  ;;  %4513 = vmatprep.subr.bf16.mxu0 %v4651_v18  ;;  %v1363_v30 = vmul.f32 %v1235_v36, %v8367_v31  ;;  %v2903_v4 = vpack.c.bf16 %v2823_v19, %v6755_v62  ;;  %v2824_v59 = vmul.f32 %v2225_v20, %v1979_v25  ;;  %v2342_v52 = vpop.f32.mrf.mxu1  ;;  %v4659_v25 = vld [vmem:[%s5034_s29 + $0x1a8] sm:$0xff]   ;;  %v8370_v0 = vld [vmem:[#allocation22_spill] sm:$0xff]  ;;  %v8371_v36 = vld [vmem:[#allocation17_spill] sm:$0xff] }
 0x185   :  { %v2873_v10 = vpack.c.bf16 %v2761_v44, %v2753_v28  ;;  %v2762_v16 = vmul.f32 %v2338_v56, %v1917_v17  ;;  %v4749_v24 = vpop.eup %4748  ;;  %v1986_v55 = vmul.f32 %v1858_v53, %v8369_v11  ;;  %v2229_v14 = vpop.f32.mrf.mxu0  ;;  %v6772_v15 = vmul.f32 0.5, %v5807_v32  ;;  %v8372_v47 = vld [vmem:[#allocation28_spill] sm:$0xff]  ;;  %v8373_v20 = vld [vmem:[#allocation62_spill] sm:$0xff]  ;;  %v8374_v56 = vld [vmem:[#allocation65_spill] sm:$0xff] }
 0x186   :  { %v1556_v23 = vmul.f32 0.7978846, %v1428_v50  ;;  %v1491_v3 = vadd.f32 %v1363_v30, %v8367_v31  ;;  %v2904_v9 = vpack.c.bf16 %v2824_v59, %v2816_v43  ;;  %v1924_v62 = vmul.f32 %v1796_v61, %v6641_v42  ;;  %v6779_v53 = vpop.f32.mrf.mxu1  ;;  %v8376_v59 = vld [vmem:[#allocation29_spill] sm:$0xff] }
 0x187   :  { %v4751_v18 = vpop.eup %4750  ;;  %v2874_v5 = vpack.c.bf16 %v2762_v16, %v2754_v51  ;;  %4514 = vmatpush3.bf16.msra.mxu0 %v4653_v57  ;;  %4756 = vtanh.f32 %v1618_v26  ;;  %v6777_v17 = vpop.f32.mrf.mxu0  ;;  %v1173_v27 = vmul.f32 %v5899_v60, %v5860_v6  ;;  %v1987_v13 = vmul.f32 %v1859_v2, %v8370_v0  ;;  %v4665_v26 = vld [vmem:[%s5034_s29 + $0x1a0] sm:$0xff]  }
 0x188   :  { %v1804_v28 = vadd.f32 1.0, %v4751_v18  ;;  %4758 = vtanh.f32 %v1556_v23  ;;  %v1619_v32 = vmul.f32 0.7978846, %v1491_v3  ;;  %4515 = vmatprep.subr.bf16.mxu0 %v4657_v40  ;;  %3673 = vmatprep.mubr.bf16.mxu1 %v2904_v9  ;;  %v1994_v42 = vmul.f32 %v1866_v63, %v6707_v45  ;;  %v2348_v50 = vpop.f32.mrf.mxu1  ;;  %v8377_v23 = vld [vmem:[#allocation63_spill] sm:$0xff] }
 0x189   :  { %3738 = vmatprep.mubr.bf16.mxu0 %v2874_v5  ;;  %v6787_v61 = vmul.f32 0.5, %v8362_v34  ;;  %v1242_v43 = vmul.f32 %v8372_v47, %v8371_v36  ;;  %v6791_v19 = vmul.f32 %v2229_v14, %v1986_v55  ;;  %v1797_v44 = vadd.f32 1.0, %v4749_v24  ;;  %v2235_v57 = vpop.f32.mrf.mxu0  ;;  %v4668_v24 = vld [vmem:[%s5034_s29 + $0x1d8] sm:$0xff]   ;;  %v8378_v3 = vld [vmem:[#allocation67_spill] sm:$0xff] }
 0x18a   :  { %v1932_v60 = vmul.f32 %v1804_v28, %v6717_v38  ;;  %3674 = vmatmul.mubr.bf16.gmra.mxu1 %v2903_v4  ;;  %3739 = vmatmul.mubr.bf16.gmra.mxu0 %v2873_v10  ;;  %v1301_v2 = vmul.f32 %v1173_v27, %v5860_v6  ;;  %v6795_v45 = vmul.f32 %v2342_v52, %v1924_v62  ;;  %v2350_v40 = vpop.f32.mrf.mxu1  ;;  %4760 = vtanh.f32 %v1619_v32  ;;  %v8375_v10 = vld [vmem:[#allocation19_spill] sm:$0xff] }
 0x18b   :  { %v6797_v51 = vmul.f32 %v2235_v57, %v1994_v42  ;;  %v1370_v34 = vmul.f32 %v1242_v43, %v8371_v36  ;;  %v1180_v63 = vmul.f32 %v8374_v56, %v8373_v20  ;;  %4516 = vmatpush3.bf16.msra.mxu0 %v4659_v25  ;;  %v2237_v38 = vpop.f32.mrf.mxu0  ;;  %v1243_v16 = vmul.f32 %v8376_v59, %v8375_v10  ;;  %v4669_v43 = vld [vmem:[%s5034_s29 + $0x198] sm:$0xff]   ;;  %v8380_v56 = vld [vmem:[#allocation68_spill] sm:$0xff] }
 0x18c   :  { %v6803_v30 = vmul.f32 %v2348_v50, %v1932_v60  ;;  %v1429_v4 = vadd.f32 %v1301_v2, %v5860_v6  ;;  %4517 = vmatprep.subr.bf16.mxu0 %v4663_v7  ;;  %v1181_v18 = vmul.f32 %v8378_v3, %v8377_v23  ;;  %v6819_v25 = vpop.f32.mrf.mxu1  ;;  %v1925_v7 = vmul.f32 %v1797_v44, %v6698_v33  ;;  %v8382_v3 = vld [vmem:[#allocation73_spill] sm:$0xff] }
 0x18d   :  { %v4753_v11 = vpop.eup %4752  ;;  %v2911_v55 = vpack.c.bf16 %v6797_v51, %v6791_v19  ;;  %v1498_v14 = vadd.f32 %v1370_v34, %v8371_v36  ;;  %v1308_v52 = vmul.f32 %v1180_v63, %v8373_v20  ;;  %v6817_v62 = vpop.f32.mrf.mxu0  ;;  %v1371_v32 = vmul.f32 %v1243_v16, %v8375_v10  ;;  %v4670_v51 = vld [vmem:[%s5034_s29 + $0x1d0] sm:$0xff]  }
 0x18e   :  { %v2881_v9 = vpack.c.bf16 %v6803_v30, %v6795_v45  ;;  %v1867_v5 = vadd.f32 1.0, %v4753_v11  ;;  %v1557_v28 = vmul.f32 0.7978846, %v1429_v4  ;;  %v1309_v47 = vmul.f32 %v1181_v18, %v8377_v23  ;;  %v6829_v50 = vpop.f32.mrf.mxu1  ;;  %v8379_v34 = vld [vmem:[#allocation64_spill] sm:$0xff] }
 0x18f   :  { %v4755_v27 = vpop.eup %4754  ;;  %v1626_v0 = vmul.f32 0.7978846, %v1498_v14  ;;  %v1436_v42 = vadd.f32 %v1308_v52, %v8373_v20  ;;  %4518 = vmatpush3.bf16.msra.mxu0 %v4665_v26  ;;  %v6827_v60 = vpop.f32.mrf.mxu0  ;;  %v1499_v2 = vadd.f32 %v1371_v32, %v8375_v10  ;;  %v1188_v63 = vmul.f32 %v8380_v56, %v8379_v34  ;;  %v8381_v52 = vld [vmem:[#allocation66_spill] sm:$0xff] }
 0x190   :  { %v1995_v19 = vmul.f32 %v1867_v5, %v6721_v29  ;;  %v1805_v57 = vadd.f32 1.0, %v4755_v27  ;;  %4762 = vtanh.f32 %v1557_v28  ;;  %4519 = vmatprep.subr.bf16.mxu0 %v4668_v24  ;;  %v1437_v44 = vadd.f32 %v1309_v47, %v8377_v23  ;;  %v6840_v16 = vpop.f32.mrf.mxu1  ;;  %v4671_v5 = vld [vmem:[%s5034_s29 + $0x190] sm:$0xff]   ;;  %v4672_v27 = vld [vmem:[%s5034_s29 + $0x1c8] sm:$0xff]  }
 0x191   :  { %4764 = vtanh.f32 %v1626_v0  ;;  %v1564_v33 = vmul.f32 0.7978846, %v1436_v42  ;;  %v2832_v29 = vmul.f32 %v6777_v17, %v1987_v13  ;;  %v6838_v59 = vpop.f32.mrf.mxu0  ;;  %v1627_v24 = vmul.f32 0.7978846, %v1499_v2  ;;  %v8383_v2 = vld [vmem:[#allocation69_spill] sm:$0xff] }
 0x192   :  { %v2840_v26 = vmul.f32 %v2237_v38, %v1995_v19  ;;  %v1933_v4 = vmul.f32 %v1805_v57, %v6772_v15  ;;  %v1565_v11 = vmul.f32 0.7978846, %v1437_v44  ;;  %v1316_v14 = vmul.f32 %v1188_v63, %v8379_v34  ;;  %v6849_v32 = vpop.f32.mrf.mxu1  ;;  %v8385_v63 = vld [vmem:[#allocation70_spill] sm:$0xff] }
 0x193   :  { %4766 = vtanh.f32 %v1564_v33  ;;  %v1126_v18 = vmul.f32 %v8382_v3, %v8381_v52  ;;  %4520 = vmatpush3.bf16.msra.mxu0 %v4669_v43  ;;  %v2770_v17 = vmul.f32 %v6779_v53, %v1925_v7  ;;  %v6847_v38 = vpop.f32.mrf.mxu0  ;;  %v916_v42 = vmul.f32 0.5, %v8364_v12  ;;  %v8384_v12 = vld [vmem:[#allocation6_spill] sm:$0xff] }
 0x194   :  { %v4757_v28 = vpop.eup %4756  ;;  %v2912_v13 = vpack.c.bf16 %v2840_v26, %v2832_v29  ;;  %v2778_v15 = vmul.f32 %v2350_v40, %v1933_v4  ;;  %4768 = vtanh.f32 %v1627_v24  ;;  %4521 = vmatprep.subr.bf16.mxu0 %v4670_v51  ;;  %v1444_v47 = vadd.f32 %v1316_v14, %v8379_v34  ;;  %v6861_v7 = vpop.f32.mrf.mxu1  ;;  %v4674_v3 = vld [vmem:[%s5034_s29 + $0x1c0] sm:$0xff]  }
 0x195   :  { %v4759_v0 = vpop.eup %4758  ;;  %4770 = vtanh.f32 %v1565_v11  ;;  %v1254_v43 = vmul.f32 %v1126_v18, %v8381_v52  ;;  %v6856_v53 = vmul.f32 0.5, %v8367_v31  ;;  %v6859_v40 = vmul.f32 0.5, %v5860_v6  ;;  %v6863_v57 = vpop.f32.mrf.mxu0  ;;  %v8386_v31 = vld [vmem:[#allocation79_spill] sm:$0xff] }
 0x196   :  { %v2882_v19 = vpack.c.bf16 %v2778_v15, %v2770_v17  ;;  %3681 = vmatprep.mubr.bf16.mxu1 %v2912_v13  ;;  %v1189_v51 = vmul.f32 %v8384_v12, %v8383_v2  ;;  %v1874_v33 = vadd.f32 1.0, %v4757_v28  ;;  %v1572_v44 = vmul.f32 0.7978846, %v1444_v47  ;;  %v4673_v6 = vld [vmem:[%s5034_s29 + $0x188] sm:$0xff]   ;;  %v6876_v14 = vpop.f32.mrf.mxu1  ;;  %v8389_v47 = vld [vmem:[#allocation74_spill] sm:$0xff] }
 0x197   :  { %3682 = vmatmul.mubr.bf16.gmra.mxu1 %v2911_v55  ;;  %v1382_v56 = vadd.f32 %v1254_v43, %v8381_v52  ;;  %v1127_v29 = vmul.f32 %v8386_v31, %v8385_v63  ;;  %4522 = vmatpush3.bf16.msra.mxu0 %v4671_v5  ;;  %v1812_v26 = vadd.f32 1.0, %v4759_v0  ;;  %v986_v4 = vmul.f32 0.5, %v8371_v36  ;;  %v6878_v55 = vpop.f32.mrf.mxu0  ;;  %v4761_v18 = vpop.eup %4760  ;;  %v8387_v15 = vld [vmem:[#allocation71_spill] sm:$0xff] }
 0x198   :  { %3746 = vmatprep.mubr.bf16.mxu0 %v2882_v19  ;;  %v6873_v24 = vmul.f32 0.5, %v8373_v20  ;;  %v1317_v11 = vmul.f32 %v1189_v51, %v8383_v2  ;;  %4523 = vmatprep.subr.bf16.mxu0 %v4672_v27  ;;  %v6885_v5 = vmul.f32 0.5, %v8375_v10  ;;  %4772 = vtanh.f32 %v1572_v44  ;;  %v8388_v27 = vld [vmem:[#allocation81_spill] sm:$0xff]  ;;  %v6897_v30 = vpop.f32.mrf.mxu1 }
 0x199   :  { %3747 = vmatmul.mubr.bf16.gmra.mxu0 %v2881_v9  ;;  %v1510_v36 = vmul.f32 0.7978846, %v1382_v56  ;;  %v1255_v20 = vmul.f32 %v1127_v29, %v8385_v63  ;;  %v6889_v28 = vmul.f32 0.5, %v8377_v23  ;;  %v6892_v17 = vmul.f32 0.5, %v8379_v34  ;;  %v6899_v9 = vpop.f32.mrf.mxu0  ;;  %v8390_v23 = vld [vmem:[#allocation82_spill] sm:$0xff] }
 0x19a   :  { %v1445_v13 = vadd.f32 %v1317_v11, %v8383_v2  ;;  %v1196_v45 = vmul.f32 %v8388_v27, %v8387_v15  ;;  %v2002_v10 = vmul.f32 %v1874_v33, %v6787_v61  ;;  %v1134_v43 = vmul.f32 %v8390_v23, %v8389_v47  ;;  %v4675_v34 = vld [vmem:[%s5034_s29 + $0x180] sm:$0xff]   ;;  %v6907_v56 = vpop.f32.mrf.mxu1  ;;  %v8394_v27 = vld [vmem:[#allocation84_spill] sm:$0xff] }
 0x19b   :  { %4774 = vtanh.f32 %v1510_v36  ;;  %v1383_v0 = vadd.f32 %v1255_v20, %v8385_v63  ;;  %4524 = vmatpush3.bf16.msra.mxu0 %v4673_v6  ;;  %v1940_v19 = vmul.f32 %v1812_v26, %v916_v42  ;;  %v1875_v12 = vadd.f32 1.0, %v4761_v18  ;;  %v6909_v31 = vpop.f32.mrf.mxu0  ;;  %v8391_v36 = vld [vmem:[#allocation75_spill] sm:$0xff] }
 0x19c   :  { %v1573_v51 = vmul.f32 0.7978846, %v1445_v13  ;;  %v1324_v44 = vmul.f32 %v1196_v45, %v8387_v15  ;;  %4525 = vmatprep.subr.bf16.mxu0 %v4674_v3  ;;  %v6912_v61 = vmul.f32 %v6817_v62, %v2002_v10  ;;  %v1262_v11 = vmul.f32 %v1134_v43, %v8389_v47  ;;  %v8392_v6 = vld [vmem:[#allocation83_spill] sm:$0xff]  ;;  %v8393_v13 = vld [vmem:[#allocation76_spill] sm:$0xff]  ;;  %v6923_v45 = vpop.f32.mrf.mxu1 }
 0x19d   :  { %v4763_v29 = vpop.eup %4762  ;;  %v1511_v33 = vmul.f32 0.7978846, %v1383_v0  ;;  %v1197_v20 = vmul.f32 %v8392_v6, %v8391_v36  ;;  %v6918_v26 = vmul.f32 %v6819_v25, %v1940_v19  ;;  %v1135_v3 = vmul.f32 %v8394_v27, %v8393_v13  ;;  %v6925_v62 = vpop.f32.mrf.mxu0 }
 0x19e   :  { %v4765_v42 = vpop.eup %4764  ;;  %4776 = vtanh.f32 %v1573_v51  ;;  %v1452_v18 = vadd.f32 %v1324_v44, %v8387_v15  ;;  %v1390_v0 = vadd.f32 %v1262_v11, %v8389_v47  ;;  %v2003_v25 = vmul.f32 %v1875_v12, %v6856_v53  ;;  %v6931_v6 = vpop.f32.mrf.mxu1 }
 0x19f   :  { %v1882_v10 = vadd.f32 1.0, %v4765_v42  ;;  %4778 = vtanh.f32 %v1511_v33  ;;  %v1325_v23 = vmul.f32 %v1197_v20, %v8391_v36  ;;  %4526 = vmatpush3.bf16.msra.mxu0 %v4675_v34  ;;  %v1813_v19 = vadd.f32 1.0, %v4763_v29  ;;  %v6933_v27 = vpop.f32.mrf.mxu0 }
 0x1a0   :  { %v4767_v43 = vpop.eup %4766  ;;  %v1580_v51 = vmul.f32 0.7978846, %v1452_v18  ;;  %v1263_v44 = vmul.f32 %v1135_v3, %v8393_v13  ;;  %v1518_v33 = vmul.f32 0.7978846, %v1390_v0  ;;  %v2848_v34 = vmul.f32 %v6827_v60, %v2003_v25  ;;  %v6938_v12 = vpop.f32.mrf.mxu1  ;;  %v8396_v60 = vld [vmem:[#allocation85_spill] sm:$0xff] }
 0x1a1   :  { %v4769_v48 = vpop.eup %4768  ;;  %v2010_v46 = vmul.f32 %v1882_v10, %v986_v4  ;;  %v1820_v42 = vadd.f32 1.0, %v4767_v43  ;;  %v1453_v11 = vadd.f32 %v1325_v23, %v8391_v36  ;;  %v6940_v29 = vpop.f32.mrf.mxu0  ;;  %v8395_v43 = vld [vmem:[#allocation72_spill] sm:$0xff] }
 0x1a2   :  { %v4771_v8 = vpop.eup %4770  ;;  %v1883_v20 = vadd.f32 1.0, %v4769_v48  ;;  %4780 = vtanh.f32 %v1580_v51  ;;  %v1391_v53 = vadd.f32 %v1263_v44, %v8393_v13  ;;  %v1204_v48 = vmul.f32 %v8396_v60, %v8395_v43  ;;  %v6947_v25 = vpop.f32.mrf.mxu1 }
 0x1a3   :  { %v2855_v18 = vmul.f32 %v6838_v59, %v2010_v46  ;;  %v1948_v3 = vmul.f32 %v1820_v42, %v6873_v24  ;;  %v1821_v4 = vadd.f32 1.0, %v4771_v8  ;;  %4782 = vtanh.f32 %v1518_v33  ;;  %v6949_v51 = vpop.f32.mrf.mxu0  ;;  %v8397_v42 = vld [vmem:[#allocation78_spill] sm:$0xff]  ;;  %v8398_v33 = vld [vmem:[#allocation87_spill] sm:$0xff] }
 0x1a4   :  { %v2011_v10 = vmul.f32 %v1883_v20, %v6885_v5  ;;  %v1581_v0 = vmul.f32 0.7978846, %v1453_v11  ;;  %v1519_v23 = vmul.f32 0.7978846, %v1391_v53  ;;  %v1941_v44 = vmul.f32 %v1813_v19, %v6859_v40  ;;  %v6959_v20 = vpop.f32.mrf.mxu1 }
 0x1a5   :  { %v2919_v54 = vpack.c.bf16 %v2855_v18, %v6912_v61  ;;  %v2793_v46 = vmul.f32 %v6840_v16, %v1948_v3  ;;  %v1949_v8 = vmul.f32 %v1821_v4, %v6889_v28  ;;  %v4773_v59 = vpop.eup %4772  ;;  %v1332_v5 = vmul.f32 %v1204_v48, %v8395_v43  ;;  %v6961_v53 = vpop.f32.mrf.mxu0  ;;  %v8400_v48 = vld [vmem:[#allocation27_spill] sm:$0xff] }
 0x1a6   :  { %v2856_v24 = vmul.f32 %v6847_v38, %v2011_v10  ;;  %4784 = vtanh.f32 %v1581_v0  ;;  %v1142_v11 = vmul.f32 %v8398_v33, %v8397_v42  ;;  %v2786_v40 = vmul.f32 %v6829_v50, %v1941_v44  ;;  %v6968_v4 = vpop.f32.mrf.mxu1  ;;  %v8399_v50 = vld [vmem:[#allocation77_spill] sm:$0xff] }
 0x1a7   :  { %v2889_v61 = vpack.c.bf16 %v2793_v46, %v6918_v26  ;;  %v2794_v16 = vmul.f32 %v6849_v32, %v1949_v8  ;;  %4786 = vtanh.f32 %v1519_v23  ;;  %v1828_v38 = vadd.f32 1.0, %v4773_v59  ;;  %v8401_v23 = vld [vmem:[#allocation86_spill] sm:$0xff]  ;;  %v8402_v46 = vld [vmem:[#allocation91_spill] sm:$0xff]  ;;  %v6977_v59 = vpop.f32.mrf.mxu0 }
 0x1a8   :  { %v4775_v28 = vpop.eup %4774  ;;  %v2920_v19 = vpack.c.bf16 %v2856_v24, %v2848_v34  ;;  %v1460_v18 = vadd.f32 %v1332_v5, %v8395_v43  ;;  %v1270_v3 = vmul.f32 %v1142_v11, %v8397_v42  ;;  %v870_v0 = vmul.f32 0.5, %v8381_v52  ;;  %v6979_v24 = vpop.f32.mrf.mxu1 }
 0x1a9   :  { %v2890_v10 = vpack.c.bf16 %v2794_v16, %v2786_v40  ;;  %v933_v60 = vmul.f32 0.5, %v8383_v2  ;;  %v1205_v26 = vmul.f32 %v8400_v48, %v8399_v50  ;;  %v1766_v44 = vadd.f32 1.0, %v4775_v28 }
 0x1aa   :  { %3689 = vmatprep.mubr.bf16.mxu1 %v2920_v19  ;;  %v1588_v32 = vmul.f32 0.7978846, %v1460_v18  ;;  %v1398_v34 = vadd.f32 %v1270_v3, %v8397_v42  ;;  %v1143_v8 = vmul.f32 %v8402_v46, %v8401_v23  ;;  %v871_v52 = vmul.f32 0.5, %v8385_v63  ;;  %v6988_v3 = vpop.f32.mrf.mxu1 }
 0x1ab   :  { %v4777_v5 = vpop.eup %4776  ;;  %3754 = vmatprep.mubr.bf16.mxu0 %v2890_v10  ;;  %v940_v2 = vmul.f32 0.5, %v8387_v15  ;;  %v878_v33 = vmul.f32 0.5, %v8389_v47  ;;  %3690 = vmatmul.mubr.bf16.gmra.mxu1 %v2919_v54  ;;  %v1333_v11 = vmul.f32 %v1205_v26, %v8399_v50  ;;  %v1956_v16 = vmul.f32 %v1828_v38, %v6892_v17  ;;  %v8403_v10 = vld [vmem:[#allocation80_spill] sm:$0xff] }
 0x1ac   :  { %v4779_v40 = vpop.eup %4778  ;;  %3755 = vmatmul.mubr.bf16.gmra.mxu0 %v2889_v61  ;;  %v941_v28 = vmul.f32 0.5, %v8391_v36  ;;  %v1526_v19 = vmul.f32 0.7978846, %v1398_v34  ;;  %v1271_v18 = vmul.f32 %v1143_v8, %v8401_v23  ;;  %v1829_v63 = vadd.f32 1.0, %v4777_v5  ;;  %v8404_v47 = vld [vmem:[#allocation8_spill] sm:$0xff]  ;;  %v6994_v61 = vpop.f32.mrf.mxu0  ;;  %v8405_v8 = vld [vmem:[#allocation7_spill] sm:$0xff] }
 0x1ad   :  { %4788 = vtanh.f32 %v1588_v32  ;;  %v1461_v15 = vadd.f32 %v1333_v11, %v8399_v50  ;;  %v1212_v54 = vmul.f32 %v8404_v47, %v8403_v10  ;;  %v1894_v48 = vmul.f32 %v1766_v44, %v870_v0  ;;  %v6996_v36 = vpop.f32.mrf.mxu1  ;;  %v8406_v5 = vld [vmem:[#allocation92_spill] sm:$0xff] }
 0x1ae   :  { %v1767_v26 = vadd.f32 1.0, %v4779_v40  ;;  %4790 = vtanh.f32 %v1526_v19  ;;  %v1399_v17 = vadd.f32 %v1271_v18, %v8401_v23  ;;  %v879_v34 = vmul.f32 0.5, %v8393_v13 }
 0x1af   :  { %v4781_v38 = vpop.eup %4780  ;;  %v1589_v46 = vmul.f32 0.7978846, %v1461_v15  ;;  %v1340_v32 = vmul.f32 %v1212_v54, %v8403_v10  ;;  %v1150_v11 = vmul.f32 %v8406_v5, %v8405_v8  ;;  %v7003_v0 = vmul.f32 %v6861_v7, %v1956_v16  ;;  %v7008_v18 = vpop.f32.mrf.mxu1 }
 0x1b0   :  { %v4783_v22 = vpop.eup %4782  ;;  %v7006_v44 = vmul.f32 %v6863_v57, %v1894_v48  ;;  %v1836_v40 = vadd.f32 1.0, %v4781_v38  ;;  %v1527_v19 = vmul.f32 0.7978846, %v1399_v17  ;;  %v1957_v47 = vmul.f32 %v1829_v63, %v933_v60  ;;  %v7014_v16 = vpop.f32.mrf.mxu0  ;;  %v8409_v60 = vld [vmem:[#allocation89_spill] sm:$0xff] }
 0x1b1   :  { %v1774_v39 = vadd.f32 1.0, %v4783_v22  ;;  %4792 = vtanh.f32 %v1589_v46  ;;  %v1468_v13 = vadd.f32 %v1340_v32, %v8403_v10  ;;  %v1895_v15 = vmul.f32 %v1767_v26, %v871_v52  ;;  %v7016_v57 = vpop.f32.mrf.mxu1  ;;  %v8410_v22 = vld [vmem:[#allocation95_spill] sm:$0xff] }
 0x1b2   :  { %v1964_v54 = vmul.f32 %v1836_v40, %v940_v2  ;;  %v1278_v5 = vmul.f32 %v1150_v11, %v8405_v8  ;;  %v1213_v7 = vmul.f32 %v8408_v49, %v8407_v37  ;;  %4794 = vtanh.f32 %v1527_v19 }
 0x1b3   :  { %v4785_v48 = vpop.eup %4784  ;;  %v1902_v17 = vmul.f32 %v1774_v39, %v878_v33  ;;  %v1596_v38 = vmul.f32 0.7978846, %v1468_v13  ;;  %v1151_v63 = vmul.f32 %v8410_v22, %v8409_v60  ;;  %v7023_v49 = vpop.f32.mrf.mxu1 }
 0x1b4   :  { %v4787_v46 = vpop.eup %4786  ;;  %v2809_v52 = vmul.f32 %v6897_v30, %v1964_v54  ;;  %v1837_v2 = vadd.f32 1.0, %v4785_v48  ;;  %v1406_v26 = vadd.f32 %v1278_v5, %v8405_v8  ;;  %v1341_v32 = vmul.f32 %v1213_v7, %v8407_v37  ;;  %v7029_v30 = vpop.f32.mrf.mxu0 }
 0x1b5   :  { %v2747_v11 = vmul.f32 %v6899_v9, %v1902_v17  ;;  %v1775_v40 = vadd.f32 1.0, %v4787_v46  ;;  %4796 = vtanh.f32 %v1596_v38  ;;  %v1279_v39 = vmul.f32 %v1151_v63, %v8409_v60  ;;  %v7031_v54 = vpop.f32.mrf.mxu1 }
 0x1b6   :  { %v2897_v33 = vpack.c.bf16 %v2809_v52, %v7003_v0  ;;  %v1965_v19 = vmul.f32 %v1837_v2, %v941_v28  ;;  %v1534_v13 = vmul.f32 0.7978846, %v1406_v26  ;;  %v1469_v22 = vadd.f32 %v1341_v32, %v8407_v37  ;;  %v8411_v0 = vld [vmem:[#allocation88_spill] sm:$0xff]  ;;  %v8412_v28 = vld [vmem:[#allocation97_spill] sm:$0xff] }
 0x1b7   :  { %v2802_v5 = vmul.f32 %v6876_v14, %v1957_v47  ;;  %v2867_v7 = vpack.c.bf16 %v2747_v11, %v7006_v44  ;;  %v1903_v48 = vmul.f32 %v1775_v40, %v879_v34  ;;  %v1407_v9 = vadd.f32 %v1279_v39, %v8409_v60  ;;  %v7039_v46 = vpop.f32.mrf.mxu1  ;;  %v8413_v14 = vld [vmem:[#allocation96_spill] sm:$0xff]  ;;  %v7050_v40 = vpop.f32.mrf.mxu0 }
 0x1b8   :  { %v2810_v17 = vmul.f32 %v6907_v56, %v1965_v19  ;;  %4798 = vtanh.f32 %v1534_v13  ;;  %v1597_v38 = vmul.f32 0.7978846, %v1469_v22  ;;  %v1220_v63 = vmul.f32 %v8412_v28, %v8411_v0  ;;  %v8414_v47 = vld [vmem:[#allocation104_spill] sm:$0xff]  ;;  %v8416_v22 = vld [vmem:[#allocation90_spill] sm:$0xff] }
 0x1b9   :  { %v2740_v52 = vmul.f32 %v6878_v55, %v1895_v15  ;;  %v2748_v2 = vmul.f32 %v6909_v31, %v1903_v48  ;;  %v1535_v26 = vmul.f32 0.7978846, %v1407_v9  ;;  %v1158_v44 = vmul.f32 %v8414_v47, %v8413_v14  ;;  %v7052_v39 = vpop.f32.mrf.mxu1  ;;  %v8418_v28 = vld [vmem:[#allocation54_spill] sm:$0xff] }
 0x1ba   :  { %v4789_v34 = vpop.eup %4788  ;;  %v7047_v32 = vadd.f32 %v6692_v35, %v8244_v41  ;;  %v2898_v56 = vpack.c.bf16 %v2810_v17, %v2802_v5  ;;  %4800 = vtanh.f32 %v1597_v38  ;;  %v1348_v11 = vmul.f32 %v1220_v63, %v8411_v0  ;;  %v8417_v5 = vld [vmem:[#allocation105_spill] sm:$0xff] }
 0x1bb   :  { %v4791_v55 = vpop.eup %4790  ;;  %v2868_v15 = vpack.c.bf16 %v2748_v2, %v2740_v52  ;;  %v948_v31 = vmul.f32 0.5, %v8395_v43  ;;  %4802 = vtanh.f32 %v1535_v26  ;;  %v1286_v19 = vmul.f32 %v1158_v44, %v8413_v14  ;;  %v7061_v9 = vpop.f32.mrf.mxu1 }
 0x1bc   :  { %8415 = vst [vmem:[#allocation23_spill] sm:$0xff] %v7047_v32  ;;  %v886_v13 = vmul.f32 0.5, %v8397_v42  ;;  %v949_v41 = vmul.f32 0.5, %v8399_v50  ;;  %3762 = vmatprep.mubr.bf16.mxu0 %v2898_v56  ;;  %v1476_v35 = vadd.f32 %v1348_v11, %v8411_v0  ;;  %v1221_v48 = vmul.f32 %v8417_v5, %v8416_v22  ;;  %v8419_v42 = vld [vmem:[#allocation106_spill] sm:$0xff]  ;;  %v7069_v44 = vpop.f32.mrf.mxu0  ;;  %v8420_v11 = vld [vmem:[#allocation93_spill] sm:$0xff] }
 0x1bd   :  { %v887_v17 = vmul.f32 0.5, %v8401_v23  ;;  %3827 = vmatprep.mubr.bf16.mxu1 %v2868_v15  ;;  %v956_v43 = vmul.f32 0.5, %v8403_v10  ;;  %3763 = vmatmul.mubr.bf16.gmra.mxu0 %v2897_v33  ;;  %v1414_v38 = vadd.f32 %v1286_v19, %v8413_v14  ;;  %v1159_v63 = vmul.f32 %v8419_v42, %v8418_v28  ;;  %v7071_v56 = vpop.f32.mrf.mxu1  ;;  %v8421_v15 = vld [vmem:[#allocation107_spill] sm:$0xff] }
 0x1be   :  { %v4793_v50 = vpop.eup %4792  ;;  %v1844_v52 = vadd.f32 1.0, %v4789_v34  ;;  %v1782_v2 = vadd.f32 1.0, %v4791_v55  ;;  %3828 = vmatmul.mubr.bf16.vlgmr.msra.gmra.mxu1 %v2867_v7  ;;  %v1604_v26 = vmul.f32 0.7978846, %v1476_v35  ;;  %v1349_v47 = vmul.f32 %v1221_v48, %v8416_v22 }
 0x1bf   :  { %v894_v23 = vmul.f32 0.5, %v8405_v8  ;;  %v1542_v10 = vmul.f32 0.7978846, %v1414_v38  ;;  %v1287_v33 = vmul.f32 %v1159_v63, %v8418_v28  ;;  %v1228_v19 = vmul.f32 %v8421_v15, %v8420_v11  ;;  %v4795_v5 = vpop.eup %4794  ;;  %v7079_v55 = vpop.f32.mrf.mxu1 }
 0x1c0   :  { %v1845_v42 = vadd.f32 1.0, %v4793_v50  ;;  %v957_v34 = vmul.f32 0.5, %v8407_v37  ;;  %4804 = vtanh.f32 %v1604_v26  ;;  %v1477_v7 = vadd.f32 %v1349_v47, %v8416_v22  ;;  %8422 = vst [vmem:[#allocation60_spill] sm:$0xff] %v7079_v55  ;;  %v8424_v50 = vld [vmem:[#allocation109_spill] sm:$0xff]  ;;  %v7086_v37 = vpop.f32.mrf.mxu0 }
 0x1c1   :  { %v895_v35 = vmul.f32 0.5, %v8409_v60  ;;  %4806 = vtanh.f32 %v1542_v10  ;;  %v1415_v8 = vadd.f32 %v1287_v33, %v8418_v28  ;;  %v1356_v48 = vmul.f32 %v1228_v19, %v8420_v11  ;;  %v7088_v26 = vpop.f32.mrf.mxu1 }
 0x1c2   :  { %v4797_v38 = vpop.eup %4796  ;;  %v1972_v63 = vmul.f32 %v1844_v52, %v948_v31  ;;  %v1910_v32 = vmul.f32 %v1782_v2, %v886_v13  ;;  %v1605_v15 = vmul.f32 0.7978846, %v1477_v7  ;;  %v1166_v1 = vmul.f32 %v8424_v50, %v8423_v58  ;;  %8425 = vst [vmem:[#allocation12_spill] sm:$0xff] %v7088_v26  ;;  %v8432_v26 = vld [vmem:[#allocation99_spill] sm:$0xff] }
 0x1c3   :  { %v1783_v47 = vadd.f32 1.0, %v4795_v5  ;;  %v1852_v21 = vadd.f32 1.0, %v4797_v38  ;;  %v1543_v55 = vmul.f32 0.7978846, %v1415_v8  ;;  %v1484_v60 = vadd.f32 %v1356_v48, %v8420_v11  ;;  %v7098_v52 = vpop.f32.mrf.mxu1  ;;  %v8427_v5 = vld [vmem:[#allocation100_spill] sm:$0xff]  ;;  %v8428_v38 = vld [vmem:[#allocation110_spill] sm:$0xff] }
 0x1c4   :  { %v7092_v10 = vmul.f32 %v6923_v45, %v1972_v63  ;;  %v7095_v33 = vmul.f32 %v6925_v62, %v1910_v32  ;;  %v1973_v31 = vmul.f32 %v1845_v42, %v949_v41  ;;  %v1294_v13 = vmul.f32 %v1166_v1, %v8423_v58  ;;  %8426 = vst [vmem:[#allocation25_spill] sm:$0xff] %v7098_v52  ;;  %v8429_v48 = vld [vmem:[#allocation101_spill] sm:$0xff]  ;;  %v8430_v63 = vld [vmem:[#allocation111_spill] sm:$0xff]  ;;  %v7105_v32 = vpop.f32.mrf.mxu0 }
 0x1c5   :  { %v4799_v2 = vpop.eup %4798  ;;  %v1980_v19 = vmul.f32 %v1852_v21, %v956_v43  ;;  %4808 = vtanh.f32 %v1605_v15  ;;  %v1612_v7 = vmul.f32 0.7978846, %v1484_v60  ;;  %v1229_v8 = vmul.f32 %v8428_v38, %v8427_v5  ;;  %v7107_v41 = vpop.f32.mrf.mxu1 }
 0x1c6   :  { %v1790_v50 = vadd.f32 1.0, %v4799_v2  ;;  %4810 = vtanh.f32 %v1543_v55  ;;  %v1422_v45 = vadd.f32 %v1294_v13, %v8423_v58  ;;  %v1167_v62 = vmul.f32 %v8430_v63, %v8429_v48  ;;  %8431 = vst [vmem:[#allocation56_spill] sm:$0xff] %v7107_v41 }
 0x1c7   :  { %v4801_v1 = vpop.eup %4800  ;;  %v1911_v42 = vmul.f32 %v1783_v47, %v887_v17  ;;  %v2825_v21 = vmul.f32 %v6938_v12, %v1980_v19  ;;  %4812 = vtanh.f32 %v1612_v7  ;;  %v1357_v43 = vmul.f32 %v1229_v8, %v8427_v5  ;;  %v7112_v38 = vpop.f32.mrf.mxu1  ;;  %v8433_v17 = vld [vmem:[#allocation30_spill] sm:$0xff] }
 0x1c8   :  { %v4803_v15 = vpop.eup %4802  ;;  %v1918_v60 = vmul.f32 %v1790_v50, %v894_v23  ;;  %v1853_v2 = vadd.f32 1.0, %v4801_v1  ;;  %v1550_v55 = vmul.f32 0.7978846, %v1422_v45  ;;  %v1295_v13 = vmul.f32 %v1167_v62, %v8429_v48  ;;  %v7120_v7 = vpop.f32.mrf.mxu0 }
 0x1c9   :  { %v2905_v63 = vpack.c.bf16 %v2825_v21, %v7092_v10  ;;  %v1791_v52 = vadd.f32 1.0, %v4803_v15  ;;  %v1485_v41 = vadd.f32 %v1357_v43, %v8427_v5  ;;  %v1236_v47 = vmul.f32 %v8433_v17, %v8432_v26  ;;  %v8434_v43 = vld [vmem:[#allocation102_spill] sm:$0xff]  ;;  %v8435_v15 = vld [vmem:[#allocation33_spill] sm:$0xff] }
 0x1ca   :  { %v2763_v12 = vmul.f32 %v6940_v29, %v1918_v60  ;;  %v1981_v19 = vmul.f32 %v1853_v2, %v957_v34  ;;  %4814 = vtanh.f32 %v1550_v55  ;;  %v1423_v23 = vadd.f32 %v1295_v13, %v8429_v48  ;;  %v7128_v34 = vpop.f32.mrf.mxu1 }
 0x1cb   :  { %v2818_v8 = vmul.f32 %v6931_v6, %v1973_v31  ;;  %v1919_v50 = vmul.f32 %v1791_v52, %v895_v35  ;;  %v1613_v45 = vmul.f32 0.7978846, %v1485_v41  ;;  %v1364_v10 = vmul.f32 %v1236_v47, %v8432_v26  ;;  %v7135_v52 = vpop.f32.mrf.mxu0  ;;  %v8436_v47 = vld [vmem:[#allocation103_spill] sm:$0xff] }
 0x1cc   :  { %v2875_v62 = vpack.c.bf16 %v2763_v12, %v7095_v33  ;;  %v2826_v1 = vmul.f32 %v6947_v25, %v1981_v19  ;;  %v1551_v21 = vmul.f32 0.7978846, %v1423_v23  ;;  %v1174_v29 = vmul.f32 %v8435_v15, %v8434_v43  ;;  %v8438_v23 = vld [vmem:[#allocation112_spill] sm:$0xff] }
 0x1cd   :  { %v4805_v60 = vpop.eup %4804  ;;  %v2756_v2 = vmul.f32 %v6933_v27, %v1911_v42  ;;  %v2764_v55 = vmul.f32 %v6949_v51, %v1919_v50  ;;  %4816 = vtanh.f32 %v1613_v45  ;;  %v1492_v6 = vadd.f32 %v1364_v10, %v8432_v26  ;;  %v8437_v27 = vld [vmem:[#allocation32_spill] sm:$0xff]  ;;  %v7144_v50 = vpop.f32.mrf.mxu1 }
 0x1ce   :  { %v4807_v35 = vpop.eup %4806  ;;  %v2906_v31 = vpack.c.bf16 %v2826_v1, %v2818_v8  ;;  %v964_v33 = vmul.f32 0.5, %v8411_v0  ;;  %4818 = vtanh.f32 %v1551_v21  ;;  %v1302_v25 = vmul.f32 %v1174_v29, %v8434_v43  ;;  %v8439_v0 = vld [vmem:[#allocation115_spill] sm:$0xff] }
 0x1cf   :  { %v2876_v41 = vpack.c.bf16 %v2764_v55, %v2756_v2  ;;  %v902_v13 = vmul.f32 0.5, %v8413_v14  ;;  %v1620_v17 = vmul.f32 0.7978846, %v1492_v6  ;;  %v1237_v42 = vmul.f32 %v8437_v27, %v8436_v47  ;;  %v7152_v2 = vpop.f32.mrf.mxu0  ;;  %v8441_v6 = vld [vmem:[#allocation116_spill] sm:$0xff] }
 0x1d0   :  { %v1860_v51 = vadd.f32 1.0, %v4805_v60  ;;  %v965_v12 = vmul.f32 0.5, %v8416_v22  ;;  %3770 = vmatprep.mubr.bf16.mxu0 %v2906_v31  ;;  %v1430_v19 = vadd.f32 %v1302_v25, %v8434_v43  ;;  %v1175_v8 = vmul.f32 %v8439_v0, %v8438_v23 }
 0x1d1   :  { %v1798_v45 = vadd.f32 1.0, %v4807_v35  ;;  %v903_v10 = vmul.f32 0.5, %v8418_v28  ;;  %3835 = vmatprep.mubr.bf16.mxu1 %v2876_v41  ;;  %v972_v14 = vmul.f32 0.5, %v8420_v11  ;;  %3771 = vmatmul.mubr.bf16.gmra.mxu0 %v2905_v63  ;;  %v1365_v1 = vmul.f32 %v1237_v42, %v8436_v47  ;;  %v8440_v63 = vld [vmem:[#allocation108_spill] sm:$0xff] }
 0x1d2   :  { %v4809_v21 = vpop.eup %4808  ;;  %v910_v22 = vmul.f32 0.5, %v8423_v58  ;;  %3836 = vmatmul.mubr.bf16.gmra.mxu1 %v2875_v62  ;;  %v973_v15 = vmul.f32 0.5, %v8427_v5  ;;  %v1558_v29 = vmul.f32 0.7978846, %v1430_v19  ;;  %v1303_v60 = vmul.f32 %v1175_v8, %v8438_v23  ;;  %v7162_v62 = vpop.f32.mrf.mxu1  ;;  %v8443_v8 = vld [vmem:[#allocation51_spill] sm:$0xff] }
 0x1d3   :  { %v4811_v55 = vpop.eup %4810  ;;  %v911_v28 = vmul.f32 0.5, %v8429_v48  ;;  %4820 = vtanh.f32 %v1620_v17  ;;  %v1493_v11 = vadd.f32 %v1365_v1, %v8436_v47  ;;  %v1244_v35 = vmul.f32 %v8441_v6, %v8440_v63  ;;  %8442 = vst [vmem:[#allocation61_spill] sm:$0xff] %v7162_v62  ;;  %v8445_v6 = vld [vmem:[#allocation113_spill] sm:$0xff] }
 0x1d4   :  { %v4813_v31 = vpop.eup %4812  ;;  %v1988_v25 = vmul.f32 %v1860_v51, %v964_v33  ;;  %v7159_v58 = vmul.f32 0.5, %v8432_v26  ;;  %4822 = vtanh.f32 %v1558_v29  ;;  %v1431_v5 = vadd.f32 %v1303_v60, %v8438_v23  ;;  %v8444_v33 = vld [vmem:[#allocation118_spill] sm:$0xff]  ;;  %v7170_v26 = vpop.f32.mrf.mxu0 }
 0x1d5   :  { %v1926_v41 = vmul.f32 %v1798_v45, %v902_v13  ;;  %v1868_v27 = vadd.f32 1.0, %v4813_v31  ;;  %v1621_v42 = vmul.f32 0.7978846, %v1493_v11  ;;  %v1372_v48 = vmul.f32 %v1244_v35, %v8440_v63  ;;  %v7179_v31 = vpop.f32.mrf.mxu1 }
 0x1d6   :  { %v7166_v17 = vmul.f32 %v6959_v20, %v1988_v25  ;;  %v1861_v19 = vadd.f32 1.0, %v4809_v21  ;;  %v1559_v0 = vmul.f32 0.7978846, %v1431_v5  ;;  %v1182_v51 = vmul.f32 %v8444_v33, %v8443_v8  ;;  %v8446_v21 = vld [vmem:[#allocation119_spill] sm:$0xff]  ;;  %8447 = vst [vmem:[#allocation14_spill] sm:$0xff] %v7179_v31  ;;  %v8448_v33 = vld [vmem:[#allocation37_spill] sm:$0xff] }
 0x1d7   :  { %v4815_v1 = vpop.eup %4814  ;;  %v7173_v29 = vmul.f32 %v6961_v53, %v1926_v41  ;;  %v1996_v60 = vmul.f32 %v1868_v27, %v972_v14  ;;  %4824 = vtanh.f32 %v1621_v42  ;;  %v1500_v13 = vadd.f32 %v1372_v48, %v8440_v63  ;;  %v8449_v53 = vld [vmem:[#allocation120_spill] sm:$0xff] }
 0x1d8   :  { %v1799_v45 = vadd.f32 1.0, %v4811_v55  ;;  %v1806_v11 = vadd.f32 1.0, %v4815_v1  ;;  %v1310_v20 = vmul.f32 %v1182_v51, %v8443_v8  ;;  %v1245_v35 = vmul.f32 %v8446_v21, %v8445_v6  ;;  %v7186_v51 = vpop.f32.mrf.mxu0 }
 0x1d9   :  { %v2841_v25 = vmul.f32 %v6979_v24, %v1996_v60  ;;  %4826 = vtanh.f32 %v1559_v0  ;;  %v1628_v5 = vmul.f32 0.7978846, %v1500_v13  ;;  %v1183_v41 = vmul.f32 %v8449_v53, %v8448_v33  ;;  %v8451_v53 = vld [vmem:[#allocation121_spill] sm:$0xff] }
 0x1da   :  { %v4817_v14 = vpop.eup %4816  ;;  %v1989_v27 = vmul.f32 %v1861_v19, %v965_v12  ;;  %v1934_v42 = vmul.f32 %v1806_v11, %v910_v22  ;;  %v1438_v55 = vadd.f32 %v1310_v20, %v8443_v8  ;;  %v1373_v48 = vmul.f32 %v1245_v35, %v8445_v6  ;;  %v7192_v22 = vpop.f32.mrf.mxu1  ;;  %v8450_v35 = vld [vmem:[#allocation57_spill] sm:$0xff] }
 0x1db   :  { %v4819_v1 = vpop.eup %4818  ;;  %v2913_v21 = vpack.c.bf16 %v2841_v25, %v7166_v17  ;;  %v1869_v31 = vadd.f32 1.0, %v4817_v14  ;;  %4828 = vtanh.f32 %v1628_v5  ;;  %v1311_v24 = vmul.f32 %v1183_v41, %v8448_v33  ;;  %v7198_v41 = vpop.f32.mrf.mxu0 }
 0x1dc   :  { %v2779_v0 = vmul.f32 %v6994_v61, %v1934_v42  ;;  %v1807_v60 = vadd.f32 1.0, %v4819_v1  ;;  %v1566_v13 = vmul.f32 0.7978846, %v1438_v55  ;;  %v1501_v12 = vadd.f32 %v1373_v48, %v8445_v6  ;;  %v8452_v55 = vld [vmem:[#allocation10_spill] sm:$0xff]  ;;  %v7207_v48 = vpop.f32.mrf.mxu1 }
 0x1dd   :  { %v1927_v19 = vmul.f32 %v1799_v45, %v903_v10  ;;  %v1997_v11 = vmul.f32 %v1869_v31, %v973_v15  ;;  %v1439_v20 = vadd.f32 %v1311_v24, %v8448_v33  ;;  %v1190_v62 = vmul.f32 %v8451_v53, %v8450_v35 }
 0x1de   :  { %v2883_v17 = vpack.c.bf16 %v2779_v0, %v7173_v29  ;;  %v1935_v25 = vmul.f32 %v1807_v60, %v911_v28  ;;  %4830 = vtanh.f32 %v1566_v13  ;;  %v1629_v5 = vmul.f32 0.7978846, %v1501_v12  ;;  %v8453_v29 = vld [vmem:[#allocation122_spill] sm:$0xff]  ;;  %v7215_v13 = vpop.f32.mrf.mxu0 }
 0x1df   :  { %v2834_v61 = vmul.f32 %v6968_v4, %v1989_v27  ;;  %v2842_v14 = vmul.f32 %v6988_v3, %v1997_v11  ;;  %v1567_v42 = vmul.f32 0.7978846, %v1439_v20  ;;  %v1318_v10 = vmul.f32 %v1190_v62, %v8450_v35  ;;  %v8454_v0 = vld [vmem:[#allocation114_spill] sm:$0xff]  ;;  %v8456_v20 = vld [vmem:[#allocation11_spill] sm:$0xff] }
 0x1e0   :  { %v4821_v15 = vpop.eup %4820  ;;  %v2772_v45 = vmul.f32 %v6977_v59, %v1927_v19  ;;  %v2780_v31 = vmul.f32 %v7014_v16, %v1935_v25  ;;  %4832 = vtanh.f32 %v1629_v5  ;;  %v1128_v28 = vmul.f32 %v8453_v29, %v8452_v55  ;;  %v8455_v16 = vld [vmem:[#allocation123_spill] sm:$0xff] }
 0x1e1   :  { %v4823_v1 = vpop.eup %4822  ;;  %v2914_v24 = vpack.c.bf16 %v2842_v14, %v2834_v61  ;;  %v918_v4 = vmul.f32 0.5, %v8434_v43  ;;  %4834 = vtanh.f32 %v1567_v42  ;;  %v1446_v3 = vadd.f32 %v1318_v10, %v8450_v35  ;;  %v8457_v43 = vld [vmem:[#allocation128_spill] sm:$0xff]  ;;  %v7223_v42 = vpop.f32.mrf.mxu1 }
 0x1e2   :  { %v2884_v27 = vpack.c.bf16 %v2780_v31, %v2772_v45  ;;  %v981_v62 = vmul.f32 0.5, %v8436_v47  ;;  %v1256_v59 = vmul.f32 %v1128_v28, %v8452_v55  ;;  %v1191_v60 = vmul.f32 %v8455_v16, %v8454_v0  ;;  %v8459_v45 = vld [vmem:[#allocation34_spill] sm:$0xff] }
 0x1e3   :  { %v1876_v12 = vadd.f32 1.0, %v4821_v15  ;;  %v919_v19 = vmul.f32 0.5, %v8438_v23  ;;  %3778 = vmatprep.mubr.bf16.mxu0 %v2914_v24  ;;  %v1574_v11 = vmul.f32 0.7978846, %v1446_v3  ;;  %v1129_v53 = vmul.f32 %v8457_v43, %v8456_v20  ;;  %v8458_v15 = vld [vmem:[#allocation117_spill] sm:$0xff]  ;;  %v7231_v24 = vpop.f32.mrf.mxu0  ;;  %v8461_v43 = vld [vmem:[#allocation130_spill] sm:$0xff] }
 0x1e4   :  { %v4825_v25 = vpop.eup %4824  ;;  %v1814_v5 = vadd.f32 1.0, %v4823_v1  ;;  %3843 = vmatprep.mubr.bf16.mxu1 %v2884_v27  ;;  %v988_v47 = vmul.f32 0.5, %v8440_v63  ;;  %3779 = vmatmul.mubr.bf16.gmra.mxu0 %v2913_v21  ;;  %v1384_v61 = vadd.f32 %v1256_v59, %v8452_v55  ;;  %v1319_v14 = vmul.f32 %v1191_v60, %v8454_v0 }
 0x1e5   :  { %v926_v10 = vmul.f32 0.5, %v8443_v8  ;;  %3844 = vmatmul.mubr.bf16.gmra.mxu1 %v2883_v17  ;;  %4836 = vtanh.f32 %v1574_v11  ;;  %v1257_v23 = vmul.f32 %v1129_v53, %v8456_v20  ;;  %v1198_v31 = vmul.f32 %v8459_v45, %v8458_v15  ;;  %v8460_v11 = vld [vmem:[#allocation124_spill] sm:$0xff]  ;;  %v7239_v53 = vpop.f32.mrf.mxu1 }
 0x1e6   :  { %v4827_v29 = vpop.eup %4826  ;;  %v1877_v28 = vadd.f32 1.0, %v4825_v25  ;;  %v989_v63 = vmul.f32 0.5, %v8445_v6  ;;  %v1512_v21 = vmul.f32 0.7978846, %v1384_v61  ;;  %v1447_v1 = vadd.f32 %v1319_v14, %v8454_v0  ;;  %8462 = vst [vmem:[#allocation26_spill] sm:$0xff] %v7239_v53  ;;  %v8467_v53 = vld [vmem:[#allocation125_spill] sm:$0xff] }
 0x1e7   :  { %v2004_v3 = vmul.f32 %v1876_v12, %v7159_v58  ;;  %v927_v8 = vmul.f32 0.5, %v8448_v33  ;;  %v1385_v17 = vadd.f32 %v1257_v23, %v8456_v20  ;;  %v1326_v27 = vmul.f32 %v1198_v31, %v8458_v15 }
 0x1e8   :  { %v4829_v59 = vpop.eup %4828  ;;  %v1942_v16 = vmul.f32 %v1814_v5, %v918_v4  ;;  %4838 = vtanh.f32 %v1512_v21  ;;  %v1575_v60 = vmul.f32 0.7978846, %v1447_v1  ;;  %v1136_v6 = vmul.f32 %v8461_v43, %v8460_v11  ;;  %v7249_v5 = vpop.f32.mrf.mxu0  ;;  %v8464_v1 = vld [vmem:[#allocation131_spill] sm:$0xff] }
 0x1e9   :  { %v1815_v25 = vadd.f32 1.0, %v4827_v29  ;;  %v1884_v61 = vadd.f32 1.0, %v4829_v59  ;;  %v1513_v14 = vmul.f32 0.7978846, %v1385_v17  ;;  %v1454_v58 = vadd.f32 %v1326_v27, %v8458_v15  ;;  %v8463_v29 = vld [vmem:[#allocation126_spill] sm:$0xff]  ;;  %v8466_v27 = vld [vmem:[#allocation132_spill] sm:$0xff] }
 0x1ea   :  { %v7243_v33 = vmul.f32 %v6996_v36, %v2004_v3  ;;  %v7246_v12 = vmul.f32 %v7029_v30, %v1942_v16  ;;  %v2005_v23 = vmul.f32 %v1877_v28, %v981_v62  ;;  %v1264_v4 = vmul.f32 %v1136_v6, %v8460_v11  ;;  %v8465_v3 = vld [vmem:[#allocation59_spill] sm:$0xff]  ;;  %v7256_v16 = vpop.f32.mrf.mxu1 }
 0x1eb   :  { %v4831_v45 = vpop.eup %4830  ;;  %v2012_v31 = vmul.f32 %v1884_v61, %v988_v47  ;;  %4840 = vtanh.f32 %v1575_v60  ;;  %v1582_v21 = vmul.f32 0.7978846, %v1454_v58  ;;  %v1199_v17 = vmul.f32 %v8464_v1, %v8463_v29 }
 0x1ec   :  { %v1822_v59 = vadd.f32 1.0, %v4831_v45  ;;  %4842 = vtanh.f32 %v1513_v14  ;;  %v1392_v36 = vadd.f32 %v1264_v4, %v8460_v11  ;;  %v1137_v30 = vmul.f32 %v8466_v27, %v8465_v3  ;;  %v7261_v45 = vpop.f32.mrf.mxu0 }
 0x1ed   :  { %v4833_v62 = vpop.eup %4832  ;;  %v1943_v28 = vmul.f32 %v1815_v25, %v919_v19  ;;  %v2857_v43 = vmul.f32 %v7016_v57, %v2012_v31  ;;  %4844 = vtanh.f32 %v1582_v21  ;;  %v1327_v47 = vmul.f32 %v1199_v17, %v8463_v29  ;;  %v8468_v19 = vld [vmem:[#allocation134_spill] sm:$0xff]  ;;  %v7269_v21 = vpop.f32.mrf.mxu1 }
 0x1ee   :  { %v4835_v60 = vpop.eup %4834  ;;  %v1950_v6 = vmul.f32 %v1822_v59, %v926_v10  ;;  %v1885_v61 = vadd.f32 1.0, %v4833_v62  ;;  %v1520_v58 = vmul.f32 0.7978846, %v1392_v36  ;;  %v1265_v14 = vmul.f32 %v1137_v30, %v8465_v3 }
 0x1ef   :  { %v2921_v4 = vpack.c.bf16 %v2857_v43, %v7243_v33  ;;  %v1823_v1 = vadd.f32 1.0, %v4835_v60  ;;  %v1455_v27 = vadd.f32 %v1327_v47, %v8463_v29  ;;  %v1206_v25 = vmul.f32 %v8468_v19, %v8467_v53  ;;  %v8469_v60 = vld [vmem:[#allocation38_spill] sm:$0xff] }
 0x1f0   :  { %v2795_v57 = vmul.f32 %v7069_v44, %v1950_v6  ;;  %v2013_v31 = vmul.f32 %v1885_v61, %v989_v63  ;;  %4846 = vtanh.f32 %v1520_v58  ;;  %v1393_v10 = vadd.f32 %v1265_v14, %v8465_v3  ;;  %v8470_v44 = vld [vmem:[#allocation135_spill] sm:$0xff]  ;;  %v7277_v6 = vpop.f32.mrf.mxu0 }
 0x1f1   :  { %v2850_v17 = vmul.f32 %v7008_v18, %v2005_v23  ;;  %v1951_v59 = vmul.f32 %v1823_v1, %v927_v8  ;;  %v1583_v36 = vmul.f32 0.7978846, %v1455_v27  ;;  %v1334_v33 = vmul.f32 %v1206_v25, %v8467_v53  ;;  %v8471_v25 = vld [vmem:[#allocation127_spill] sm:$0xff] }
 0x1f2   :  { %v4837_v30 = vpop.eup %4836  ;;  %v2891_v62 = vpack.c.bf16 %v2795_v57, %v7246_v12  ;;  %v2858_v43 = vmul.f32 %v7023_v49, %v2013_v31  ;;  %v1521_v47 = vmul.f32 0.7978846, %v1393_v10  ;;  %v1144_v63 = vmul.f32 %v8470_v44, %v8469_v60  ;;  %v7284_v49 = vpop.f32.mrf.mxu1  ;;  %v8472_v57 = vld [vmem:[#allocation138_spill] sm:$0xff]  ;;  %v8474_v10 = vld [vmem:[#allocation141_spill] sm:$0xff] }
 0x1f3   :  { %v2788_v61 = vmul.f32 %v7050_v40, %v1943_v28  ;;  %v2796_v58 = vmul.f32 %v7086_v37, %v1951_v59  ;;  %4848 = vtanh.f32 %v1583_v36  ;;  %v1462_v18 = vadd.f32 %v1334_v33, %v8467_v53  ;;  %v7293_v59 = vpop.f32.mrf.mxu0 }
 0x1f4   :  { %v2922_v8 = vpack.c.bf16 %v2858_v43, %v2850_v17  ;;  %v934_v23 = vmul.f32 0.5, %v8450_v35  ;;  %4850 = vtanh.f32 %v1521_v47  ;;  %v1272_v12 = vmul.f32 %v1144_v63, %v8469_v60  ;;  %v8473_v35 = vld [vmem:[#allocation133_spill] sm:$0xff] }
 0x1f5   :  { %v4839_v14 = vpop.eup %4838  ;;  %v2892_v1 = vpack.c.bf16 %v2796_v58, %v2788_v61  ;;  %v1830_v27 = vadd.f32 1.0, %v4837_v30  ;;  %v1590_v19 = vmul.f32 0.7978846, %v1462_v18  ;;  %v1207_v40 = vmul.f32 %v8472_v57, %v8471_v25  ;;  %v7303_v61 = vpop.f32.mrf.mxu1  ;;  %v8476_v18 = vld [vmem:[#allocation129_spill] sm:$0xff] }
 0x1f6   :  { %v872_v37 = vmul.f32 0.5, %v8452_v55  ;;  %v935_v28 = vmul.f32 0.5, %v8454_v0  ;;  %3786 = vmatprep.mubr.bf16.mxu0 %v2922_v8  ;;  %v1400_v31 = vadd.f32 %v1272_v12, %v8469_v60  ;;  %v1145_v17 = vmul.f32 %v8474_v10, %v8473_v35  ;;  %8475 = vst [vmem:[#allocation15_spill] sm:$0xff] %v7303_v61  ;;  %v8478_v10 = vld [vmem:[#allocation137_spill] sm:$0xff] }
 0x1f7   :  { %v7296_v36 = vmul.f32 0.5, %v8456_v20  ;;  %3851 = vmatprep.mubr.bf16.mxu1 %v2892_v1  ;;  %v942_v33 = vmul.f32 0.5, %v8458_v15  ;;  %v880_v30 = vmul.f32 0.5, %v8460_v11  ;;  %3787 = vmatmul.mubr.bf16.gmra.mxu0 %v2921_v4  ;;  %v1335_v55 = vmul.f32 %v1207_v40, %v8471_v25  ;;  %v8477_v11 = vld [vmem:[#allocation35_spill] sm:$0xff] }
 0x1f8   :  { %v4841_v0 = vpop.eup %4840  ;;  %v1768_v43 = vadd.f32 1.0, %v4839_v14  ;;  %3852 = vmatmul.mubr.bf16.gmra.mxu1 %v2891_v62  ;;  %v943_v47 = vmul.f32 0.5, %v8463_v29  ;;  %v1528_v44 = vmul.f32 0.7978846, %v1400_v31  ;;  %v1273_v63 = vmul.f32 %v1145_v17, %v8473_v35  ;;  %v7313_v14 = vpop.f32.mrf.mxu0 }
 0x1f9   :  { %v4843_v20 = vpop.eup %4842  ;;  %v1958_v58 = vmul.f32 %v1830_v27, %v934_v23  ;;  %4852 = vtanh.f32 %v1590_v19  ;;  %v1463_v15 = vadd.f32 %v1335_v55, %v8471_v25  ;;  %v1214_v4 = vmul.f32 %v8477_v11, %v8476_v18 }
 0x1fa   :  { %v4845_v8 = vpop.eup %4844  ;;  %v881_v12 = vmul.f32 0.5, %v8465_v3  ;;  %v7310_v62 = vmul.f32 0.5, %v8467_v53  ;;  %4854 = vtanh.f32 %v1528_v44  ;;  %v1401_v29 = vadd.f32 %v1273_v63, %v8473_v35  ;;  %v8479_v3 = vld [vmem:[#allocation144_spill] sm:$0xff]  ;;  %v7321_v53 = vpop.f32.mrf.mxu1 }
 0x1fb   :  { %v7316_v1 = vmul.f32 %v7105_v32, %v1958_v58  ;;  %v1838_v23 = vadd.f32 1.0, %v4845_v8  ;;  %v1591_v27 = vmul.f32 0.7978846, %v1463_v15  ;;  %v1342_v19 = vmul.f32 %v1214_v4, %v8476_v18  ;;  %v7330_v4 = vpop.f32.mrf.mxu0 }
 0x1fc   :  { %v1896_v57 = vmul.f32 %v1768_v43, %v872_v37  ;;  %v1831_v40 = vadd.f32 1.0, %v4841_v0  ;;  %v1529_v31 = vmul.f32 0.7978846, %v1401_v29  ;;  %v1152_v17 = vmul.f32 %v8479_v3, %v8478_v10  ;;  %v8480_v37 = vld [vmem:[#allocation139_spill] sm:$0xff]  ;;  %v8481_v0 = vld [vmem:[#allocation146_spill] sm:$0xff] }
 0x1fd   :  { %v4847_v55 = vpop.eup %4846  ;;  %v1769_v44 = vadd.f32 1.0, %v4843_v20  ;;  %v1966_v63 = vmul.f32 %v1838_v23, %v942_v33  ;;  %4856 = vtanh.f32 %v1591_v27  ;;  %v1470_v11 = vadd.f32 %v1342_v19, %v8476_v18  ;;  %v8482_v20 = vld [vmem:[#allocation142_spill] sm:$0xff]  ;;  %v8483_v33 = vld [vmem:[#allocation147_spill] sm:$0xff] }
 0x1fe   :  { %v7325_v32 = vmul.f32 %v7031_v54, %v1896_v57  ;;  %v1776_v58 = vadd.f32 1.0, %v4847_v55  ;;  %v1280_v15 = vmul.f32 %v1152_v17, %v8478_v10  ;;  %v1215_v43 = vmul.f32 %v8481_v0, %v8480_v37  ;;  %v7337_v17 = vpop.f32.mrf.mxu1 }
 0x1ff   :  { %v2811_v8 = vmul.f32 %v7135_v52, %v1966_v63  ;;  %4858 = vtanh.f32 %v1529_v31  ;;  %v1598_v29 = vmul.f32 0.7978846, %v1470_v11  ;;  %v1153_v23 = vmul.f32 %v8483_v33, %v8482_v20  ;;  %v8485_v33 = vld [vmem:[#allocation148_spill] sm:$0xff] }
 0x200   :  { %v4849_v27 = vpop.eup %4848  ;;  %v1959_v19 = vmul.f32 %v1831_v40, %v935_v28  ;;  %v1904_v3 = vmul.f32 %v1776_v58, %v880_v30  ;;  %v1408_v54 = vadd.f32 %v1280_v15, %v8478_v10  ;;  %v1343_v57 = vmul.f32 %v1215_v43, %v8480_v37  ;;  %v7343_v30 = vpop.f32.mrf.mxu0  ;;  %v8484_v43 = vld [vmem:[#allocation136_spill] sm:$0xff] }
 0x201   :  { %v4851_v55 = vpop.eup %4850  ;;  %v2899_v0 = vpack.c.bf16 %v2811_v8, %v7316_v1  ;;  %v1839_v61 = vadd.f32 1.0, %v4849_v27  ;;  %4860 = vtanh.f32 %v1598_v29  ;;  %v1281_v52 = vmul.f32 %v1153_v23, %v8482_v20 }
 0x202   :  { %v2749_v31 = vmul.f32 %v7052_v39, %v1904_v3  ;;  %v1777_v63 = vadd.f32 1.0, %v4851_v55  ;;  %v1536_v11 = vmul.f32 0.7978846, %v1408_v54  ;;  %v1471_v28 = vadd.f32 %v1343_v57, %v8480_v37  ;;  %v7350_v39 = vpop.f32.mrf.mxu1  ;;  %v7352_v27 = vpop.f32.mrf.mxu0 }
 0x203   :  { %v1897_v40 = vmul.f32 %v1769_v44, %v7296_v36  ;;  %v1967_v58 = vmul.f32 %v1839_v61, %v943_v47  ;;  %v1409_v15 = vadd.f32 %v1281_v52, %v8482_v20  ;;  %v1222_v1 = vmul.f32 %v8485_v33, %v8484_v43  ;;  %8486 = vst [vmem:[#allocation22_spill] sm:$0xff] %v7352_v27 }
 0x204   :  { %v2869_v8 = vpack.c.bf16 %v2749_v31, %v7325_v32  ;;  %v1905_v29 = vmul.f32 %v1777_v63, %v881_v12  ;;  %4862 = vtanh.f32 %v1536_v11  ;;  %v1599_v23 = vmul.f32 0.7978846, %v1471_v28  ;;  %v8487_v12 = vld [vmem:[#allocation40_spill] sm:$0xff]  ;;  %v8488_v32 = vld [vmem:[#allocation149_spill] sm:$0xff] }
 0x205   :  { %v2804_v3 = vmul.f32 %v7120_v7, %v1959_v19  ;;  %v2812_v54 = vmul.f32 %v7152_v2, %v1967_v58  ;;  %v1537_v36 = vmul.f32 0.7978846, %v1409_v15  ;;  %v1350_v47 = vmul.f32 %v1222_v1, %v8484_v43  ;;  %v8489_v28 = vld [vmem:[#allocation140_spill] sm:$0xff]  ;;  %v7369_v58 = vpop.f32.mrf.mxu0  ;;  %v8492_v1 = vld [vmem:[#allocation145_spill] sm:$0xff] }
 0x206   :  { %v4853_v61 = vpop.eup %4852  ;;  %v2742_v44 = vmul.f32 %v7039_v46, %v1897_v40  ;;  %v2750_v57 = vmul.f32 %v7061_v9, %v1905_v29  ;;  %4864 = vtanh.f32 %v1599_v23  ;;  %v1160_v55 = vmul.f32 %v8488_v32, %v8487_v12  ;;  %v8490_v46 = vld [vmem:[#allocation152_spill] sm:$0xff]  ;;  %v7367_v9 = vpop.f32.mrf.mxu1  ;;  %8491 = vst [vmem:[#allocation17_spill] sm:$0xff] %v7369_v58  ;;  %v8493_v29 = vld [vmem:[#allocation153_spill] sm:$0xff] }
 0x207   :  { %v4855_v52 = vpop.eup %4854  ;;  %v2900_v31 = vpack.c.bf16 %v2812_v54, %v2804_v3  ;;  %v888_v63 = vmul.f32 0.5, %v8469_v60  ;;  %4866 = vtanh.f32 %v1537_v36  ;;  %v1478_v7 = vadd.f32 %v1350_v47, %v8484_v43  ;;  %v8495_v32 = vld [vmem:[#allocation156_spill] sm:$0xff] }
 0x208   :  { %v2870_v2 = vpack.c.bf16 %v2750_v57, %v2742_v44  ;;  %v951_v19 = vmul.f32 0.5, %v8471_v25  ;;  %v1288_v11 = vmul.f32 %v1160_v55, %v8487_v12  ;;  %v1223_v40 = vmul.f32 %v8490_v46, %v8489_v28  ;;  %v8494_v57 = vld [vmem:[#allocation143_spill] sm:$0xff] }
 0x209   :  { %v1846_v15 = vadd.f32 1.0, %v4853_v61  ;;  %v889_v33 = vmul.f32 0.5, %v8473_v35  ;;  %3859 = vmatprep.mubr.bf16.mxu1 %v2900_v31  ;;  %v1606_v60 = vmul.f32 0.7978846, %v1478_v7  ;;  %v1161_v23 = vmul.f32 %v8493_v29, %v8492_v1 }
 0x20a   :  { %v4857_v3 = vpop.eup %4856  ;;  %v1784_v54 = vadd.f32 1.0, %v4855_v52  ;;  %3924 = vmatprep.mubr.bf16.mxu0 %v2870_v2  ;;  %v958_v25 = vmul.f32 0.5, %v8476_v18  ;;  %3860 = vmatmul.mubr.bf16.gmra.mxu1 %v2899_v0  ;;  %v1416_v36 = vadd.f32 %v1288_v11, %v8487_v12  ;;  %v1351_v47 = vmul.f32 %v1223_v40, %v8489_v28  ;;  %v7383_v0 = vpop.f32.mrf.mxu1 }
 0x20b   :  { %v896_v44 = vmul.f32 0.5, %v8478_v10  ;;  %3925 = vmatmul.mubr.bf16.vlgmr.msra.gmra.mxu0 %v2869_v8  ;;  %v959_v35 = vmul.f32 0.5, %v8480_v37  ;;  %v1289_v61 = vmul.f32 %v1161_v23, %v8492_v1  ;;  %v1230_v55 = vmul.f32 %v8495_v32, %v8494_v57  ;;  %v7385_v2 = vpop.f32.mrf.mxu0  ;;  %v8497_v23 = vld [vmem:[#allocation36_spill] sm:$0xff] }
 0x20c   :  { %v4859_v31 = vpop.eup %4858  ;;  %v1847_v52 = vadd.f32 1.0, %v4857_v3  ;;  %4868 = vtanh.f32 %v1606_v60  ;;  %v1544_v7 = vmul.f32 0.7978846, %v1416_v36  ;;  %v1479_v18 = vadd.f32 %v1351_v47, %v8489_v28  ;;  %v8496_v60 = vld [vmem:[#allocation150_spill] sm:$0xff] }
 0x20d   :  { %v1974_v10 = vmul.f32 %v1846_v15, %v7310_v62  ;;  %v897_v8 = vmul.f32 0.5, %v8482_v20  ;;  %v1417_v37 = vadd.f32 %v1289_v61, %v8492_v1  ;;  %v1358_v11 = vmul.f32 %v1230_v55, %v8494_v57 }
 0x20e   :  { %v4861_v46 = vpop.eup %4860  ;;  %v1912_v40 = vmul.f32 %v1784_v54, %v888_v63  ;;  %4870 = vtanh.f32 %v1544_v7  ;;  %v1607_v29 = vmul.f32 0.7978846, %v1479_v18  ;;  %v1168_v3 = vmul.f32 %v8497_v23, %v8496_v60  ;;  %v7401_v63 = vpop.f32.mrf.mxu1  ;;  %v8499_v18 = vld [vmem:[#allocation154_spill] sm:$0xff] }
 0x20f   :  { %v1785_v36 = vadd.f32 1.0, %v4859_v31  ;;  %v1854_v47 = vadd.f32 1.0, %v4861_v46  ;;  %v1545_v32 = vmul.f32 0.7978846, %v1417_v37  ;;  %v1486_v27 = vadd.f32 %v1358_v11, %v8494_v57  ;;  %8498 = vst [vmem:[#allocation28_spill] sm:$0xff] %v7401_v63  ;;  %v7403_v54 = vpop.f32.mrf.mxu0  ;;  %v8500_v37 = vld [vmem:[#allocation160_spill] sm:$0xff] }
 0x210   :  { %v7395_v62 = vmul.f32 %v7170_v26, %v1974_v10  ;;  %v7398_v20 = vmul.f32 %v7071_v56, %v1912_v40  ;;  %v1975_v15 = vmul.f32 %v1847_v52, %v951_v19  ;;  %v1296_v61 = vmul.f32 %v1168_v3, %v8496_v60  ;;  %v8501_v56 = vld [vmem:[#allocation157_spill] sm:$0xff]  ;;  %v8502_v10 = vld [vmem:[#allocation162_spill] sm:$0xff] }
 0x211   :  { %v4863_v55 = vpop.eup %4862  ;;  %v1982_v7 = vmul.f32 %v1854_v47, %v958_v25  ;;  %4872 = vtanh.f32 %v1607_v29  ;;  %v1614_v31 = vmul.f32 0.7978846, %v1486_v27  ;;  %v1231_v11 = vmul.f32 %v8500_v37, %v8499_v18  ;;  %v8576_v63 = vld [vmem:[#allocation21_spill] sm:$0xff] }
 0x212   :  { %v1792_v46 = vadd.f32 1.0, %v4863_v55  ;;  %4874 = vtanh.f32 %v1545_v32  ;;  %v1424_v26 = vadd.f32 %v1296_v61, %v8496_v60  ;;  %v1169_v19 = vmul.f32 %v8502_v10, %v8501_v56  ;;  %v7413_v55 = vpop.f32.mrf.mxu1  ;;  %v7415_v32 = vpop.f32.mrf.mxu0 }
 0x213   :  { %v4865_v52 = vpop.eup %4864  ;;  %v1913_v40 = vmul.f32 %v1785_v36, %v889_v33  ;;  %v2827_v23 = vmul.f32 %v7198_v41, %v1982_v7  ;;  %4876 = vtanh.f32 %v1614_v31  ;;  %v1359_v3 = vmul.f32 %v1231_v11, %v8499_v18  ;;  %8503 = vst [vmem:[#allocation62_spill] sm:$0xff] %v7413_v55  ;;  %8504 = vst [vmem:[#allocation65_spill] sm:$0xff] %v7415_v32  ;;  %v8505_v36 = vld [vmem:[#allocation151_spill] sm:$0xff]  ;;  %v8507_v31 = vld [vmem:[#allocation12_spill] sm:$0xff] }
 0x214   :  { %v4867_v25 = vpop.eup %4866  ;;  %v1920_v29 = vmul.f32 %v1792_v46, %v896_v44  ;;  %v1855_v27 = vadd.f32 1.0, %v4865_v52  ;;  %v1552_v47 = vmul.f32 0.7978846, %v1424_v26  ;;  %v1297_v37 = vmul.f32 %v1169_v19, %v8501_v56  ;;  %v8506_v41 = vld [vmem:[#allocation163_spill] sm:$0xff]  ;;  %v8509_v55 = vld [vmem:[#allocation164_spill] sm:$0xff]  ;;  %v7429_v32 = vpop.f32.mrf.mxu1 }
 0x215   :  { %v2907_v61 = vpack.c.bf16 %v2827_v23, %v7395_v62  ;;  %v1793_v10 = vadd.f32 1.0, %v4867_v25  ;;  %v1487_v33 = vadd.f32 %v1359_v3, %v8499_v18  ;;  %v1238_v7 = vmul.f32 %v8506_v41, %v8505_v36  ;;  %v8508_v25 = vld [vmem:[#allocation41_spill] sm:$0xff]  ;;  %8510 = vst [vmem:[#allocation19_spill] sm:$0xff] %v7429_v32 }
 0x216   :  { %v2765_v11 = vmul.f32 %v8507_v31, %v1920_v29  ;;  %v1983_v58 = vmul.f32 %v1855_v27, %v959_v35  ;;  %4878 = vtanh.f32 %v1552_v47  ;;  %v1425_v44 = vadd.f32 %v1297_v37, %v8501_v56  ;;  %v7431_v35 = vpop.f32.mrf.mxu0  ;;  %v8512_v27 = vld [vmem:[#allocation60_spill] sm:$0xff]  ;;  %v8515_v31 = vld [vmem:[#allocation166_spill] sm:$0xff] }
 0x217   :  { %v2820_v46 = vmul.f32 %v7186_v51, %v1975_v15  ;;  %v1921_v26 = vmul.f32 %v1793_v10, %v897_v8  ;;  %v1615_v19 = vmul.f32 0.7978846, %v1487_v33  ;;  %v1366_v52 = vmul.f32 %v1238_v7, %v8505_v36  ;;  %8511 = vst [vmem:[#allocation29_spill] sm:$0xff] %v7431_v35  ;;  %v8513_v51 = vld [vmem:[#allocation25_spill] sm:$0xff]  ;;  %v8514_v7 = vld [vmem:[#allocation155_spill] sm:$0xff] }
 0x218   :  { %v2877_v62 = vpack.c.bf16 %v2765_v11, %v7398_v20  ;;  %v2828_v23 = vmul.f32 %v7215_v13, %v1983_v58  ;;  %v1553_v3 = vmul.f32 0.7978846, %v1425_v44  ;;  %v1176_v41 = vmul.f32 %v8509_v55, %v8508_v25 }
 0x219   :  { %v4869_v29 = vpop.eup %4868  ;;  %v2758_v47 = vmul.f32 %v8512_v27, %v1913_v40  ;;  %v2766_v8 = vmul.f32 %v8513_v51, %v1921_v26  ;;  %4880 = vtanh.f32 %v1615_v19  ;;  %v1494_v15 = vadd.f32 %v1366_v52, %v8505_v36  ;;  %v8517_v19 = vld [vmem:[#allocation167_spill] sm:$0xff]  ;;  %v7445_v52 = vpop.f32.mrf.mxu1 }
 0x21a   :  { %v2908_v37 = vpack.c.bf16 %v2828_v23, %v2820_v46  ;;  %v966_v20 = vmul.f32 0.5, %v8484_v43  ;;  %4882 = vtanh.f32 %v1553_v3  ;;  %v1304_v13 = vmul.f32 %v1176_v41, %v8508_v25  ;;  %v8516_v46 = vld [vmem:[#allocation159_spill] sm:$0xff]  ;;  %8518 = vst [vmem:[#allocation63_spill] sm:$0xff] %v7445_v52  ;;  %v7447_v23 = vpop.f32.mrf.mxu0 }
 0x21b   :  { %v4871_v58 = vpop.eup %4870  ;;  %v2878_v55 = vpack.c.bf16 %v2766_v8, %v2758_v47  ;;  %v904_v10 = vmul.f32 0.5, %v8487_v12  ;;  %v1622_v33 = vmul.f32 0.7978846, %v1494_v15  ;;  %v1239_v11 = vmul.f32 %v8515_v31, %v8514_v7  ;;  %8519 = vst [vmem:[#allocation67_spill] sm:$0xff] %v7447_v23 }
 0x21c   :  { %v1862_v40 = vadd.f32 1.0, %v4869_v29  ;;  %v967_v44 = vmul.f32 0.5, %v8489_v28  ;;  %3867 = vmatprep.mubr.bf16.mxu1 %v2908_v37  ;;  %v1432_v26 = vadd.f32 %v1304_v13, %v8508_v25  ;;  %v1177_v43 = vmul.f32 %v8517_v19, %v8516_v46  ;;  %v8520_v13 = vld [vmem:[#allocation158_spill] sm:$0xff] }
 0x21d   :  { %v1800_v3 = vadd.f32 1.0, %v4871_v58  ;;  %v7450_v12 = vmul.f32 0.5, %v8492_v1  ;;  %3932 = vmatprep.mubr.bf16.mxu0 %v2878_v55  ;;  %v974_v41 = vmul.f32 0.5, %v8494_v57  ;;  %3868 = vmatmul.mubr.bf16.gmra.mxu1 %v2907_v61  ;;  %v1367_v28 = vmul.f32 %v1239_v11, %v8514_v7  ;;  %v8521_v57 = vld [vmem:[#allocation168_spill] sm:$0xff] }
 0x21e   :  { %v4873_v29 = vpop.eup %4872  ;;  %v912_v27 = vmul.f32 0.5, %v8496_v60  ;;  %3933 = vmatmul.mubr.bf16.gmra.mxu0 %v2877_v62  ;;  %v975_v47 = vmul.f32 0.5, %v8499_v18  ;;  %v1560_v51 = vmul.f32 0.7978846, %v1432_v26  ;;  %v1305_v8 = vmul.f32 %v1177_v43, %v8516_v46  ;;  %v7465_v18 = vpop.f32.mrf.mxu1 }
 0x21f   :  { %v4875_v15 = vpop.eup %4874  ;;  %v913_v37 = vmul.f32 0.5, %v8501_v56  ;;  %4884 = vtanh.f32 %v1622_v33  ;;  %v1495_v1 = vadd.f32 %v1367_v28, %v8514_v7  ;;  %v1246_v61 = vmul.f32 %v8521_v57, %v8520_v13  ;;  %8522 = vst [vmem:[#allocation64_spill] sm:$0xff] %v7465_v18  ;;  %v7467_v62 = vpop.f32.mrf.mxu0  ;;  %v8527_v57 = vld [vmem:[#allocation56_spill] sm:$0xff]  ;;  %v8558_v18 = vld [vmem:[#allocation9_spill] sm:$0xff] }
 0x220   :  { %v4877_v58 = vpop.eup %4876  ;;  %v1990_v55 = vmul.f32 %v1862_v40, %v966_v20  ;;  %v7462_v31 = vmul.f32 0.5, %v8505_v36  ;;  %4886 = vtanh.f32 %v1560_v51  ;;  %v1433_v60 = vadd.f32 %v1305_v8, %v8516_v46  ;;  %8523 = vst [vmem:[#allocation68_spill] sm:$0xff] %v7467_v62  ;;  %v8524_v40 = vld [vmem:[#allocation161_spill] sm:$0xff] }
 0x221   :  { %v1928_v11 = vmul.f32 %v1800_v3, %v904_v10  ;;  %v1870_v56 = vadd.f32 1.0, %v4877_v58  ;;  %v1623_v33 = vmul.f32 0.7978846, %v1495_v1  ;;  %v1374_v26 = vmul.f32 %v1246_v61, %v8520_v13  ;;  %v8525_v36 = vld [vmem:[#allocation169_spill] sm:$0xff]  ;;  %v8528_v61 = vld [vmem:[#allocation171_spill] sm:$0xff] }
 0x222   :  { %v7471_v19 = vmul.f32 %v7231_v24, %v1990_v55  ;;  %v1863_v43 = vadd.f32 1.0, %v4873_v29  ;;  %v1561_v20 = vmul.f32 0.7978846, %v1433_v60  ;;  %v1184_v28 = vmul.f32 %v8525_v36, %v8524_v40  ;;  %v7475_v51 = vpop.f32.mrf.mxu1  ;;  %v8529_v29 = vld [vmem:[#allocation48_spill] sm:$0xff]  ;;  %v7486_v60 = vpop.f32.mrf.mxu0 }
 0x223   :  { %8526 = vst [vmem:[#allocation66_spill] sm:$0xff] %v7475_v51  ;;  %v4879_v8 = vpop.eup %4878  ;;  %v7478_v23 = vmul.f32 %v8527_v57, %v1928_v11  ;;  %v1801_v62 = vadd.f32 1.0, %v4875_v15  ;;  %v1998_v10 = vmul.f32 %v1870_v56, %v974_v41  ;;  %v1502_v3 = vadd.f32 %v1374_v26, %v8520_v13  ;;  %8531 = vst [vmem:[#allocation69_spill] sm:$0xff] %v7486_v60  ;;  %v8532_v57 = vld [vmem:[#allocation172_spill] sm:$0xff]  ;;  %v8533_v15 = vld [vmem:[#allocation39_spill] sm:$0xff] }
 0x224   :  { %v1808_v1 = vadd.f32 1.0, %v4879_v8  ;;  %4888 = vtanh.f32 %v1623_v33  ;;  %v1312_v24 = vmul.f32 %v1184_v28, %v8524_v40  ;;  %v1247_v58 = vmul.f32 %v8529_v29, %v8528_v61  ;;  %v7484_v55 = vpop.f32.mrf.mxu1 }
 0x225   :  { %8530 = vst [vmem:[#allocation73_spill] sm:$0xff] %v7484_v55  ;;  %v2843_v36 = vmul.f32 %v7261_v45, %v1998_v10  ;;  %4890 = vtanh.f32 %v1561_v20  ;;  %v1630_v11 = vmul.f32 0.7978846, %v1502_v3  ;;  %v1185_v41 = vmul.f32 %v8533_v15, %v8532_v57 }
 0x226   :  { %v4881_v56 = vpop.eup %4880  ;;  %v1991_v26 = vmul.f32 %v1863_v43, %v967_v44  ;;  %v1936_v8 = vmul.f32 %v1808_v1, %v912_v27  ;;  %v1440_v33 = vadd.f32 %v1312_v24, %v8524_v40  ;;  %v1375_v28 = vmul.f32 %v1247_v58, %v8528_v61  ;;  %v7493_v51 = vpop.f32.mrf.mxu1 }
 0x227   :  { %8534 = vst [vmem:[#allocation6_spill] sm:$0xff] %v7493_v51  ;;  %v4883_v29 = vpop.eup %4882  ;;  %v2915_v55 = vpack.c.bf16 %v2843_v36, %v7471_v19  ;;  %v1871_v60 = vadd.f32 1.0, %v4881_v56  ;;  %4892 = vtanh.f32 %v1630_v11  ;;  %v1313_v45 = vmul.f32 %v1185_v41, %v8532_v57  ;;  %v7501_v43 = vpop.f32.mrf.mxu0  ;;  %v8537_v19 = vld [vmem:[#allocation165_spill] sm:$0xff] }
 0x228   :  { %v2781_v20 = vmul.f32 %v7128_v34, %v1936_v8  ;;  %v1809_v10 = vadd.f32 1.0, %v4883_v29  ;;  %v1568_v3 = vmul.f32 0.7978846, %v1440_v33  ;;  %v1503_v44 = vadd.f32 %v1375_v28, %v8528_v61  ;;  %v7499_v27 = vpop.f32.mrf.mxu1  ;;  %8536 = vst [vmem:[#allocation79_spill] sm:$0xff] %v7501_v43  ;;  %v8538_v36 = vld [vmem:[#allocation45_spill] sm:$0xff]  ;;  %v8539_v29 = vld [vmem:[#allocation170_spill] sm:$0xff] }
 0x229   :  { %8535 = vst [vmem:[#allocation70_spill] sm:$0xff] %v7499_v27  ;;  %v1929_v1 = vmul.f32 %v1801_v62, %v7450_v12  ;;  %v1999_v24 = vmul.f32 %v1871_v60, %v975_v47  ;;  %v1441_v58 = vadd.f32 %v1313_v45, %v8532_v57  ;;  %v1192_v11 = vmul.f32 %v8538_v36, %v8537_v19  ;;  %v8549_v27 = vld [vmem:[#allocation53_spill] sm:$0xff] }
 0x22a   :  { %v2885_v15 = vpack.c.bf16 %v2781_v20, %v7478_v23  ;;  %v1937_v41 = vmul.f32 %v1809_v10, %v913_v37  ;;  %4894 = vtanh.f32 %v1568_v3  ;;  %v1631_v34 = vmul.f32 0.7978846, %v1503_v44  ;;  %v7508_v56 = vpop.f32.mrf.mxu1  ;;  %v8540_v23 = vld [vmem:[#allocation42_spill] sm:$0xff]  ;;  %v7519_v20 = vpop.f32.mrf.mxu0  ;;  %v8542_v44 = vld [vmem:[#allocation43_spill] sm:$0xff]  ;;  %v8550_v51 = vld [vmem:[#allocation13_spill] sm:$0xff] }
 0x22b   :  { %v2836_v8 = vmul.f32 %v7249_v5, %v1991_v26  ;;  %v2844_v33 = vmul.f32 %v7277_v6, %v1999_v24  ;;  %v1569_v28 = vmul.f32 0.7978846, %v1441_v58  ;;  %v1320_v12 = vmul.f32 %v1192_v11, %v8537_v19  ;;  %8541 = vst [vmem:[#allocation71_spill] sm:$0xff] %v7519_v20 }
 0x22c   :  { %v4885_v47 = vpop.eup %4884  ;;  %v2774_v62 = vmul.f32 %v7112_v38, %v1929_v1  ;;  %v2782_v60 = vmul.f32 %v7144_v50, %v1937_v41  ;;  %4896 = vtanh.f32 %v1631_v34  ;;  %v1193_v37 = vmul.f32 %v8540_v23, %v8539_v29  ;;  %v7517_v45 = vpop.f32.mrf.mxu1  ;;  %v8543_v1 = vld [vmem:[#allocation174_spill] sm:$0xff]  ;;  %v8544_v34 = vld [vmem:[#allocation173_spill] sm:$0xff] }
 0x22d   :  { %v4887_v10 = vpop.eup %4886  ;;  %v2916_v5 = vpack.c.bf16 %v2844_v33, %v2836_v8  ;;  %v920_v6 = vmul.f32 0.5, %v8508_v25  ;;  %4898 = vtanh.f32 %v1569_v28  ;;  %v1448_v26 = vadd.f32 %v1320_v12, %v8537_v19  ;;  %v8545_v8 = vld [vmem:[#allocation24_spill] sm:$0xff] }
 0x22e   :  { %v2886_v3 = vpack.c.bf16 %v2782_v60, %v2774_v62  ;;  %v983_v38 = vmul.f32 0.5, %v8514_v7  ;;  %v1321_v50 = vmul.f32 %v1193_v37, %v8539_v29  ;;  %v1200_v24 = vmul.f32 %v8543_v1, %v8542_v44  ;;  %v7527_v58 = vpop.f32.mrf.mxu1  ;;  %v7537_v60 = vpop.f32.mrf.mxu0 }
 0x22f   :  { %v1878_v36 = vadd.f32 1.0, %v4885_v47  ;;  %v1816_v11 = vadd.f32 1.0, %v4887_v10  ;;  %3875 = vmatprep.mubr.bf16.mxu1 %v2916_v5  ;;  %v1576_v41 = vmul.f32 0.7978846, %v1448_v26  ;;  %v1201_v25 = vmul.f32 %v8545_v8, %v8544_v34  ;;  %8546 = vst [vmem:[#allocation81_spill] sm:$0xff] %v7537_v60  ;;  %v8547_v10 = vld [vmem:[#allocation44_spill] sm:$0xff] }
 0x230   :  { %v921_v33 = vmul.f32 0.5, %v8516_v46  ;;  %3940 = vmatprep.mubr.bf16.mxu0 %v2886_v3  ;;  %v990_v28 = vmul.f32 0.5, %v8520_v13  ;;  %3876 = vmatmul.mubr.bf16.gmra.mxu1 %v2915_v55  ;;  %v1449_v7 = vadd.f32 %v1321_v50, %v8539_v29  ;;  %v1328_v12 = vmul.f32 %v1200_v24, %v8542_v44  ;;  %v7535_v62 = vpop.f32.mrf.mxu1  ;;  %v8548_v5 = vld [vmem:[#allocation46_spill] sm:$0xff] }
 0x231   :  { %v4889_v47 = vpop.eup %4888  ;;  %v928_v23 = vmul.f32 0.5, %v8524_v40  ;;  %3941 = vmatmul.mubr.bf16.gmra.mxu0 %v2885_v15  ;;  %v991_v37 = vmul.f32 0.5, %v8528_v61  ;;  %v1329_v46 = vmul.f32 %v1201_v25, %v8544_v34  ;;  %v1208_v13 = vmul.f32 %v8548_v5, %v8547_v10 }
 0x232   :  { %v4891_v55 = vpop.eup %4890  ;;  %v929_v26 = vmul.f32 0.5, %v8532_v57  ;;  %4900 = vtanh.f32 %v1576_v41  ;;  %v1577_v3 = vmul.f32 0.7978846, %v1449_v7  ;;  %v1456_v50 = vadd.f32 %v1328_v12, %v8542_v44  ;;  %v7546_v1 = vpop.f32.mrf.mxu1 }
 0x233   :  { %v2006_v24 = vmul.f32 %v1878_v36, %v7462_v31  ;;  %v1944_v40 = vmul.f32 %v1816_v11, %v920_v6  ;;  %v1457_v15 = vadd.f32 %v1329_v46, %v8544_v34  ;;  %v1336_v61 = vmul.f32 %v1208_v13, %v8547_v10  ;;  %v7555_v7 = vpop.f32.mrf.mxu0  ;;  %v8552_v36 = vld [vmem:[#allocation61_spill] sm:$0xff] }
 0x234   :  { %v4893_v8 = vpop.eup %4892  ;;  %v1879_v25 = vadd.f32 1.0, %v4889_v47  ;;  %4902 = vtanh.f32 %v1577_v3  ;;  %v1584_v5 = vmul.f32 0.7978846, %v1456_v50  ;;  %v1209_v57 = vmul.f32 %v8550_v51, %v8549_v27  ;;  %v7553_v41 = vpop.f32.mrf.mxu1  ;;  %8551 = vst [vmem:[#allocation74_spill] sm:$0xff] %v7555_v7  ;;  %v8554_v50 = vld [vmem:[#allocation49_spill] sm:$0xff]  ;;  %v8556_v7 = vld [vmem:[#allocation16_spill] sm:$0xff] }
 0x235   :  { %v1817_v12 = vadd.f32 1.0, %v4891_v55  ;;  %v1886_v20 = vadd.f32 1.0, %v4893_v8  ;;  %v1585_v60 = vmul.f32 0.7978846, %v1457_v15  ;;  %v1464_v31 = vadd.f32 %v1336_v61, %v8547_v10  ;;  %v8553_v55 = vld [vmem:[#allocation47_spill] sm:$0xff] }
 0x236   :  { %v7559_v6 = vmul.f32 %v7293_v59, %v2006_v24  ;;  %v7562_v11 = vmul.f32 %v8552_v36, %v1944_v40  ;;  %4904 = vtanh.f32 %v1584_v5  ;;  %v1337_v47 = vmul.f32 %v1209_v57, %v8549_v27  ;;  %v7565_v46 = vpop.f32.mrf.mxu1  ;;  %v8555_v24 = vld [vmem:[#allocation175_spill] sm:$0xff]  ;;  %v7574_v5 = vpop.f32.mrf.mxu0 }
 0x237   :  { %v4895_v51 = vpop.eup %4894  ;;  %v2014_v13 = vmul.f32 %v1886_v20, %v990_v28  ;;  %4906 = vtanh.f32 %v1585_v60  ;;  %v1592_v3 = vmul.f32 0.7978846, %v1464_v31  ;;  %v1216_v15 = vmul.f32 %v8554_v50, %v8553_v55  ;;  %8557 = vst [vmem:[#allocation82_spill] sm:$0xff] %v7574_v5 }
 0x238   :  { %v2007_v8 = vmul.f32 %v1879_v25, %v983_v38  ;;  %v1824_v61 = vadd.f32 1.0, %v4895_v51  ;;  %v1465_v59 = vadd.f32 %v1337_v47, %v8549_v27  ;;  %v1217_v40 = vmul.f32 %v8556_v7, %v8555_v24  ;;  %v7572_v36 = vpop.f32.mrf.mxu1 }
 0x239   :  { %v4897_v57 = vpop.eup %4896  ;;  %v1945_v43 = vmul.f32 %v1817_v12, %v921_v33  ;;  %v2859_v20 = vmul.f32 %v7330_v4, %v2014_v13  ;;  %4908 = vtanh.f32 %v1592_v3  ;;  %v1344_v28 = vmul.f32 %v1216_v15, %v8553_v55  ;;  %v8559_v33 = vld [vmem:[#allocation52_spill] sm:$0xff]  ;;  %v7589_v15 = vpop.f32.mrf.mxu0 }
 0x23a   :  { %v4899_v60 = vpop.eup %4898  ;;  %v1952_v31 = vmul.f32 %v1824_v61, %v928_v23  ;;  %v1887_v38 = vadd.f32 1.0, %v4897_v57  ;;  %v1593_v25 = vmul.f32 0.7978846, %v1465_v59  ;;  %v1345_v47 = vmul.f32 %v1217_v40, %v8555_v24  ;;  %v7579_v51 = vpop.f32.mrf.mxu1  ;;  %8560 = vst [vmem:[#allocation75_spill] sm:$0xff] %v7589_v15 }
 0x23b   :  { %v2923_v7 = vpack.c.bf16 %v2859_v20, %v7559_v6  ;;  %v1825_v50 = vadd.f32 1.0, %v4899_v60  ;;  %v1472_v5 = vadd.f32 %v1344_v28, %v8553_v55  ;;  %v1224_v12 = vmul.f32 %v8559_v33, %v8558_v18 }
 0x23c   :  { %v2797_v4 = vmul.f32 %v7192_v22, %v1952_v31  ;;  %v2015_v13 = vmul.f32 %v1887_v38, %v991_v37  ;;  %4910 = vtanh.f32 %v1593_v25  ;;  %v1473_v23 = vadd.f32 %v1345_v47, %v8555_v24  ;;  %v7587_v3 = vpop.f32.mrf.mxu1  ;;  %v8561_v22 = vld [vmem:[#allocation50_spill] sm:$0xff]  ;;  %v8562_v37 = vld [vmem:[#allocation177_spill] sm:$0xff] }
 0x23d   :  { %v2852_v61 = vmul.f32 %v7313_v14, %v2007_v8  ;;  %v1953_v59 = vmul.f32 %v1825_v50, %v929_v26  ;;  %v1600_v6 = vmul.f32 0.7978846, %v1472_v5  ;;  %v1352_v40 = vmul.f32 %v1224_v12, %v8558_v18  ;;  %v8563_v25 = vld [vmem:[#allocation14_spill] sm:$0xff]  ;;  %v8564_v26 = vld [vmem:[#allocation176_spill] sm:$0xff]  ;;  %v7606_v5 = vpop.f32.mrf.mxu0 }
 0x23e   :  { %v2893_v57 = vpack.c.bf16 %v2797_v4, %v7562_v11  ;;  %v2860_v20 = vmul.f32 %v7343_v30, %v2015_v13  ;;  %v1601_v28 = vmul.f32 0.7978846, %v1473_v23  ;;  %v1225_v60 = vmul.f32 %v8562_v37, %v8561_v22  ;;  %v7597_v31 = vpop.f32.mrf.mxu1  ;;  %8565 = vst [vmem:[#allocation83_spill] sm:$0xff] %v7606_v5  ;;  %v8566_v4 = vld [vmem:[#allocation23_spill] sm:$0xff]  ;;  %v8567_v23 = vld [vmem:[#allocation20_spill] sm:$0xff] }
 0x23f   :  { %v4901_v38 = vpop.eup %4900  ;;  %v2790_v47 = vmul.f32 %v8563_v25, %v1945_v43  ;;  %v2798_v33 = vmul.f32 %v7207_v48, %v1953_v59  ;;  %4912 = vtanh.f32 %v1600_v6  ;;  %v1480_v14 = vadd.f32 %v1352_v40, %v8558_v18  ;;  %v8568_v59 = vld [vmem:[#allocation178_spill] sm:$0xff] }
 0x240   :  { %v7603_v8 = vmul.f32 0.044715, %v8564_v26  ;;  %v2924_v11 = vpack.c.bf16 %v2860_v20, %v2852_v61  ;;  %4914 = vtanh.f32 %v1601_v28  ;;  %v1353_v30 = vmul.f32 %v1225_v60, %v8561_v22  ;;  %v7608_v50 = vpop.f32.mrf.mxu1  ;;  %v8569_v20 = vld [vmem:[#allocation58_spill] sm:$0xff]  ;;  %v8570_v28 = vld [vmem:[#allocation179_spill] sm:$0xff] }
 0x241   :  { %v4903_v12 = vpop.eup %4902  ;;  %v7611_v13 = vmul.f32 0.044715, %v8566_v4  ;;  %v2894_v43 = vpack.c.bf16 %v2798_v33, %v2790_v47  ;;  %v1608_v48 = vmul.f32 0.7978846, %v1480_v14  ;;  %v1232_v6 = vmul.f32 %v8568_v59, %v8567_v23 }
 0x242   :  { %v936_v40 = vmul.f32 0.5, %v8537_v19  ;;  %v1832_v37 = vadd.f32 1.0, %v4901_v38  ;;  %3883 = vmatprep.mubr.bf16.mxu1 %v2924_v11  ;;  %v1481_v61 = vadd.f32 %v1353_v30, %v8561_v22  ;;  %v1233_v60 = vmul.f32 %v8570_v28, %v8569_v20  ;;  %v7619_v25 = vpop.f32.mrf.mxu1  ;;  %v7621_v15 = vpop.f32.mrf.mxu0 }
 0x243   :  { %8571 = vst [vmem:[#allocation76_spill] sm:$0xff] %v7621_v15  ;;  %v4905_v5 = vpop.eup %4904  ;;  %v937_v47 = vmul.f32 0.5, %v8539_v29  ;;  %v1833_v33 = vadd.f32 1.0, %v4903_v12  ;;  %3948 = vmatprep.mubr.bf16.mxu0 %v2894_v43  ;;  %v944_v14 = vmul.f32 0.5, %v8542_v44  ;;  %3884 = vmatmul.mubr.bf16.gmra.mxu1 %v2923_v7  ;;  %v1360_v19 = vmul.f32 %v1232_v6, %v8567_v23  ;;  %v8573_v44 = vld [vmem:[#allocation55_spill] sm:$0xff]  ;;  %v8574_v7 = vld [vmem:[#allocation180_spill] sm:$0xff] }
 0x244   :  { %v4907_v38 = vpop.eup %4906  ;;  %v1840_v11 = vadd.f32 1.0, %v4905_v5  ;;  %3949 = vmatmul.mubr.bf16.gmra.mxu0 %v2893_v57  ;;  %v945_v30 = vmul.f32 0.5, %v8544_v34  ;;  %v1609_v59 = vmul.f32 0.7978846, %v1481_v61  ;;  %v1361_v28 = vmul.f32 %v1233_v60, %v8569_v20  ;;  %v7628_v32 = vpop.f32.mrf.mxu1 }
 0x245   :  { %v7630_v15 = vpop.f32.mrf.mxu0  ;;  %v1841_v29 = vadd.f32 1.0, %v4907_v38  ;;  %4916 = vtanh.f32 %v1608_v48  ;;  %v1488_v12 = vadd.f32 %v1360_v19, %v8567_v23  ;;  %v1240_v43 = vmul.f32 %v8574_v7, %v8573_v44 }
 0x246   :  { %8572 = vst [vmem:[#allocation84_spill] sm:$0xff] %v7630_v15  ;;  %v4909_v6 = vpop.eup %4908  ;;  %v1960_v52 = vmul.f32 %v1832_v37, %v936_v40  ;;  %v1968_v5 = vmul.f32 %v1840_v11, %v944_v14  ;;  %4918 = vtanh.f32 %v1609_v59  ;;  %v1489_v34 = vadd.f32 %v1361_v28, %v8569_v20  ;;  %v7636_v57 = vpop.f32.mrf.mxu1  ;;  %v8577_v40 = vld [vmem:[#allocation18_spill] sm:$0xff] }
 0x247   :  { %v7638_v61 = vpop.f32.mrf.mxu0  ;;  %v1961_v60 = vmul.f32 %v1833_v33, %v937_v47  ;;  %v1969_v35 = vmul.f32 %v1841_v29, %v945_v30  ;;  %v1616_v15 = vmul.f32 0.7978846, %v1488_v12  ;;  %v1368_v48 = vmul.f32 %v1240_v43, %v8573_v44  ;;  %v8578_v28 = vld [vmem:[#allocation26_spill] sm:$0xff] }
 0x248   :  { %8575 = vst [vmem:[#allocation72_spill] sm:$0xff] %v7638_v61  ;;  %v2805_v19 = vmul.f32 %v7223_v42, %v1960_v52  ;;  %v2813_v38 = vmul.f32 %v7256_v16, %v1968_v5  ;;  %v1617_v7 = vmul.f32 0.7978846, %v1489_v34  ;;  %v1241_v37 = vmul.f32 %v8577_v40, %v8576_v63  ;;  %v7645_v14 = vpop.f32.mrf.mxu1 }
 0x249   :  { %v7647_v11 = vpop.f32.mrf.mxu0  ;;  %v4911_v59 = vpop.eup %4910  ;;  %v2806_v61 = vmul.f32 %v8578_v28, %v1961_v60  ;;  %v2814_v47 = vmul.f32 %v7269_v21, %v1969_v35  ;;  %4920 = vtanh.f32 %v1616_v15  ;;  %v1496_v33 = vadd.f32 %v1368_v48, %v8573_v44 }
 0x24a   :  { %v2901_v30 = vpack.c.bf16 %v2813_v38, %v2805_v19  ;;  %v1848_v42 = vadd.f32 1.0, %v4909_v6  ;;  %4922 = vtanh.f32 %v1617_v7  ;;  %v1369_v16 = vmul.f32 %v1241_v37, %v8576_v63  ;;  %v7653_v52 = vpop.f32.mrf.mxu1 }
 0x24b   :  { %v7655_v29 = vpop.f32.mrf.mxu0  ;;  %v2902_v12 = vpack.c.bf16 %v2814_v47, %v2806_v61  ;;  %v1849_v43 = vadd.f32 1.0, %v4911_v59  ;;  %v1624_v5 = vmul.f32 0.7978846, %v1496_v33  ;;  %v1248_v34 = vmul.f32 %v7603_v8, %v8564_v26 }
 0x24c   :  { %v4913_v60 = vpop.eup %4912  ;;  %v952_v21 = vmul.f32 0.5, %v8547_v10  ;;  %v953_v35 = vmul.f32 0.5, %v8549_v27  ;;  %v1497_v15 = vadd.f32 %v1369_v16, %v8576_v63  ;;  %v1249_v6 = vmul.f32 %v7611_v13, %v8566_v4  ;;  %v7664_v48 = vpop.f32.mrf.mxu1 }
 0x24d   :  { %v4915_v19 = vpop.eup %4914  ;;  %3956 = vmatprep.mubr.bf16.mxu0 %v2902_v12  ;;  %v960_v61 = vmul.f32 0.5, %v8553_v55  ;;  %v1856_v38 = vadd.f32 1.0, %v4913_v60  ;;  %v961_v7 = vmul.f32 0.5, %v8555_v24  ;;  %v1376_v8 = vmul.f32 %v1248_v34, %v8564_v26  ;;  %v4406_v40 = vpop.f32.mrf.mxu0 }
 0x24e   :  { %v1976_v10 = vmul.f32 %v1848_v42, %v952_v21  ;;  %3957 = vmatmul.mubr.bf16.gmra.mxu0 %v2901_v30  ;;  %v1857_v27 = vadd.f32 1.0, %v4915_v19  ;;  %v1625_v37 = vmul.f32 0.7978846, %v1497_v15  ;;  %v1377_v59 = vmul.f32 %v1249_v6, %v8566_v4  ;;  %v4368_v33 = vpop.f32.mrf.mxu1 }
 0x24f   :  { %v1977_v28 = vmul.f32 %v1849_v43, %v953_v35  ;;  %v1984_v13 = vmul.f32 %v1856_v38, %v960_v61  ;;  %4924 = vtanh.f32 %v1624_v5  ;;  %v1504_v47 = vadd.f32 %v1376_v8, %v8564_v26  ;;  %v4408_v34 = vpop.f32.mrf.mxu0  ;;  %v8579_v43 = vld [vmem:[#allocation15_spill] sm:$0xff] }
 0x250   :  { %v1985_v16 = vmul.f32 %v1857_v27, %v961_v7  ;;  %4926 = vtanh.f32 %v1625_v37  ;;  %v1505_v55 = vadd.f32 %v1377_v59, %v8566_v4  ;;  %v4343_v24 = vadd.f32 %v7517_v45, %v7508_v56 }
 0x251   :  { %v2821_v42 = vmul.f32 %v7284_v49, %v1976_v10  ;;  %v2829_v30 = vmul.f32 %v7321_v53, %v1984_v13  ;;  %v1632_v12 = vmul.f32 0.7978846, %v1504_v47  ;;  %v2822_v21 = vmul.f32 %v8579_v43, %v1977_v28  ;;  %v4369_v49 = vpop.f32.mrf.mxu1  ;;  %v4409_v7 = vpop.f32.mrf.mxu0 }
 0x252   :  { %v4917_v60 = vpop.eup %4916  ;;  %v2830_v5 = vmul.f32 %v7337_v17, %v1985_v16  ;;  %v1633_v35 = vmul.f32 0.7978846, %v1505_v55  ;;  %v4346_v15 = vadd.f32 %v7535_v62, %v7527_v58  ;;  %v4349_v56 = vadd.f32 %v7553_v41, %v7546_v1 }
 0x253   :  { %v4919_v6 = vpop.eup %4918  ;;  %v2909_v19 = vpack.c.bf16 %v2829_v30, %v2821_v42  ;;  %4928 = vtanh.f32 %v1632_v12  ;;  %v1864_v53 = vadd.f32 1.0, %v4917_v60  ;;  %v4352_v38 = vadd.f32 %v7572_v36, %v7565_v46  ;;  %v8580_v42 = vld [vmem:[#allocation28_spill] sm:$0xff] }
 0x254   :  { %v2910_v45 = vpack.c.bf16 %v2830_v5, %v2822_v21  ;;  %4930 = vtanh.f32 %v1633_v35  ;;  %v1865_v61 = vadd.f32 1.0, %v4919_v6  ;;  %v7686_v17 = vadd.f32 %v7587_v3, %v7579_v51 }
 0x255   :  { %v968_v62 = vmul.f32 0.5, %v8558_v18  ;;  %v7691_v1 = vadd.f32 %v7608_v50, %v7597_v31  ;;  %v7695_v41 = vadd.f32 %v7628_v32, %v7619_v25  ;;  %v969_v46 = vmul.f32 0.5, %v8561_v22 }
 0x256   :  { %v4921_v58 = vpop.eup %4920  ;;  %3964 = vmatprep.mubr.bf16.mxu0 %v2910_v45  ;;  %v976_v36 = vmul.f32 0.5, %v8567_v23  ;;  %v7701_v3 = vadd.f32 %v7645_v14, %v7636_v57  ;;  %v977_v10 = vmul.f32 0.5, %v8569_v20  ;;  %v3644_v32 = vadd.f32 %v4343_v24, %v7403_v54 }
 0x257   :  { %v4923_v8 = vpop.eup %4922  ;;  %v1872_v51 = vadd.f32 1.0, %v4921_v58  ;;  %3965 = vmatmul.mubr.bf16.gmra.mxu0 %v2909_v19  ;;  %v4371_v18 = vpop.f32.mrf.mxu1  ;;  %v1992_v50 = vmul.f32 %v1864_v53, %v968_v62  ;;  %v1993_v27 = vmul.f32 %v1865_v61, %v969_v46  ;;  %v7707_v23 = vadd.f32 %v7664_v48, %v7653_v52 }
 0x258   :  { %v1873_v31 = vadd.f32 1.0, %v4923_v8  ;;  %v4407_v28 = vadd.f32 %v4406_v40, %v7655_v29  ;;  %v7710_v57 = vadd.f32 %v4369_v49, %v4368_v33  ;;  %v3647_v13 = vadd.f32 %v7385_v2, %v4346_v15  ;;  %v8581_v2 = vld [vmem:[#allocation29_spill] sm:$0xff] }
 0x259   :  { %v2000_v37 = vmul.f32 %v1872_v51, %v976_v36  ;;  %v4411_v25 = vpop.f32.mrf.mxu0  ;;  %v4372_v59 = vpop.f32.mrf.mxu1  ;;  %v2837_v14 = vmul.f32 %v7350_v39, %v1992_v50  ;;  %v4410_v47 = vadd.f32 %v4409_v7, %v4408_v34  ;;  %v2838_v24 = vmul.f32 %v7367_v9, %v1993_v27  ;;  %v8582_v15 = vld [vmem:[#allocation65_spill] sm:$0xff] }
 0x25a   :  { %v2001_v22 = vmul.f32 %v1873_v31, %v977_v10  ;;  %v7717_v52 = vadd.f32 %v4407_v28, %v3644_v32  ;;  %v7721_v33 = vadd.f32 %v4372_v59, %v4371_v18  ;;  %v3652_v34 = vadd.f32 %v4349_v56, %v8581_v2  ;;  %v8583_v18 = vld [vmem:[#allocation62_spill] sm:$0xff]  ;;  %v8584_v31 = vld [vmem:[#allocation63_spill] sm:$0xff] }
 0x25b   :  { %v2845_v20 = vmul.f32 %v7383_v0, %v2000_v37  ;;  %v4412_v16 = vpop.f32.mrf.mxu0  ;;  %v4374_v54 = vpop.f32.mrf.mxu1  ;;  %v7719_v40 = vadd.f32 %v4410_v47, %v3647_v13  ;;  %v3655_v6 = vadd.f32 %v8582_v15, %v4352_v38  ;;  %v984_v53 = vmul.f32 0.5, %v8573_v44  ;;  %v8585_v44 = vld [vmem:[#allocation19_spill] sm:$0xff]  ;;  %v8591_v15 = vld [vmem:[#allocation69_spill] sm:$0xff] }
 0x25c   :  { %v4925_v55 = vpop.eup %4924  ;;  %v2846_v30 = vmul.f32 %v8580_v42, %v2001_v22  ;;  %v4413_v60 = vadd.f32 %v4412_v16, %v4411_v25  ;;  %v992_v61 = vmul.f32 0.5, %v8564_v26  ;;  %v985_v56 = vmul.f32 0.5, %v8576_v63  ;;  %v8586_v26 = vld [vmem:[#allocation64_spill] sm:$0xff]  ;;  %v8588_v16 = vld [vmem:[#allocation83_spill] sm:$0xff] }
 0x25d   :  { %v4927_v48 = vpop.eup %4926  ;;  %v2917_v29 = vpack.c.bf16 %v2845_v20, %v2837_v14  ;;  %v4414_v39 = vpop.f32.mrf.mxu0  ;;  %v1880_v21 = vadd.f32 1.0, %v4925_v55  ;;  %v993_v58 = vmul.f32 0.5, %v8566_v4  ;;  %v8587_v14 = vld [vmem:[#allocation68_spill] sm:$0xff] }
 0x25e   :  { %v4375_v0 = vpop.f32.mrf.mxu1  ;;  %v2918_v12 = vpack.c.bf16 %v2846_v30, %v2838_v24  ;;  %v1881_v35 = vadd.f32 1.0, %v4927_v48  ;;  %v7727_v19 = vadd.f32 %v4413_v60, %v3652_v34  ;;  %v3660_v20 = vadd.f32 %v7686_v17, %v8587_v14  ;;  %v8590_v60 = vld [vmem:[#allocation79_spill] sm:$0xff] }
 0x25f   :  { %v7724_v43 = vadd.f32 %v4375_v0, %v4374_v54  ;;  %v4415_v9 = vpop.f32.mrf.mxu0  ;;  %v2008_v46 = vmul.f32 %v1880_v21, %v984_v53  ;;  %v3668_v17 = vadd.f32 %v7695_v41, %v8590_v60  ;;  %v8600_v60 = vld [vmem:[#allocation84_spill] sm:$0xff] }
 0x260   :  { %v4929_v5 = vpop.eup %4928  ;;  %3972 = vmatprep.mubr.bf16.mxu0 %v2918_v12  ;;  %v4416_v49 = vadd.f32 %v4415_v9, %v4414_v39  ;;  %v2009_v38 = vmul.f32 %v1881_v35, %v985_v56 }
 0x261   :  { %v4931_v45 = vpop.eup %4930  ;;  %v1888_v7 = vadd.f32 1.0, %v4929_v5  ;;  %3973 = vmatmul.mubr.bf16.gmra.mxu0 %v2917_v29  ;;  %v2853_v10 = vmul.f32 %v8583_v18, %v2008_v46  ;;  %v8589_v29 = vld [vmem:[#allocation67_spill] sm:$0xff] }
 0x262   :  { %v1889_v62 = vadd.f32 1.0, %v4931_v45  ;;  %v7733_v8 = vadd.f32 %v4416_v49, %v3655_v6  ;;  %v2854_v27 = vmul.f32 %v8585_v44, %v2009_v38  ;;  %v3663_v39 = vadd.f32 %v8589_v29, %v7691_v1  ;;  %v8593_v46 = vld [vmem:[#allocation71_spill] sm:$0xff]  ;;  %v8597_v29 = vld [vmem:[#allocation66_spill] sm:$0xff] }
 0x263   :  { %v2016_v36 = vmul.f32 %v1888_v7, %v992_v61  ;;  %v3671_v6 = vadd.f32 %v8591_v15, %v7701_v3  ;;  %v8592_v61 = vld [vmem:[#allocation81_spill] sm:$0xff] }
 0x264   :  { %v2017_v51 = vmul.f32 %v1889_v62, %v993_v58  ;;  %v3676_v7 = vadd.f32 %v7707_v23, %v8592_v61 }
 0x265   :  { %v2861_v50 = vmul.f32 %v8584_v31, %v2016_v36  ;;  %v3679_v36 = vadd.f32 %v8593_v46, %v7710_v57 }
 0x266   :  { %v2862_v37 = vmul.f32 %v8586_v26, %v2017_v51  ;;  %v8595_v26 = vld [vmem:[#allocation74_spill] sm:$0xff] }
 0x267   :  { %v2925_v32 = vpack.c.bf16 %v2861_v50, %v2853_v10  ;;  %v8594_v10 = vld [vmem:[#allocation82_spill] sm:$0xff] }
 0x268   :  { %v2926_v25 = vpack.c.bf16 %v2862_v37, %v2854_v27  ;;  %v3684_v31 = vadd.f32 %v7721_v33, %v8594_v10  ;;  %v3687_v37 = vadd.f32 %v8595_v26, %v7724_v43 }
 0x26a   :  { %3980 = vmatprep.mubr.bf16.mxu0 %v2926_v25 }
 0x26b   :  { %3981 = vmatmul.mubr.bf16.gmra.mxu0 %v2925_v32  ;;  %v4377_v63 = vpop.f32.mrf.mxu1 }
 0x26c   :  { %v4417_v4 = vpop.f32.mrf.mxu0 }
 0x26d   :  { %v4378_v59 = vpop.f32.mrf.mxu1 }
 0x26e   :  { %v4379_v22 = vadd.f32 %v4378_v59, %v4377_v63  ;;  %v4418_v28 = vpop.f32.mrf.mxu0 }
 0x26f   :  { %v4419_v13 = vadd.f32 %v4418_v28, %v4417_v4  ;;  %v4380_v47 = vpop.f32.mrf.mxu1 }
 0x270   :  { %v3692_v54 = vadd.f32 %v4379_v22, %v8588_v16  ;;  %v4420_v55 = vpop.f32.mrf.mxu0 }
 0x271   :  { %v7742_v24 = vadd.f32 %v4419_v13, %v3660_v20  ;;  %v4381_v42 = vpop.f32.mrf.mxu1 }
 0x272   :  { %v4382_v30 = vadd.f32 %v4381_v42, %v4380_v47  ;;  %v4421_v48 = vpop.f32.mrf.mxu0  ;;  %v8596_v47 = vld [vmem:[#allocation75_spill] sm:$0xff] }
 0x273   :  { %v4422_v0 = vadd.f32 %v4421_v48, %v4420_v55 }
 0x274   :  { %v3695_v16 = vadd.f32 %v8596_v47, %v4382_v30 }
 0x275   :  { %v7746_v12 = vadd.f32 %v4422_v0, %v3663_v39  ;;  %v8598_v39 = vld [vmem:[#allocation73_spill] sm:$0xff] }
 0x276   :  { %v4337_v0 = vadd.f32 %v8598_v39, %v8597_v29 }
 0x27d   :  { %v4423_v2 = vpop.f32.mrf.mxu0 }
 0x27e   :  { %v4463_v57 = vpop.f32.mrf.mxu1 }
 0x27f   :  { %v4424_v34 = vpop.f32.mrf.mxu0 }
 0x280   :  { %v4425_v21 = vadd.f32 %v4424_v34, %v4423_v2  ;;  %v4464_v63 = vpop.f32.mrf.mxu1  ;;  %v8599_v34 = vld [vmem:[#allocation76_spill] sm:$0xff] }
 0x281   :  { %v4426_v9 = vpop.f32.mrf.mxu0 }
 0x282   :  { %v7750_v5 = vadd.f32 %v4425_v21, %v3668_v17  ;;  %v4466_v4 = vpop.f32.mrf.mxu1  ;;  %v4401_v17 = vadd.f32 %v8600_v60, %v8599_v34  ;;  %v8601_v21 = vld [vmem:[#allocation17_spill] sm:$0xff] }
 0x283   :  { %v4427_v35 = vpop.f32.mrf.mxu0 }
 0x284   :  { %v4428_v49 = vadd.f32 %v4427_v35, %v4426_v9  ;;  %v4467_v14 = vpop.f32.mrf.mxu1  ;;  %v3636_v9 = vadd.f32 %v4337_v0, %v8601_v21  ;;  %v8602_v35 = vld [vmem:[#allocation6_spill] sm:$0xff]  ;;  %v2930_v21 = vld [vmem:[#allocation2 + $0x18] sm:$0xff] }
 0x285   :  { %v4468_v46 = vadd.f32 %v4467_v14, %v4466_v4 }
 0x286   :  { %v7754_v45 = vadd.f32 %v4428_v49, %v3671_v6  ;;  %v4465_v6 = vadd.f32 %v4464_v63, %v4463_v57 }
 0x291   :  { %v4429_v1 = vpop.f32.mrf.mxu0 }
 0x292   :  { %v4469_v42 = vpop.f32.mrf.mxu1 }
 0x293   :  { %v4430_v53 = vpop.f32.mrf.mxu0 }
 0x294   :  { %v4431_v56 = vadd.f32 %v4430_v53, %v4429_v1  ;;  %v4470_v43 = vpop.f32.mrf.mxu1  ;;  %v3733_v1 = vadd.f32 %v4401_v17, %v3636_v9  ;;  %v8604_v53 = vld [vmem:[#allocation72_spill] sm:$0xff] }
 0x295   :  { %v4432_v58 = vpop.f32.mrf.mxu0  ;;  %v4404_v61 = vadd.f32 %v7647_v11, %v8604_v53 }
 0x296   :  { %v7758_v62 = vadd.f32 %v4431_v56, %v3676_v7  ;;  %v4472_v2 = vpop.f32.mrf.mxu1  ;;  %v8605_v56 = vld [vmem:[#allocation22_spill] sm:$0xff] }
 0x297   :  { %v4433_v41 = vpop.f32.mrf.mxu0 }
 0x298   :  { %v4434_v38 = vadd.f32 %v4433_v41, %v4432_v58  ;;  %v4473_v49 = vpop.f32.mrf.mxu1  ;;  %v3830_v41 = vadd.f32 %v4465_v6, %v3733_v1  ;;  %v2931_v1 = vld [vmem:[#allocation2 + $0x20] sm:$0xff] }
 0x29a   :  { %v7762_v51 = vadd.f32 %v4434_v38, %v3679_v36 }
 0x2a4   :  { %v4435_v3 = vpop.f32.mrf.mxu0 }
 0x2a5   :  { %v4475_v38 = vpop.f32.mrf.mxu1 }
 0x2a6   :  { %v4436_v18 = vpop.f32.mrf.mxu0 }
 0x2a7   :  { %v4437_v50 = vadd.f32 %v4436_v18, %v4435_v3  ;;  %v2927_v3 = vld [vmem:[#allocation2] sm:$0xff] }
 0x2a8   :  { %v4438_v44 = vpop.f32.mrf.mxu0 }
 0x2a9   :  { %v7766_v27 = vadd.f32 %v4437_v50, %v3684_v31 }
 0x2aa   :  { %v4439_v23 = vpop.f32.mrf.mxu0 }
 0x2ab   :  { %v4440_v32 = vadd.f32 %v4439_v23, %v4438_v44 }
 0x2ad   :  { %v7770_v25 = vadd.f32 %v4440_v32, %v3687_v37  ;;  %v4476_v37 = vpop.f32.mrf.mxu1  ;;  %v2928_v32 = vld [vmem:[#allocation2 + $0x8] sm:$0xff] }
 0x2af   :  { %v4478_v63 = vpop.f32.mrf.mxu1 }
 0x2b1   :  { %v4479_v4 = vpop.f32.mrf.mxu1 }
 0x2b7   :  { %v4441_v59 = vpop.f32.mrf.mxu0 }
 0x2b9   :  { %v4442_v22 = vpop.f32.mrf.mxu0 }
 0x2ba   :  { %v4443_v28 = vadd.f32 %v4442_v22, %v4441_v59  ;;  %v4471_v59 = vadd.f32 %v4470_v43, %v4469_v42 }
 0x2bb   :  { %v4444_v20 = vpop.f32.mrf.mxu0 }
 0x2bc   :  { %v7772_v33 = vadd.f32 %v4443_v28, %v3692_v54  ;;  %v8603_v54 = vld [vmem:[#allocation70_spill] sm:$0xff]  ;;  %v4481_v28 = vpop.f32.mrf.mxu1 }
 0x2bd   :  { %v4445_v13 = vpop.f32.mrf.mxu0  ;;  %v4340_v15 = vadd.f32 %v8603_v54, %v8602_v35 }
 0x2be   :  { %v4446_v55 = vadd.f32 %v4445_v13, %v4444_v20  ;;  %v3838_v20 = vadd.f32 %v4471_v59, %v7717_v52  ;;  %v4474_v13 = vadd.f32 %v4473_v49, %v4472_v2  ;;  %v4482_v29 = vpop.f32.mrf.mxu1  ;;  %v4477_v2 = vadd.f32 %v4476_v37, %v4475_v38 }
 0x2bf   :  { %v3639_v58 = vadd.f32 %v8605_v56, %v4340_v15 }
 0x2c0   :  { %v7775_v48 = vadd.f32 %v4446_v55, %v3695_v16  ;;  %v2929_v16 = vld [vmem:[#allocation2 + $0x10] sm:$0xff]  ;;  %v3841_v34 = vadd.f32 %v4474_v13, %v7719_v40  ;;  %v4484_v9 = vpop.f32.mrf.mxu1  ;;  %v3846_v49 = vadd.f32 %v4477_v2, %v7727_v19 }
 0x2c1   :  { %v3736_v10 = vadd.f32 %v4404_v61, %v3639_v58 }
 0x2c2   :  { %v4485_v35 = vpop.f32.mrf.mxu1 }
 0x2c3   :  { %v3833_v44 = vadd.f32 %v4468_v46, %v3736_v10  ;;  %v4483_v10 = vadd.f32 %v4482_v29, %v4481_v28 }
 0x2ca   :  { %v4487_v52 = vpop.f32.mrf.mxu1 }
 0x2cb   :  { %v4527_v30 = vpop.f32.mrf.mxu0 }
 0x2cc   :  { %v4488_v15 = vpop.f32.mrf.mxu1 }
 0x2cd   :  { %v4528_v7 = vpop.f32.mrf.mxu0  ;;  %v4489_v13 = vadd.f32 %v4488_v15, %v4487_v52  ;;  %v2936_v52 = vld [vmem:[#allocation2 + $0x48] sm:$0xff] }
 0x2ce   :  { %v4529_v36 = vadd.f32 %v4528_v7, %v4527_v30  ;;  %v4480_v30 = vadd.f32 %v4479_v4, %v4478_v63  ;;  %v4490_v7 = vpop.f32.mrf.mxu1 }
 0x2cf   :  { %v4530_v18 = vpop.f32.mrf.mxu0  ;;  %v3862_v29 = vadd.f32 %v4489_v13, %v7750_v5 }
 0x2d0   :  { %v3927_v31 = vadd.f32 %v4529_v36, %v3830_v41  ;;  %v3849_v58 = vadd.f32 %v4480_v30, %v7733_v8  ;;  %v2932_v36 = vld [vmem:[#allocation2 + $0x28] sm:$0xff] }
 0x2d1   :  { %v4531_v50 = vpop.f32.mrf.mxu0 }
 0x2d2   :  { %v3989_v23 = vadd.f32 %v3927_v31, %v2927_v3  ;;  %v4532_v26 = vadd.f32 %v4531_v50, %v4530_v18  ;;  %v4491_v3 = vpop.f32.mrf.mxu1 }
 0x2d4   :  { %4005 = vst.msk [vmem:[#allocation2] sm:$0xff] %vm109_vm0, %v3989_v23  ;;  %v3930_v11 = vadd.f32 %v4532_v26, %v3833_v44  ;;  %v3854_v23 = vadd.f32 %v4483_v10, %v7742_v24  ;;  %v4486_v26 = vadd.f32 %v4485_v35, %v4484_v9 }
 0x2d6   :  { %v3990_v57 = vadd.f32 %v3930_v11, %v2928_v32  ;;  %v2933_v32 = vld [vmem:[#allocation2 + $0x30] sm:$0xff]  ;;  %v3857_v4 = vadd.f32 %v4486_v26, %v7746_v12 }
 0x2d8   :  { %4006 = vst.msk [vmem:[#allocation2 + $0x8] sm:$0xff] %vm109_vm0, %v3990_v57 }
 0x2dd   :  { %v4493_v19 = vpop.f32.mrf.mxu1 }
 0x2de   :  { %v4533_v22 = vpop.f32.mrf.mxu0 }
 0x2df   :  { %v4494_v31 = vpop.f32.mrf.mxu1 }
 0x2e0   :  { %v4534_v14 = vpop.f32.mrf.mxu0  ;;  %v4495_v35 = vadd.f32 %v4494_v31, %v4493_v19 }
 0x2e1   :  { %v4535_v47 = vadd.f32 %v4534_v14, %v4533_v22  ;;  %v4496_v37 = vpop.f32.mrf.mxu1 }
 0x2e2   :  { %v4536_v55 = vpop.f32.mrf.mxu0 }
 0x2e3   :  { %v3935_v39 = vadd.f32 %v4535_v47, %v3838_v20  ;;  %v4497_v59 = vpop.f32.mrf.mxu1  ;;  %v2934_v20 = vld [vmem:[#allocation2 + $0x38] sm:$0xff] }
 0x2e4   :  { %v4537_v0 = vpop.f32.mrf.mxu0  ;;  %v4498_v30 = vadd.f32 %v4497_v59, %v4496_v37 }
 0x2e5   :  { %v3991_v60 = vadd.f32 %v3935_v39, %v2929_v16  ;;  %v4538_v17 = vadd.f32 %v4537_v0, %v4536_v55  ;;  %v4492_v39 = vadd.f32 %v4491_v3, %v4490_v7 }
 0x2e7   :  { %4007 = vst.msk [vmem:[#allocation2 + $0x10] sm:$0xff] %vm109_vm0, %v3991_v60  ;;  %v3938_v42 = vadd.f32 %v4538_v17, %v3841_v34  ;;  %v2935_v34 = vld [vmem:[#allocation2 + $0x40] sm:$0xff]  ;;  %v3865_v9 = vadd.f32 %v4492_v39, %v7754_v45 }
 0x2e9   :  { %v3992_v43 = vadd.f32 %v3938_v42, %v2930_v21 }
 0x2eb   :  { %4008 = vst.msk [vmem:[#allocation2 + $0x18] sm:$0xff] %vm109_vm0, %v3992_v43 }
 0x2f0   :  { %v4499_v16 = vpop.f32.mrf.mxu1 }
 0x2f1   :  { %v4539_v54 = vpop.f32.mrf.mxu0 }
 0x2f2   :  { %v4500_v60 = vpop.f32.mrf.mxu1 }
 0x2f3   :  { %v4540_v6 = vpop.f32.mrf.mxu0 }
 0x2f4   :  { %v4541_v40 = vadd.f32 %v4540_v6, %v4539_v54  ;;  %v4502_v2 = vpop.f32.mrf.mxu1 }
 0x2f5   :  { %v4542_v53 = vpop.f32.mrf.mxu0 }
 0x2f6   :  { %v3943_v61 = vadd.f32 %v4541_v40, %v3846_v49  ;;  %v3870_v49 = vadd.f32 %v4495_v35, %v7758_v62 }
 0x2f7   :  { %v4543_v56 = vpop.f32.mrf.mxu0 }
 0x2f8   :  { %v3993_v41 = vadd.f32 %v3943_v61, %v2931_v1  ;;  %v4544_v46 = vadd.f32 %v4543_v56, %v4542_v53  ;;  %v4503_v1 = vpop.f32.mrf.mxu1  ;;  %v2937_v53 = vld [vmem:[#allocation2 + $0x50] sm:$0xff]  ;;  %v3873_v56 = vadd.f32 %v4498_v30, %v7762_v51 }
 0x2fa   :  { %4009 = vst.msk [vmem:[#allocation2 + $0x20] sm:$0xff] %vm109_vm0, %v3993_v41  ;;  %v3946_v38 = vadd.f32 %v4544_v46, %v3849_v58 }
 0x2fc   :  { %v3994_v18 = vadd.f32 %v3946_v38, %v2932_v36  ;;  %v2938_v36 = vld [vmem:[#allocation2 + $0x58] sm:$0xff]  ;;  %v4501_v38 = vadd.f32 %v4500_v60, %v4499_v16  ;;  %v2941_v16 = vld [vmem:[#allocation2 + $0x70] sm:$0xff] }
 0x2fe   :  { %4010 = vst.msk [vmem:[#allocation2 + $0x28] sm:$0xff] %vm109_vm0, %v3994_v18  ;;  %v3878_v31 = vadd.f32 %v4501_v38, %v7766_v27 }
 0x303   :  { %v4505_v46 = vpop.f32.mrf.mxu1 }
 0x304   :  { %v4545_v50 = vpop.f32.mrf.mxu0 }
 0x305   :  { %v4506_v19 = vpop.f32.mrf.mxu1 }
 0x306   :  { %v4546_v44 = vpop.f32.mrf.mxu0 }
 0x307   :  { %v4547_v8 = vadd.f32 %v4546_v44, %v4545_v50  ;;  %v4504_v50 = vadd.f32 %v4503_v1, %v4502_v2  ;;  %v4508_v37 = vpop.f32.mrf.mxu1 }
 0x308   :  { %v4548_v11 = vpop.f32.mrf.mxu0 }
 0x309   :  { %v3951_v57 = vadd.f32 %v4547_v8, %v3854_v23  ;;  %v2939_v23 = vld [vmem:[#allocation2 + $0x60] sm:$0xff] }
 0x30a   :  { %v4549_v63 = vpop.f32.mrf.mxu0 }
 0x30b   :  { %v3995_v22 = vadd.f32 %v3951_v57, %v2933_v32  ;;  %v4550_v14 = vadd.f32 %v4549_v63, %v4548_v11  ;;  %v3881_v32 = vadd.f32 %v4504_v50, %v7770_v25  ;;  %v2940_v63 = vld [vmem:[#allocation2 + $0x68] sm:$0xff] }
 0x30d   :  { %4011 = vst.msk [vmem:[#allocation2 + $0x30] sm:$0xff] %vm109_vm0, %v3995_v22  ;;  %v3954_v28 = vadd.f32 %v4550_v14, %v3857_v4  ;;  %v4507_v4 = vadd.f32 %v4506_v19, %v4505_v46  ;;  %v4509_v22 = vpop.f32.mrf.mxu1 }
 0x30e   :  { %v4551_v47 = vpop.f32.mrf.mxu0 }
 0x30f   :  { %v3996_v24 = vadd.f32 %v3954_v28, %v2934_v20  ;;  %v3886_v13 = vadd.f32 %v4507_v4, %v7772_v33  ;;  %v4510_v28 = vadd.f32 %v4509_v22, %v4508_v37 }
 0x310   :  { %v4552_v55 = vpop.f32.mrf.mxu0 }
 0x311   :  { %4012 = vst.msk [vmem:[#allocation2 + $0x38] sm:$0xff] %vm109_vm0, %v3996_v24  ;;  %v4553_v0 = vadd.f32 %v4552_v55, %v4551_v47 }
 0x312   :  { %v4554_v12 = vpop.f32.mrf.mxu0 }
 0x313   :  { %v3959_v17 = vadd.f32 %v4553_v0, %v3862_v29  ;;  %v3889_v29 = vadd.f32 %v4510_v28, %v7775_v48 }
 0x314   :  { %v4555_v21 = vpop.f32.mrf.mxu0 }
 0x315   :  { %v3997_v42 = vadd.f32 %v3959_v17, %v2935_v34  ;;  %v4556_v43 = vadd.f32 %v4555_v21, %v4554_v12  ;;  %v2942_v34 = vld [vmem:[#allocation2 + $0x78] sm:$0xff] }
 0x317   :  { %4013 = vst.msk [vmem:[#allocation2 + $0x40] sm:$0xff] %vm109_vm0, %v3997_v42  ;;  %v3962_v54 = vadd.f32 %v4556_v43, %v3865_v9  ;;  %v4557_v5 = vpop.f32.mrf.mxu0 }
 0x319   :  { %v3998_v15 = vadd.f32 %v3962_v54, %v2936_v52  ;;  %v4558_v6 = vpop.f32.mrf.mxu0 }
 0x31a   :  { %v4559_v40 = vadd.f32 %v4558_v6, %v4557_v5 }
 0x31b   :  { %4014 = vst.msk [vmem:[#allocation2 + $0x48] sm:$0xff] %vm109_vm0, %v3998_v15  ;;  %v4560_v45 = vpop.f32.mrf.mxu0 }
 0x31c   :  { %v3967_v61 = vadd.f32 %v4559_v40, %v3870_v49 }
 0x31d   :  { %v4561_v7 = vpop.f32.mrf.mxu0 }
 0x31e   :  { %v3999_v58 = vadd.f32 %v3967_v61, %v2937_v53  ;;  %v4562_v41 = vadd.f32 %v4561_v7, %v4560_v45 }
 0x320   :  { %4015 = vst.msk [vmem:[#allocation2 + $0x50] sm:$0xff] %vm109_vm0, %v3999_v58  ;;  %v3970_v3 = vadd.f32 %v4562_v41, %v3873_v56 }
 0x321   :  { %v4563_v62 = vpop.f32.mrf.mxu0 }
 0x322   :  { %v4000_v18 = vadd.f32 %v3970_v3, %v2938_v36 }
 0x323   :  { %v4564_v10 = vpop.f32.mrf.mxu0 }
 0x324   :  { %4016 = vst.msk [vmem:[#allocation2 + $0x58] sm:$0xff] %vm109_vm0, %v4000_v18  ;;  %v4565_v44 = vadd.f32 %v4564_v10, %v4563_v62 }
 0x325   :  { %v4566_v51 = vpop.f32.mrf.mxu0 }
 0x326   :  { %v3975_v26 = vadd.f32 %v4565_v44, %v3878_v31 }
 0x327   :  { %v4567_v8 = vpop.f32.mrf.mxu0 }
 0x328   :  { %v4001_v11 = vadd.f32 %v3975_v26, %v2939_v23  ;;  %v4568_v57 = vadd.f32 %v4567_v8, %v4566_v51 }
 0x32a   :  { %4017 = vst.msk [vmem:[#allocation2 + $0x60] sm:$0xff] %vm109_vm0, %v4001_v11  ;;  %v3978_v59 = vadd.f32 %v4568_v57, %v3881_v32 }
 0x32b   :  { %v4569_v27 = vpop.f32.mrf.mxu0 }
 0x32c   :  { %v4002_v14 = vadd.f32 %v3978_v59, %v2940_v63 }
 0x32d   :  { %v4570_v20 = vpop.f32.mrf.mxu0 }
 0x32e   :  { %4018 = vst.msk [vmem:[#allocation2 + $0x68] sm:$0xff] %vm109_vm0, %v4002_v14  ;;  %v4571_v47 = vadd.f32 %v4570_v20, %v4569_v27 }
 0x32f   :  { %v4572_v24 = vpop.f32.mrf.mxu0 }
 0x330   :  { %v3983_v25 = vadd.f32 %v4571_v47, %v3886_v13 }
 0x331   :  { %v4573_v55 = vpop.f32.mrf.mxu0 }
 0x332   :  { %v4003_v39 = vadd.f32 %v3983_v25, %v2941_v16  ;;  %v4574_v0 = vadd.f32 %v4573_v55, %v4572_v24 }
 0x334   :  { %4019 = vst.msk [vmem:[#allocation2 + $0x70] sm:$0xff] %vm109_vm0, %v4003_v39  ;;  %v3986_v12 = vadd.f32 %v4574_v0, %v3889_v29 }
 0x336   :  { %v4004_v60 = vadd.f32 %v3986_v12, %v2942_v34 }
 0x338   :  { %4020 = vst.msk [vmem:[#allocation2 + $0x78] sm:$0xff] %vm109_vm0, %v4004_v60 }
 0x339 PF:  { %v4024_v33 = vld [vmem:[#allocation2] sm:$0xff]  ;;  %v4025_v17 = vld [vmem:[#allocation2 + $0x8] sm:$0xff]  ;;  %v4026_v21 = vld [vmem:[#allocation2 + $0x10] sm:$0xff] }
 0x33a   :  { %4041 = vst.msk [vmem:[%s7886_s9] sm:$0xff] %vm109_vm0, %v4024_v33  ;;  %4042 = vst.msk [vmem:[%s7886_s9 + $0x8] sm:$0xff] %vm109_vm0, %v4025_v17  ;;  %v4027_v48 = vld [vmem:[#allocation2 + $0x18] sm:$0xff]  ;;  %v4028_v9 = vld [vmem:[#allocation2 + $0x20] sm:$0xff] }
 0x33b   :  { %4043 = vst.msk [vmem:[%s7886_s9 + $0x10] sm:$0xff] %vm109_vm0, %v4026_v21  ;;  %v4029_v42 = vld [vmem:[#allocation2 + $0x28] sm:$0xff]  ;;  %4044 = vst.msk [vmem:[%s7886_s9 + $0x18] sm:$0xff] %vm109_vm0, %v4027_v48  ;;  %v4030_v43 = vld [vmem:[#allocation2 + $0x30] sm:$0xff] }
 0x33c   :  { %4045 = vst.msk [vmem:[%s7886_s9 + $0x20] sm:$0xff] %vm109_vm0, %v4028_v9  ;;  %4046 = vst.msk [vmem:[%s7886_s9 + $0x28] sm:$0xff] %vm109_vm0, %v4029_v42  ;;  %v4031_v35 = vld [vmem:[#allocation2 + $0x38] sm:$0xff]  ;;  %v4032_v52 = vld [vmem:[#allocation2 + $0x40] sm:$0xff] }
 0x33d   :  { %4047 = vst.msk [vmem:[%s7886_s9 + $0x30] sm:$0xff] %vm109_vm0, %v4030_v43  ;;  %4048 = vst.msk [vmem:[%s7886_s9 + $0x38] sm:$0xff] %vm109_vm0, %v4031_v35  ;;  %v4033_v2 = vld [vmem:[#allocation2 + $0x48] sm:$0xff]  ;;  %v4034_v54 = vld [vmem:[#allocation2 + $0x50] sm:$0xff] }
 0x33e   :  { %4049 = vst.msk [vmem:[%s7886_s9 + $0x40] sm:$0xff] %vm109_vm0, %v4032_v52  ;;  %v4035_v5 = vld [vmem:[#allocation2 + $0x58] sm:$0xff]  ;;  %4050 = vst.msk [vmem:[%s7886_s9 + $0x48] sm:$0xff] %vm109_vm0, %v4033_v2  ;;  %v4036_v15 = vld [vmem:[#allocation2 + $0x60] sm:$0xff] }
 0x33f   :  { %4051 = vst.msk [vmem:[%s7886_s9 + $0x50] sm:$0xff] %vm109_vm0, %v4034_v54  ;;  %4052 = vst.msk [vmem:[%s7886_s9 + $0x58] sm:$0xff] %vm109_vm0, %v4035_v5  ;;  %v4037_v6 = vld [vmem:[#allocation2 + $0x68] sm:$0xff]  ;;  %v4038_v49 = vld [vmem:[#allocation2 + $0x70] sm:$0xff] }
 0x340   :  { %4053 = vst.msk [vmem:[%s7886_s9 + $0x60] sm:$0xff] %vm109_vm0, %v4036_v15  ;;  %4054 = vst.msk [vmem:[%s7886_s9 + $0x68] sm:$0xff] %vm109_vm0, %v4037_v6  ;;  %v4039_v30 = vld [vmem:[#allocation2 + $0x78] sm:$0xff] }
 0x341   :  { %4055 = vst.msk [vmem:[%s7886_s9 + $0x70] sm:$0xff] %vm109_vm0, %v4038_v49  ;;  %4056 = vst.msk [vmem:[%s7886_s9 + $0x78] sm:$0xff] %vm109_vm0, %v4039_v30 }

</bundles_post_ra>
